<compile_context>
chip_gen: v5e
topology: v5e:2x2
jax: 0.10.0
libtpu: 0.0.40
codegen_flags: <defaults>
</compile_context>

<pallas_src>
import functools
import inspect

import jax
import jax.numpy as jnp
from jax.experimental import pallas as pl
from jax.experimental.pallas import tpu as pltpu


def _round_up(a, b):
    return (a + b - 1) // b * b


# pipeline_mode / Buffered availability (guarded so the script always runs).
try:
    _HAS_SINGLE_BUFFER = (
        hasattr(pl, "Buffered")
        and "pipeline_mode" in inspect.signature(pl.BlockSpec).parameters)
except (TypeError, ValueError):  # pragma: no cover
    _HAS_SINGLE_BUFFER = False


# ----------------------------- kernels --------------------------------------


def _finish(x_ref, vec1, wu1xt_ref, wu1vt_ref, b1_ref, wu2t_ref, b2_ref,
            out_ref, O, cd):
    """update_net + gating; reads/writes the (TN, 4*O) output slab in place."""
    # update_net[0]: split matmul replaces concat([x, vec1]).
    h = (jnp.dot(x_ref[...], wu1xt_ref[...], preferred_element_type=jnp.float32)
         + jnp.dot(vec1.astype(cd), wu1vt_ref[...],
                   preferred_element_type=jnp.float32)
         + b1_ref[...])
    h = h * jax.nn.sigmoid(h)                          # SiLU in f32 (EUP)

    # update_net[2]: one fused (H, 2O) matmul; split xg / vg in-register.
    u = (jnp.dot(h.astype(cd), wu2t_ref[...], preferred_element_type=jnp.float32)
         + b2_ref[...])                                # (TN, 2O)
    xg = u[:, :O]
    vg = u[:, O:]

    out_ref[:, :O] = xg * jax.nn.sigmoid(xg)           # scalar branch SiLU
    for k in range(3):                                 # gate stashed vec2 in place
        sl = slice((k + 1) * O, (k + 2) * O)
        out_ref[:, sl] = vg * out_ref[:, sl]


def _geb_kernel_fused(x_ref, v_ref, wvt_ref, wu1xt_ref, wu1vt_ref, b1_ref,
                      wu2t_ref, b2_ref, out_ref, *, H, O):
    # Fused [W1^T | W2^T] path: only used when H % 128 == 0 so the column
    # split of the (TN, H+O) matmul result is lane-tile aligned (copy-free).
    cd = wvt_ref.dtype
    wv = wvt_ref[...]                                  # (H, H+O), VMEM-resident
    sq = None
    for k in range(3):                                 # static unroll over spatial comps
        vk = v_ref[:, k * H:(k + 1) * H]               # lane slice of flattened v
        vp = jnp.dot(vk, wv, preferred_element_type=jnp.float32)
        p1 = vp[:, :H]
        sq = p1 * p1 if sq is None else sq + p1 * p1
        out_ref[:, (k + 1) * O:(k + 2) * O] = vp[:, H:]   # stash vec2_k in output slab
    # No eps under sqrt: matches the PyTorch forward exactly (norm of projection).
    _finish(x_ref, jnp.sqrt(sq), wu1xt_ref, wu1vt_ref, b1_ref, wu2t_ref,
            b2_ref, out_ref, O, cd)


def _geb_kernel_split(x_ref, v_ref, w1t_ref, w2t_ref, wu1xt_ref, wu1vt_ref,
                      b1_ref, wu2t_ref, b2_ref, out_ref, *, H, O):
    # Separate W1 / W2 dots: used when H % 128 != 0 (a misaligned fused-weight
    # column split would force relayout copies three times per tile).
    cd = w1t_ref.dtype
    w1 = w1t_ref[...]                                  # (H, H)
    w2 = w2t_ref[...]                                  # (H, O)
    sq = None
    for k in range(3):
        vk = v_ref[:, k * H:(k + 1) * H]
        p1 = jnp.dot(vk, w1, preferred_element_type=jnp.float32)
        sq = p1 * p1 if sq is None else sq + p1 * p1
        out_ref[:, (k + 1) * O:(k + 2) * O] = jnp.dot(
            vk, w2, preferred_element_type=jnp.float32)    # stash vec2_k
    _finish(x_ref, jnp.sqrt(sq), wu1xt_ref, wu1vt_ref, b1_ref, wu2t_ref,
            b2_ref, out_ref, O, cd)


# ----------------------------- wrapper ---------------------------------------


def gated_equivariant_block(x, v, params, *, tile_n=512,
                            compute_dtype=jnp.float32):
    """x: (N, H), v: (N, 3, H). Returns (x_out (N, O) f32, v_out (N, 3, O) f32)."""
    N, H = x.shape
    O = params["w2"].shape[0]
    cd = jnp.dtype(compute_dtype)
    elt = cd.itemsize
    fused = (H % 128 == 0)

    # ---- pack weights once (transposed so every dot is (TN, K) @ (K, M)) ----
    w1t = params["w1"].T.astype(cd)                    # (H, H)
    w2t = params["w2"].T.astype(cd)                    # (H, O)
    wu1 = params["wu1"]                                # (H, 2H), cols = [x | vec1]
    wu1xt = wu1[:, :H].T.astype(cd)                    # (H, H)
    wu1vt = wu1[:, H:].T.astype(cd)                    # (H, H)
    wu2t = params["wu2"].T.astype(cd)                  # (H, 2O), cols = [x-branch | gate]
    b1 = params["b1"].reshape(1, H).astype(jnp.float32)
    b2 = params["b2"].reshape(1, 2 * O).astype(jnp.float32)

    # ---- lane-dense activations: flatten the spatial axis into lanes --------
    x_in = x.astype(cd)
    v_in = v.reshape(N, 3 * H).astype(cd)              # (N, 3H), row-major view

    # ---- tile over N: large tiles amortize per-step overhead and MXU weight
    # restaging, but cap so the grid has >= 2 steps (v7x megacore sharding).
    # No host-side padding: Pallas masks the edge block (row-independent math).
    half_n = -(-N // 2)
    TN = max(8, min(_round_up(tile_n, 8), _round_up(half_n, 8)))
    grid = (pl.cdiv(N, TN),)

    # ---- explicit VMEM budget (double-buffered activations + weights) -------
    w_bytes = (H * (H + O) + 2 * H * H + 2 * H * O) * elt + (H + 2 * O) * 4
    wbuf = 1 if _HAS_SINGLE_BUFFER else 2
    act_bytes = 2 * (TN * H * elt + TN * 3 * H * elt + TN * 4 * O * 4)
    est = act_bytes + wbuf * w_bytes
    # >=32 MiB scoped (v5e default is ~16 MiB), <=56 MiB (headroom under v7x 64 MiB).
    vmem_limit = int(min(max(2 * est + (8 << 20), 32 << 20), 56 << 20))

    # Advisory cost estimate so XLA schedules surrounding ops sensibly.
    cost = pl.CostEstimate(
        flops=int(2 * N * 5 * H * (H + O)),            # 3x(HH+HO) + 2HH + 2HO per row
        transcendentals=int(N * (2 * H + O)),          # sqrt + sigmoid(h) + sigmoid(xg)
        bytes_accessed=int(N * 4 * H * elt + N * 4 * O * 4 + w_bytes),
    )

    def _call(single_buffer_weights):
        def wspec(shape):                              # VMEM-resident weight spec
            if single_buffer_weights:
                return pl.BlockSpec(shape, lambda i: (0,) * len(shape),
                                    pipeline_mode=pl.Buffered(1))
            return pl.BlockSpec(shape, lambda i: (0,) * len(shape))

        if fused:
            kernel = functools.partial(_geb_kernel_fused, H=H, O=O)
            wvt = jnp.concatenate([w1t, w2t], axis=1)  # (H, H+O), split lane-aligned
            vec_args = (wvt,)
            vec_specs = [wspec((H, H + O))]
        else:
            kernel = functools.partial(_geb_kernel_split, H=H, O=O)
            vec_args = (w1t, w2t)
            vec_specs = [wspec((H, H)), wspec((H, O))]

        return pl.pallas_call(
            kernel,
            out_shape=jax.ShapeDtypeStruct((N, 4 * O), jnp.float32),
            grid=grid,
            in_specs=[
                pl.BlockSpec((TN, H), lambda i: (i, 0)),        # x tile
                pl.BlockSpec((TN, 3 * H), lambda i: (i, 0)),    # v tile (lane-dense)
                *vec_specs,                                     # vec-projection weight(s)
                wspec((H, H)), wspec((H, H)), wspec((1, H)),    # update_net[0]
                wspec((H, 2 * O)), wspec((1, 2 * O)),           # update_net[2] (fused)
            ],
            out_specs=pl.BlockSpec((TN, 4 * O), lambda i: (i, 0)),
            compiler_params=pltpu.CompilerParams(
                dimension_semantics=("parallel",),
                vmem_limit_bytes=vmem_limit),
            cost_estimate=cost,
        )(x_in, v_in, *vec_args, wu1xt, wu1vt, b1, wu2t, b2)

    if _HAS_SINGLE_BUFFER:
        try:
            out = _call(True)
        except Exception:   # pipeline_mode rejected by this backend -> default buffering
            out = _call(False)
    else:
        out = _call(False)

    x_out = out[:, :O]
    v_out = out[:, O:].reshape(N, 3, O)
    return x_out, v_out


# ----------------------------- parameters / reference -----------------------


def xavier_uniform(key, fan_out, fan_in):
    bound = jnp.sqrt(6.0 / (fan_in + fan_out))
    return jax.random.uniform(key, (fan_out, fan_in), jnp.float32, -bound, bound)


def init_params(key, hidden_channels, out_channels):
    k1, k2, k3, k4 = jax.random.split(key, 4)
    H, O = hidden_channels, out_channels
    return {
        "w1": xavier_uniform(k1, H, H),          # vec1_proj.weight      (H, H)
        "w2": xavier_uniform(k2, O, H),          # vec2_proj.weight      (O, H)
        "wu1": xavier_uniform(k3, H, 2 * H),     # update_net[0].weight  (H, 2H)
        "b1": jnp.zeros((H,), jnp.float32),
        "wu2": xavier_uniform(k4, 2 * O, H),     # update_net[2].weight  (2O, H)
        "b2": jnp.zeros((2 * O,), jnp.float32),
    }


def reference(x, v, params):
    """Pure-JAX reference mirroring the PyTorch forward."""
    vec1 = jnp.linalg.norm(v @ params["w1"].T, axis=-2)      # (N, H)
    vec2 = v @ params["w2"].T                                # (N, 3, O)
    xc = jnp.concatenate([x, vec1], axis=-1)                 # (N, 2H)
    h = xc @ params["wu1"].T + params["b1"]
    h = h * jax.nn.sigmoid(h)
    u = h @ params["wu2"].T + params["b2"]
    O = params["w2"].shape[0]
    xo, vg = u[:, :O], u[:, O:]
    return xo * jax.nn.sigmoid(xo), vg[:, None, :] * vec2


if __name__ == "__main__":
    key = jax.random.PRNGKey(0)

    # --- test 1: H % 128 != 0 -> split vec-projection path; multi-step grid
    # with a masked edge block (N % TN != 0), both TCs busy on v7x.
    N, H, O = 300, 64, 32
    kx, kv, kp, k2 = jax.random.split(key, 4)
    x = jax.random.normal(kx, (N, H), jnp.float32)
    v = jax.random.normal(kv, (N, 3, H), jnp.float32)
    params = init_params(kp, H, O)

    x_out, v_out = gated_equivariant_block(x, v, params)
    jax.block_until_ready((x_out, v_out))
    x_ref, v_ref = reference(x, v, params)
    assert x_out.shape == (N, O) and v_out.shape == (N, 3, O)
    assert jnp.allclose(x_out, x_ref, atol=1e-3, rtol=1e-3)
    assert jnp.allclose(v_out, v_ref, atol=1e-3, rtol=1e-3)

    # --- test 2: H % 128 == 0 -> fused [W1^T | W2^T] vec-projection path.
    N2, H2, O2 = 64, 128, 32
    ka, kb, kc = jax.random.split(k2, 3)
    x2 = jax.random.normal(ka, (N2, H2), jnp.float32)
    v2 = jax.random.normal(kb, (N2, 3, H2), jnp.float32)
    params2 = init_params(kc, H2, O2)
    x2_out, v2_out = gated_equivariant_block(x2, v2, params2)
    jax.block_until_ready((x2_out, v2_out))
    x2_ref, v2_ref = reference(x2, v2, params2)
    assert x2_out.shape == (N2, O2) and v2_out.shape == (N2, 3, O2)
    assert jnp.allclose(x2_out, x2_ref, atol=1e-3, rtol=1e-3)
    assert jnp.allclose(v2_out, v2_ref, atol=1e-3, rtol=1e-3)

    # --- bf16 MXU fast path (recommended default on v5e): checked against the
    # f32 reference with a loose relative-to-max tolerance (bf16 inputs,
    # f32 accumulation), not just finiteness.
    x_bf, v_bf = gated_equivariant_block(x, v, params,
                                         compute_dtype=jnp.bfloat16)
    jax.block_until_ready((x_bf, v_bf))

    def rel_err(a, b):
        return float(jnp.max(jnp.abs(a - b)) / (jnp.max(jnp.abs(b)) + 1e-6))

    assert x_bf.shape == (N, O) and v_bf.shape == (N, 3, O)
    assert rel_err(x_bf, x_ref) < 1e-1
    assert rel_err(v_bf, v_ref) < 1e-1

    print("KERNEL_OK")
</pallas_src>

<mosaic_0001>
module attributes {stable_mosaic.version = 11 : i64} {
  func.func @_geb_kernel_split(%arg0: i32, %arg1: memref<152x64xf32, #tpu.memory_space<vmem>>, %arg2: memref<152x192xf32, #tpu.memory_space<vmem>>, %arg3: memref<64x64xf32, #tpu.memory_space<vmem>>, %arg4: memref<64x32xf32, #tpu.memory_space<vmem>>, %arg5: memref<64x64xf32, #tpu.memory_space<vmem>>, %arg6: memref<64x64xf32, #tpu.memory_space<vmem>>, %arg7: memref<1x64xf32, #tpu.memory_space<vmem>>, %arg8: memref<64x64xf32, #tpu.memory_space<vmem>>, %arg9: memref<1x64xf32, #tpu.memory_space<vmem>>, %arg10: memref<152x128xf32, #tpu.memory_space<vmem>>) attributes {dimension_semantics = [#tpu.dimension_semantics<parallel>], iteration_bounds = array<i64: 2>, scalar_prefetch = 0 : i64, scratch_operands = 0 : i64, tpu.core_type = #tpu.core_type<tc>, window_params = [{transform_indices = @transform_0, window_bounds = array<i64: 152, 64>}, {transform_indices = @transform_1, window_bounds = array<i64: 152, 192>}, {pipeline_mode = #tpu.pipeline_mode<synchronous>, transform_indices = @transform_2, window_bounds = array<i64: 64, 64>}, {pipeline_mode = #tpu.pipeline_mode<synchronous>, transform_indices = @transform_3, window_bounds = array<i64: 64, 32>}, {pipeline_mode = #tpu.pipeline_mode<synchronous>, transform_indices = @transform_4, window_bounds = array<i64: 64, 64>}, {pipeline_mode = #tpu.pipeline_mode<synchronous>, transform_indices = @transform_5, window_bounds = array<i64: 64, 64>}, {pipeline_mode = #tpu.pipeline_mode<synchronous>, transform_indices = @transform_6, window_bounds = array<i64: 1, 64>}, {pipeline_mode = #tpu.pipeline_mode<synchronous>, transform_indices = @transform_7, window_bounds = array<i64: 64, 64>}, {pipeline_mode = #tpu.pipeline_mode<synchronous>, transform_indices = @transform_8, window_bounds = array<i64: 1, 64>}, {transform_indices = @transform_9, window_bounds = array<i64: 152, 128>}]} {
    %c0 = arith.constant 0 : index
    %c0_0 = arith.constant 0 : index
    %0 = vector.load %arg3[%c0, %c0_0] : memref<64x64xf32, #tpu.memory_space<vmem>>, vector<64x64xf32>
    %c0_1 = arith.constant 0 : index
    %c0_2 = arith.constant 0 : index
    %1 = vector.load %arg4[%c0_1, %c0_2] : memref<64x32xf32, #tpu.memory_space<vmem>>, vector<64x32xf32>
    %c0_3 = arith.constant 0 : index
    %c0_4 = arith.constant 0 : index
    %2 = vector.load %arg2[%c0_3, %c0_4] : memref<152x192xf32, #tpu.memory_space<vmem>>, vector<152x64xf32>
    %cst = arith.constant dense<0.000000e+00> : vector<152x64xf32>
    %3 = tpu.matmul %2, %0, %cst {dimension_numbers = #tpu.dot_dimension_numbers<[1], [0], [0], [1], [0, 0, 1, 1], [], []>} : vector<152x64xf32>, vector<64x64xf32>, vector<152x64xf32> -> vector<152x64xf32>
    %4 = arith.mulf %3, %3 : vector<152x64xf32>
    %cst_5 = arith.constant dense<0.000000e+00> : vector<152x32xf32>
    %5 = tpu.matmul %2, %1, %cst_5 {dimension_numbers = #tpu.dot_dimension_numbers<[1], [0], [0], [1], [0, 0, 1, 1], [], []>} : vector<152x64xf32>, vector<64x32xf32>, vector<152x32xf32> -> vector<152x32xf32>
    %c0_6 = arith.constant 0 : index
    %c32 = arith.constant 32 : index
    %6 = vector.load %arg10[%c0_6, %c32] : memref<152x128xf32, #tpu.memory_space<vmem>>, vector<152x32xf32>
    tpu.vector_store %arg10[%c0_6, %c32], %5 {strides = array<i32>} : memref<152x128xf32, #tpu.memory_space<vmem>>, vector<152x32xf32>,
    %c0_7 = arith.constant 0 : index
    %c64 = arith.constant 64 : index
    %7 = vector.load %arg2[%c0_7, %c64] : memref<152x192xf32, #tpu.memory_space<vmem>>, vector<152x64xf32>
    %cst_8 = arith.constant dense<0.000000e+00> : vector<152x64xf32>
    %8 = tpu.matmul %7, %0, %cst_8 {dimension_numbers = #tpu.dot_dimension_numbers<[1], [0], [0], [1], [0, 0, 1, 1], [], []>} : vector<152x64xf32>, vector<64x64xf32>, vector<152x64xf32> -> vector<152x64xf32>
    %9 = arith.mulf %8, %8 : vector<152x64xf32>
    %10 = arith.addf %4, %9 : vector<152x64xf32>
    %cst_9 = arith.constant dense<0.000000e+00> : vector<152x32xf32>
    %11 = tpu.matmul %7, %1, %cst_9 {dimension_numbers = #tpu.dot_dimension_numbers<[1], [0], [0], [1], [0, 0, 1, 1], [], []>} : vector<152x64xf32>, vector<64x32xf32>, vector<152x32xf32> -> vector<152x32xf32>
    %c0_10 = arith.constant 0 : index
    %c64_11 = arith.constant 64 : index
    %12 = vector.load %arg10[%c0_10, %c64_11] : memref<152x128xf32, #tpu.memory_space<vmem>>, vector<152x32xf32>
    tpu.vector_store %arg10[%c0_10, %c64_11], %11 {strides = array<i32>} : memref<152x128xf32, #tpu.memory_space<vmem>>, vector<152x32xf32>,
    %c0_12 = arith.constant 0 : index
    %c128 = arith.constant 128 : index
    %13 = vector.load %arg2[%c0_12, %c128] : memref<152x192xf32, #tpu.memory_space<vmem>>, vector<152x64xf32>
    %cst_13 = arith.constant dense<0.000000e+00> : vector<152x64xf32>
    %14 = tpu.matmul %13, %0, %cst_13 {dimension_numbers = #tpu.dot_dimension_numbers<[1], [0], [0], [1], [0, 0, 1, 1], [], []>} : vector<152x64xf32>, vector<64x64xf32>, vector<152x64xf32> -> vector<152x64xf32>
    %15 = arith.mulf %14, %14 : vector<152x64xf32>
    %16 = arith.addf %10, %15 : vector<152x64xf32>
    %cst_14 = arith.constant dense<0.000000e+00> : vector<152x32xf32>
    %17 = tpu.matmul %13, %1, %cst_14 {dimension_numbers = #tpu.dot_dimension_numbers<[1], [0], [0], [1], [0, 0, 1, 1], [], []>} : vector<152x64xf32>, vector<64x32xf32>, vector<152x32xf32> -> vector<152x32xf32>
    %c0_15 = arith.constant 0 : index
    %c96 = arith.constant 96 : index
    %18 = vector.load %arg10[%c0_15, %c96] : memref<152x128xf32, #tpu.memory_space<vmem>>, vector<152x32xf32>
    tpu.vector_store %arg10[%c0_15, %c96], %17 {strides = array<i32>} : memref<152x128xf32, #tpu.memory_space<vmem>>, vector<152x32xf32>,
    %19 = math.sqrt %16 : vector<152x64xf32>
    %c0_16 = arith.constant 0 : index
    %c0_17 = arith.constant 0 : index
    %20 = vector.load %arg1[%c0_16, %c0_17] : memref<152x64xf32, #tpu.memory_space<vmem>>, vector<152x64xf32>
    %c0_18 = arith.constant 0 : index
    %c0_19 = arith.constant 0 : index
    %21 = vector.load %arg5[%c0_18, %c0_19] : memref<64x64xf32, #tpu.memory_space<vmem>>, vector<64x64xf32>
    %cst_20 = arith.constant dense<0.000000e+00> : vector<152x64xf32>
    %22 = tpu.matmul %20, %21, %cst_20 {dimension_numbers = #tpu.dot_dimension_numbers<[1], [0], [0], [1], [0, 0, 1, 1], [], []>} : vector<152x64xf32>, vector<64x64xf32>, vector<152x64xf32> -> vector<152x64xf32>
    %c0_21 = arith.constant 0 : index
    %c0_22 = arith.constant 0 : index
    %23 = vector.load %arg6[%c0_21, %c0_22] : memref<64x64xf32, #tpu.memory_space<vmem>>, vector<64x64xf32>
    %cst_23 = arith.constant dense<0.000000e+00> : vector<152x64xf32>
    %24 = tpu.matmul %19, %23, %cst_23 {dimension_numbers = #tpu.dot_dimension_numbers<[1], [0], [0], [1], [0, 0, 1, 1], [], []>} : vector<152x64xf32>, vector<64x64xf32>, vector<152x64xf32> -> vector<152x64xf32>
    %25 = arith.addf %22, %24 : vector<152x64xf32>
    %c0_24 = arith.constant 0 : index
    %c0_25 = arith.constant 0 : index
    %26 = vector.load %arg7[%c0_24, %c0_25] : memref<1x64xf32, #tpu.memory_space<vmem>>, vector<1x64xf32>
    %27 = vector.broadcast %26 : vector<1x64xf32> to vector<152x64xf32>
    %28 = arith.addf %25, %27 : vector<152x64xf32>
    %29 = arith.negf %28 : vector<152x64xf32>
    %30 = math.exp %29 : vector<152x64xf32>
    %cst_26 = arith.constant 1.000000e+00 : f32
    %31 = vector.broadcast %cst_26 : f32 to vector<152x64xf32>
    %32 = arith.addf %31, %30 : vector<152x64xf32>
    %33 = arith.divf %31, %32 : vector<152x64xf32>
    %34 = arith.mulf %28, %33 : vector<152x64xf32>
    %c0_27 = arith.constant 0 : index
    %c0_28 = arith.constant 0 : index
    %35 = vector.load %arg8[%c0_27, %c0_28] : memref<64x64xf32, #tpu.memory_space<vmem>>, vector<64x64xf32>
    %cst_29 = arith.constant dense<0.000000e+00> : vector<152x64xf32>
    %36 = tpu.matmul %34, %35, %cst_29 {dimension_numbers = #tpu.dot_dimension_numbers<[1], [0], [0], [1], [0, 0, 1, 1], [], []>} : vector<152x64xf32>, vector<64x64xf32>, vector<152x64xf32> -> vector<152x64xf32>
    %c0_30 = arith.constant 0 : index
    %c0_31 = arith.constant 0 : index
    %37 = vector.load %arg9[%c0_30, %c0_31] : memref<1x64xf32, #tpu.memory_space<vmem>>, vector<1x64xf32>
    %38 = vector.broadcast %37 : vector<1x64xf32> to vector<152x64xf32>
    %39 = arith.addf %36, %38 : vector<152x64xf32>
    %40 = vector.extract_strided_slice %39 {offsets = [0, 0], sizes = [152, 32], strides = [1, 1]} : vector<152x64xf32> to vector<152x32xf32>
    %41 = vector.extract_strided_slice %39 {offsets = [0, 32], sizes = [152, 32], strides = [1, 1]} : vector<152x64xf32> to vector<152x32xf32>
    %42 = arith.negf %40 : vector<152x32xf32>
    %43 = math.exp %42 : vector<152x32xf32>
    %cst_32 = arith.constant 1.000000e+00 : f32
    %44 = vector.broadcast %cst_32 : f32 to vector<152x32xf32>
    %45 = arith.addf %44, %43 : vector<152x32xf32>
    %46 = arith.divf %44, %45 : vector<152x32xf32>
    %47 = arith.mulf %40, %46 : vector<152x32xf32>
    %c0_33 = arith.constant 0 : index
    %c0_34 = arith.constant 0 : index
    %48 = vector.load %arg10[%c0_33, %c0_34] : memref<152x128xf32, #tpu.memory_space<vmem>>, vector<152x32xf32>
    tpu.vector_store %arg10[%c0_33, %c0_34], %47 {strides = array<i32>} : memref<152x128xf32, #tpu.memory_space<vmem>>, vector<152x32xf32>,
    %c0_35 = arith.constant 0 : index
    %c32_36 = arith.constant 32 : index
    %49 = vector.load %arg10[%c0_35, %c32_36] : memref<152x128xf32, #tpu.memory_space<vmem>>, vector<152x32xf32>
    %50 = arith.mulf %41, %49 : vector<152x32xf32>
    %c0_37 = arith.constant 0 : index
    %c32_38 = arith.constant 32 : index
    %51 = vector.load %arg10[%c0_37, %c32_38] : memref<152x128xf32, #tpu.memory_space<vmem>>, vector<152x32xf32>
    tpu.vector_store %arg10[%c0_37, %c32_38], %50 {strides = array<i32>} : memref<152x128xf32, #tpu.memory_space<vmem>>, vector<152x32xf32>,
    %c0_39 = arith.constant 0 : index
    %c64_40 = arith.constant 64 : index
    %52 = vector.load %arg10[%c0_39, %c64_40] : memref<152x128xf32, #tpu.memory_space<vmem>>, vector<152x32xf32>
    %53 = arith.mulf %41, %52 : vector<152x32xf32>
    %c0_41 = arith.constant 0 : index
    %c64_42 = arith.constant 64 : index
    %54 = vector.load %arg10[%c0_41, %c64_42] : memref<152x128xf32, #tpu.memory_space<vmem>>, vector<152x32xf32>
    tpu.vector_store %arg10[%c0_41, %c64_42], %53 {strides = array<i32>} : memref<152x128xf32, #tpu.memory_space<vmem>>, vector<152x32xf32>,
    %c0_43 = arith.constant 0 : index
    %c96_44 = arith.constant 96 : index
    %55 = vector.load %arg10[%c0_43, %c96_44] : memref<152x128xf32, #tpu.memory_space<vmem>>, vector<152x32xf32>
    %56 = arith.mulf %41, %55 : vector<152x32xf32>
    %c0_45 = arith.constant 0 : index
    %c96_46 = arith.constant 96 : index
    %57 = vector.load %arg10[%c0_45, %c96_46] : memref<152x128xf32, #tpu.memory_space<vmem>>, vector<152x32xf32>
    tpu.vector_store %arg10[%c0_45, %c96_46], %56 {strides = array<i32>} : memref<152x128xf32, #tpu.memory_space<vmem>>, vector<152x32xf32>,
    return
  }
  func.func @transform_0(%arg0: i32) -> (i32, i32) {
    %c0_i32 = arith.constant 0 : i32
    %c0_i32_0 = arith.constant 0 : i32
    return %arg0, %c0_i32 : i32, i32
  }
  func.func @transform_1(%arg0: i32) -> (i32, i32) {
    %c0_i32 = arith.constant 0 : i32
    %c0_i32_0 = arith.constant 0 : i32
    return %arg0, %c0_i32 : i32, i32
  }
  func.func @transform_2(%arg0: i32) -> (i32, i32) {
    %c0_i32 = arith.constant 0 : i32
    %c0_i32_0 = arith.constant 0 : i32
    %c0_i32_1 = arith.constant 0 : i32
    return %c0_i32, %c0_i32_0 : i32, i32
  }
  func.func @transform_3(%arg0: i32) -> (i32, i32) {
    %c0_i32 = arith.constant 0 : i32
    %c0_i32_0 = arith.constant 0 : i32
    %c0_i32_1 = arith.constant 0 : i32
    return %c0_i32, %c0_i32_0 : i32, i32
  }
  func.func @transform_4(%arg0: i32) -> (i32, i32) {
    %c0_i32 = arith.constant 0 : i32
    %c0_i32_0 = arith.constant 0 : i32
    %c0_i32_1 = arith.constant 0 : i32
    return %c0_i32, %c0_i32_0 : i32, i32
  }
  func.func @transform_5(%arg0: i32) -> (i32, i32) {
    %c0_i32 = arith.constant 0 : i32
    %c0_i32_0 = arith.constant 0 : i32
    %c0_i32_1 = arith.constant 0 : i32
    return %c0_i32, %c0_i32_0 : i32, i32
  }
  func.func @transform_6(%arg0: i32) -> (i32, i32) {
    %c0_i32 = arith.constant 0 : i32
    %c0_i32_0 = arith.constant 0 : i32
    %c0_i32_1 = arith.constant 0 : i32
    return %c0_i32, %c0_i32_0 : i32, i32
  }
  func.func @transform_7(%arg0: i32) -> (i32, i32) {
    %c0_i32 = arith.constant 0 : i32
    %c0_i32_0 = arith.constant 0 : i32
    %c0_i32_1 = arith.constant 0 : i32
    return %c0_i32, %c0_i32_0 : i32, i32
  }
  func.func @transform_8(%arg0: i32) -> (i32, i32) {
    %c0_i32 = arith.constant 0 : i32
    %c0_i32_0 = arith.constant 0 : i32
    %c0_i32_1 = arith.constant 0 : i32
    return %c0_i32, %c0_i32_0 : i32, i32
  }
  func.func @transform_9(%arg0: i32) -> (i32, i32) {
    %c0_i32 = arith.constant 0 : i32
    %c0_i32_0 = arith.constant 0 : i32
    return %arg0, %c0_i32 : i32, i32
  }
}

module attributes {stable_mosaic.version = 11 : i64} {
  func.func @_geb_kernel_split(%arg0: i32, %arg1: memref<152x64xf32, #tpu.memory_space<vmem>>, %arg2: memref<152x192xf32, #tpu.memory_space<vmem>>, %arg3: memref<64x64xf32, #tpu.memory_space<vmem>>, %arg4: memref<64x32xf32, #tpu.memory_space<vmem>>, %arg5: memref<64x64xf32, #tpu.memory_space<vmem>>, %arg6: memref<64x64xf32, #tpu.memory_space<vmem>>, %arg7: memref<1x64xf32, #tpu.memory_space<vmem>>, %arg8: memref<64x64xf32, #tpu.memory_space<vmem>>, %arg9: memref<1x64xf32, #tpu.memory_space<vmem>>, %arg10: memref<152x128xf32, #tpu.memory_space<vmem>>) attributes {dimension_semantics = [#tpu.dimension_semantics<parallel>], iteration_bounds = array<i64: 2>, scalar_prefetch = 0 : i64, scratch_operands = 0 : i64, tpu.core_type = #tpu.core_type<tc>, window_params = [{transform_indices = @transform_0, window_bounds = array<i64: 152, 64>}, {transform_indices = @transform_1, window_bounds = array<i64: 152, 192>}, {pipeline_mode = #tpu.pipeline_mode<synchronous>, transform_indices = @transform_2, window_bounds = array<i64: 64, 64>}, {pipeline_mode = #tpu.pipeline_mode<synchronous>, transform_indices = @transform_3, window_bounds = array<i64: 64, 32>}, {pipeline_mode = #tpu.pipeline_mode<synchronous>, transform_indices = @transform_4, window_bounds = array<i64: 64, 64>}, {pipeline_mode = #tpu.pipeline_mode<synchronous>, transform_indices = @transform_5, window_bounds = array<i64: 64, 64>}, {pipeline_mode = #tpu.pipeline_mode<synchronous>, transform_indices = @transform_6, window_bounds = array<i64: 1, 64>}, {pipeline_mode = #tpu.pipeline_mode<synchronous>, transform_indices = @transform_7, window_bounds = array<i64: 64, 64>}, {pipeline_mode = #tpu.pipeline_mode<synchronous>, transform_indices = @transform_8, window_bounds = array<i64: 1, 64>}, {transform_indices = @transform_9, window_bounds = array<i64: 152, 128>}]} {
    %c0 = arith.constant 0 : index
    %c0_0 = arith.constant 0 : index
    %0 = vector.load %arg3[%c0, %c0_0] : memref<64x64xf32, #tpu.memory_space<vmem>>, vector<64x64xf32>
    %c0_1 = arith.constant 0 : index
    %c0_2 = arith.constant 0 : index
    %1 = vector.load %arg4[%c0_1, %c0_2] : memref<64x32xf32, #tpu.memory_space<vmem>>, vector<64x32xf32>
    %c0_3 = arith.constant 0 : index
    %c0_4 = arith.constant 0 : index
    %2 = vector.load %arg2[%c0_3, %c0_4] : memref<152x192xf32, #tpu.memory_space<vmem>>, vector<152x64xf32>
    %cst = arith.constant dense<0.000000e+00> : vector<152x64xf32>
    %3 = tpu.matmul %2, %0, %cst {dimension_numbers = #tpu.dot_dimension_numbers<[1], [0], [0], [1], [0, 0, 1, 1], [], []>} : vector<152x64xf32>, vector<64x64xf32>, vector<152x64xf32> -> vector<152x64xf32>
    %4 = arith.mulf %3, %3 : vector<152x64xf32>
    %cst_5 = arith.constant dense<0.000000e+00> : vector<152x32xf32>
    %5 = tpu.matmul %2, %1, %cst_5 {dimension_numbers = #tpu.dot_dimension_numbers<[1], [0], [0], [1], [0, 0, 1, 1], [], []>} : vector<152x64xf32>, vector<64x32xf32>, vector<152x32xf32> -> vector<152x32xf32>
    %c0_6 = arith.constant 0 : index
    %c32 = arith.constant 32 : index
    %6 = vector.load %arg10[%c0_6, %c32] : memref<152x128xf32, #tpu.memory_space<vmem>>, vector<152x32xf32>
    tpu.vector_store %arg10[%c0_6, %c32], %5 {strides = array<i32>} : memref<152x128xf32, #tpu.memory_space<vmem>>, vector<152x32xf32>,
    %c0_7 = arith.constant 0 : index
    %c64 = arith.constant 64 : index
    %7 = vector.load %arg2[%c0_7, %c64] : memref<152x192xf32, #tpu.memory_space<vmem>>, vector<152x64xf32>
    %cst_8 = arith.constant dense<0.000000e+00> : vector<152x64xf32>
    %8 = tpu.matmul %7, %0, %cst_8 {dimension_numbers = #tpu.dot_dimension_numbers<[1], [0], [0], [1], [0, 0, 1, 1], [], []>} : vector<152x64xf32>, vector<64x64xf32>, vector<152x64xf32> -> vector<152x64xf32>
    %9 = arith.mulf %8, %8 : vector<152x64xf32>
    %10 = arith.addf %4, %9 : vector<152x64xf32>
    %cst_9 = arith.constant dense<0.000000e+00> : vector<152x32xf32>
    %11 = tpu.matmul %7, %1, %cst_9 {dimension_numbers = #tpu.dot_dimension_numbers<[1], [0], [0], [1], [0, 0, 1, 1], [], []>} : vector<152x64xf32>, vector<64x32xf32>, vector<152x32xf32> -> vector<152x32xf32>
    %c0_10 = arith.constant 0 : index
    %c64_11 = arith.constant 64 : index
    %12 = vector.load %arg10[%c0_10, %c64_11] : memref<152x128xf32, #tpu.memory_space<vmem>>, vector<152x32xf32>
    tpu.vector_store %arg10[%c0_10, %c64_11], %11 {strides = array<i32>} : memref<152x128xf32, #tpu.memory_space<vmem>>, vector<152x32xf32>,
    %c0_12 = arith.constant 0 : index
    %c128 = arith.constant 128 : index
    %13 = vector.load %arg2[%c0_12, %c128] : memref<152x192xf32, #tpu.memory_space<vmem>>, vector<152x64xf32>
    %cst_13 = arith.constant dense<0.000000e+00> : vector<152x64xf32>
    %14 = tpu.matmul %13, %0, %cst_13 {dimension_numbers = #tpu.dot_dimension_numbers<[1], [0], [0], [1], [0, 0, 1, 1], [], []>} : vector<152x64xf32>, vector<64x64xf32>, vector<152x64xf32> -> vector<152x64xf32>
    %15 = arith.mulf %14, %14 : vector<152x64xf32>
    %16 = arith.addf %10, %15 : vector<152x64xf32>
    %cst_14 = arith.constant dense<0.000000e+00> : vector<152x32xf32>
    %17 = tpu.matmul %13, %1, %cst_14 {dimension_numbers = #tpu.dot_dimension_numbers<[1], [0], [0], [1], [0, 0, 1, 1], [], []>} : vector<152x64xf32>, vector<64x32xf32>, vector<152x32xf32> -> vector<152x32xf32>
    %c0_15 = arith.constant 0 : index
    %c96 = arith.constant 96 : index
    %18 = vector.load %arg10[%c0_15, %c96] : memref<152x128xf32, #tpu.memory_space<vmem>>, vector<152x32xf32>
    tpu.vector_store %arg10[%c0_15, %c96], %17 {strides = array<i32>} : memref<152x128xf32, #tpu.memory_space<vmem>>, vector<152x32xf32>,
    %19 = math.sqrt %16 : vector<152x64xf32>
    %c0_16 = arith.constant 0 : index
    %c0_17 = arith.constant 0 : index
    %20 = vector.load %arg1[%c0_16, %c0_17] : memref<152x64xf32, #tpu.memory_space<vmem>>, vector<152x64xf32>
    %c0_18 = arith.constant 0 : index
    %c0_19 = arith.constant 0 : index
    %21 = vector.load %arg5[%c0_18, %c0_19] : memref<64x64xf32, #tpu.memory_space<vmem>>, vector<64x64xf32>
    %cst_20 = arith.constant dense<0.000000e+00> : vector<152x64xf32>
    %22 = tpu.matmul %20, %21, %cst_20 {dimension_numbers = #tpu.dot_dimension_numbers<[1], [0], [0], [1], [0, 0, 1, 1], [], []>} : vector<152x64xf32>, vector<64x64xf32>, vector<152x64xf32> -> vector<152x64xf32>
    %c0_21 = arith.constant 0 : index
    %c0_22 = arith.constant 0 : index
    %23 = vector.load %arg6[%c0_21, %c0_22] : memref<64x64xf32, #tpu.memory_space<vmem>>, vector<64x64xf32>
    %cst_23 = arith.constant dense<0.000000e+00> : vector<152x64xf32>
    %24 = tpu.matmul %19, %23, %cst_23 {dimension_numbers = #tpu.dot_dimension_numbers<[1], [0], [0], [1], [0, 0, 1, 1], [], []>} : vector<152x64xf32>, vector<64x64xf32>, vector<152x64xf32> -> vector<152x64xf32>
    %25 = arith.addf %22, %24 : vector<152x64xf32>
    %c0_24 = arith.constant 0 : index
    %c0_25 = arith.constant 0 : index
    %26 = vector.load %arg7[%c0_24, %c0_25] : memref<1x64xf32, #tpu.memory_space<vmem>>, vector<1x64xf32>
    %27 = vector.broadcast %26 : vector<1x64xf32> to vector<152x64xf32>
    %28 = arith.addf %25, %27 : vector<152x64xf32>
    %29 = arith.negf %28 : vector<152x64xf32>
    %30 = math.exp %29 : vector<152x64xf32>
    %cst_26 = arith.constant 1.000000e+00 : f32
    %31 = vector.broadcast %cst_26 : f32 to vector<152x64xf32>
    %32 = arith.addf %31, %30 : vector<152x64xf32>
    %33 = arith.divf %31, %32 : vector<152x64xf32>
    %34 = arith.mulf %28, %33 : vector<152x64xf32>
    %c0_27 = arith.constant 0 : index
    %c0_28 = arith.constant 0 : index
    %35 = vector.load %arg8[%c0_27, %c0_28] : memref<64x64xf32, #tpu.memory_space<vmem>>, vector<64x64xf32>
    %cst_29 = arith.constant dense<0.000000e+00> : vector<152x64xf32>
    %36 = tpu.matmul %34, %35, %cst_29 {dimension_numbers = #tpu.dot_dimension_numbers<[1], [0], [0], [1], [0, 0, 1, 1], [], []>} : vector<152x64xf32>, vector<64x64xf32>, vector<152x64xf32> -> vector<152x64xf32>
    %c0_30 = arith.constant 0 : index
    %c0_31 = arith.constant 0 : index
    %37 = vector.load %arg9[%c0_30, %c0_31] : memref<1x64xf32, #tpu.memory_space<vmem>>, vector<1x64xf32>
    %38 = vector.broadcast %37 : vector<1x64xf32> to vector<152x64xf32>
    %39 = arith.addf %36, %38 : vector<152x64xf32>
    %40 = vector.extract_strided_slice %39 {offsets = [0, 0], sizes = [152, 32], strides = [1, 1]} : vector<152x64xf32> to vector<152x32xf32>
    %41 = vector.extract_strided_slice %39 {offsets = [0, 32], sizes = [152, 32], strides = [1, 1]} : vector<152x64xf32> to vector<152x32xf32>
    %42 = arith.negf %40 : vector<152x32xf32>
    %43 = math.exp %42 : vector<152x32xf32>
    %cst_32 = arith.constant 1.000000e+00 : f32
    %44 = vector.broadcast %cst_32 : f32 to vector<152x32xf32>
    %45 = arith.addf %44, %43 : vector<152x32xf32>
    %46 = arith.divf %44, %45 : vector<152x32xf32>
    %47 = arith.mulf %40, %46 : vector<152x32xf32>
    %c0_33 = arith.constant 0 : index
    %c0_34 = arith.constant 0 : index
    %48 = vector.load %arg10[%c0_33, %c0_34] : memref<152x128xf32, #tpu.memory_space<vmem>>, vector<152x32xf32>
    tpu.vector_store %arg10[%c0_33, %c0_34], %47 {strides = array<i32>} : memref<152x128xf32, #tpu.memory_space<vmem>>, vector<152x32xf32>,
    %c0_35 = arith.constant 0 : index
    %c32_36 = arith.constant 32 : index
    %49 = vector.load %arg10[%c0_35, %c32_36] : memref<152x128xf32, #tpu.memory_space<vmem>>, vector<152x32xf32>
    %50 = arith.mulf %41, %49 : vector<152x32xf32>
    %c0_37 = arith.constant 0 : index
    %c32_38 = arith.constant 32 : index
    %51 = vector.load %arg10[%c0_37, %c32_38] : memref<152x128xf32, #tpu.memory_space<vmem>>, vector<152x32xf32>
    tpu.vector_store %arg10[%c0_37, %c32_38], %50 {strides = array<i32>} : memref<152x128xf32, #tpu.memory_space<vmem>>, vector<152x32xf32>,
    %c0_39 = arith.constant 0 : index
    %c64_40 = arith.constant 64 : index
    %52 = vector.load %arg10[%c0_39, %c64_40] : memref<152x128xf32, #tpu.memory_space<vmem>>, vector<152x32xf32>
    %53 = arith.mulf %41, %52 : vector<152x32xf32>
    %c0_41 = arith.constant 0 : index
    %c64_42 = arith.constant 64 : index
    %54 = vector.load %arg10[%c0_41, %c64_42] : memref<152x128xf32, #tpu.memory_space<vmem>>, vector<152x32xf32>
    tpu.vector_store %arg10[%c0_41, %c64_42], %53 {strides = array<i32>} : memref<152x128xf32, #tpu.memory_space<vmem>>, vector<152x32xf32>,
    %c0_43 = arith.constant 0 : index
    %c96_44 = arith.constant 96 : index
    %55 = vector.load %arg10[%c0_43, %c96_44] : memref<152x128xf32, #tpu.memory_space<vmem>>, vector<152x32xf32>
    %56 = arith.mulf %41, %55 : vector<152x32xf32>
    %c0_45 = arith.constant 0 : index
    %c96_46 = arith.constant 96 : index
    %57 = vector.load %arg10[%c0_45, %c96_46] : memref<152x128xf32, #tpu.memory_space<vmem>>, vector<152x32xf32>
    tpu.vector_store %arg10[%c0_45, %c96_46], %56 {strides = array<i32>} : memref<152x128xf32, #tpu.memory_space<vmem>>, vector<152x32xf32>,
    return
  }
  func.func @transform_0(%arg0: i32) -> (i32, i32) {
    %c0_i32 = arith.constant 0 : i32
    %c0_i32_0 = arith.constant 0 : i32
    return %arg0, %c0_i32 : i32, i32
  }
  func.func @transform_1(%arg0: i32) -> (i32, i32) {
    %c0_i32 = arith.constant 0 : i32
    %c0_i32_0 = arith.constant 0 : i32
    return %arg0, %c0_i32 : i32, i32
  }
  func.func @transform_2(%arg0: i32) -> (i32, i32) {
    %c0_i32 = arith.constant 0 : i32
    %c0_i32_0 = arith.constant 0 : i32
    %c0_i32_1 = arith.constant 0 : i32
    return %c0_i32, %c0_i32_0 : i32, i32
  }
  func.func @transform_3(%arg0: i32) -> (i32, i32) {
    %c0_i32 = arith.constant 0 : i32
    %c0_i32_0 = arith.constant 0 : i32
    %c0_i32_1 = arith.constant 0 : i32
    return %c0_i32, %c0_i32_0 : i32, i32
  }
  func.func @transform_4(%arg0: i32) -> (i32, i32) {
    %c0_i32 = arith.constant 0 : i32
    %c0_i32_0 = arith.constant 0 : i32
    %c0_i32_1 = arith.constant 0 : i32
    return %c0_i32, %c0_i32_0 : i32, i32
  }
  func.func @transform_5(%arg0: i32) -> (i32, i32) {
    %c0_i32 = arith.constant 0 : i32
    %c0_i32_0 = arith.constant 0 : i32
    %c0_i32_1 = arith.constant 0 : i32
    return %c0_i32, %c0_i32_0 : i32, i32
  }
  func.func @transform_6(%arg0: i32) -> (i32, i32) {
    %c0_i32 = arith.constant 0 : i32
    %c0_i32_0 = arith.constant 0 : i32
    %c0_i32_1 = arith.constant 0 : i32
    return %c0_i32, %c0_i32_0 : i32, i32
  }
  func.func @transform_7(%arg0: i32) -> (i32, i32) {
    %c0_i32 = arith.constant 0 : i32
    %c0_i32_0 = arith.constant 0 : i32
    %c0_i32_1 = arith.constant 0 : i32
    return %c0_i32, %c0_i32_0 : i32, i32
  }
  func.func @transform_8(%arg0: i32) -> (i32, i32) {
    %c0_i32 = arith.constant 0 : i32
    %c0_i32_0 = arith.constant 0 : i32
    %c0_i32_1 = arith.constant 0 : i32
    return %c0_i32, %c0_i32_0 : i32, i32
  }
  func.func @transform_9(%arg0: i32) -> (i32, i32) {
    %c0_i32 = arith.constant 0 : i32
    %c0_i32_0 = arith.constant 0 : i32
    return %arg0, %c0_i32 : i32, i32
  }
}

</mosaic_0001>

<bundles_post_ra>
// kernel: tpu_custom_call.1
= control target key start
LH: loop header
LB: loop body
LE: loop exit
PB: predicated region body
PF: predicated region fallthrough
CT: control target
= control target key end

     0   :  { %14 = vsyncpa [#allocation3], 0  ;;  %s5857_s0 = inlined_call_operand.vmem [shape: f32[300,64], index: 0, kind: input, shape index: {}]   ;;  %s5858_s1 = inlined_call_operand.vmem [shape: f32[300,192], index: 1, kind: input, shape index: {}]   ;;  %s5859_s2 = inlined_call_operand.vmem [shape: f32[64,64], index: 2, kind: input, shape index: {}]   ;;  %s5860_s3 = inlined_call_operand.vmem [shape: f32[64,32], index: 3, kind: input, shape index: {}]   ;;  %s5861_s4 = inlined_call_operand.vmem [shape: f32[64,64], index: 4, kind: input, shape index: {}]   ;;  %s5862_s5 = inlined_call_operand.vmem [shape: f32[64,64], index: 5, kind: input, shape index: {}]   ;;  %s5863_s6 = inlined_call_operand.vmem [shape: f32[1,64], index: 6, kind: input, shape index: {}]   ;;  %s5864_s7 = inlined_call_operand.vmem [shape: f32[64,64], index: 7, kind: input, shape index: {}]   ;;  %s5865_s8 = inlined_call_operand.vmem [shape: f32[1,64], index: 8, kind: input, shape index: {}]   ;;  %s5866_s9 = inlined_call_operand.hbm [shape: f32[300,128], index: 9, kind: output, shape index: {}]  }
   0x1   :  { %16 = vsyncpa [#allocation3 + $0x1], 0  ;;  %s4106_s30 = smov 0   ;;  %s4108_s10 = smov 0  }
   0x2   :  { %s4110_s11 = smov 0   ;;  %s4112_s12 = smov 0  }
   0x3 LB: > { %s4127_s13 = sadd.s32 4294967295, %s4049_s12   ;;  %s3505_s14 = sadd.s32 4294967294, %s4049_s12   ;;  %s4049_s12 = sphi %s4112_s12, %s5872_s12   ;;  %s4045_s11 = sphi %s4110_s11, %s5871_s11   ;;  %s4041_s10 = sphi %s4108_s10, %s5870_s10   ;;  %s4037_s30 = sphi %s4106_s30, %s5869_s30  }
   0x4   : > { %s4131_s15 = sadd.s32 1, %s4049_s12   ;;  %s228_s16 = sadd.s32 1, %s4045_s11 }
   0x5   : > { %s225_s17 = ssub.s32 %s4049_s12, %s4131_s15  ;;  %p238_p0 = scmp.ne.s32.totalorder %s4045_s11, %s4041_s10 }
   0x6   : > { %p226_p1 = scmp.eq.s32.totalorder %s225_s17, 0  ;;  %p239_p2 = scmp.eq.s32.totalorder %s4127_s13, 1 }
   0x7   : > { %p244_p3 = scmp.ne.s32.totalorder %s4041_s10, %s4037_s30  ;;  %p245_p4 = scmp.eq.s32.totalorder %s3505_s14, 1 }
   0x8   : > { %s4142_s18 = scalar_select %p226_p1, %s4045_s11, %s228_s16  }
   0x9   : > { %p4144_p5 = por %p239_p2, %p238_p0  ;;  %p4148_p6 = por %p245_p4, %p244_p3 }
   0xa   : > { %p3508_p7 = scmp.ge.s32.totalorder %s4049_s12, 1  ;;  %p303_p8 = scmp.lt.s32.totalorder %s4049_s12, 3 }
   0xc   : > { %p304_p9 = pnand %p3508_p7, %p303_p8 }
   0xd   : > { %s345_s25 = smul.u32 (!%p304_p9), 19, %s4127_s13  ;;  %s4051_s27 = smov (!%p304_p9), 64  }
   0xe   : > { %307 = sbr.rel (%p304_p9) target bundleno = 1243 (0x4db), region = 56  ;;  %s342_s24 = sand.u32 (!%p304_p9), 1, %s4041_s10  }
   0xf   : > { %p346_p10 = scmp.lt.s32.totalorder (!%p304_p9), %s345_s25, 37  ;;  %s3750_s26 = smul.u32 (!%p304_p9), 152, %s342_s24 }
  0x10   : > { %s3416_s28 = scalar_lea.sflag (!%p304_p9), [#allocation3], %s342_s24 }
  0x13   : > { %v4157_v0 = vld [vmem:[%s5859_s2 + $0x38] sm:$0xff]  ;;  %v4162_v1 = vld [vmem:[%s5859_s2 + $0x30] sm:$0xff]  ;;  %v4170_v2 = vld [vmem:[%s5859_s2 + $0x28] sm:$0xff]  ;;  %s5874_s25 = smov (!%p346_p10, %s345_s25), 37  ;;  %vm394_vm0 = vcmask 523264   ;;  %vm695_vm5 = vcmask 523520  }
  0x14   : > { %3726 = vmatpush.msra.mxu1 %v4157_v0  ;;  %3727 = vmatpush.msra.mxu2 %v4157_v0  ;;  %v4179_v3 = vld [vmem:[%s5859_s2 + $0x20] sm:$0xff]  ;;  %v4190_v4 = vld [vmem:[%s5859_s2 + $0x18] sm:$0xff]  ;;  %s3724_s17 = sshll.u32 %s5874_s25, 4  ;;  %v4208_v6 = vld [vmem:[%s5859_s2 + $0x10] sm:$0xff] }
  0x15   : > { %460 = vmatpush.msra.mxu0 %v4157_v0  ;;  %3728 = vmatpush.msra.mxu3 %v4157_v0  ;;  %s4199_s23 = scalar_lea.vmem %s5858_s1, %s3724_s17  ;;  %v4221_v8 = vld [vmem:[%s5859_s2 + $0x8] sm:$0xff]  ;;  %v4231_v9 = vld [vmem:[%s5859_s2] sm:$0xff]  ;;  %v374_v12 = vld [vmem:[%s5860_s3 + $0x38] sm:$0xff]  ;;  %s4052_s17 = smov 32  }
  0x16   : > { %3729 = vmatpush.msra.mxu1 %v4162_v1  ;;  %3730 = vmatpush.msra.mxu2 %v4162_v1  ;;  %v4203_v5 = vld [vmem:[%s4199_s23] sm:$0xff]  ;;  %v4237_v10 = vld [vmem:[%s4199_s23 + $0x50] sm:$0xff]  ;;  %v372_v15 = vld [vmem:[%s5860_s3 + $0x28] sm:$0xff] }
  0x17   : > { %461 = vmatpush.msra.mxu0 %v4162_v1  ;;  %3731 = vmatpush.msra.mxu3 %v4162_v1  ;;  %v4216_v7 = vld [vmem:[%s4199_s23 + $0x20] sm:$0xff]  ;;  %v4241_v11 = vld [vmem:[%s4199_s23 + $0x10] sm:$0xff]  ;;  %v370_v18 = vld [vmem:[%s5860_s3 + $0x18] sm:$0xff] }
  0x18   : > { %3732 = vmatpush.msra.mxu1 %v4170_v2  ;;  %3733 = vmatpush.msra.mxu2 %v4170_v2  ;;  %v4250_v13 = vld [vmem:[%s4199_s23 + $0x30] sm:$0xff]  ;;  %v371_v16 = vld [vmem:[%s5860_s3 + $0x20] sm:$0xff]  ;;  %v368_v21 = vld [vmem:[%s5860_s3 + $0x8] sm:$0xff] }
  0x19   : > { %462 = vmatpush.msra.mxu0 %v4170_v2  ;;  %3734 = vmatpush.msra.mxu3 %v4170_v2  ;;  %v373_v14 = vld [vmem:[%s5860_s3 + $0x30] sm:$0xff]  ;;  %v4274_v17 = vld [vmem:[%s4199_s23 + $0x60] sm:$0xff]  ;;  %v1731_v35 = vld [vmem:[%s5862_s5 + $0x38] sm:$0xff] }
  0x1a   : > { %3735 = vmatpush.msra.mxu1 %v4179_v3  ;;  %3736 = vmatpush.msra.mxu2 %v4179_v3  ;;  %v369_v19 = vld [vmem:[%s5860_s3 + $0x10] sm:$0xff]  ;;  %v367_v22 = vld [vmem:[%s5860_s3] sm:$0xff]  ;;  %v1723_v36 = vld [vmem:[%s5861_s4 + $0x38] sm:$0xff] }
  0x1b   : > { %463 = vmatpush.msra.mxu0 %v4179_v3  ;;  %3737 = vmatpush.msra.mxu3 %v4179_v3  ;;  %v4291_v20 = vld [vmem:[%s4199_s23 + $0x70] sm:$0xff]  ;;  %v719_v24 = vld [vmem:[%s4199_s23 + $0x40] sm:$0xff]  ;;  %v4422_v37 = vld [vmem:[%s4199_s23 + $0x8] sm:$0xff] }
  0x1c   : > { %3738 = vmatpush.msra.mxu1 %v4190_v4  ;;  %753 = vrot.lane.b32.xlu0 %v4203_v5, %s4051_s27  ;;  %v4312_v23 = vld [vmem:[%s4199_s23 + $0x90] sm:$0xff]  ;;  %v4323_v25 = vld [vmem:[%s4199_s23 + $0x80] sm:$0xff]  ;;  %v4429_v38 = vld [vmem:[%s4199_s23 + $0x18] sm:$0xff] }
  0x1d   : > { %757 = vrot.lane.b32.xlu1 %v4216_v7, %s4051_s27  ;;  %3739 = vmatpush.msra.mxu2 %v4190_v4  ;;  %v4339_v26 = vld [vmem:[%s4199_s23 + $0xa0] sm:$0xff]  ;;  %v4351_v27 = vld [vmem:[%s4199_s23 + $0xb0] sm:$0xff]  ;;  %v4436_v39 = vld [vmem:[%s4199_s23 + $0x28] sm:$0xff] }
  0x1e   : > { %3741 = vmatpush.msra.mxu1 %v4208_v6  ;;  %464 = vmatpush.msra.mxu0 %v4190_v4  ;;  %v4354_v28 = vld [vmem:[%s4199_s23 + $0xf0] sm:$0xff]  ;;  %v4365_v29 = vld [vmem:[%s4199_s23 + $0xc0] sm:$0xff]  ;;  %v4449_v43 = vld [vmem:[%s4199_s23 + $0x38] sm:$0xff] }
  0x1f   : > { %3742 = vmatpush.msra.mxu2 %v4208_v6  ;;  %3740 = vmatpush.msra.mxu3 %v4190_v4  ;;  %v4368_v30 = vld [vmem:[%s4199_s23 + $0x100] sm:$0xff]  ;;  %v4379_v31 = vld [vmem:[%s4199_s23 + $0xd0] sm:$0xff]  ;;  %v4458_v45 = vld [vmem:[%s4199_s23 + $0x48] sm:$0xff] }
  0x20   : > { %3744 = vmatpush.msra.mxu1 %v4221_v8  ;;  %465 = vmatpush.msra.mxu0 %v4208_v6  ;;  %v4382_v32 = vld [vmem:[%s4199_s23 + $0x110] sm:$0xff]  ;;  %v4395_v33 = vld [vmem:[%s4199_s23 + $0xe0] sm:$0xff]  ;;  %v1729_v47 = vld [vmem:[%s5862_s5 + $0x28] sm:$0xff] }
  0x21   : > { %3745 = vmatpush.msra.mxu2 %v4221_v8  ;;  %3743 = vmatpush.msra.mxu3 %v4208_v6  ;;  %v4398_v34 = vld [vmem:[%s4199_s23 + $0x120] sm:$0xff]  ;;  %v1730_v40 = vld [vmem:[%s5862_s5 + $0x30] sm:$0xff]  ;;  %v1721_v48 = vld [vmem:[%s5861_s4 + $0x28] sm:$0xff] }
  0x22   : > { %3747 = vmatpush.msra.mxu1 %v4231_v9  ;;  %466 = vmatpush.msra.mxu0 %v4221_v8  ;;  %v1722_v41 = vld [vmem:[%s5861_s4 + $0x30] sm:$0xff]  ;;  %v4473_v49 = vld [vmem:[%s4199_s23 + $0x58] sm:$0xff]  ;;  %v4484_v52 = vld [vmem:[%s4199_s23 + $0x68] sm:$0xff] }
  0x23   : > { %3517 = vmatmul.msk.f32.vlgmr.msra.gmra.mxu1 %vm394_vm0, %v4237_v10  ;;  %3748 = vmatpush.msra.mxu2 %v4231_v9  ;;  %v4495_v55 = vld [vmem:[%s4199_s23 + $0x78] sm:$0xff]  ;;  %v1728_v56 = vld [vmem:[%s5862_s5 + $0x20] sm:$0xff]  ;;  %v4512_v60 = vld [vmem:[%s4199_s23 + $0x88] sm:$0xff] }
  0x24   : > { %755 = vrot.lane.b32.xlu0 %v4241_v11, %s4051_s27  ;;  %553 = vmatpush.msrb.mxu1 %v374_v12  ;;  %v1720_v57 = vld [vmem:[%s5861_s4 + $0x20] sm:$0xff]  ;;  %v4523_v63 = vld [vmem:[%s4199_s23 + $0x98] sm:$0xff] }
  0x25   : > { %759 = vrot.lane.b32.xlu1 %v4250_v13, %s4051_s27  ;;  %837 = vmatpush.msrb.mxu2 %v4157_v0 }
  0x26   : > { %554 = vmatpush.msrb.mxu1 %v373_v14  ;;  %3746 = vmatpush.msra.mxu3 %v4221_v8 }
  0x27   : > { %838 = vmatpush.msrb.mxu2 %v4162_v1  ;;  %467 = vmatpush.msra.mxu0 %v4231_v9 }
  0x28   : > { %555 = vmatpush.msrb.mxu1 %v372_v15  ;;  %3749 = vmatpush.msra.mxu3 %v4231_v9 }
  0x29   : > { %3512 = vmatmul.msk.f32.vlgmr.msra.gmra.mxu0 %vm394_vm0, %v4203_v5  ;;  %839 = vmatpush.msrb.mxu2 %v4170_v2 }
  0x2a   : > { %556 = vmatpush.msrb.mxu1 %v371_v16  ;;  %1195 = vmatpush.msrb.mxu0 %v4157_v0 }
  0x2b   : > { %3518 = vmatmul.msk.f32.gmra.mxu1 %vm394_vm0, %v4274_v17  ;;  %840 = vmatpush.msrb.mxu2 %v4179_v3 }
  0x2c   : > { %557 = vmatpush.msrb.mxu1 %v370_v18  ;;  %765 = vrot.lane.b32.xlu0 %v4274_v17, %s4051_s27 }
  0x2d   : > { %767 = vrot.lane.b32.xlu1 %v4291_v20, %s4051_s27  ;;  %1196 = vmatpush.msrb.mxu0 %v4162_v1  ;;  %v1727_v1 = vld [vmem:[%s5862_s5 + $0x18] sm:$0xff] }
  0x2e   : > { %558 = vmatpush.msrb.mxu1 %v369_v19  ;;  %949 = vmatpush.msrb.mxu3 %v374_v12 }
  0x2f   : > { %1197 = vmatpush.msrb.mxu0 %v4170_v2  ;;  %841 = vmatpush.msrb.mxu2 %v4190_v4  ;;  %v1719_v2 = vld [vmem:[%s5861_s4 + $0x18] sm:$0xff] }
  0x30   : > { %559 = vmatpush.msrb.mxu1 %v368_v21  ;;  %950 = vmatpush.msrb.mxu3 %v373_v14 }
  0x31   : > { %3513 = vmatmul.msk.f32.gmra.mxu0 %vm394_vm0, %v4241_v11  ;;  %842 = vmatpush.msrb.mxu2 %v4208_v6 }
  0x32   : > { %560 = vmatpush.msrb.mxu1 %v367_v22  ;;  %951 = vmatpush.msrb.mxu3 %v372_v15 }
  0x33   : > { %3519 = vmatmul.msk.f32.gmra.mxu1 %vm394_vm0, %v4291_v20  ;;  %1198 = vmatpush.msrb.mxu0 %v4179_v3 }
  0x34   : > { %761 = vrot.lane.b32.xlu2 %v719_v24, %s4051_s27  ;;  %771 = vrot.lane.b32.xlu0 %v4312_v23, %s4051_s27 }
  0x35   : > { %952 = vmatpush.msrb.mxu3 %v371_v16  ;;  %1199 = vmatpush.msrb.mxu0 %v4190_v4  ;;  %v4540_v4 = vld [vmem:[%s4199_s23 + $0xa8] sm:$0xff] }
  0x36   : > { %843 = vmatpush.msrb.mxu2 %v4221_v8  ;;  %1307 = vmatpush.msra.mxu1 %v374_v12  ;;  %v1718_v12 = vld [vmem:[%s5861_s4 + $0x10] sm:$0xff] }
  0x37   : > { %953 = vmatpush.msrb.mxu3 %v370_v18  ;;  %1200 = vmatpush.msrb.mxu0 %v4208_v6 }
  0x38   : > { %844 = vmatpush.msrb.mxu2 %v4231_v9  ;;  %1308 = vmatpush.msra.mxu1 %v373_v14  ;;  %v4570_v14 = vld [vmem:[%s4199_s23 + $0xc8] sm:$0xff] }
  0x39   : > { %3514 = vmatmul.msk.f32.gmra.mxu0 %vm394_vm0, %v4216_v7  ;;  %954 = vmatpush.msrb.mxu3 %v369_v19 }
  0x3a   : > { %1201 = vmatpush.msrb.mxu0 %v4221_v8  ;;  %1309 = vmatpush.msra.mxu1 %v372_v15  ;;  %v4552_v8 = vld [vmem:[%s4199_s23 + $0xb8] sm:$0xff] }
  0x3b   : > { %3520 = vmatmul.msk.f32.gmra.mxu1 %vm394_vm0, %v4323_v25  ;;  %955 = vmatpush.msrb.mxu3 %v368_v21 }
  0x3c   : > { %763 = vrot.lane.b32.xlu2 %v4237_v10, %s4051_s27  ;;  %1202 = vmatpush.msrb.mxu0 %v4231_v9 }
  0x3d   : > { %956 = vmatpush.msrb.mxu3 %v367_v22  ;;  %1310 = vmatpush.msra.mxu1 %v371_v16 }
  0x3e   : > { %3522 = vmatmul.msk.f32.vlgmr.msra.gmra.mxu2 %vm394_vm0, %v4339_v26  ;;  %773 = vrot.lane.b32.xlu1 %v4339_v26, %s4051_s27 }
  0x3f   : > { %1311 = vmatpush.msra.mxu1 %v370_v18  ;;  %3527 = vmatmul.msk.f32.vlgmr.msra.gmra.mxu3 %vm394_vm0, %v4354_v28  ;;  %v4582_v18 = vld [vmem:[%s4199_s23 + $0xd8] sm:$0xff] }
  0x40   : > { %777 = vrot.lane.b32.xlu0 %v4365_v29, %s4051_s27  ;;  %1797 = vmatpush.msra.mxu2 %v1731_v35 }
  0x41   : > { %3515 = vmatmul.msk.f32.gmra.mxu0 %vm394_vm0, %v4250_v13  ;;  %1312 = vmatpush.msra.mxu1 %v369_v19 }
  0x42   : > { %1928 = vmatpush.msra.mxu3 %v1723_v36  ;;  %1798 = vmatpush.msra.mxu2 %v1730_v40 }
  0x43   : > { %3521 = vmatmul.msk.f32.gmra.mxu1 %vm394_vm0, %v4312_v23 }
  0x44   : > { %769 = vrot.lane.b32.xlu2 %v4323_v25, %s4051_s27  ;;  %1313 = vmatpush.msra.mxu1 %v368_v21 }
  0x45   : > { %1929 = vmatpush.msra.mxu3 %v1722_v41  ;;  %1799 = vmatpush.msra.mxu2 %v1729_v47  ;;  %v1724_v41 = vld [vmem:[%s5862_s5] sm:$0xff]  ;;  %v4652_v47 = vld [vmem:[%s4199_s23 + $0x118] sm:$0xff] }
  0x46   : > { %1314 = vmatpush.msra.mxu1 %v367_v22  ;;  %3523 = vmatmul.msk.f32.gmra.mxu2 %vm394_vm0, %v4351_v27 }
  0x47   : > { %3528 = vmatmul.msk.f32.gmra.mxu3 %vm394_vm0, %v4368_v30  ;;  %779 = vrot.lane.b32.xlu1 %v4379_v31, %s4051_s27 }
  0x48   : > { %783 = vrot.lane.b32.xlu0 %v4354_v28, %s4051_s27  ;;  %1930 = vmatpush.msra.mxu3 %v1721_v48 }
  0x49   : > { %3516 = vmatmul.msk.f32.gmra.mxu0 %vm394_vm0, %v719_v24  ;;  %1800 = vmatpush.msra.mxu2 %v1728_v56 }
  0x4a   : > { %1931 = vmatpush.msra.mxu3 %v1720_v57 }
  0x4b   : > { %3531 = vmatmul.msk.f32.vlgmr.msrb.gmra.mxu1 %vm394_vm0, %v4203_v5  ;;  %1801 = vmatpush.msra.mxu2 %v1727_v1 }
  0x4c   : > { %775 = vrot.lane.b32.xlu2 %v4351_v27, %s4051_s27  ;;  %1932 = vmatpush.msra.mxu3 %v1719_v2 }
  0x4e   : > { %3524 = vmatmul.msk.f32.gmra.mxu2 %vm394_vm0, %v4365_v29  ;;  %1933 = vmatpush.msra.mxu3 %v1718_v12 }
  0x4f   : > { %3529 = vmatmul.msk.f32.gmra.mxu3 %vm394_vm0, %v4382_v32  ;;  %785 = vrot.lane.b32.xlu1 %v4368_v30, %s4051_s27 }
  0x50   : > { %789 = vrot.lane.b32.xlu0 %v4398_v34, %s4051_s27 }
  0x51   : > { %3588 = vmatmul.msk.f32.vlgmr.msrb.gmra.mxu0 %vm394_vm0, %v4422_v37 }
  0x53   : > { %3532 = vmatmul.msk.f32.gmra.mxu1 %vm394_vm0, %v4241_v11  ;;  %v1726_v11 = vld [vmem:[%s5862_s5 + $0x10] sm:$0xff] }
  0x54   : > { %781 = vrot.lane.b32.xlu2 %v4395_v33, %s4051_s27  ;;  %1802 = vmatpush.msra.mxu2 %v1726_v11 }
  0x56   : > { %3525 = vmatmul.msk.f32.gmra.mxu2 %vm394_vm0, %v4379_v31 }
  0x57   : > { %3530 = vmatmul.msk.f32.gmra.mxu3 %vm394_vm0, %v4398_v34 }
  0x59   : > { %3589 = vmatmul.msk.f32.gmra.mxu0 %vm394_vm0, %v4429_v38 }
  0x5b   : > { %3533 = vmatmul.msk.f32.gmra.mxu1 %vm394_vm0, %v4216_v7 }
  0x5c   : > { %787 = vrot.lane.b32.xlu2 %v4382_v32, %s4051_s27 }
  0x5e   : > { %3526 = vmatmul.msk.f32.gmra.mxu2 %vm394_vm0, %v4395_v33 }
  0x61   : > { %3590 = vmatmul.msk.f32.gmra.mxu0 %vm394_vm0, %v4436_v39 }
  0x63   : > { %3534 = vmatmul.msk.f32.gmra.mxu1 %vm394_vm0, %v4250_v13 }
  0x69   : > { %3591 = vmatmul.msk.f32.gmra.mxu0 %vm394_vm0, %v4449_v43 }
  0x6b   : > { %3535 = vmatmul.msk.f32.gmra.mxu1 %vm394_vm0, %v719_v24 }
  0x71   : > { %3592 = vmatmul.msk.f32.gmra.mxu0 %vm394_vm0, %v4458_v45 }
  0x73   : > { %3536 = vmatmul.msk.f32.gmra.mxu1 %vm394_vm0, %v4237_v10 }
  0x79   : > { %3593 = vmatmul.msk.f32.gmra.mxu0 %vm394_vm0, %v4473_v49 }
  0x7b   : > { %3537 = vmatmul.msk.f32.gmra.mxu1 %vm394_vm0, %v4274_v17 }
  0x81   : > { %3594 = vmatmul.msk.f32.gmra.mxu0 %vm394_vm0, %v4484_v52 }
  0x83   : > { %3538 = vmatmul.msk.f32.gmra.mxu1 %vm394_vm0, %v4291_v20 }
  0x89   : > { %3595 = vmatmul.msk.f32.gmra.mxu0 %vm394_vm0, %v4495_v55 }
  0x8b   : > { %3539 = vmatmul.msk.f32.gmra.mxu1 %vm394_vm0, %v4323_v25  ;;  %v1725_v25 = vld [vmem:[%s5862_s5 + $0x8] sm:$0xff] }
  0x8c   : > { %1803 = vmatpush.msra.mxu2 %v1725_v25 }
  0x8e   : > { %v754_v42 = vpop.permute.xlu0 %753  ;;  %v762_v54 = vpop.permute.xlu2 %761  ;;  %1804 = vmatpush.msra.mxu2 %v1724_v41 }
  0x8f   : > { %3550 = vmatmul.msk.f32.vlgmr.msrb.gmra.mxu2 %vm394_vm0, %v754_v42  ;;  %3569 = vmatmul.msk.f32.vlgmr.msrb.gmra.mxu3 %vm394_vm0, %v754_v42  ;;  %v758_v46 = vpop.permute.xlu1 %757  ;;  %v1716_v42 = vld [vmem:[%s5861_s4] sm:$0xff] }
  0x91   : > { %3596 = vmatmul.msk.f32.gmra.mxu0 %vm394_vm0, %v4512_v60 }
  0x93   : > { %3540 = vmatmul.msk.f32.gmra.mxu1 %vm394_vm0, %v4312_v23  ;;  %v4596_v23 = vld [vmem:[%s4199_s23 + $0xe8] sm:$0xff] }
  0x96   : > { %v756_v44 = vpop.permute.xlu0 %755  ;;  %v764_v59 = vpop.permute.xlu2 %763 }
  0x97   : > { %3551 = vmatmul.msk.f32.gmra.mxu2 %vm394_vm0, %v756_v44  ;;  %3570 = vmatmul.msk.f32.gmra.mxu3 %vm394_vm0, %v756_v44  ;;  %v760_v51 = vpop.permute.xlu1 %759 }
  0x99   : > { %3597 = vmatmul.msk.f32.gmra.mxu0 %vm394_vm0, %v4523_v63 }
  0x9b   : > { %3541 = vmatmul.msk.f32.gmra.mxu1 %vm394_vm0, %v4339_v26  ;;  %v1717_v26 = vld [vmem:[%s5861_s4 + $0x8] sm:$0xff] }
  0x9c   : > { %1934 = vmatpush.msra.mxu3 %v1717_v26 }
  0x9e   : > { %v766_v62 = vpop.permute.xlu0 %765  ;;  %v770_v7 = vpop.permute.xlu2 %769  ;;  %1935 = vmatpush.msra.mxu3 %v1716_v42 }
  0x9f   : > { %3552 = vmatmul.msk.f32.gmra.mxu2 %vm394_vm0, %v758_v46  ;;  %3571 = vmatmul.msk.f32.gmra.mxu3 %vm394_vm0, %v758_v46  ;;  %v768_v3 = vpop.permute.xlu1 %767 }
  0xa0   : > { %v4477_v50 = vpop.f32.mrf.mxu1 }
  0xa1   : > { %3598 = vmatmul.msk.f32.gmra.mxu0 %vm394_vm0, %v4540_v4 }
  0xa3   : > { %3542 = vmatmul.msk.f32.gmra.mxu1 %vm394_vm0, %v4351_v27 }
  0xa6   : > { %v4549_v6 = vpop.f32.mrf.mxu0  ;;  %v772_v13 = vpop.permute.xlu0 %771 }
  0xa7   : > { %3553 = vmatmul.msk.f32.gmra.mxu2 %vm394_vm0, %v760_v51  ;;  %3572 = vmatmul.msk.f32.gmra.mxu3 %vm394_vm0, %v760_v51  ;;  %v776_v22 = vpop.permute.xlu2 %775 }
  0xa8   : > { %v4488_v53 = vpop.f32.mrf.mxu1 }
  0xa9   : > { %3599 = vmatmul.msk.f32.gmra.mxu0 %vm394_vm0, %v4552_v8 }
  0xab   : > { %3543 = vmatmul.msk.f32.gmra.mxu1 %vm394_vm0, %v4365_v29 }
  0xae   : > { %v4561_v10 = vpop.f32.mrf.mxu0 }
  0xaf   : > { %3554 = vmatmul.msk.f32.gmra.mxu2 %vm394_vm0, %v762_v54  ;;  %3573 = vmatmul.msk.f32.gmra.mxu3 %vm394_vm0, %v762_v54  ;;  %v4662_v54 = vld [vmem:[%s4199_s23 + $0x128] sm:$0xff] }
  0xb0   : > { %v4505_v58 = vpop.f32.mrf.mxu1  ;;  %v774_v17 = vpop.permute.xlu1 %773 }
  0xb1   : > { %3600 = vmatmul.msk.f32.gmra.mxu0 %vm394_vm0, %v4570_v14 }
  0xb3   : > { %3544 = vmatmul.msk.f32.gmra.mxu1 %vm394_vm0, %v4379_v31  ;;  %v4618_v31 = vld [vmem:[%s4199_s23 + $0xf8] sm:$0xff] }
  0xb6   : > { %v4579_v16 = vpop.f32.mrf.mxu0 }
  0xb7   : > { %3555 = vmatmul.msk.f32.gmra.mxu2 %vm394_vm0, %v764_v59  ;;  %3574 = vmatmul.msk.f32.gmra.mxu3 %vm394_vm0, %v764_v59  ;;  %v528_v41 = vmul.f32 %v4579_v16, %v4579_v16 }
  0xb8   : > { %v4516_v61 = vpop.f32.mrf.mxu1 }
  0xb9   : > { %3601 = vmatmul.msk.f32.gmra.mxu0 %vm394_vm0, %v4582_v18 }
  0xbb   : > { %3545 = vmatmul.msk.f32.gmra.mxu1 %vm394_vm0, %v4395_v33 }
  0xbe   : > { %v4593_v21 = vpop.f32.mrf.mxu0 }
  0xbf   : > { %3556 = vmatmul.msk.f32.gmra.mxu2 %vm394_vm0, %v766_v62  ;;  %3575 = vmatmul.msk.f32.gmra.mxu3 %vm394_vm0, %v766_v62 }
  0xc0   : > { %v4527_v0 = vpop.f32.mrf.mxu1 }
  0xc1   : > { %v4586_v19 = vpop.f32.mrf.mxu2  ;;  %3602 = vmatmul.msk.f32.gmra.mxu0 %vm394_vm0, %v4596_v23 }
  0xc3   : > { %3546 = vmatmul.msk.f32.gmra.mxu1 %vm394_vm0, %v4354_v28  ;;  %v4611_v28 = vpop.f32.mrf.mxu3 }
  0xc6   : > { %v4615_v29 = vpop.f32.mrf.mxu0 }
  0xc7   : > { %3557 = vmatmul.msk.f32.gmra.mxu2 %vm394_vm0, %v768_v3  ;;  %3576 = vmatmul.msk.f32.gmra.mxu3 %vm394_vm0, %v768_v3 }
  0xc8   : > { %v562_v5 = vpop.f32.mrf.mxu1 }
  0xc9   : > { %638 = vrot.lane.b32.xlu1 %v562_v5, %s4052_s17  ;;  %v4608_v27 = vpop.f32.mrf.mxu2  ;;  %3603 = vmatmul.msk.f32.gmra.mxu0 %vm394_vm0, %v4618_v31  ;;  %v526_v5 = vmul.f32 %v4549_v6, %v4549_v6 }
  0xcb   : > { %3547 = vmatmul.msk.f32.gmra.mxu1 %vm394_vm0, %v4368_v30  ;;  %v778_v30 = vpop.permute.xlu0 %777  ;;  %v4629_v35 = vpop.f32.mrf.mxu3 }
  0xce   : > { %v1204_v36 = vpop.f32.mrf.mxu0 }
  0xcf   : > { %3558 = vmatmul.msk.f32.gmra.mxu2 %vm394_vm0, %v770_v7  ;;  %3577 = vmatmul.msk.f32.gmra.mxu3 %vm394_vm0, %v770_v7 }
  0xd0   : > { %v565_v9 = vpop.f32.mrf.mxu1 }
  0xd1   : > { %640 = vrot.lane.b32.xlu2 %v565_v9, %s4052_s17  ;;  %v4627_v33 = vpop.f32.mrf.mxu2 }
  0xd3   : > { %3548 = vmatmul.msk.f32.gmra.mxu1 %vm394_vm0, %v4382_v32  ;;  %v4649_v46 = vpop.f32.mrf.mxu3  ;;  %v784_v48 = vpop.permute.xlu0 %783 }
  0xd6   : > { %v1207_v44 = vpop.f32.mrf.mxu0 }
  0xd7   : > { %3559 = vmatmul.msk.f32.gmra.mxu2 %vm394_vm0, %v772_v13  ;;  %3578 = vmatmul.msk.f32.gmra.mxu3 %vm394_vm0, %v772_v13 }
  0xd8   : > { %v568_v15 = vpop.f32.mrf.mxu1 }
  0xd9   : > { %642 = vrot.lane.b32.xlu0 %v568_v15, %s4052_s17  ;;  %v4641_v40 = vpop.f32.mrf.mxu2 }
  0xdb   : > { %3549 = vmatmul.msk.f32.gmra.mxu1 %vm394_vm0, %v4398_v34  ;;  %v780_v34 = vpop.permute.xlu1 %779  ;;  %v4668_v59 = vpop.f32.mrf.mxu3 }
  0xde   : > { %v1210_v51 = vpop.f32.mrf.mxu0 }
  0xdf   : > { %3560 = vmatmul.msk.f32.gmra.mxu2 %vm394_vm0, %v774_v17  ;;  %3579 = vmatmul.msk.f32.gmra.mxu3 %vm394_vm0, %v774_v17 }
  0xe0   : > { %v571_v20 = vpop.f32.mrf.mxu1 }
  0xe1   : > { %644 = vrot.lane.b32.xlu1 %v571_v20, %s4052_s17  ;;  %v4665_v56 = vpop.f32.mrf.mxu2 }
  0xe3   : > { %3607 = vmatmul.msk.f32.vlgmr.msra.gmra.mxu1 %vm394_vm0, %v4422_v37  ;;  %v4632_v37 = vld [vmem:[%s4199_s23 + $0x108] sm:$0xff]  ;;  %s3509_s23 = sshll.u32 %s5874_s25, 3  ;;  %s4053_s25 = smov 96  }
  0xe4   : > { %3604 = vmatmul.msk.f32.gmra.mxu0 %vm394_vm0, %v4632_v37  ;;  %s4712_s21 = scalar_lea.vmem %s5857_s0, %s3509_s23  ;;  %s4776_s23 = scalar_lea.vmem [#allocation2], %s3750_s26 }
  0xe5   : > { %s3428_s22 = sshll.u32 %s4776_s23, 4  ;;  %s3429_s22 = int_to_ptr.vmem [resolvable:$true] %s3428_s22 }
  0xe6   : > { %v4675_v62 = vpop.f32.mrf.mxu0 }
  0xe7   : > { %3561 = vmatmul.msk.f32.gmra.mxu2 %vm394_vm0, %v776_v22  ;;  %3580 = vmatmul.msk.f32.gmra.mxu3 %vm394_vm0, %v776_v22  ;;  %v1262_v22 = vmul.f32 %v1207_v44, %v1207_v44  ;;  %v1263_v44 = vmul.f32 %v1210_v51, %v1210_v51  ;;  %v529_v51 = vmul.f32 %v4593_v21, %v4593_v21 }
  0xe8   : > { %v574_v24 = vpop.f32.mrf.mxu1 }
  0xe9   : > { %646 = vrot.lane.b32.xlu2 %v574_v24, %s4052_s17  ;;  %v790_v24 = vpop.permute.xlu0 %789 }
  0xeb   : > { %3608 = vmatmul.msk.f32.gmra.mxu1 %vm394_vm0, %v4429_v38 }
  0xec   : > { %3605 = vmatmul.msk.f32.gmra.mxu0 %vm394_vm0, %v4652_v47 }
  0xee   : > { %v4685_v12 = vpop.f32.mrf.mxu0 }
  0xef   : > { %3562 = vmatmul.msk.f32.gmra.mxu2 %vm394_vm0, %v778_v30  ;;  %3581 = vmatmul.msk.f32.gmra.mxu3 %vm394_vm0, %v778_v30 }
  0xf0   : > { %v577_v32 = vpop.f32.mrf.mxu1 }
  0xf1   : > { %648 = vrot.lane.b32.xlu0 %v577_v32, %s4052_s17 }
  0xf3   : > { %3609 = vmatmul.msk.f32.gmra.mxu1 %vm394_vm0, %v4436_v39  ;;  %v782_v39 = vpop.permute.xlu2 %781 }
  0xf4   : > { %3606 = vmatmul.msk.f32.gmra.mxu0 %vm394_vm0, %v4662_v54 }
  0xf6   : > { %v4698_v26 = vpop.f32.mrf.mxu0 }
  0xf7   : > { %3563 = vmatmul.msk.f32.gmra.mxu2 %vm394_vm0, %v780_v34  ;;  %3582 = vmatmul.msk.f32.gmra.mxu3 %vm394_vm0, %v780_v34 }
  0xf8   : > { %v580_v38 = vpop.f32.mrf.mxu1 }
  0xf9   : > { %650 = vrot.lane.b32.xlu1 %v580_v38, %s4052_s17 }
  0xfb   : > { %3610 = vmatmul.msk.f32.gmra.mxu1 %vm394_vm0, %v4449_v43  ;;  %v788_v9 = vpop.permute.xlu2 %787 }
  0xff   : > { %3564 = vmatmul.msk.f32.gmra.mxu2 %vm394_vm0, %v782_v39  ;;  %3583 = vmatmul.msk.f32.gmra.mxu3 %vm394_vm0, %v782_v39 }
 0x100   : > { %v583_v43 = vpop.f32.mrf.mxu1 }
 0x101   : > { %652 = vrot.lane.b32.xlu2 %v583_v43, %s4052_s17 }
 0x103   : > { %3611 = vmatmul.msk.f32.gmra.mxu1 %vm394_vm0, %v4458_v45  ;;  %v786_v45 = vpop.permute.xlu1 %785 }
 0x107   : > { %3565 = vmatmul.msk.f32.gmra.mxu2 %vm394_vm0, %v784_v48  ;;  %3584 = vmatmul.msk.f32.gmra.mxu3 %vm394_vm0, %v784_v48  ;;  %v1697_v48 = vld [vmem:[%s4712_s21] sm:$0xff] }
 0x108   : > { %v586_v57 = vpop.f32.mrf.mxu1 }
 0x109   : > { %654 = vrot.lane.b32.xlu0 %v586_v57, %s4052_s17 }
 0x10b   : > { %3612 = vmatmul.msk.f32.gmra.mxu1 %vm394_vm0, %v4473_v49  ;;  %v1261_v49 = vmul.f32 %v1204_v36, %v1204_v36 }
 0x10f   : > { %3566 = vmatmul.msk.f32.gmra.mxu2 %vm394_vm0, %v786_v45  ;;  %3585 = vmatmul.msk.f32.gmra.mxu3 %vm394_vm0, %v786_v45 }
 0x110   : > { %v589_v1 = vpop.f32.mrf.mxu1 }
 0x111   : > { %656 = vrot.lane.b32.xlu1 %v589_v1, %s4052_s17 }
 0x112   : > { %v846_v2 = vpop.f32.mrf.mxu2  ;;  %v958_v3 = vpop.f32.mrf.mxu3 }
 0x113   : > { %v903_v7 = vmul.f32 %v846_v2, %v846_v2  ;;  %3613 = vmatmul.msk.f32.gmra.mxu1 %vm394_vm0, %v4484_v52  ;;  %1034 = vrot.lane.b32.xlu2 %v958_v3, %s4051_s27  ;;  %v527_v52 = vmul.f32 %v4561_v10, %v4561_v10  ;;  %v4725_v3 = vpop.f32.mrf.mxu0 }
 0x115   : > { %v922_v11 = vadd.f32 %v903_v7, %v526_v5 }
 0x117   : > { %v4687_v13 = vadd.f32 %v1261_v49, %v922_v11  ;;  %3567 = vmatmul.msk.f32.gmra.mxu2 %vm394_vm0, %v788_v9  ;;  %3586 = vmatmul.msk.f32.gmra.mxu3 %vm394_vm0, %v788_v9 }
 0x118   : > { %v592_v15 = vpop.f32.mrf.mxu1 }
 0x119   : > { %3797 = vrsqrt.f32 %v4687_v13  ;;  %vm1476_vm1 = vcmp.eq.f32.partialorder %v4687_v13, inf  ;;  %vm1478_vm2 = vcmp.eq.f32.partialorder %v4687_v13, 0.0 }
 0x11a   : > { %v849_v6 = vpop.f32.mrf.mxu2  ;;  %v961_v17 = vpop.f32.mrf.mxu3 }
 0x11b   : > { %v904_v20 = vmul.f32 %v849_v6, %v849_v6  ;;  %3614 = vmatmul.msk.f32.gmra.mxu1 %vm394_vm0, %v4495_v55  ;;  %1036 = vrot.lane.b32.xlu0 %v961_v17, %s4051_s27  ;;  %v2404_v55 = vld [vmem:[%s5864_s7 + $0x38] sm:$0xff]  ;;  %v1264_v6 = vmul.f32 %v4675_v62, %v4675_v62  ;;  %v1479_v17 = vand.u32 2147483648, %v4687_v13 }
 0x11c   : > { %658 = vrot.lane.b32.xlu2 %v592_v15, %s4052_s17  ;;  %2474 = vmatpush.msra.mxu0 %v2404_v55 }
 0x11d   : > { %v923_v25 = vadd.f32 %v904_v20, %v527_v52  ;;  %v1698_v20 = vld [vmem:[%s4712_s21 + $0x8] sm:$0xff] }
 0x11f   : > { %v3798_v30 = vpop.eup %3797  ;;  %v4701_v32 = vadd.f32 %v1262_v22, %v923_v25  ;;  %3568 = vmatmul.msk.f32.gmra.mxu2 %vm394_vm0, %v790_v24  ;;  %3587 = vmatmul.msk.f32.gmra.mxu3 %vm394_vm0, %v790_v24 }
 0x120   : > { %v595_v10 = vpop.f32.mrf.mxu1  ;;  %v1470_v34 = vmul.f32 %v3798_v30, %v4687_v13 }
 0x121   : > { %3799 = vrsqrt.f32 %v4701_v32  ;;  %vm1488_vm3 = vcmp.eq.f32.partialorder %v4701_v32, inf  ;;  %vm1490_vm4 = vcmp.eq.f32.partialorder %v4701_v32, 0.0 }
 0x122   : > { %v852_v36 = vpop.f32.mrf.mxu2  ;;  %v964_v38 = vpop.f32.mrf.mxu3  ;;  %v1471_v39 = vmul.f32 %v3798_v30, %v1470_v34 }
 0x123   : > { %v905_v42 = vmul.f32 %v852_v36, %v852_v36  ;;  %3615 = vmatmul.msk.f32.gmra.mxu1 %vm394_vm0, %v4512_v60  ;;  %1038 = vrot.lane.b32.xlu1 %v964_v38, %s4051_s27  ;;  %v530_v36 = vmul.f32 %v4615_v29, %v4615_v29 }
 0x124   : > { %660 = vrot.lane.b32.xlu0 %v595_v10, %s4052_s17  ;;  %v1472_v43 = vmul.f32 0.5, %v1471_v39 }
 0x125   : > { %v924_v57 = vadd.f32 %v905_v42, %v528_v41 }
 0x126   : > { %v1473_v45 = vsub.f32 1.5, %v1472_v43  ;;  %v1265_v43 = vmul.f32 %v4685_v12, %v4685_v12 }
 0x127   : > { %v3800_v1 = vpop.eup %3799  ;;  %v4722_v2 = vadd.f32 %v1263_v44, %v924_v57  ;;  %3645 = vmatmul.msk.f32.vlgmr.msra.gmra.mxu3 %vm394_vm0, %v1697_v48  ;;  %v1491_v48 = vand.u32 2147483648, %v4701_v32 }
 0x128   : > { %v598_v16 = vpop.f32.mrf.mxu1  ;;  %v1474_v5 = vmul.f32 %v3798_v30, %v1473_v45  ;;  %v1482_v60 = vmul.f32 %v3800_v1, %v4701_v32  ;;  %v1699_v45 = vld [vmem:[%s4712_s21 + $0x10] sm:$0xff] }
 0x129   : > { %3801 = vrsqrt.f32 %v4722_v2  ;;  %vm1500_vm6 = vcmp.eq.f32.partialorder %v4722_v2, inf  ;;  %vm1502_vm7 = vcmp.eq.f32.partialorder %v4722_v2, 0.0 }
 0x12a   : > { %v855_v7 = vpop.f32.mrf.mxu2  ;;  %v967_v49 = vpop.f32.mrf.mxu3  ;;  %v1475_v9 = vmul.f32 %v1474_v5, %v4687_v13  ;;  %v1483_v11 = vmul.f32 %v3800_v1, %v1482_v60 }
 0x12b   : > { %v906_v15 = vmul.f32 %v855_v7, %v855_v7  ;;  %1040 = vrot.lane.b32.xlu2 %v967_v49, %s4051_s27  ;;  %662 = vrot.lane.b32.xlu1 %v598_v16, %s4052_s17 }
 0x12c   : > { %v1477_v52 = vsel %vm1476_vm1, %v4687_v13, %v1475_v9  ;;  %v1484_v21 = vmul.f32 0.5, %v1483_v11  ;;  %3616 = vmatmul.msk.f32.gmra.mxu1 %vm394_vm0, %v4523_v63  ;;  %v2403_v13 = vld [vmem:[%s5864_s7 + $0x30] sm:$0xff]  ;;  %v4753_v63 = vpop.f32.mrf.mxu0 }
 0x12d   : > { %v925_v22 = vadd.f32 %v906_v15, %v529_v51  ;;  %v1480_v62 = vsel %vm1478_vm2, %v1479_v17, %v1477_v52  ;;  %2475 = vmatpush.msra.mxu0 %v2403_v13  ;;  %v641_v51 = vpop.permute.xlu2 %640  ;;  %v1266_v52 = vmul.f32 %v4698_v26, %v4698_v26 }
 0x12e   : > { %3626 = vmatmul.msk.f32.vlgmr.msra.gmra.mxu2 %vm394_vm0, %v1480_v62  ;;  %v1485_v24 = vsub.f32 1.5, %v1484_v21  ;;  %697 = vst.msk [vmem:[%s4776_s23 + $0x8] sm:$0xff] %vm695_vm5, %v641_v51  ;;  %v1503_v21 = vand.u32 2147483648, %v4722_v2  ;;  %v1700_v62 = vld [vmem:[%s4712_s21 + $0x18] sm:$0xff] }
 0x12f   : > { %v3802_v25 = vpop.eup %3801  ;;  %v4744_v30 = vadd.f32 %v1264_v6, %v925_v22  ;;  %3646 = vmatmul.msk.f32.gmra.mxu3 %vm394_vm0, %v1698_v20 }
 0x130   : > { %v601_v55 = vpop.f32.mrf.mxu1  ;;  %v1486_v10 = vmul.f32 %v3800_v1, %v1485_v24  ;;  %v1494_v34 = vmul.f32 %v3802_v25, %v4722_v2 }
 0x131   : > { %3803 = vrsqrt.f32 %v4744_v30  ;;  %vm1512_vm8 = vcmp.eq.f32.partialorder %v4744_v30, inf  ;;  %vm1514_vm9 = vcmp.eq.f32.partialorder %v4744_v30, 0.0 }
 0x132   : > { %v858_v38 = vpop.f32.mrf.mxu2  ;;  %v970_v39 = vpop.f32.mrf.mxu3  ;;  %v1487_v41 = vmul.f32 %v1486_v10, %v4701_v32  ;;  %v1495_v42 = vmul.f32 %v3802_v25, %v1494_v34 }
 0x133   : > { %v907_v44 = vmul.f32 %v858_v38, %v858_v38  ;;  %1042 = vrot.lane.b32.xlu0 %v970_v39, %s4051_s27  ;;  %664 = vrot.lane.b32.xlu2 %v601_v55, %s4052_s17 }
 0x134   : > { %v1489_v29 = vsel %vm1488_vm3, %v4701_v32, %v1487_v41  ;;  %v1496_v57 = vmul.f32 0.5, %v1495_v42  ;;  %3617 = vmatmul.msk.f32.gmra.mxu1 %vm394_vm0, %v4540_v4  ;;  %v531_v4 = vmul.f32 %v4477_v50, %v4477_v50  ;;  %v4790_v50 = vpop.f32.mrf.mxu0  ;;  %vm1091_vm3 = vcmask 785920  }
 0x135   : > { %v926_v12 = vadd.f32 %v907_v44, %v530_v36  ;;  %v1492_v1 = vsel %vm1490_vm4, %v1491_v48, %v1489_v29  ;;  %v1267_v44 = vmul.f32 %v4725_v3, %v4725_v3 }
 0x136   : > { %3627 = vmatmul.msk.f32.gmra.mxu2 %vm394_vm0, %v1492_v1  ;;  %v1497_v16 = vsub.f32 1.5, %v1496_v57  ;;  %v1701_v57 = vld [vmem:[%s4712_s21 + $0x20] sm:$0xff]  ;;  %v2402_v1 = vld [vmem:[%s5864_s7 + $0x28] sm:$0xff] }
 0x137   : > { %v3804_v5 = vpop.eup %3803  ;;  %v4772_v60 = vadd.f32 %v1265_v43, %v926_v12  ;;  %3647 = vmatmul.msk.f32.gmra.mxu3 %vm394_vm0, %v1699_v45  ;;  %v1515_v43 = vand.u32 2147483648, %v4744_v30  ;;  %2476 = vmatpush.msra.mxu0 %v2402_v1  ;;  %v535_v1 = vmul.f32 %v4527_v0, %v4527_v0 }
 0x138   : > { %v604_v7 = vpop.f32.mrf.mxu1  ;;  %v1498_v49 = vmul.f32 %v3802_v25, %v1497_v16  ;;  %v1506_v32 = vmul.f32 %v3804_v5, %v4744_v30 }
 0x139   : > { %3805 = vrsqrt.f32 %v4772_v60  ;;  %vm1524_vm10 = vcmp.eq.f32.partialorder %v4772_v60, inf  ;;  %vm1526_vm11 = vcmp.eq.f32.partialorder %v4772_v60, 0.0 }
 0x13a   : > { %v861_v9 = vpop.f32.mrf.mxu2  ;;  %v973_v11 = vpop.f32.mrf.mxu3  ;;  %v1499_v15 = vmul.f32 %v1498_v49, %v4722_v2  ;;  %v1507_v6 = vmul.f32 %v3804_v5, %v1506_v32  ;;  %v533_v49 = vmul.f32 %v4505_v58, %v4505_v58 }
 0x13b   : > { %v908_v17 = vmul.f32 %v861_v9, %v861_v9  ;;  %1044 = vrot.lane.b32.xlu1 %v973_v11, %s4051_s27  ;;  %666 = vrot.lane.b32.xlu0 %v604_v7, %s4052_s17 }
 0x13c   : > { %v1501_v20 = vsel %vm1500_vm6, %v4722_v2, %v1499_v15  ;;  %v1508_v22 = vmul.f32 0.5, %v1507_v6  ;;  %3618 = vmatmul.msk.f32.gmra.mxu1 %vm394_vm0, %v4552_v8  ;;  %v532_v2 = vmul.f32 %v4488_v53, %v4488_v53  ;;  %v4819_v12 = vpop.f32.mrf.mxu0  ;;  %v1268_v6 = vmul.f32 %v4753_v63, %v4753_v63 }
 0x13d   : > { %v927_v26 = vadd.f32 %v908_v17, %v531_v4  ;;  %v1504_v24 = vsel %vm1502_vm7, %v1503_v21, %v1501_v20  ;;  %v1527_v17 = vand.u32 2147483648, %v4772_v60  ;;  %v1702_v21 = vld [vmem:[%s4712_s21 + $0x28] sm:$0xff]  ;;  %v639_v20 = vpop.permute.xlu1 %638 }
 0x13e   : > { %3628 = vmatmul.msk.f32.gmra.mxu2 %vm394_vm0, %v1504_v24  ;;  %v1509_v25 = vsub.f32 1.5, %v1508_v22  ;;  %696 = vst.msk [vmem:[%s4776_s23] sm:$0xff] %vm695_vm5, %v639_v20 }
 0x13f   : > { %v3806_v13 = vpop.eup %3805  ;;  %v4798_v55 = vadd.f32 %v1266_v52, %v927_v26  ;;  %3648 = vmatmul.msk.f32.gmra.mxu3 %vm394_vm0, %v1700_v62 }
 0x140   : > { %v607_v10 = vpop.f32.mrf.mxu1  ;;  %v1510_v34 = vmul.f32 %v3804_v5, %v1509_v25  ;;  %v1518_v36 = vmul.f32 %v3806_v13, %v4772_v60 }
 0x141   : > { %3807 = vrsqrt.f32 %v4798_v55  ;;  %vm1536_vm12 = vcmp.eq.f32.partialorder %v4798_v55, inf  ;;  %vm1538_vm13 = vcmp.eq.f32.partialorder %v4798_v55, 0.0 }
 0x142   : > { %v864_v8 = vpop.f32.mrf.mxu2  ;;  %v976_v38 = vpop.f32.mrf.mxu3  ;;  %v1511_v39 = vmul.f32 %v1510_v34, %v4744_v30  ;;  %v1519_v41 = vmul.f32 %v3806_v13, %v1518_v36 }
 0x143   : > { %v909_v42 = vmul.f32 %v864_v8, %v864_v8  ;;  %1046 = vrot.lane.b32.xlu2 %v976_v38, %s4051_s27  ;;  %668 = vrot.lane.b32.xlu1 %v607_v10, %s4052_s17  ;;  %v647_v53 = vpop.permute.xlu2 %646 }
 0x144   : > { %v1513_v48 = vsel %vm1512_vm8, %v4744_v30, %v1511_v39  ;;  %v1520_v29 = vmul.f32 0.5, %v1519_v41  ;;  %700 = vst.msk [vmem:[%s4776_s23 + $0x20] sm:$0xff] %vm695_vm5, %v647_v53  ;;  %3619 = vmatmul.msk.f32.gmra.mxu1 %vm394_vm0, %v4570_v14  ;;  %v4850_v25 = vpop.f32.mrf.mxu0  ;;  %v1269_v39 = vmul.f32 %v4790_v50, %v4790_v50  ;;  %v1539_v41 = vand.u32 2147483648, %v4798_v55 }
 0x145   : > { %v928_v3 = vadd.f32 %v909_v42, %v532_v2  ;;  %v1516_v45 = vsel %vm1514_vm9, %v1515_v43, %v1513_v48 }
 0x146   : > { %3629 = vmatmul.msk.f32.gmra.mxu2 %vm394_vm0, %v1516_v45  ;;  %v1521_v16 = vsub.f32 1.5, %v1520_v29 }
 0x147   : > { %v3808_v30 = vpop.eup %3807  ;;  %v4825_v5 = vadd.f32 %v1267_v44, %v928_v3  ;;  %3649 = vmatmul.msk.f32.gmra.mxu3 %vm394_vm0, %v1701_v57  ;;  %v1703_v44 = vld [vmem:[%s4712_s21 + $0x30] sm:$0xff] }
 0x148   : > { %v610_v51 = vpop.f32.mrf.mxu1  ;;  %v1522_v7 = vmul.f32 %v3806_v13, %v1521_v16  ;;  %v1530_v14 = vmul.f32 %v3808_v30, %v4798_v55 }
 0x149   : > { %3809 = vrsqrt.f32 %v4825_v5  ;;  %vm1548_vm14 = vcmp.eq.f32.partialorder %v4825_v5, inf  ;;  %v1551_v0 = vand.u32 2147483648, %v4825_v5  ;;  %vm1550_vm15 = vcmp.eq.f32.partialorder %v4825_v5, 0.0 }
 0x14a   : > { %v867_v32 = vpop.f32.mrf.mxu2  ;;  %v979_v4 = vpop.f32.mrf.mxu3  ;;  %v1523_v9 = vmul.f32 %v1522_v7, %v4772_v60  ;;  %v1531_v11 = vmul.f32 %v3808_v30, %v1530_v14 }
 0x14b   : > { %v910_v15 = vmul.f32 %v867_v32, %v867_v32  ;;  %1048 = vrot.lane.b32.xlu0 %v979_v4, %s4051_s27  ;;  %670 = vrot.lane.b32.xlu2 %v610_v51, %s4052_s17  ;;  %v643_v50 = vpop.permute.xlu0 %642  ;;  %v1270_v32 = vmul.f32 %v4819_v12, %v4819_v12 }
 0x14c   : > { %v1525_v58 = vsel %vm1524_vm10, %v4772_v60, %v1523_v9  ;;  %v1532_v52 = vmul.f32 0.5, %v1531_v11  ;;  %3620 = vmatmul.msk.f32.gmra.mxu1 %vm394_vm0, %v4582_v18  ;;  %v534_v18 = vmul.f32 %v4516_v61, %v4516_v61  ;;  %698 = vst.msk [vmem:[%s4776_s23 + $0x10] sm:$0xff] %vm695_vm5, %v643_v50  ;;  %v4880_v16 = vpop.f32.mrf.mxu0 }
 0x14d   : > { %v929_v22 = vadd.f32 %v910_v15, %v533_v49  ;;  %v1528_v63 = vsel %vm1526_vm11, %v1527_v17, %v1525_v58  ;;  %v1704_v15 = vld [vmem:[%s4712_s21 + $0x38] sm:$0xff] }
 0x14e   : > { %3630 = vmatmul.msk.f32.gmra.mxu2 %vm394_vm0, %v1528_v63  ;;  %v1533_v62 = vsub.f32 1.5, %v1532_v52 }
 0x14f   : > { %v3810_v26 = vpop.eup %3809  ;;  %v4847_v24 = vadd.f32 %v1268_v6, %v929_v22  ;;  %3650 = vmatmul.msk.f32.gmra.mxu3 %vm394_vm0, %v1702_v21 }
 0x150   : > { %v613_v60 = vpop.f32.mrf.mxu1  ;;  %v1534_v13 = vmul.f32 %v3808_v30, %v1533_v62  ;;  %v1542_v10 = vmul.f32 %v3810_v26, %v4825_v5 }
 0x151   : > { %3811 = vrsqrt.f32 %v4847_v24  ;;  %vm1560_vm1 = vcmp.eq.f32.partialorder %v4847_v24, inf  ;;  %vm1562_vm2 = vcmp.eq.f32.partialorder %v4847_v24, 0.0 }
 0x152   : > { %v870_v34 = vpop.f32.mrf.mxu2  ;;  %v982_v36 = vpop.f32.mrf.mxu3  ;;  %v1535_v2 = vmul.f32 %v1534_v13, %v4798_v55  ;;  %v1543_v8 = vmul.f32 %v3810_v26, %v1542_v10  ;;  %v1271_v10 = vmul.f32 %v4850_v25, %v4850_v25 }
 0x153   : > { %v911_v38 = vmul.f32 %v870_v34, %v870_v34  ;;  %1050 = vrot.lane.b32.xlu1 %v982_v36, %s4051_s27  ;;  %672 = vrot.lane.b32.xlu0 %v613_v60, %s4052_s17  ;;  %v645_v17 = vpop.permute.xlu1 %644 }
 0x154   : > { %v1537_v61 = vsel %vm1536_vm12, %v4798_v55, %v1535_v2  ;;  %v1544_v42 = vmul.f32 0.5, %v1543_v8  ;;  %3621 = vmatmul.msk.f32.gmra.mxu1 %vm394_vm0, %v4596_v23  ;;  %v2401_v55 = vld [vmem:[%s5864_s7 + $0x20] sm:$0xff]  ;;  %699 = vst.msk [vmem:[%s4776_s23 + $0x18] sm:$0xff] %vm695_vm5, %v645_v17  ;;  %v1240_v34 = vpop.f32.mrf.mxu0 }
 0x155   : > { %v930_v43 = vadd.f32 %v911_v38, %v534_v18  ;;  %v1540_v53 = vsel %vm1538_vm13, %v1539_v41, %v1537_v61  ;;  %2477 = vmatpush.msra.mxu0 %v2401_v55  ;;  %v1563_v18 = vand.u32 2147483648, %v4847_v24  ;;  %v1705_v8 = vld [vmem:[%s4712_s21 + $0x40] sm:$0xff] }
 0x156   : > { %3631 = vmatmul.msk.f32.gmra.mxu2 %vm394_vm0, %v1540_v53  ;;  %v1545_v48 = vsub.f32 1.5, %v1544_v42 }
 0x157   : > { %v3812_v29 = vpop.eup %3811  ;;  %v4871_v57 = vadd.f32 %v1269_v39, %v930_v43  ;;  %3651 = vmatmul.msk.f32.gmra.mxu3 %vm394_vm0, %v1703_v44  ;;  %v537_v43 = vmul.f32 %v4608_v27, %v4608_v27 }
 0x158   : > { %v616_v3 = vpop.f32.mrf.mxu1  ;;  %v1546_v45 = vmul.f32 %v3810_v26, %v1545_v48  ;;  %v1554_v23 = vmul.f32 %v3812_v29, %v4847_v24 }
 0x159   : > { %3813 = vrsqrt.f32 %v4871_v57  ;;  %vm1572_vm4 = vcmp.eq.f32.partialorder %v4871_v57, inf  ;;  %vm1574_vm6 = vcmp.eq.f32.partialorder %v4871_v57, 0.0 }
 0x15a   : > { %v873_v30 = vpop.f32.mrf.mxu2  ;;  %v985_v51 = vpop.f32.mrf.mxu3  ;;  %v1547_v7 = vmul.f32 %v1546_v45, %v4825_v5  ;;  %v1555_v14 = vmul.f32 %v3812_v29, %v1554_v23  ;;  %v1575_v45 = vand.u32 2147483648, %v4871_v57 }
 0x15b   : > { %v912_v49 = vmul.f32 %v873_v30, %v873_v30  ;;  %1052 = vrot.lane.b32.xlu2 %v985_v51, %s4051_s27  ;;  %674 = vrot.lane.b32.xlu1 %v616_v3, %s4052_s17  ;;  %v653_v4 = vpop.permute.xlu2 %652  ;;  %v1272_v3 = vmul.f32 %v4880_v16, %v4880_v16  ;;  %v1706_v30 = vld [vmem:[%s4712_s21 + $0x48] sm:$0xff] }
 0x15c   : > { %v1549_v9 = vsel %vm1548_vm14, %v4825_v5, %v1547_v7  ;;  %703 = vst.msk [vmem:[%s4776_s23 + $0x38] sm:$0xff] %vm695_vm5, %v653_v4  ;;  %v1556_v11 = vmul.f32 0.5, %v1555_v14  ;;  %3622 = vmatmul.msk.f32.gmra.mxu1 %vm394_vm0, %v4618_v31  ;;  %v536_v31 = vmul.f32 %v4586_v19, %v4586_v19  ;;  %v1243_v16 = vpop.f32.mrf.mxu0 }
 0x15d   : > { %v931_v12 = vadd.f32 %v912_v49, %v535_v1  ;;  %v1552_v6 = vsel %vm1550_vm15, %v1551_v0, %v1549_v9 }
 0x15e   : > { %3632 = vmatmul.msk.f32.gmra.mxu2 %vm394_vm0, %v1552_v6  ;;  %v1557_v58 = vsub.f32 1.5, %v1556_v11 }
 0x15f   : > { %v3814_v52 = vpop.eup %3813  ;;  %v4900_v21 = vadd.f32 %v1270_v32, %v931_v12  ;;  %3652 = vmatmul.msk.f32.gmra.mxu3 %vm394_vm0, %v1704_v15 }
 0x160   : > { %v1316_v5 = vpop.f32.mrf.mxu1  ;;  %v1558_v20 = vmul.f32 %v3812_v29, %v1557_v58  ;;  %v1566_v22 = vmul.f32 %v3814_v52, %v4871_v57  ;;  %v1273_v58 = vmul.f32 %v1240_v34, %v1240_v34 }
 0x161   : > { %1392 = vrot.lane.b32.xlu0 %v1316_v5, %s4053_s25  ;;  %3815 = vrsqrt.f32 %v4900_v21  ;;  %vm1584_vm7 = vcmp.eq.f32.partialorder %v4900_v21, inf  ;;  %vm1586_vm8 = vcmp.eq.f32.partialorder %v4900_v21, 0.0 }
 0x162   : > { %v876_v63 = vpop.f32.mrf.mxu2  ;;  %v988_v62 = vpop.f32.mrf.mxu3  ;;  %v1559_v26 = vmul.f32 %v1558_v20, %v4847_v24  ;;  %v1567_v60 = vmul.f32 %v3814_v52, %v1566_v22  ;;  %v1707_v22 = vld [vmem:[%s4712_s21 + $0x50] sm:$0xff] }
 0x163   : > { %v913_v13 = vmul.f32 %v876_v63, %v876_v63  ;;  %v649_v36 = vpop.permute.xlu0 %648 }
 0x164   : > { %v1561_v2 = vsel %vm1560_vm1, %v4847_v24, %v1559_v26  ;;  %v1568_v19 = vmul.f32 0.5, %v1567_v60  ;;  %701 = vst.msk [vmem:[%s4776_s23 + $0x28] sm:$0xff] %vm695_vm5, %v649_v36  ;;  %3623 = vmatmul.msk.f32.gmra.mxu1 %vm394_vm0, %v4632_v37  ;;  %v2400_v37 = vld [vmem:[%s5864_s7 + $0x18] sm:$0xff] }
 0x165   : > { %v932_v38 = vadd.f32 %v913_v13, %v536_v31  ;;  %v1564_v39 = vsel %vm1562_vm2, %v1563_v18, %v1561_v2  ;;  %2478 = vmatpush.msra.mxu0 %v2400_v37  ;;  %v1246_v13 = vpop.f32.mrf.mxu0  ;;  %v2399_v37 = vld [vmem:[%s5864_s7 + $0x10] sm:$0xff] }
 0x166   : > { %3633 = vmatmul.msk.f32.gmra.mxu2 %vm394_vm0, %v1564_v39  ;;  %v1569_v25 = vsub.f32 1.5, %v1568_v19 }
 0x167   : > { %v3816_v41 = vpop.eup %3815  ;;  %v4921_v61 = vadd.f32 %v1271_v10, %v932_v38  ;;  %3653 = vmatmul.msk.f32.gmra.mxu3 %vm394_vm0, %v1705_v8  ;;  %v1274_v38 = vmul.f32 %v1243_v16, %v1243_v16  ;;  %2479 = vmatpush.msra.mxu0 %v2399_v37 }
 0x168   : > { %v1319_v42 = vpop.f32.mrf.mxu1  ;;  %v1570_v44 = vmul.f32 %v3814_v52, %v1569_v25  ;;  %v1578_v24 = vmul.f32 %v3816_v41, %v4900_v21  ;;  %v1587_v52 = vand.u32 2147483648, %v4900_v21 }
 0x169   : > { %1054 = vrot.lane.b32.xlu0 %v988_v62, %s4051_s27  ;;  %1394 = vrot.lane.b32.xlu1 %v1319_v42, %s4053_s25  ;;  %3817 = vrsqrt.f32 %v4921_v61  ;;  %vm1596_vm9 = vcmp.eq.f32.partialorder %v4921_v61, inf  ;;  %v1599_v39 = vand.u32 2147483648, %v4921_v61  ;;  %vm1598_vm10 = vcmp.eq.f32.partialorder %v4921_v61, 0.0 }
 0x16a   : > { %v879_v53 = vpop.f32.mrf.mxu2  ;;  %v991_v50 = vpop.f32.mrf.mxu3  ;;  %v1571_v48 = vmul.f32 %v1570_v44, %v4871_v57  ;;  %v1579_v29 = vmul.f32 %v3816_v41, %v1578_v24 }
 0x16b   : > { %v914_v55 = vmul.f32 %v879_v53, %v879_v53  ;;  %v651_v23 = vpop.permute.xlu1 %650 }
 0x16c   : > { %v1573_v27 = vsel %vm1572_vm4, %v4871_v57, %v1571_v48  ;;  %v1580_v1 = vmul.f32 0.5, %v1579_v29  ;;  %702 = vst.msk [vmem:[%s4776_s23 + $0x30] sm:$0xff] %vm695_vm5, %v651_v23  ;;  %3624 = vmatmul.msk.f32.gmra.mxu1 %vm394_vm0, %v4652_v47  ;;  %v538_v47 = vmul.f32 %v4627_v33, %v4627_v33 }
 0x16d   : > { %v933_v51 = vadd.f32 %v914_v55, %v537_v43  ;;  %v1035_v7 = vpop.permute.xlu2 %1034  ;;  %v1576_v14 = vsel %vm1574_vm6, %v1575_v45, %v1573_v27  ;;  %v1249_v55 = vpop.f32.mrf.mxu0 }
 0x16e   : > { %1092 = vst.msk [vmem:[%s4776_s23] sm:$0xff] %vm1091_vm3, %v1035_v7  ;;  %3634 = vmatmul.msk.f32.gmra.mxu2 %vm394_vm0, %v1576_v14  ;;  %v1581_v49 = vsub.f32 1.5, %v1580_v1 }
 0x16f   : > { %v3818_v32 = vpop.eup %3817  ;;  %v4948_v0 = vadd.f32 %v1272_v3, %v933_v51  ;;  %3654 = vmatmul.msk.f32.gmra.mxu3 %vm394_vm0, %v1706_v30  ;;  %v540_v3 = vmul.f32 %v4665_v56, %v4665_v56  ;;  %v1275_v51 = vmul.f32 %v1246_v13, %v1246_v13 }
 0x170   : > { %v1322_v57 = vpop.f32.mrf.mxu1  ;;  %v1582_v4 = vmul.f32 %v3816_v41, %v1581_v49  ;;  %v1590_v9 = vmul.f32 %v3818_v32, %v4921_v61  ;;  %v1709_v49 = vld [vmem:[%s4712_s21 + $0x60] sm:$0xff] }
 0x171   : > { %1056 = vrot.lane.b32.xlu1 %v991_v50, %s4051_s27  ;;  %1396 = vrot.lane.b32.xlu2 %v1322_v57, %s4053_s25  ;;  %3819 = vrsqrt.f32 %v4948_v0  ;;  %vm1608_vm11 = vcmp.eq.f32.partialorder %v4948_v0, inf  ;;  %v1611_v7 = vand.u32 2147483648, %v4948_v0  ;;  %vm1610_vm12 = vcmp.eq.f32.partialorder %v4948_v0, 0.0 }
 0x172   : > { %v882_v11 = vpop.f32.mrf.mxu2  ;;  %v994_v15 = vpop.f32.mrf.mxu3  ;;  %v1583_v12 = vmul.f32 %v1582_v4, %v4900_v21  ;;  %v1591_v6 = vmul.f32 %v3818_v32, %v1590_v9 }
 0x173   : > { %v915_v17 = vmul.f32 %v882_v11, %v882_v11 }
 0x174   : > { %v1585_v5 = vsel %vm1584_vm7, %v4900_v21, %v1583_v12  ;;  %v1592_v20 = vmul.f32 0.5, %v1591_v6  ;;  %3625 = vmatmul.msk.f32.gmra.mxu1 %vm394_vm0, %v4662_v54  ;;  %v539_v54 = vmul.f32 %v4641_v40, %v4641_v40  ;;  %v1708_v40 = vld [vmem:[%s4712_s21 + $0x58] sm:$0xff]  ;;  %v541_v6 = vmul.f32 %v4611_v28, %v4611_v28  ;;  %v1710_v28 = vld [vmem:[%s4712_s21 + $0x68] sm:$0xff] }
 0x175   : > { %v934_v33 = vadd.f32 %v915_v17, %v538_v47  ;;  %v1588_v31 = vsel %vm1586_vm8, %v1587_v52, %v1585_v5 }
 0x176   : > { %3635 = vmatmul.msk.f32.gmra.mxu2 %vm394_vm0, %v1588_v31  ;;  %v1593_v63 = vsub.f32 1.5, %v1592_v20  ;;  %v659_v62 = vpop.permute.xlu2 %658 }
 0x177   : > { %v3820_v26 = vpop.eup %3819  ;;  %v4966_v60 = vadd.f32 %v1273_v58, %v934_v33  ;;  %3655 = vmatmul.msk.f32.gmra.mxu3 %vm394_vm0, %v1707_v22  ;;  %706 = vst.msk [vmem:[%s4776_s23 + $0x50] sm:$0xff] %vm695_vm5, %v659_v62  ;;  %v1276_v22 = vmul.f32 %v1249_v55, %v1249_v55 }
 0x178   : > { %v1325_v21 = vpop.f32.mrf.mxu1  ;;  %v1594_v10 = vmul.f32 %v3818_v32, %v1593_v63  ;;  %v1602_v18 = vmul.f32 %v3820_v26, %v4948_v0  ;;  %v1252_v63 = vpop.f32.mrf.mxu0 }
 0x179   : > { %1058 = vrot.lane.b32.xlu2 %v994_v15, %s4051_s27  ;;  %1398 = vrot.lane.b32.xlu0 %v1325_v21, %s4053_s25  ;;  %3821 = vrsqrt.f32 %v4966_v60  ;;  %vm1620_vm13 = vcmp.eq.f32.partialorder %v4966_v60, inf  ;;  %v1623_v33 = vand.u32 2147483648, %v4966_v60  ;;  %vm1622_vm14 = vcmp.eq.f32.partialorder %v4966_v60, 0.0 }
 0x17a   : > { %v885_v34 = vpop.f32.mrf.mxu2  ;;  %v997_v36 = vpop.f32.mrf.mxu3  ;;  %v1595_v2 = vmul.f32 %v1594_v10, %v4921_v61  ;;  %v1603_v19 = vmul.f32 %v3820_v26, %v1602_v18 }
 0x17b   : > { %v916_v8 = vmul.f32 %v885_v34, %v885_v34  ;;  %v655_v25 = vpop.permute.xlu0 %654 }
 0x17c   : > { %v1597_v41 = vsel %vm1596_vm9, %v4921_v61, %v1595_v2  ;;  %704 = vst.msk [vmem:[%s4776_s23 + $0x40] sm:$0xff] %vm695_vm5, %v655_v25  ;;  %v1604_v42 = vmul.f32 0.5, %v1603_v19 }
 0x17d   : > { %v935_v44 = vadd.f32 %v916_v8, %v539_v54  ;;  %v1600_v24 = vsel %vm1598_vm10, %v1599_v39, %v1597_v41  ;;  %v2398_v54 = vld [vmem:[%s5864_s7 + $0x8] sm:$0xff]  ;;  %v542_v8 = vmul.f32 %v4629_v35, %v4629_v35 }
 0x17e   : > { %3636 = vmatmul.msk.f32.gmra.mxu2 %vm394_vm0, %v1600_v24  ;;  %v1605_v43 = vsub.f32 1.5, %v1604_v42  ;;  %2480 = vmatpush.msra.mxu0 %v2398_v54 }
 0x17f   : > { %v3822_v53 = vpop.eup %3821  ;;  %v4989_v50 = vadd.f32 %v1274_v38, %v935_v44  ;;  %3656 = vmatmul.msk.f32.gmra.mxu3 %vm394_vm0, %v1708_v40  ;;  %v1277_v40 = vmul.f32 %v1252_v63, %v1252_v63 }
 0x180   : > { %v1328_v61 = vpop.f32.mrf.mxu1  ;;  %v1606_v48 = vmul.f32 %v3820_v26, %v1605_v43  ;;  %v1614_v29 = vmul.f32 %v3822_v53, %v4966_v60  ;;  %v1711_v43 = vld [vmem:[%s4712_s21 + $0x70] sm:$0xff] }
 0x181   : > { %1060 = vrot.lane.b32.xlu0 %v997_v36, %s4051_s27  ;;  %1400 = vrot.lane.b32.xlu1 %v1328_v61, %s4053_s25  ;;  %3823 = vrsqrt.f32 %v4989_v50  ;;  %vm1632_vm15 = vcmp.eq.f32.partialorder %v4989_v50, inf  ;;  %v1635_v44 = vand.u32 2147483648, %v4989_v50  ;;  %vm1634_vm1 = vcmp.eq.f32.partialorder %v4989_v50, 0.0 }
 0x182   : > { %v888_v45 = vpop.f32.mrf.mxu2  ;;  %v1000_v23 = vpop.f32.mrf.mxu3  ;;  %v1607_v27 = vmul.f32 %v1606_v48, %v4948_v0  ;;  %v1615_v1 = vmul.f32 %v3822_v53, %v1614_v29 }
 0x183   : > { %v917_v30 = vmul.f32 %v888_v45, %v888_v45  ;;  %v657_v14 = vpop.permute.xlu1 %656  ;;  %v1255_v48 = vpop.f32.mrf.mxu0 }
 0x184   : > { %v1609_v16 = vsel %vm1608_vm11, %v4948_v0, %v1607_v27  ;;  %705 = vst.msk [vmem:[%s4776_s23 + $0x48] sm:$0xff] %vm695_vm5, %v657_v14  ;;  %v1616_v56 = vmul.f32 0.5, %v1615_v1  ;;  %v543_v1 = vmul.f32 %v4649_v46, %v4649_v46 }
 0x185   : > { %v936_v32 = vadd.f32 %v917_v30, %v540_v3  ;;  %v1612_v57 = vsel %vm1610_vm12, %v1611_v7, %v1609_v16  ;;  %v1041_v4 = vpop.permute.xlu2 %1040 }
 0x186   : > { %3637 = vmatmul.msk.f32.gmra.mxu2 %vm394_vm0, %v1612_v57  ;;  %1095 = vst.msk [vmem:[%s4776_s23 + $0x18] sm:$0xff] %vm1091_vm3, %v1041_v4  ;;  %v1617_v9 = vsub.f32 1.5, %v1616_v56  ;;  %v1278_v56 = vmul.f32 %v1255_v48, %v1255_v48  ;;  %v1712_v4 = vld [vmem:[%s4712_s21 + $0x78] sm:$0xff] }
 0x187   : > { %v3824_v47 = vpop.eup %3823  ;;  %v5009_v11 = vadd.f32 %v1275_v51, %v936_v32  ;;  %3657 = vmatmul.msk.f32.gmra.mxu3 %vm394_vm0, %v1709_v49 }
 0x188   : > { %v1331_v15 = vpop.f32.mrf.mxu1  ;;  %v1618_v12 = vmul.f32 %v3822_v53, %v1617_v9  ;;  %v1626_v0 = vmul.f32 %v3824_v47, %v4989_v50 }
 0x189   : > { %3825 = vrsqrt.f32 %v5009_v11  ;;  %1062 = vrot.lane.b32.xlu1 %v1000_v23, %s4051_s27  ;;  %1402 = vrot.lane.b32.xlu2 %v1331_v15, %s4053_s25  ;;  %vm1644_vm2 = vcmp.eq.f32.partialorder %v5009_v11, inf  ;;  %v1647_v49 = vand.u32 2147483648, %v5009_v11  ;;  %vm1646_vm4 = vcmp.eq.f32.partialorder %v5009_v11, 0.0 }
 0x18a   : > { %v891_v17 = vpop.f32.mrf.mxu2  ;;  %v1003_v58 = vpop.f32.mrf.mxu3  ;;  %v1619_v52 = vmul.f32 %v1618_v12, %v4966_v60  ;;  %v1627_v5 = vmul.f32 %v3824_v47, %v1626_v0 }
 0x18b   : > { %v918_v20 = vmul.f32 %v891_v17, %v891_v17 }
 0x18c   : > { %v1621_v31 = vsel %vm1620_vm13, %v4966_v60, %v1619_v52  ;;  %v1628_v62 = vmul.f32 0.5, %v1627_v5  ;;  %v544_v5 = vmul.f32 %v4668_v59, %v4668_v59 }
 0x18d   : > { %v937_v26 = vadd.f32 %v918_v20, %v541_v6  ;;  %v1037_v13 = vpop.permute.xlu0 %1036  ;;  %v1624_v21 = vsel %vm1622_vm14, %v1623_v33, %v1621_v31  ;;  %v665_v18 = vpop.permute.xlu2 %664  ;;  %vm1449_vm14 = vcmask 1048320  }
 0x18e   : > { %1093 = vst.msk [vmem:[%s4776_s23 + $0x8] sm:$0xff] %vm1091_vm3, %v1037_v13  ;;  %3638 = vmatmul.msk.f32.gmra.mxu2 %vm394_vm0, %v1624_v21  ;;  %v1629_v10 = vsub.f32 1.5, %v1628_v62  ;;  %v1713_v21 = vld [vmem:[%s4712_s21 + $0x80] sm:$0xff] }
 0x18f   : > { %v3826_v34 = vpop.eup %3825  ;;  %v5030_v36 = vadd.f32 %v1276_v22, %v937_v26  ;;  %3658 = vmatmul.msk.f32.gmra.mxu3 %vm394_vm0, %v1710_v28  ;;  %709 = vst.msk [vmem:[%s4776_s23 + $0x68] sm:$0xff] %vm695_vm5, %v665_v18 }
 0x190   : > { %v1334_v60 = vpop.f32.mrf.mxu1  ;;  %v1630_v2 = vmul.f32 %v3824_v47, %v1629_v10  ;;  %v1638_v19 = vmul.f32 %v3826_v34, %v5009_v11 }
 0x191   : > { %3827 = vrsqrt.f32 %v5030_v36  ;;  %1064 = vrot.lane.b32.xlu2 %v1003_v58, %s4051_s27  ;;  %1404 = vrot.lane.b32.xlu0 %v1334_v60, %s4053_s25  ;;  %vm1656_vm6 = vcmp.eq.f32.partialorder %v5030_v36, inf  ;;  %v1659_v28 = vand.u32 2147483648, %v5030_v36  ;;  %vm1658_vm7 = vcmp.eq.f32.partialorder %v5030_v36, 0.0 }
 0x192   : > { %v894_v38 = vpop.f32.mrf.mxu2  ;;  %v1006_v39 = vpop.f32.mrf.mxu3  ;;  %v1631_v25 = vmul.f32 %v1630_v2, %v4989_v50  ;;  %v1639_v41 = vmul.f32 %v3826_v34, %v1638_v19 }
 0x193   : > { %v919_v42 = vmul.f32 %v894_v38, %v894_v38 }
 0x194   : > { %v1633_v24 = vsel %vm1632_vm15, %v4989_v50, %v1631_v25  ;;  %v1640_v37 = vmul.f32 0.5, %v1639_v41 }
 0x195   : > { %v938_v35 = vadd.f32 %v919_v42, %v542_v8  ;;  %v1039_v53 = vpop.permute.xlu1 %1038  ;;  %v1636_v61 = vsel %vm1634_vm1, %v1635_v44, %v1633_v24 }
 0x196   : > { %1094 = vst.msk [vmem:[%s4776_s23 + $0x10] sm:$0xff] %vm1091_vm3, %v1039_v53  ;;  %3639 = vmatmul.msk.f32.gmra.mxu2 %vm394_vm0, %v1636_v61  ;;  %v1641_v29 = vsub.f32 1.5, %v1640_v37  ;;  %v661_v55 = vpop.permute.xlu0 %660  ;;  %v5113_v53 = vld [vmem:[%s5863_s6] ss:$0 sm:$0xff] }
 0x197   : > { %v3828_v3 = vpop.eup %3827  ;;  %v5050_v45 = vadd.f32 %v1277_v40, %v938_v35  ;;  %3659 = vmatmul.msk.f32.gmra.mxu3 %vm394_vm0, %v1711_v43  ;;  %707 = vst.msk [vmem:[%s4776_s23 + $0x58] sm:$0xff] %vm695_vm5, %v661_v55  ;;  %v1714_v40 = vld [vmem:[%s4712_s21 + $0x88] sm:$0xff] }
 0x198   : > { %v1337_v50 = vpop.f32.mrf.mxu1  ;;  %v1642_v23 = vmul.f32 %v3826_v34, %v1641_v29  ;;  %v1650_v27 = vmul.f32 %v3828_v3, %v5030_v36 }
 0x199   : > { %3829 = vrsqrt.f32 %v5050_v45  ;;  %1066 = vrot.lane.b32.xlu0 %v1006_v39, %s4051_s27  ;;  %1406 = vrot.lane.b32.xlu1 %v1337_v50, %s4053_s25  ;;  %vm1668_vm8 = vcmp.eq.f32.partialorder %v5050_v45, inf  ;;  %v1671_v25 = vand.u32 2147483648, %v5050_v45  ;;  %vm1670_vm9 = vcmp.eq.f32.partialorder %v5050_v45, 0.0 }
 0x19a   : > { %v897_v30 = vpop.f32.mrf.mxu2  ;;  %v1009_v51 = vpop.f32.mrf.mxu3  ;;  %v1643_v7 = vmul.f32 %v1642_v23, %v5009_v11  ;;  %v1651_v14 = vmul.f32 %v3828_v3, %v1650_v27  ;;  %v2397_v27 = vld [vmem:[%s5864_s7] sm:$0xff] }
 0x19b   : > { %v920_v16 = vmul.f32 %v897_v30, %v897_v30  ;;  %2481 = vmatpush.msra.mxu0 %v2397_v27 }
 0x19c   : > { %v1645_v32 = vsel %vm1644_vm2, %v5009_v11, %v1643_v7  ;;  %v1652_v57 = vmul.f32 0.5, %v1651_v14  ;;  %v1258_v11 = vpop.f32.mrf.mxu0  ;;  %v1715_v7 = vld [vmem:[%s4712_s21 + $0x90] sm:$0xff] }
 0x19d   : > { %v939_v46 = vadd.f32 %v920_v16, %v543_v1  ;;  %v1648_v9 = vsel %vm1646_vm4, %v1647_v49, %v1645_v32  ;;  %v1047_v47 = vpop.permute.xlu2 %1046  ;;  %v663_v12 = vpop.permute.xlu1 %662  ;;  %v1279_v62 = vmul.f32 %v1258_v11, %v1258_v11 }
 0x19e   : > { %3640 = vmatmul.msk.f32.gmra.mxu2 %vm394_vm0, %v1648_v9  ;;  %1098 = vst.msk [vmem:[%s4776_s23 + $0x30] sm:$0xff] %vm1091_vm3, %v1047_v47  ;;  %v1653_v15 = vsub.f32 1.5, %v1652_v57 }
 0x19f   : > { %v3830_v0 = vpop.eup %3829  ;;  %v5070_v6 = vadd.f32 %v1278_v56, %v939_v46  ;;  %3660 = vmatmul.msk.f32.gmra.mxu3 %vm394_vm0, %v1712_v4  ;;  %708 = vst.msk [vmem:[%s4776_s23 + $0x60] sm:$0xff] %vm695_vm5, %v663_v12 }
 0x1a0   : > { %v1340_v17 = vpop.f32.mrf.mxu1  ;;  %v1654_v58 = vmul.f32 %v3828_v3, %v1653_v15  ;;  %v1662_v52 = vmul.f32 %v3830_v0, %v5050_v45 }
 0x1a1   : > { %3831 = vrsqrt.f32 %v5070_v6  ;;  %1068 = vrot.lane.b32.xlu1 %v1009_v51, %s4051_s27  ;;  %1408 = vrot.lane.b32.xlu2 %v1340_v17, %s4053_s25  ;;  %vm1680_vm10 = vcmp.eq.f32.partialorder %v5070_v6, inf  ;;  %v1683_v23 = vand.u32 2147483648, %v5070_v6  ;;  %vm1682_vm11 = vcmp.eq.f32.partialorder %v5070_v6, 0.0 }
 0x1a2   : > { %v900_v20 = vpop.f32.mrf.mxu2  ;;  %v1012_v22 = vpop.f32.mrf.mxu3  ;;  %v1655_v33 = vmul.f32 %v1654_v58, %v5030_v36  ;;  %v1663_v31 = vmul.f32 %v3830_v0, %v1662_v52 }
 0x1a3   : > { %v921_v63 = vmul.f32 %v900_v20, %v900_v20 }
 0x1a4   : > { %v1657_v26 = vsel %vm1656_vm6, %v5030_v36, %v1655_v33  ;;  %v1664_v13 = vmul.f32 0.5, %v1663_v31 }
 0x1a5   : > { %v940_v59 = vadd.f32 %v921_v63, %v544_v5  ;;  %v1660_v10 = vsel %vm1658_vm7, %v1659_v28, %v1657_v26  ;;  %v1043_v18 = vpop.permute.xlu0 %1042  ;;  %v671_v34 = vpop.permute.xlu2 %670 }
 0x1a6   : > { %3641 = vmatmul.msk.f32.gmra.mxu2 %vm394_vm0, %v1660_v10  ;;  %1096 = vst.msk [vmem:[%s4776_s23 + $0x20] sm:$0xff] %vm1091_vm3, %v1043_v18  ;;  %v1665_v54 = vsub.f32 1.5, %v1664_v13 }
 0x1a7   : > { %v3832_v60 = vpop.eup %3831  ;;  %v5090_v2 = vadd.f32 %v1279_v62, %v940_v59  ;;  %3661 = vmatmul.msk.f32.gmra.mxu3 %vm394_vm0, %v1713_v21  ;;  %712 = vst.msk [vmem:[%s4776_s23 + $0x80] sm:$0xff] %vm695_vm5, %v671_v34 }
 0x1a8   : > { %v1666_v36 = vmul.f32 %v3830_v0, %v1665_v54  ;;  %v1674_v19 = vmul.f32 %v3832_v60, %v5070_v6 }
 0x1a9   : > { %3833 = vrsqrt.f32 %v5090_v2  ;;  %1070 = vrot.lane.b32.xlu2 %v1012_v22, %s4051_s27  ;;  %vm1692_vm12 = vcmp.eq.f32.partialorder %v5090_v2, inf  ;;  %v1695_v15 = vand.u32 2147483648, %v5090_v2  ;;  %vm1694_vm13 = vcmp.eq.f32.partialorder %v5090_v2, 0.0 }
 0x1aa   : > { %v1667_v8 = vmul.f32 %v1666_v36, %v5050_v45  ;;  %v1937_v38 = vpop.f32.mrf.mxu3  ;;  %v1675_v39 = vmul.f32 %v3832_v60, %v1674_v19 }
 0x1ac   : > { %v1669_v41 = vsel %vm1668_vm8, %v5050_v45, %v1667_v8  ;;  %v1676_v42 = vmul.f32 0.5, %v1675_v39 }
 0x1ad   : > { %v1672_v44 = vsel %vm1670_vm9, %v1671_v25, %v1669_v41  ;;  %v1045_v24 = vpop.permute.xlu1 %1044  ;;  %v667_v43 = vpop.permute.xlu0 %666 }
 0x1ae   : > { %3642 = vmatmul.msk.f32.gmra.mxu2 %vm394_vm0, %v1672_v44  ;;  %1097 = vst.msk [vmem:[%s4776_s23 + $0x28] sm:$0xff] %vm1091_vm3, %v1045_v24  ;;  %v1677_v37 = vsub.f32 1.5, %v1676_v42 }
 0x1af   : > { %v3834_v35 = vpop.eup %3833  ;;  %3662 = vmatmul.msk.f32.gmra.mxu3 %vm394_vm0, %v1714_v40  ;;  %710 = vst.msk [vmem:[%s4776_s23 + $0x70] sm:$0xff] %vm695_vm5, %v667_v43 }
 0x1b0   : > { %v1678_v61 = vmul.f32 %v3832_v60, %v1677_v37  ;;  %v1686_v48 = vmul.f32 %v3834_v35, %v5090_v2 }
 0x1b1   : > { %v1806_v29 = vpop.f32.mrf.mxu2 }
 0x1b2   : > { %v1938_v55 = vadd.f32 %v1937_v38, %v1806_v29  ;;  %v1679_v3 = vmul.f32 %v1678_v61, %v5070_v6  ;;  %v1940_v45 = vpop.f32.mrf.mxu3  ;;  %v1687_v50 = vmul.f32 %v3834_v35, %v1686_v48 }
 0x1b4   : > { %v5123_v1 = vadd.f32 %v5113_v53, %v1938_v55  ;;  %v1681_v30 = vsel %vm1680_vm10, %v5070_v6, %v1679_v3  ;;  %v1688_v51 = vmul.f32 0.5, %v1687_v50 }
 0x1b5   : > { %v1684_v14 = vsel %vm1682_vm11, %v1683_v23, %v1681_v30  ;;  %v1053_v16 = vpop.permute.xlu2 %1052  ;;  %v669_v32 = vpop.permute.xlu1 %668 }
 0x1b6   : > { %v3664_v56 = vmul.f32 -1.442695, %v5123_v1  ;;  %3643 = vmatmul.msk.f32.gmra.mxu2 %vm394_vm0, %v1684_v14  ;;  %1101 = vst.msk [vmem:[%s4776_s23 + $0x48] sm:$0xff] %vm1091_vm3, %v1053_v16  ;;  %v1689_v49 = vsub.f32 1.5, %v1688_v51 }
 0x1b7   : > { %3663 = vmatmul.msk.f32.gmra.mxu3 %vm394_vm0, %v1715_v7  ;;  %711 = vst.msk [vmem:[%s4776_s23 + $0x78] sm:$0xff] %vm695_vm5, %v669_v32 }
 0x1b8   : > { %3835 = vpow2.f32 %v3664_v56  ;;  %v1690_v57 = vmul.f32 %v3834_v35, %v1689_v49 }
 0x1b9   : > { %v1809_v4 = vpop.f32.mrf.mxu2 }
 0x1ba   : > { %v1941_v46 = vadd.f32 %v1940_v45, %v1809_v4  ;;  %v1691_v9 = vmul.f32 %v1690_v57, %v5090_v2  ;;  %v1943_v47 = vpop.f32.mrf.mxu3 }
 0x1bc   : > { %v5139_v12 = vadd.f32 %v5113_v53, %v1941_v46  ;;  %v1693_v0 = vsel %vm1692_vm12, %v5090_v2, %v1691_v9 }
 0x1bd   : > { %v1696_v6 = vsel %vm1694_vm13, %v1695_v15, %v1693_v0  ;;  %v1049_v17 = vpop.permute.xlu0 %1048 }
 0x1be   : > { %v3836_v11 = vpop.eup %3835  ;;  %v3665_v58 = vmul.f32 -1.442695, %v5139_v12  ;;  %3644 = vmatmul.msk.f32.gmra.mxu2 %vm394_vm0, %v1696_v6  ;;  %1099 = vst.msk [vmem:[%s4776_s23 + $0x38] sm:$0xff] %vm1091_vm3, %v1049_v17 }
 0x1bf   : > { %v2074_v52 = vadd.f32 1.0, %v3836_v11 }
 0x1c0   : > { %3837 = vpow2.f32 %v3665_v58 }
 0x1c1   : > { %3839 = vrcp.f32 %v2074_v52  ;;  %v1812_v5 = vpop.f32.mrf.mxu2  ;;  %v2104_v34 = vand.u32 2147483648, %v2074_v52  ;;  %v2102_v36 = vand.u32 2147483647, %v2074_v52  ;;  %vm2098_vm1 = vweird.f32 %v2074_v52 }
 0x1c2   : > { %v1944_v20 = vadd.f32 %v1943_v47, %v1812_v5  ;;  %v1946_v22 = vpop.f32.mrf.mxu3 }
 0x1c3   : > { %v2105_v42 = vor.u32 1.1754944e-38, %v2104_v34  ;;  %vm2103_vm4 = vcmp.eq.f32.partialorder %v2102_v36, 8.507059e+37 }
 0x1c4   : > { %v5148_v33 = vadd.f32 %v5113_v53, %v1944_v20 }
 0x1c5   : > { %v1051_v31 = vpop.permute.xlu1 %1050  ;;  %v673_v28 = vpop.permute.xlu0 %672 }
 0x1c6   : > { %v3838_v63 = vpop.eup %3837  ;;  %v3666_v62 = vmul.f32 -1.442695, %v5148_v33  ;;  %1100 = vst.msk [vmem:[%s4776_s23 + $0x40] sm:$0xff] %vm1091_vm3, %v1051_v31 }
 0x1c7   : > { %v3840_v26 = vpop.eup %3839  ;;  %v2075_v13 = vadd.f32 1.0, %v3838_v63  ;;  %713 = vst.msk [vmem:[%s4776_s23 + $0x88] sm:$0xff] %vm695_vm5, %v673_v28 }
 0x1c8   : > { %v2094_v21 = vmul.f32 %v3840_v26, %v2074_v52  ;;  %3841 = vpow2.f32 %v3666_v62  ;;  %vm2099_vm15 = vweird.f32 %v3840_v26 }
 0x1c9   : > { %3843 = vrcp.f32 %v2075_v13  ;;  %v1815_v59 = vpop.f32.mrf.mxu2  ;;  %vm2100_vm2 = vmor %vm2098_vm1, %vm2099_vm15  ;;  %v2119_v55 = vand.u32 2147483648, %v2075_v13  ;;  %v2117_v23 = vand.u32 2147483647, %v2075_v13  ;;  %vm2113_vm7 = vweird.f32 %v2075_v13 }
 0x1ca   : > { %v2095_v10 = vsub.f32 1.0, %v2094_v21  ;;  %v1947_v18 = vadd.f32 %v1946_v22, %v1815_v59  ;;  %v1949_v54 = vpop.f32.mrf.mxu3 }
 0x1cb   : > { %v1397_v60 = vpop.permute.xlu2 %1396  ;;  %v2120_v14 = vor.u32 1.1754944e-38, %v2119_v55  ;;  %vm2118_vm9 = vcmp.eq.f32.partialorder %v2117_v23, 8.507059e+37 }
 0x1cc   : > { %v2096_v2 = vmul.f32 %v3840_v26, %v2095_v10  ;;  %v5156_v19 = vadd.f32 %v5113_v53, %v1947_v18  ;;  %1452 = vst.msk [vmem:[%s4776_s23 + $0x10] sm:$0xff] %vm1449_vm14, %v1397_v60 }
 0x1cd   : > { %v675_v8 = vpop.permute.xlu1 %674 }
 0x1ce   : > { %v3842_v38 = vpop.eup %3841  ;;  %v2097_v39 = vadd.f32 %v3840_v26, %v2096_v2  ;;  %v3667_v25 = vmul.f32 -1.442695, %v5156_v19  ;;  %714 = vst.msk [vmem:[%s4776_s23 + $0x90] sm:$0xff] %vm695_vm5, %v675_v8 }
 0x1cf   : > { %v3844_v41 = vpop.eup %3843  ;;  %v2076_v40 = vadd.f32 1.0, %v3842_v38 }
 0x1d0   : > { %v2101_v44 = vsel %vm2100_vm2, %v3840_v26, %v2097_v39  ;;  %v2109_v24 = vmul.f32 %v3844_v41, %v2075_v13  ;;  %3845 = vpow2.f32 %v3667_v25  ;;  %vm2114_vm6 = vweird.f32 %v3844_v41 }
 0x1d1   : > { %v2106_v37 = vsel %vm2103_vm4, %v2105_v42, %v2101_v44  ;;  %3847 = vrcp.f32 %v2076_v40  ;;  %v1818_v43 = vpop.f32.mrf.mxu2  ;;  %vm2115_vm8 = vmor %vm2113_vm7, %vm2114_vm6  ;;  %v2134_v15 = vand.u32 2147483648, %v2076_v40  ;;  %v2132_v11 = vand.u32 2147483647, %v2076_v40 }
 0x1d2   : > { %v2378_v35 = vmul.f32 %v2106_v37, %v5123_v1  ;;  %v2110_v61 = vsub.f32 1.0, %v2109_v24  ;;  %v1950_v48 = vadd.f32 %v1949_v54, %v1818_v43  ;;  %v1952_v29 = vpop.f32.mrf.mxu3  ;;  %vm2128_vm11 = vweird.f32 %v2076_v40 }
 0x1d3   : > { %v1393_v3 = vpop.permute.xlu0 %1392  ;;  %v1059_v45 = vpop.permute.xlu2 %1058  ;;  %v2135_v22 = vor.u32 1.1754944e-38, %v2134_v15  ;;  %vm2133_vm13 = vcmp.eq.f32.partialorder %v2132_v11, 8.507059e+37 }
 0x1d4   : > { %v2111_v50 = vmul.f32 %v3844_v41, %v2110_v61  ;;  %v5165_v27 = vadd.f32 %v5113_v53, %v1950_v48  ;;  %1450 = vst.msk [vmem:[%s4776_s23] sm:$0xff] %vm1449_vm14, %v1393_v3  ;;  %3683 = vmatmul.msk.f32.vlgmr.msra.gmra.mxu0 %vm394_vm0, %v2378_v35 }
 0x1d5   : > { %1104 = vst.msk [vmem:[%s4776_s23 + $0x60] sm:$0xff] %vm1091_vm3, %v1059_v45 }
 0x1d6   : > { %v3846_v30 = vpop.eup %3845  ;;  %v2112_v1 = vadd.f32 %v3844_v41, %v2111_v50  ;;  %v3668_v51 = vmul.f32 -1.442695, %v5165_v27 }
 0x1d7   : > { %v3848_v7 = vpop.eup %3847  ;;  %v2077_v16 = vadd.f32 1.0, %v3846_v30 }
 0x1d8   : > { %v2116_v56 = vsel %vm2115_vm8, %v3844_v41, %v2112_v1  ;;  %v2124_v49 = vmul.f32 %v3848_v7, %v2076_v40  ;;  %3849 = vpow2.f32 %v3668_v51  ;;  %vm2129_vm10 = vweird.f32 %v3848_v7 }
 0x1d9   : > { %v2121_v32 = vsel %vm2118_vm9, %v2120_v14, %v2116_v56  ;;  %3851 = vrcp.f32 %v2077_v16  ;;  %v1821_v57 = vpop.f32.mrf.mxu2  ;;  %vm2130_vm12 = vmor %vm2128_vm11, %vm2129_vm10  ;;  %v2149_v18 = vand.u32 2147483648, %v2077_v16  ;;  %v2147_v2 = vand.u32 2147483647, %v2077_v16 }
 0x1da   : > { %v2379_v4 = vmul.f32 %v2121_v32, %v5139_v12  ;;  %v2125_v46 = vsub.f32 1.0, %v2124_v49  ;;  %v1953_v9 = vadd.f32 %v1952_v29, %v1821_v57  ;;  %v1955_v47 = vpop.f32.mrf.mxu3  ;;  %vm2143_vm1 = vweird.f32 %v2077_v16 }
 0x1db   : > { %v1055_v0 = vpop.permute.xlu0 %1054  ;;  %v1395_v6 = vpop.permute.xlu1 %1394  ;;  %v2150_v25 = vor.u32 1.1754944e-38, %v2149_v18  ;;  %vm2148_vm4 = vcmp.eq.f32.partialorder %v2147_v2, 8.507059e+37 }
 0x1dc   : > { %v2126_v17 = vmul.f32 %v3848_v7, %v2125_v46  ;;  %v5175_v58 = vadd.f32 %v5113_v53, %v1953_v9  ;;  %1102 = vst.msk [vmem:[%s4776_s23 + $0x50] sm:$0xff] %vm1091_vm3, %v1055_v0  ;;  %3684 = vmatmul.msk.f32.gmra.mxu0 %vm394_vm0, %v2379_v4 }
 0x1dd   : > { %1451 = vst.msk [vmem:[%s4776_s23 + $0x8] sm:$0xff] %vm1449_vm14, %v1395_v6 }
 0x1de   : > { %v3850_v52 = vpop.eup %3849  ;;  %v2127_v12 = vadd.f32 %v3848_v7, %v2126_v17  ;;  %v3669_v5 = vmul.f32 -1.442695, %v5175_v58 }
 0x1df   : > { %v3852_v20 = vpop.eup %3851  ;;  %v2078_v31 = vadd.f32 1.0, %v3850_v52 }
 0x1e0   : > { %v2131_v63 = vsel %vm2130_vm12, %v3848_v7, %v2127_v12  ;;  %v2139_v62 = vmul.f32 %v3852_v20, %v2077_v16  ;;  %3853 = vpow2.f32 %v3669_v5  ;;  %vm2144_vm15 = vweird.f32 %v3852_v20 }
 0x1e1   : > { %v2136_v28 = vsel %vm2133_vm13, %v2135_v22, %v2131_v63  ;;  %3855 = vrcp.f32 %v2078_v31  ;;  %v1824_v26 = vpop.f32.mrf.mxu2  ;;  %vm2145_vm2 = vmor %vm2143_vm1, %vm2144_vm15  ;;  %v2164_v48 = vand.u32 2147483648, %v2078_v31  ;;  %v2162_v45 = vand.u32 2147483647, %v2078_v31 }
 0x1e2   : > { %v2380_v13 = vmul.f32 %v2136_v28, %v5148_v33  ;;  %v2140_v21 = vsub.f32 1.0, %v2139_v62  ;;  %v1956_v59 = vadd.f32 %v1955_v47, %v1824_v26  ;;  %v1958_v10 = vpop.f32.mrf.mxu3  ;;  %vm2158_vm7 = vweird.f32 %v2078_v31 }
 0x1e3   : > { %v1057_v54 = vpop.permute.xlu1 %1056  ;;  %v1403_v34 = vpop.permute.xlu2 %1402  ;;  %v2165_v51 = vor.u32 1.1754944e-38, %v2164_v48  ;;  %vm2163_vm9 = vcmp.eq.f32.partialorder %v2162_v45, 8.507059e+37 }
 0x1e4   : > { %v2141_v60 = vmul.f32 %v3852_v20, %v2140_v21  ;;  %v5185_v36 = vadd.f32 %v5113_v53, %v1956_v59  ;;  %1103 = vst.msk [vmem:[%s4776_s23 + $0x58] sm:$0xff] %vm1091_vm3, %v1057_v54  ;;  %3685 = vmatmul.msk.f32.gmra.mxu0 %vm394_vm0, %v2380_v13 }
 0x1e5   : > { %1455 = vst.msk [vmem:[%s4776_s23 + $0x28] sm:$0xff] %vm1449_vm14, %v1403_v34 }
 0x1e6   : > { %v3854_v8 = vpop.eup %3853  ;;  %v2142_v33 = vadd.f32 %v3852_v20, %v2141_v60  ;;  %v3670_v38 = vmul.f32 -1.442695, %v5185_v36 }
 0x1e7   : > { %v3856_v39 = vpop.eup %3855  ;;  %v2079_v41 = vadd.f32 1.0, %v3854_v8 }
 0x1e8   : > { %v2146_v42 = vsel %vm2145_vm2, %v3852_v20, %v2142_v33  ;;  %v2154_v40 = vmul.f32 %v3856_v39, %v2078_v31  ;;  %3857 = vpow2.f32 %v3670_v38  ;;  %vm2159_vm6 = vweird.f32 %v3856_v39 }
 0x1e9   : > { %v2151_v44 = vsel %vm2148_vm4, %v2150_v25, %v2146_v42  ;;  %3859 = vrcp.f32 %v2079_v41  ;;  %v1827_v24 = vpop.f32.mrf.mxu2  ;;  %vm2160_vm8 = vmor %vm2158_vm7, %vm2159_vm6  ;;  %v2179_v9 = vand.u32 2147483648, %v2079_v41  ;;  %v2177_v6 = vand.u32 2147483647, %v2079_v41 }
 0x1ea   : > { %v2381_v37 = vmul.f32 %v2151_v44, %v5156_v19  ;;  %v2155_v43 = vsub.f32 1.0, %v2154_v40  ;;  %v1959_v35 = vadd.f32 %v1958_v10, %v1827_v24  ;;  %v1961_v61 = vpop.f32.mrf.mxu3  ;;  %vm2173_vm11 = vweird.f32 %v2079_v41 }
 0x1eb   : > { %v1399_v29 = vpop.permute.xlu0 %1398  ;;  %v1065_v55 = vpop.permute.xlu2 %1064  ;;  %v2180_v5 = vor.u32 1.1754944e-38, %v2179_v9  ;;  %vm2178_vm13 = vcmp.eq.f32.partialorder %v2177_v6, 8.507059e+37 }
 0x1ec   : > { %v2156_v3 = vmul.f32 %v3856_v39, %v2155_v43  ;;  %v5195_v50 = vadd.f32 %v5113_v53, %v1959_v35  ;;  %1453 = vst.msk [vmem:[%s4776_s23 + $0x18] sm:$0xff] %vm1449_vm14, %v1399_v29  ;;  %3686 = vmatmul.msk.f32.gmra.mxu0 %vm394_vm0, %v2381_v37 }
 0x1ed   : > { %1107 = vst.msk [vmem:[%s4776_s23 + $0x78] sm:$0xff] %vm1091_vm3, %v1065_v55 }
 0x1ee   : > { %v3858_v23 = vpop.eup %3857  ;;  %v2157_v19 = vadd.f32 %v3856_v39, %v2156_v3  ;;  %v3671_v30 = vmul.f32 -1.442695, %v5195_v50 }
 0x1ef   : > { %v3860_v1 = vpop.eup %3859  ;;  %v2080_v7 = vadd.f32 1.0, %v3858_v23 }
 0x1f0   : > { %v2161_v14 = vsel %vm2160_vm8, %v3856_v39, %v2157_v19  ;;  %v2169_v16 = vmul.f32 %v3860_v1, %v2079_v41  ;;  %3861 = vpow2.f32 %v3671_v30  ;;  %vm2174_vm10 = vweird.f32 %v3860_v1 }
 0x1f1   : > { %v2166_v56 = vsel %vm2163_vm9, %v2165_v51, %v2161_v14  ;;  %3863 = vrcp.f32 %v2080_v7  ;;  %v1830_v49 = vpop.f32.mrf.mxu2  ;;  %vm2175_vm12 = vmor %vm2173_vm11, %vm2174_vm10  ;;  %v2194_v59 = vand.u32 2147483648, %v2080_v7  ;;  %v2192_v34 = vand.u32 2147483647, %v2080_v7 }
 0x1f2   : > { %v2382_v32 = vmul.f32 %v2166_v56, %v5165_v27  ;;  %v2170_v57 = vsub.f32 1.0, %v2169_v16  ;;  %v1962_v4 = vadd.f32 %v1961_v61, %v1830_v49  ;;  %v1964_v46 = vpop.f32.mrf.mxu3  ;;  %vm2188_vm1 = vweird.f32 %v2080_v7 }
 0x1f3   : > { %v1061_v47 = vpop.permute.xlu0 %1060  ;;  %v1401_v15 = vpop.permute.xlu1 %1400  ;;  %v2195_v38 = vor.u32 1.1754944e-38, %v2194_v59  ;;  %vm2193_vm4 = vcmp.eq.f32.partialorder %v2192_v34, 8.507059e+37 }
 0x1f4   : > { %v2171_v0 = vmul.f32 %v3860_v1, %v2170_v57  ;;  %v5205_v17 = vadd.f32 %v5113_v53, %v1962_v4  ;;  %1105 = vst.msk [vmem:[%s4776_s23 + $0x68] sm:$0xff] %vm1091_vm3, %v1061_v47  ;;  %3687 = vmatmul.msk.f32.gmra.mxu0 %vm394_vm0, %v2382_v32 }
 0x1f5   : > { %1454 = vst.msk [vmem:[%s4776_s23 + $0x20] sm:$0xff] %vm1449_vm14, %v1401_v15 }
 0x1f6   : > { %v3862_v11 = vpop.eup %3861  ;;  %v2172_v27 = vadd.f32 %v3860_v1, %v2171_v0  ;;  %v3672_v52 = vmul.f32 -1.442695, %v5205_v17 }
 0x1f7   : > { %v3864_v12 = vpop.eup %3863  ;;  %v2081_v20 = vadd.f32 1.0, %v3862_v11 }
 0x1f8   : > { %v2176_v22 = vsel %vm2175_vm12, %v3860_v1, %v2172_v27  ;;  %v2184_v31 = vmul.f32 %v3864_v12, %v2080_v7  ;;  %3865 = vpow2.f32 %v3672_v52  ;;  %vm2189_vm15 = vweird.f32 %v3864_v12 }
 0x1f9   : > { %v2181_v63 = vsel %vm2178_vm13, %v2180_v5, %v2176_v22  ;;  %3867 = vrcp.f32 %v2081_v20  ;;  %v1833_v62 = vpop.f32.mrf.mxu2  ;;  %vm2190_vm2 = vmor %vm2188_vm1, %vm2189_vm15  ;;  %v2209_v35 = vand.u32 2147483648, %v2081_v20  ;;  %v2207_v55 = vand.u32 2147483647, %v2081_v20 }
 0x1fa   : > { %v2383_v28 = vmul.f32 %v2181_v63, %v5175_v58  ;;  %v2185_v26 = vsub.f32 1.0, %v2184_v31  ;;  %v1965_v13 = vadd.f32 %v1964_v46, %v1833_v62  ;;  %v1967_v21 = vpop.f32.mrf.mxu3  ;;  %vm2203_vm7 = vweird.f32 %v2081_v20 }
 0x1fb   : > { %v1063_v10 = vpop.permute.xlu1 %1062  ;;  %v1409_v18 = vpop.permute.xlu2 %1408  ;;  %v2210_v30 = vor.u32 1.1754944e-38, %v2209_v35  ;;  %vm2208_vm9 = vcmp.eq.f32.partialorder %v2207_v55, 8.507059e+37 }
 0x1fc   : > { %v2186_v54 = vmul.f32 %v3864_v12, %v2185_v26  ;;  %v5215_v60 = vadd.f32 %v5113_v53, %v1965_v13  ;;  %1106 = vst.msk [vmem:[%s4776_s23 + $0x70] sm:$0xff] %vm1091_vm3, %v1063_v10  ;;  %3688 = vmatmul.msk.f32.gmra.mxu0 %vm394_vm0, %v2383_v28 }
 0x1fd   : > { %1458 = vst.msk [vmem:[%s4776_s23 + $0x40] sm:$0xff] %vm1449_vm14, %v1409_v18 }
 0x1fe   : > { %v3866_v2 = vpop.eup %3865  ;;  %v2187_v58 = vadd.f32 %v3864_v12, %v2186_v54  ;;  %v3673_v8 = vmul.f32 -1.442695, %v5215_v60 }
 0x1ff   : > { %v3868_v33 = vpop.eup %3867  ;;  %v2082_v39 = vadd.f32 1.0, %v3866_v2 }
 0x200   : > { %v2191_v25 = vsel %vm2190_vm2, %v3864_v12, %v2187_v58  ;;  %v2199_v41 = vmul.f32 %v3868_v33, %v2081_v20  ;;  %3869 = vpow2.f32 %v3673_v8  ;;  %vm2204_vm6 = vweird.f32 %v3868_v33 }
 0x201   : > { %v2196_v42 = vsel %vm2193_vm4, %v2195_v38, %v2191_v25  ;;  %3871 = vrcp.f32 %v2082_v39  ;;  %v1836_v40 = vpop.f32.mrf.mxu2  ;;  %vm2205_vm8 = vmor %vm2203_vm7, %vm2204_vm6  ;;  %v2224_v4 = vand.u32 2147483648, %v2082_v39  ;;  %v2222_v15 = vand.u32 2147483647, %v2082_v39 }
 0x202   : > { %v2384_v44 = vmul.f32 %v2196_v42, %v5185_v36  ;;  %v2200_v24 = vsub.f32 1.0, %v2199_v41  ;;  %v1968_v37 = vadd.f32 %v1967_v21, %v1836_v40  ;;  %v1970_v43 = vpop.f32.mrf.mxu3  ;;  %vm2218_vm11 = vweird.f32 %v2082_v39 }
 0x203   : > { %v1405_v61 = vpop.permute.xlu0 %1404  ;;  %v1071_v48 = vpop.permute.xlu2 %1070  ;;  %v2225_v52 = vor.u32 1.1754944e-38, %v2224_v4  ;;  %vm2223_vm13 = vcmp.eq.f32.partialorder %v2222_v15, 8.507059e+37 }
 0x204   : > { %v2201_v29 = vmul.f32 %v3868_v33, %v2200_v24  ;;  %v5225_v3 = vadd.f32 %v5113_v53, %v1968_v37  ;;  %1456 = vst.msk [vmem:[%s4776_s23 + $0x30] sm:$0xff] %vm1449_vm14, %v1405_v61  ;;  %3689 = vmatmul.msk.f32.gmra.mxu0 %vm394_vm0, %v2384_v44 }
 0x205   : > { %1110 = vst.msk [vmem:[%s4776_s23 + $0x90] sm:$0xff] %vm1091_vm3, %v1071_v48 }
 0x206   : > { %v3870_v45 = vpop.eup %3869  ;;  %v2202_v36 = vadd.f32 %v3868_v33, %v2201_v29  ;;  %v3674_v23 = vmul.f32 -1.442695, %v5225_v3 }
 0x207   : > { %v3872_v19 = vpop.eup %3871  ;;  %v2083_v1 = vadd.f32 1.0, %v3870_v45 }
 0x208   : > { %v2206_v51 = vsel %vm2205_vm8, %v3868_v33, %v2202_v36  ;;  %v2214_v7 = vmul.f32 %v3872_v19, %v2082_v39  ;;  %3873 = vpow2.f32 %v3674_v23  ;;  %vm2219_vm10 = vweird.f32 %v3872_v19 }
 0x209   : > { %v2211_v14 = vsel %vm2208_vm9, %v2210_v30, %v2206_v51  ;;  %3875 = vrcp.f32 %v2083_v1  ;;  %v1839_v16 = vpop.f32.mrf.mxu2  ;;  %vm2220_vm12 = vmor %vm2218_vm11, %vm2219_vm10  ;;  %v2239_v13 = vand.u32 2147483648, %v2083_v1  ;;  %v2237_v10 = vand.u32 2147483647, %v2083_v1 }
 0x20a   : > { %v2385_v56 = vmul.f32 %v2211_v14, %v5195_v50  ;;  %v2215_v49 = vsub.f32 1.0, %v2214_v7  ;;  %v1971_v32 = vadd.f32 %v1970_v43, %v1839_v16  ;;  %v1973_v57 = vpop.f32.mrf.mxu3  ;;  %vm2233_vm1 = vweird.f32 %v2083_v1 }
 0x20b   : > { %v1067_v46 = vpop.permute.xlu0 %1066  ;;  %v1407_v9 = vpop.permute.xlu1 %1406  ;;  %v2240_v58 = vor.u32 1.1754944e-38, %v2239_v13  ;;  %vm2238_vm4 = vcmp.eq.f32.partialorder %v2237_v10, 8.507059e+37 }
 0x20c   : > { %v2216_v47 = vmul.f32 %v3872_v19, %v2215_v49  ;;  %v5235_v0 = vadd.f32 %v5113_v53, %v1971_v32  ;;  %1108 = vst.msk [vmem:[%s4776_s23 + $0x80] sm:$0xff] %vm1091_vm3, %v1067_v46  ;;  %3690 = vmatmul.msk.f32.gmra.mxu0 %vm394_vm0, %v2385_v56 }
 0x20d   : > { %1457 = vst.msk [vmem:[%s4776_s23 + $0x38] sm:$0xff] %vm1449_vm14, %v1407_v9 }
 0x20e   : > { %v3874_v6 = vpop.eup %3873  ;;  %v2217_v50 = vadd.f32 %v3872_v19, %v2216_v47  ;;  %v3675_v11 = vmul.f32 -1.442695, %v5235_v0 }
 0x20f   : > { %v3876_v27 = vpop.eup %3875  ;;  %v2084_v12 = vadd.f32 1.0, %v3874_v6 }
 0x210   : > { %v2221_v5 = vsel %vm2220_vm12, %v3872_v19, %v2217_v50  ;;  %v2229_v20 = vmul.f32 %v3876_v27, %v2083_v1  ;;  %3877 = vpow2.f32 %v3675_v11  ;;  %vm2234_vm15 = vweird.f32 %v3876_v27 }
 0x211   : > { %v2226_v22 = vsel %vm2223_vm13, %v2225_v52, %v2221_v5  ;;  %3879 = vrcp.f32 %v2084_v12  ;;  %v1842_v31 = vpop.f32.mrf.mxu2  ;;  %vm2235_vm2 = vmor %vm2233_vm1, %vm2234_vm15  ;;  %v2254_v24 = vand.u32 2147483648, %v2084_v12  ;;  %v2252_v43 = vand.u32 2147483647, %v2084_v12 }
 0x212   : > { %v2386_v63 = vmul.f32 %v2226_v22, %v5205_v17  ;;  %v2230_v62 = vsub.f32 1.0, %v2229_v20  ;;  %v1974_v28 = vadd.f32 %v1973_v57, %v1842_v31  ;;  %v1976_v26 = vpop.f32.mrf.mxu3  ;;  %vm2248_vm7 = vweird.f32 %v2084_v12  ;;  %v1343_v57 = vpop.f32.mrf.mxu1 }
 0x213   : > { %v1069_v21 = vpop.permute.xlu1 %1068  ;;  %vm2253_vm9 = vcmp.eq.f32.partialorder %v2252_v43, 8.507059e+37  ;;  %1410 = vrot.lane.b32.xlu0 %v1343_v57, %s4053_s25 }
 0x214   : > { %v2231_v59 = vmul.f32 %v3876_v27, %v2230_v62  ;;  %v5245_v18 = vadd.f32 %v5113_v53, %v1974_v28  ;;  %1109 = vst.msk [vmem:[%s4776_s23 + $0x88] sm:$0xff] %vm1091_vm3, %v1069_v21  ;;  %3691 = vmatmul.msk.f32.gmra.mxu0 %vm394_vm0, %v2386_v63 }
 0x216   : > { %v3878_v54 = vpop.eup %3877  ;;  %v2232_v34 = vadd.f32 %v3876_v27, %v2231_v59  ;;  %v3676_v17 = vmul.f32 -1.442695, %v5245_v18 }
 0x217   : > { %v3880_v2 = vpop.eup %3879  ;;  %v2085_v8 = vadd.f32 1.0, %v3878_v54 }
 0x218   : > { %v2236_v33 = vsel %vm2235_vm2, %v3876_v27, %v2232_v34  ;;  %v2244_v38 = vmul.f32 %v3880_v2, %v2084_v12  ;;  %3881 = vpow2.f32 %v3676_v17  ;;  %vm2249_vm6 = vweird.f32 %v3880_v2 }
 0x219   : > { %v2241_v39 = vsel %vm2238_vm4, %v2240_v58, %v2236_v33  ;;  %3883 = vrcp.f32 %v2085_v8  ;;  %v1845_v25 = vpop.f32.mrf.mxu2  ;;  %vm2250_vm8 = vmor %vm2248_vm7, %vm2249_vm6  ;;  %v2269_v16 = vand.u32 2147483648, %v2085_v8  ;;  %v2267_v49 = vand.u32 2147483647, %v2085_v8 }
 0x21a   : > { %v2387_v41 = vmul.f32 %v2241_v39, %v5215_v60  ;;  %v2245_v42 = vsub.f32 1.0, %v2244_v38  ;;  %v1977_v40 = vadd.f32 %v1976_v26, %v1845_v25  ;;  %v1979_v44 = vpop.f32.mrf.mxu3  ;;  %v2255_v60 = vor.u32 1.1754944e-38, %v2254_v24  ;;  %v1346_v28 = vpop.f32.mrf.mxu1 }
 0x21b   : > { %vm2263_vm11 = vweird.f32 %v2085_v8  ;;  %v2270_v47 = vor.u32 1.1754944e-38, %v2269_v16  ;;  %vm2268_vm13 = vcmp.eq.f32.partialorder %v2267_v49, 8.507059e+37  ;;  %1412 = vrot.lane.b32.xlu1 %v1346_v28, %s4053_s25 }
 0x21c   : > { %v2246_v37 = vmul.f32 %v3880_v2, %v2245_v42  ;;  %v5253_v35 = vadd.f32 %v5113_v53, %v1977_v40  ;;  %3692 = vmatmul.msk.f32.gmra.mxu0 %vm394_vm0, %v2387_v41 }
 0x21e   : > { %v3882_v61 = vpop.eup %3881  ;;  %v2247_v48 = vadd.f32 %v3880_v2, %v2246_v37  ;;  %v3677_v29 = vmul.f32 -1.442695, %v5253_v35 }
 0x21f   : > { %v3884_v55 = vpop.eup %3883  ;;  %v2086_v45 = vadd.f32 1.0, %v3882_v61 }
 0x220   : > { %v2251_v36 = vsel %vm2250_vm8, %v3880_v2, %v2247_v48  ;;  %v2259_v23 = vmul.f32 %v3884_v55, %v2085_v8  ;;  %3885 = vpow2.f32 %v3677_v29  ;;  %vm2264_vm10 = vweird.f32 %v3884_v55 }
 0x221   : > { %v2256_v19 = vsel %vm2253_vm9, %v2255_v60, %v2251_v36  ;;  %3887 = vrcp.f32 %v2086_v45  ;;  %v1848_v30 = vpop.f32.mrf.mxu2  ;;  %vm2265_vm12 = vmor %vm2263_vm11, %vm2264_vm10  ;;  %v2284_v20 = vand.u32 2147483648, %v2086_v45  ;;  %v2282_v63 = vand.u32 2147483647, %v2086_v45 }
 0x222   : > { %v2388_v1 = vmul.f32 %v2256_v19, %v5225_v3  ;;  %v2260_v51 = vsub.f32 1.0, %v2259_v23  ;;  %v1980_v7 = vadd.f32 %v1979_v44, %v1848_v30  ;;  %v1982_v14 = vpop.f32.mrf.mxu3  ;;  %vm2278_vm1 = vweird.f32 %v2086_v45  ;;  %v1349_v42 = vpop.f32.mrf.mxu1 }
 0x223   : > { %v2285_v59 = vor.u32 1.1754944e-38, %v2284_v20  ;;  %vm2283_vm4 = vcmp.eq.f32.partialorder %v2282_v63, 8.507059e+37  ;;  %1414 = vrot.lane.b32.xlu2 %v1349_v42, %s4053_s25 }
 0x224   : > { %v2261_v56 = vmul.f32 %v3884_v55, %v2260_v51  ;;  %v5259_v32 = vadd.f32 %v5113_v53, %v1980_v7  ;;  %3693 = vmatmul.msk.f32.gmra.mxu0 %vm394_vm0, %v2388_v1 }
 0x226   : > { %v3886_v4 = vpop.eup %3885  ;;  %v2262_v46 = vadd.f32 %v3884_v55, %v2261_v56  ;;  %v3678_v3 = vmul.f32 -1.442695, %v5259_v32 }
 0x227   : > { %v3888_v9 = vpop.eup %3887  ;;  %v2087_v15 = vadd.f32 1.0, %v3886_v4 }
 0x228   : > { %v2266_v6 = vsel %vm2265_vm12, %v3884_v55, %v2262_v46  ;;  %v2274_v50 = vmul.f32 %v3888_v9, %v2086_v45  ;;  %3889 = vpow2.f32 %v3678_v3  ;;  %vm2279_vm15 = vweird.f32 %v3888_v9 }
 0x229   : > { %v2271_v11 = vsel %vm2268_vm13, %v2270_v47, %v2266_v6  ;;  %3891 = vrcp.f32 %v2087_v15  ;;  %v1851_v27 = vpop.f32.mrf.mxu2  ;;  %vm2280_vm2 = vmor %vm2278_vm1, %vm2279_vm15  ;;  %v2299_v38 = vand.u32 2147483648, %v2087_v15  ;;  %v2297_v25 = vand.u32 2147483647, %v2087_v15 }
 0x22a   : > { %v2389_v52 = vmul.f32 %v2271_v11, %v5235_v0  ;;  %v2275_v12 = vsub.f32 1.0, %v2274_v50  ;;  %v1983_v5 = vadd.f32 %v1982_v14, %v1851_v27  ;;  %v1985_v22 = vpop.f32.mrf.mxu3  ;;  %vm2293_vm7 = vweird.f32 %v2087_v15  ;;  %v1352_v7 = vpop.f32.mrf.mxu1 }
 0x22b   : > { %v2300_v43 = vor.u32 1.1754944e-38, %v2299_v38  ;;  %vm2298_vm9 = vcmp.eq.f32.partialorder %v2297_v25, 8.507059e+37  ;;  %1416 = vrot.lane.b32.xlu0 %v1352_v7, %s4053_s25 }
 0x22c   : > { %v2276_v31 = vmul.f32 %v3888_v9, %v2275_v12  ;;  %v5266_v62 = vadd.f32 %v5113_v53, %v1983_v5  ;;  %3694 = vmatmul.msk.f32.gmra.mxu0 %vm394_vm0, %v2389_v52 }
 0x22e   : > { %v3890_v26 = vpop.eup %3889  ;;  %v2277_v13 = vadd.f32 %v3888_v9, %v2276_v31  ;;  %v3679_v0 = vmul.f32 -1.442695, %v5266_v62 }
 0x22f   : > { %v3892_v21 = vpop.eup %3891  ;;  %v2088_v10 = vadd.f32 1.0, %v3890_v26 }
 0x230   : > { %v2281_v54 = vsel %vm2280_vm2, %v3888_v9, %v2277_v13  ;;  %v2289_v34 = vmul.f32 %v3892_v21, %v2087_v15  ;;  %3893 = vpow2.f32 %v3679_v0  ;;  %vm2294_vm6 = vweird.f32 %v3892_v21 }
 0x231   : > { %v2286_v17 = vsel %vm2283_vm4, %v2285_v59, %v2281_v54  ;;  %3895 = vrcp.f32 %v2088_v10  ;;  %v1854_v2 = vpop.f32.mrf.mxu2  ;;  %vm2295_vm8 = vmor %vm2293_vm7, %vm2294_vm6  ;;  %v2314_v19 = vand.u32 2147483648, %v2088_v10  ;;  %v2312_v1 = vand.u32 2147483647, %v2088_v10 }
 0x232   : > { %v2390_v58 = vmul.f32 %v2286_v17, %v5245_v18  ;;  %v2290_v8 = vsub.f32 1.0, %v2289_v34  ;;  %v1986_v33 = vadd.f32 %v1985_v22, %v1854_v2  ;;  %v1988_v40 = vpop.f32.mrf.mxu3  ;;  %vm2308_vm11 = vweird.f32 %v2088_v10  ;;  %v1355_v5 = vpop.f32.mrf.mxu1 }
 0x233   : > { %v2315_v49 = vor.u32 1.1754944e-38, %v2314_v19  ;;  %vm2313_vm13 = vcmp.eq.f32.partialorder %v2312_v1, 8.507059e+37  ;;  %1418 = vrot.lane.b32.xlu1 %v1355_v5, %s4053_s25 }
 0x234   : > { %v2291_v39 = vmul.f32 %v3892_v21, %v2290_v8  ;;  %v5273_v41 = vadd.f32 %v5113_v53, %v1986_v33  ;;  %3695 = vmatmul.msk.f32.gmra.mxu0 %vm394_vm0, %v2390_v58  ;;  %v5298_v58 = vld [vmem:[%s5865_s8] ss:$0 sm:$0xff] }
 0x236   : > { %v3894_v44 = vpop.eup %3893  ;;  %v2292_v24 = vadd.f32 %v3892_v21, %v2291_v39  ;;  %v3680_v18 = vmul.f32 -1.442695, %v5273_v41 }
 0x237   : > { %v3896_v37 = vpop.eup %3895  ;;  %v2089_v61 = vadd.f32 1.0, %v3894_v44 }
 0x238   : > { %v2296_v48 = vsel %vm2295_vm8, %v3892_v21, %v2292_v24  ;;  %v2304_v29 = vmul.f32 %v3896_v37, %v2088_v10  ;;  %3897 = vpow2.f32 %v3680_v18  ;;  %vm2309_vm10 = vweird.f32 %v3896_v37 }
 0x239   : > { %v2301_v55 = vsel %vm2298_vm9, %v2300_v43, %v2296_v48  ;;  %3899 = vrcp.f32 %v2089_v61  ;;  %v1857_v60 = vpop.f32.mrf.mxu2  ;;  %vm2310_vm12 = vmor %vm2308_vm11, %vm2309_vm10  ;;  %v2329_v11 = vand.u32 2147483648, %v2089_v61  ;;  %v2327_v52 = vand.u32 2147483647, %v2089_v61 }
 0x23a   : > { %v2391_v45 = vmul.f32 %v2301_v55, %v5253_v35  ;;  %v2305_v36 = vsub.f32 1.0, %v2304_v29  ;;  %v1989_v23 = vadd.f32 %v1988_v40, %v1857_v60  ;;  %v1991_v4 = vpop.f32.mrf.mxu3  ;;  %vm2323_vm1 = vweird.f32 %v2089_v61  ;;  %v1358_v34 = vpop.f32.mrf.mxu1 }
 0x23b   : > { %v2330_v63 = vor.u32 1.1754944e-38, %v2329_v11  ;;  %vm2328_vm4 = vcmp.eq.f32.partialorder %v2327_v52, 8.507059e+37  ;;  %1420 = vrot.lane.b32.xlu2 %v1358_v34, %s4053_s25 }
 0x23c   : > { %v2306_v30 = vmul.f32 %v3896_v37, %v2305_v36  ;;  %v5280_v51 = vadd.f32 %v5113_v53, %v1989_v23  ;;  %3696 = vmatmul.msk.f32.gmra.mxu0 %vm394_vm0, %v2391_v45 }
 0x23e   : > { %v3898_v14 = vpop.eup %3897  ;;  %v2307_v16 = vadd.f32 %v3896_v37, %v2306_v30  ;;  %v3681_v56 = vmul.f32 -1.442695, %v5280_v51 }
 0x23f   : > { %v3900_v35 = vpop.eup %3899  ;;  %v2090_v57 = vadd.f32 1.0, %v3898_v14 }
 0x240   : > { %v2311_v46 = vsel %vm2310_vm12, %v3896_v37, %v2307_v16  ;;  %v2319_v3 = vmul.f32 %v3900_v35, %v2089_v61  ;;  %3901 = vpow2.f32 %v3681_v56  ;;  %vm2324_vm15 = vweird.f32 %v3900_v35 }
 0x241   : > { %v2316_v9 = vsel %vm2313_vm13, %v2315_v49, %v2311_v46  ;;  %3903 = vrcp.f32 %v2090_v57  ;;  %v1860_v47 = vpop.f32.mrf.mxu2  ;;  %vm2325_vm2 = vmor %vm2323_vm1, %vm2324_vm15  ;;  %v2344_v59 = vand.u32 2147483648, %v2090_v57  ;;  %v2342_v54 = vand.u32 2147483647, %v2090_v57 }
 0x242   : > { %v2392_v15 = vmul.f32 %v2316_v9, %v5259_v32  ;;  %v2320_v6 = vsub.f32 1.0, %v2319_v3  ;;  %v1992_v50 = vadd.f32 %v1991_v4, %v1860_v47  ;;  %vm2338_vm7 = vweird.f32 %v2090_v57  ;;  %v1361_v48 = vpop.f32.mrf.mxu1 }
 0x243   : > { %vm2343_vm9 = vcmp.eq.f32.partialorder %v2342_v54, 8.507059e+37  ;;  %1422 = vrot.lane.b32.xlu0 %v1361_v48, %s4053_s25 }
 0x244   : > { %v2321_v27 = vmul.f32 %v3900_v35, %v2320_v6  ;;  %v5287_v12 = vadd.f32 %v5113_v53, %v1992_v50  ;;  %3697 = vmatmul.msk.f32.gmra.mxu0 %vm394_vm0, %v2392_v15 }
 0x246   : > { %v3902_v20 = vpop.eup %3901  ;;  %v2322_v22 = vadd.f32 %v3900_v35, %v2321_v27  ;;  %v3682_v31 = vmul.f32 -1.442695, %v5287_v12 }
 0x247   : > { %v3904_v32 = vpop.eup %3903  ;;  %v2091_v28 = vadd.f32 1.0, %v3902_v20 }
 0x248   : > { %v2326_v26 = vsel %vm2325_vm2, %v3900_v35, %v2322_v22  ;;  %v2334_v13 = vmul.f32 %v3904_v32, %v2090_v57  ;;  %3905 = vpow2.f32 %v3682_v31  ;;  %vm2339_vm6 = vweird.f32 %v3904_v32 }
 0x249   : > { %v2331_v53 = vsel %vm2328_vm4, %v2330_v63, %v2326_v26  ;;  %3907 = vrcp.f32 %v2091_v28  ;;  %vm2340_vm8 = vmor %vm2338_vm7, %vm2339_vm6  ;;  %v2359_v18 = vand.u32 2147483648, %v2091_v28  ;;  %v2357_v43 = vand.u32 2147483647, %v2091_v28 }
 0x24a   : > { %v2393_v0 = vmul.f32 %v2331_v53, %v5266_v62  ;;  %v2335_v21 = vsub.f32 1.0, %v2334_v13  ;;  %v2345_v62 = vor.u32 1.1754944e-38, %v2344_v59  ;;  %vm2353_vm11 = vweird.f32 %v2091_v28  ;;  %v1364_v49 = vpop.f32.mrf.mxu1 }
 0x24b   : > { %vm2358_vm13 = vcmp.eq.f32.partialorder %v2357_v43, 8.507059e+37  ;;  %1424 = vrot.lane.b32.xlu1 %v1364_v49, %s4053_s25 }
 0x24c   : > { %v2336_v10 = vmul.f32 %v3904_v32, %v2335_v21  ;;  %3698 = vmatmul.msk.f32.gmra.mxu0 %vm394_vm0, %v2393_v0 }
 0x24e   : > { %v3906_v17 = vpop.eup %3905  ;;  %v2337_v2 = vadd.f32 %v3904_v32, %v2336_v10 }
 0x24f   : > { %v3908_v8 = vpop.eup %3907  ;;  %v2092_v33 = vadd.f32 1.0, %v3906_v17 }
 0x250   : > { %v2341_v38 = vsel %vm2340_vm8, %v3904_v32, %v2337_v2  ;;  %v2349_v39 = vmul.f32 %v3908_v8, %v2091_v28  ;;  %vm2354_vm10 = vweird.f32 %v3908_v8 }
 0x251   : > { %v2346_v25 = vsel %vm2343_vm9, %v2345_v62, %v2341_v38  ;;  %3909 = vrcp.f32 %v2092_v33  ;;  %v2483_v42 = vpop.f32.mrf.mxu0  ;;  %vm2355_vm12 = vmor %vm2353_vm11, %vm2354_vm10  ;;  %v2374_v7 = vand.u32 2147483648, %v2092_v33  ;;  %v2372_v56 = vand.u32 2147483647, %v2092_v33 }
 0x252   : > { %v2394_v40 = vmul.f32 %v2346_v25, %v5273_v41  ;;  %v2350_v44 = vsub.f32 1.0, %v2349_v39  ;;  %v5302_v24 = vadd.f32 %v5298_v58, %v2483_v42  ;;  %v2360_v41 = vor.u32 1.1754944e-38, %v2359_v18  ;;  %v1367_v11 = vpop.f32.mrf.mxu1 }
 0x253   : > { %vm2368_vm1 = vweird.f32 %v2092_v33  ;;  %vm2373_vm4 = vcmp.eq.f32.partialorder %v2372_v56, 8.507059e+37  ;;  %1426 = vrot.lane.b32.xlu2 %v1367_v11, %s4053_s25  ;;  %vm2920_vm9 = vcmask 261120  }
 0x254   : > { %v2351_v37 = vmul.f32 %v3908_v8, %v2350_v44  ;;  %v3702_v61 = vmul.f32 -1.442695, %v5302_v24  ;;  %3699 = vmatmul.msk.f32.gmra.mxu0 %vm394_vm0, %v2394_v40 }
 0x256   : > { %v2352_v29 = vadd.f32 %v3908_v8, %v2351_v37  ;;  %3911 = vpow2.f32 %v3702_v61 }
 0x257   : > { %v3910_v55 = vpop.eup %3909 }
 0x258   : > { %v2356_v60 = vsel %vm2355_vm12, %v3908_v8, %v2352_v29  ;;  %v2364_v45 = vmul.f32 %v3910_v55, %v2092_v33  ;;  %vm2369_vm15 = vweird.f32 %v3910_v55 }
 0x259   : > { %v2361_v36 = vsel %vm2358_vm13, %v2360_v41, %v2356_v60  ;;  %v2486_v23 = vpop.f32.mrf.mxu0  ;;  %vm2370_vm2 = vmor %vm2368_vm1, %vm2369_vm15 }
 0x25a   : > { %v2395_v19 = vmul.f32 %v2361_v36, %v5280_v51  ;;  %v2365_v30 = vsub.f32 1.0, %v2364_v45  ;;  %v5309_v1 = vadd.f32 %v5298_v58, %v2486_v23  ;;  %v2375_v51 = vor.u32 1.1754944e-38, %v2374_v7  ;;  %v1370_v53 = vpop.f32.mrf.mxu1 }
 0x25b   : > { %1428 = vrot.lane.b32.xlu0 %v1370_v53, %s4053_s25 }
 0x25c   : > { %v3912_v14 = vpop.eup %3911  ;;  %v2366_v16 = vmul.f32 %v3910_v55, %v2365_v30  ;;  %v3703_v35 = vmul.f32 -1.442695, %v5309_v1  ;;  %3700 = vmatmul.msk.f32.gmra.mxu0 %vm394_vm0, %v2395_v19 }
 0x25d   : > { %v2597_v57 = vadd.f32 1.0, %v3912_v14 }
 0x25e   : > { %v2367_v4 = vadd.f32 %v3910_v55, %v2366_v16  ;;  %3913 = vpow2.f32 %v3703_v35 }
 0x25f   : > { %3915 = vrcp.f32 %v2597_v57  ;;  %v2627_v22 = vand.u32 2147483648, %v2597_v57  ;;  %v2625_v32 = vand.u32 2147483647, %v2597_v57 }
 0x260   : > { %v2371_v46 = vsel %vm2370_vm2, %v3910_v55, %v2367_v4 }
 0x261   : > { %v2376_v3 = vsel %vm2373_vm4, %v2375_v51, %v2371_v46  ;;  %v2489_v9 = vpop.f32.mrf.mxu0  ;;  %v2628_v21 = vor.u32 1.1754944e-38, %v2627_v22  ;;  %vm2626_vm8 = vcmp.eq.f32.partialorder %v2625_v32, 8.507059e+37 }
 0x262   : > { %v2396_v47 = vmul.f32 %v2376_v3, %v5287_v12  ;;  %v5316_v15 = vadd.f32 %v5298_v58, %v2489_v9 }
 0x264   : > { %v3914_v6 = vpop.eup %3913  ;;  %v3704_v50 = vmul.f32 -1.442695, %v5316_v15  ;;  %3701 = vmatmul.msk.f32.gmra.mxu0 %vm394_vm0, %v2396_v47  ;;  %vm2621_vm0 = vweird.f32 %v2597_v57 }
 0x265   : > { %v3916_v27 = vpop.eup %3915  ;;  %v2598_v52 = vadd.f32 1.0, %v3914_v6 }
 0x266   : > { %v2617_v5 = vmul.f32 %v3916_v27, %v2597_v57  ;;  %3917 = vpow2.f32 %v3704_v50  ;;  %vm2622_vm6 = vweird.f32 %v3916_v27 }
 0x267   : > { %3919 = vrcp.f32 %v2598_v52  ;;  %vm2623_vm7 = vmor %vm2621_vm0, %vm2622_vm6  ;;  %v2642_v8 = vand.u32 2147483648, %v2598_v52  ;;  %v2640_v38 = vand.u32 2147483647, %v2598_v52  ;;  %vm2636_vm11 = vweird.f32 %v2598_v52 }
 0x268   : > { %v2618_v20 = vsub.f32 1.0, %v2617_v5 }
 0x269   : > { %v2492_v31 = vpop.f32.mrf.mxu0  ;;  %v2643_v18 = vor.u32 1.1754944e-38, %v2642_v8  ;;  %vm2641_vm13 = vcmp.eq.f32.partialorder %v2640_v38, 8.507059e+37 }
 0x26a   : > { %v2619_v12 = vmul.f32 %v3916_v27, %v2618_v20  ;;  %v5322_v63 = vadd.f32 %v5298_v58, %v2492_v31 }
 0x26c   : > { %v3918_v28 = vpop.eup %3917  ;;  %v2620_v26 = vadd.f32 %v3916_v27, %v2619_v12  ;;  %v3705_v13 = vmul.f32 -1.442695, %v5322_v63 }
 0x26d   : > { %v3920_v0 = vpop.eup %3919  ;;  %v2599_v59 = vadd.f32 1.0, %v3918_v28 }
 0x26e   : > { %v2624_v10 = vsel %vm2623_vm7, %v3916_v27, %v2620_v26  ;;  %v2632_v54 = vmul.f32 %v3920_v0, %v2598_v52  ;;  %3921 = vpow2.f32 %v3705_v13  ;;  %vm2637_vm10 = vweird.f32 %v3920_v0 }
 0x26f   : > { %v2629_v34 = vsel %vm2626_vm8, %v2628_v21, %v2624_v10  ;;  %3923 = vrcp.f32 %v2599_v59  ;;  %vm2638_vm12 = vmor %vm2636_vm11, %vm2637_vm10  ;;  %v2655_v60 = vand.u32 2147483647, %v2599_v59  ;;  %v2657_v45 = vand.u32 2147483648, %v2599_v59 }
 0x270   : > { %v2901_v17 = vmul.f32 %v2629_v34, %v5302_v24  ;;  %v2633_v2 = vsub.f32 1.0, %v2632_v54  ;;  %vm2651_vm1 = vweird.f32 %v2599_v59 }
 0x271   : > { %v2495_v62 = vpop.f32.mrf.mxu0  ;;  %v2658_v35 = vor.u32 1.1754944e-38, %v2657_v45  ;;  %vm2656_vm4 = vcmp.eq.f32.partialorder %v2655_v60, 8.507059e+37 }
 0x272   : > { %2921 = vst.msk [vmem:[%s4776_s23] sm:$0xff] %vm2920_vm9, %v2901_v17  ;;  %v2634_v33 = vmul.f32 %v3920_v0, %v2633_v2  ;;  %v5330_v39 = vadd.f32 %v5298_v58, %v2495_v62 }
 0x274   : > { %v3922_v25 = vpop.eup %3921  ;;  %v2635_v42 = vadd.f32 %v3920_v0, %v2634_v33  ;;  %v3706_v40 = vmul.f32 -1.442695, %v5330_v39 }
 0x275   : > { %v3924_v44 = vpop.eup %3923  ;;  %v2600_v37 = vadd.f32 1.0, %v3922_v25 }
 0x276   : > { %v2639_v43 = vsel %vm2638_vm12, %v3920_v0, %v2635_v42  ;;  %v2647_v61 = vmul.f32 %v3924_v44, %v2599_v59  ;;  %3925 = vpow2.f32 %v3706_v40  ;;  %vm2652_vm15 = vweird.f32 %v3924_v44 }
 0x277   : > { %v2644_v48 = vsel %vm2641_vm13, %v2643_v18, %v2639_v43  ;;  %3927 = vrcp.f32 %v2600_v37  ;;  %vm2653_vm2 = vmor %vm2651_vm1, %vm2652_vm15  ;;  %v2670_v47 = vand.u32 2147483647, %v2600_v37  ;;  %v2672_v6 = vand.u32 2147483648, %v2600_v37 }
 0x278   : > { %v2902_v29 = vmul.f32 %v2644_v48, %v5309_v1  ;;  %v2648_v55 = vsub.f32 1.0, %v2647_v61  ;;  %vm2666_vm0 = vweird.f32 %v2600_v37 }
 0x279   : > { %v2940_v41 = vld [vmem:[%s4776_s23] sm:$0xff]  ;;  %v2498_v36 = vpop.f32.mrf.mxu0  ;;  %v2673_v32 = vor.u32 1.1754944e-38, %v2672_v6  ;;  %vm2671_vm8 = vcmp.eq.f32.partialorder %v2670_v47, 8.507059e+37 }
 0x27a   : > { %v2959_v23 = vmul.f32 %v2940_v41, %v5302_v24  ;;  %2922 = vst.msk [vmem:[%s4776_s23 + $0x8] sm:$0xff] %vm2920_vm9, %v2902_v29  ;;  %v2649_v19 = vmul.f32 %v3924_v44, %v2648_v55  ;;  %v5339_v30 = vadd.f32 %v5298_v58, %v2498_v36 }
 0x27c   : > { %v3926_v7 = vpop.eup %3925  ;;  %2978 = vst.msk [vmem:[%s4776_s23] sm:$0xff] %vm695_vm5, %v2959_v23  ;;  %v2650_v14 = vadd.f32 %v3924_v44, %v2649_v19  ;;  %v3707_v16 = vmul.f32 -1.442695, %v5339_v30 }
 0x27d   : > { %v3928_v56 = vpop.eup %3927  ;;  %v2601_v49 = vadd.f32 1.0, %v3926_v7  ;;  %v1415_v61 = vpop.permute.xlu2 %1414 }
 0x27e   : > { %v2654_v57 = vsel %vm2653_vm2, %v3924_v44, %v2650_v14  ;;  %v2662_v4 = vmul.f32 %v3928_v56, %v2600_v37  ;;  %3929 = vpow2.f32 %v3707_v16  ;;  %vm2667_vm6 = vweird.f32 %v3928_v56  ;;  %1461 = vst.msk [vmem:[%s4776_s23 + $0x58] sm:$0xff] %vm1449_vm14, %v1415_v61 }
 0x27f   : > { %v2659_v51 = vsel %vm2656_vm4, %v2658_v35, %v2654_v57  ;;  %3931 = vrcp.f32 %v2601_v49  ;;  %vm2668_vm7 = vmor %vm2666_vm0, %vm2667_vm6  ;;  %v2685_v10 = vand.u32 2147483647, %v2601_v49  ;;  %v2687_v54 = vand.u32 2147483648, %v2601_v49 }
 0x280   : > { %v2903_v46 = vmul.f32 %v2659_v51, %v5316_v15  ;;  %v2663_v3 = vsub.f32 1.0, %v2662_v4  ;;  %vm2681_vm11 = vweird.f32 %v2601_v49 }
 0x281   : > { %v2941_v9 = vld [vmem:[%s4776_s23 + $0x8] sm:$0xff]  ;;  %v2501_v50 = vpop.f32.mrf.mxu0  ;;  %v2688_v40 = vor.u32 1.1754944e-38, %v2687_v54  ;;  %vm2686_vm13 = vcmp.eq.f32.partialorder %v2685_v10, 8.507059e+37 }
 0x282   : > { %v2960_v11 = vmul.f32 %v2941_v9, %v5309_v1  ;;  %2923 = vst.msk [vmem:[%s4776_s23 + $0x10] sm:$0xff] %vm2920_vm9, %v2903_v46  ;;  %v2664_v27 = vmul.f32 %v3928_v56, %v2663_v3  ;;  %v5350_v52 = vadd.f32 %v5298_v58, %v2501_v50 }
 0x283   : > { %v2997_v5 = vld [vmem:[%s4776_s23] sm:$0xff] }
 0x284   : > { %v3930_v20 = vpop.eup %3929  ;;  %2979 = vst.msk [vmem:[%s4776_s23 + $0x8] sm:$0xff] %vm695_vm5, %v2960_v11  ;;  %v2665_v22 = vadd.f32 %v3928_v56, %v2664_v27  ;;  %v3708_v31 = vmul.f32 -1.442695, %v5350_v52  ;;  %3035 = vrot.lane.b32.xlu1 %v2997_v5, %s4053_s25 }
 0x285   : > { %v3932_v12 = vpop.eup %3931  ;;  %v2602_v28 = vadd.f32 1.0, %v3930_v20  ;;  %v1411_v3 = vpop.permute.xlu0 %1410 }
 0x286   : > { %v2669_v26 = vsel %vm2668_vm7, %v3928_v56, %v2665_v22  ;;  %v2677_v13 = vmul.f32 %v3932_v12, %v2601_v49  ;;  %3933 = vpow2.f32 %v3708_v31  ;;  %vm2682_vm10 = vweird.f32 %v3932_v12  ;;  %1459 = vst.msk [vmem:[%s4776_s23 + $0x48] sm:$0xff] %vm1449_vm14, %v1411_v3 }
 0x287   : > { %v2674_v53 = vsel %vm2671_vm8, %v2673_v32, %v2669_v26  ;;  %3935 = vrcp.f32 %v2602_v28  ;;  %vm2683_vm12 = vmor %vm2681_vm11, %vm2682_vm10  ;;  %v2700_v41 = vand.u32 2147483647, %v2602_v28  ;;  %v2702_v60 = vand.u32 2147483648, %v2602_v28 }
 0x288   : > { %v2904_v0 = vmul.f32 %v2674_v53, %v5322_v63  ;;  %v2678_v21 = vsub.f32 1.0, %v2677_v13  ;;  %vm2696_vm1 = vweird.f32 %v2602_v28 }
 0x289   : > { %v2942_v59 = vld [vmem:[%s4776_s23 + $0x10] sm:$0xff]  ;;  %v2504_v34 = vpop.f32.mrf.mxu0  ;;  %v2703_v49 = vor.u32 1.1754944e-38, %v2702_v60  ;;  %vm2701_vm4 = vcmp.eq.f32.partialorder %v2700_v41, 8.507059e+37 }
 0x28a   : > { %v2961_v17 = vmul.f32 %v2942_v59, %v5316_v15  ;;  %2924 = vst.msk [vmem:[%s4776_s23 + $0x18] sm:$0xff] %vm2920_vm9, %v2904_v0  ;;  %v2679_v2 = vmul.f32 %v3932_v12, %v2678_v21  ;;  %v5363_v8 = vadd.f32 %v5298_v58, %v2504_v34 }
 0x28b   : > { %v2998_v62 = vld [vmem:[%s4776_s23 + $0x8] sm:$0xff] }
 0x28c   : > { %v3934_v33 = vpop.eup %3933  ;;  %2980 = vst.msk [vmem:[%s4776_s23 + $0x10] sm:$0xff] %vm695_vm5, %v2961_v17  ;;  %v2680_v38 = vadd.f32 %v3932_v12, %v2679_v2  ;;  %v3709_v25 = vmul.f32 -1.442695, %v5363_v8  ;;  %3037 = vrot.lane.b32.xlu2 %v2998_v62, %s4053_s25 }
 0x28d   : > { %v3936_v42 = vpop.eup %3935  ;;  %v5370_v44 = vadd.f32 1.0, %v3934_v33  ;;  %v1413_v10 = vpop.permute.xlu1 %1412 }
 0x28e   : > { %v2684_v18 = vsel %vm2683_vm12, %v3932_v12, %v2680_v38  ;;  %v2692_v37 = vmul.f32 %v3936_v42, %v2602_v28  ;;  %3937 = vpow2.f32 %v3709_v25  ;;  %vm2697_vm15 = vweird.f32 %v3936_v42  ;;  %1460 = vst.msk [vmem:[%s4776_s23 + $0x50] sm:$0xff] %vm1449_vm14, %v1413_v10 }
 0x28f   : > { %v2689_v43 = vsel %vm2686_vm13, %v2688_v40, %v2684_v18  ;;  %3939 = vrcp.f32 %v5370_v44  ;;  %vm2698_vm2 = vmor %vm2696_vm1, %vm2697_vm15  ;;  %v2715_v50 = vand.u32 2147483647, %v5370_v44  ;;  %v2717_v11 = vand.u32 2147483648, %v5370_v44 }
 0x290   : > { %v2905_v48 = vmul.f32 %v2689_v43, %v5330_v39  ;;  %v2693_v29 = vsub.f32 1.0, %v2692_v37  ;;  %vm2711_vm0 = vweird.f32 %v5370_v44 }
 0x291   : > { %v2943_v55 = vld [vmem:[%s4776_s23 + $0x18] sm:$0xff]  ;;  %v2507_v45 = vpop.f32.mrf.mxu0  ;;  %v2718_v13 = vor.u32 1.1754944e-38, %v2717_v11  ;;  %vm2716_vm8 = vcmp.eq.f32.partialorder %v2715_v50, 8.507059e+37 }
 0x292   : > { %v2962_v36 = vmul.f32 %v2943_v55, %v5322_v63  ;;  %2925 = vst.msk [vmem:[%s4776_s23 + $0x20] sm:$0xff] %vm2920_vm9, %v2905_v48  ;;  %v2694_v23 = vmul.f32 %v3936_v42, %v2693_v29  ;;  %v5381_v19 = vadd.f32 %v5298_v58, %v2507_v45 }
 0x293   : > { %v2999_v7 = vld [vmem:[%s4776_s23 + $0x10] sm:$0xff] }
 0x294   : > { %v3938_v14 = vpop.eup %3937  ;;  %2981 = vst.msk [vmem:[%s4776_s23 + $0x18] sm:$0xff] %vm695_vm5, %v2962_v36  ;;  %v2695_v16 = vadd.f32 %v3936_v42, %v2694_v23  ;;  %v3710_v56 = vmul.f32 -1.442695, %v5381_v19  ;;  %3039 = vrot.lane.b32.xlu0 %v2999_v7, %s4053_s25 }
 0x295   : > { %v3940_v35 = vpop.eup %3939  ;;  %v5388_v57 = vadd.f32 1.0, %v3938_v14  ;;  %v1421_v60 = vpop.permute.xlu2 %1420 }
 0x296   : > { %v2699_v4 = vsel %vm2698_vm2, %v3936_v42, %v2695_v16  ;;  %v2707_v51 = vmul.f32 %v3940_v35, %v5370_v44  ;;  %3941 = vpow2.f32 %v3710_v56  ;;  %vm2712_vm6 = vweird.f32 %v3940_v35  ;;  %1464 = vst.msk [vmem:[%s4776_s23 + $0x70] sm:$0xff] %vm1449_vm14, %v1421_v60 }
 0x297   : > { %v2704_v46 = vsel %vm2701_vm4, %v2703_v49, %v2699_v4  ;;  %3943 = vrcp.f32 %v5388_v57  ;;  %vm2713_vm7 = vmor %vm2711_vm0, %vm2712_vm6  ;;  %v2730_v2 = vand.u32 2147483647, %v5388_v57  ;;  %v2732_v62 = vand.u32 2147483648, %v5388_v57 }
 0x298   : > { %v2906_v9 = vmul.f32 %v2704_v46, %v5339_v30  ;;  %v2708_v47 = vsub.f32 1.0, %v2707_v51  ;;  %vm2726_vm11 = vweird.f32 %v5388_v57 }
 0x299   : > { %v2944_v6 = vld [vmem:[%s4776_s23 + $0x20] sm:$0xff]  ;;  %v2510_v27 = vpop.f32.mrf.mxu0  ;;  %v2733_v61 = vor.u32 1.1754944e-38, %v2732_v62  ;;  %vm2731_vm13 = vcmp.eq.f32.partialorder %v2730_v2, 8.507059e+37 }
 0x29a   : > { %v2963_v5 = vmul.f32 %v2944_v6, %v5330_v39  ;;  %2926 = vst.msk [vmem:[%s4776_s23 + $0x28] sm:$0xff] %vm2920_vm9, %v2906_v9  ;;  %v2709_v20 = vmul.f32 %v3940_v35, %v2708_v47  ;;  %v5402_v22 = vadd.f32 %v5298_v58, %v2510_v27 }
 0x29b   : > { %v3000_v31 = vld [vmem:[%s4776_s23 + $0x18] sm:$0xff] }
 0x29c   : > { %v3942_v12 = vpop.eup %3941  ;;  %2982 = vst.msk [vmem:[%s4776_s23 + $0x20] sm:$0xff] %vm695_vm5, %v2963_v5  ;;  %v2710_v32 = vadd.f32 %v3940_v35, %v2709_v20  ;;  %v3711_v28 = vmul.f32 -1.442695, %v5402_v22  ;;  %3041 = vrot.lane.b32.xlu1 %v3000_v31, %s4053_s25 }
 0x29d   : > { %v3944_v26 = vpop.eup %3943  ;;  %v5410_v53 = vadd.f32 1.0, %v3942_v12  ;;  %v1417_v27 = vpop.permute.xlu0 %1416 }
 0x29e   : > { %v2714_v0 = vsel %vm2713_vm7, %v3940_v35, %v2710_v32  ;;  %v2722_v21 = vmul.f32 %v3944_v26, %v5388_v57  ;;  %3945 = vpow2.f32 %v3711_v28  ;;  %vm2727_vm10 = vweird.f32 %v3944_v26  ;;  %1462 = vst.msk [vmem:[%s4776_s23 + $0x60] sm:$0xff] %vm1449_vm14, %v1417_v27 }
 0x29f   : > { %v2719_v59 = vsel %vm2716_vm8, %v2718_v13, %v2714_v0  ;;  %3947 = vrcp.f32 %v5410_v53  ;;  %vm2728_vm12 = vmor %vm2726_vm11, %vm2727_vm10  ;;  %v2745_v7 = vand.u32 2147483647, %v5410_v53  ;;  %v2747_v14 = vand.u32 2147483648, %v5410_v53 }
 0x2a0   : > { %v2907_v54 = vmul.f32 %v2719_v59, %v5350_v52  ;;  %v2723_v34 = vsub.f32 1.0, %v2722_v21  ;;  %vm2741_vm1 = vweird.f32 %v5410_v53 }
 0x2a1   : > { %v2945_v17 = vld [vmem:[%s4776_s23 + $0x28] sm:$0xff]  ;;  %v2513_v33 = vpop.f32.mrf.mxu0  ;;  %v2748_v9 = vor.u32 1.1754944e-38, %v2747_v14  ;;  %vm2746_vm4 = vcmp.eq.f32.partialorder %v2745_v7, 8.507059e+37 }
 0x2a2   : > { %v2964_v38 = vmul.f32 %v2945_v17, %v5339_v30  ;;  %2927 = vst.msk [vmem:[%s4776_s23 + $0x30] sm:$0xff] %vm2920_vm9, %v2907_v54  ;;  %v2724_v25 = vmul.f32 %v3944_v26, %v2723_v34  ;;  %v5424_v42 = vadd.f32 %v5298_v58, %v2513_v33 }
 0x2a3   : > { %v3001_v40 = vld [vmem:[%s4776_s23 + $0x20] sm:$0xff] }
 0x2a4   : > { %v3946_v44 = vpop.eup %3945  ;;  %2983 = vst.msk [vmem:[%s4776_s23 + $0x28] sm:$0xff] %vm695_vm5, %v2964_v38  ;;  %v2725_v18 = vadd.f32 %v3944_v26, %v2724_v25  ;;  %v3712_v37 = vmul.f32 -1.442695, %v5424_v42  ;;  %3043 = vrot.lane.b32.xlu2 %v3001_v40, %s4053_s25 }
 0x2a5   : > { %v3948_v43 = vpop.eup %3947  ;;  %v5432_v48 = vadd.f32 1.0, %v3946_v44  ;;  %v1419_v38 = vpop.permute.xlu1 %1418 }
 0x2a6   : > { %v2729_v29 = vsel %vm2728_vm12, %v3944_v26, %v2725_v18  ;;  %v2737_v55 = vmul.f32 %v3948_v43, %v5410_v53  ;;  %3949 = vpow2.f32 %v3712_v37  ;;  %vm2742_vm15 = vweird.f32 %v3948_v43  ;;  %1463 = vst.msk [vmem:[%s4776_s23 + $0x68] sm:$0xff] %vm1449_vm14, %v1419_v38 }
 0x2a7   : > { %v2734_v41 = vsel %vm2731_vm13, %v2733_v61, %v2729_v29  ;;  %3951 = vrcp.f32 %v5432_v48  ;;  %vm2743_vm2 = vmor %vm2741_vm1, %vm2742_vm15  ;;  %v2760_v12 = vand.u32 2147483647, %v5432_v48  ;;  %v2762_v32 = vand.u32 2147483648, %v5432_v48 }
 0x2a8   : > { %v2908_v45 = vmul.f32 %v2734_v41, %v5363_v8  ;;  %v2738_v36 = vsub.f32 1.0, %v2737_v55  ;;  %vm2756_vm0 = vweird.f32 %v5432_v48 }
 0x2a9   : > { %v2946_v23 = vld [vmem:[%s4776_s23 + $0x30] sm:$0xff]  ;;  %v2516_v16 = vpop.f32.mrf.mxu0  ;;  %v2763_v34 = vor.u32 1.1754944e-38, %v2762_v32  ;;  %vm2761_vm8 = vcmp.eq.f32.partialorder %v2760_v12, 8.507059e+37 }
 0x2aa   : > { %v2965_v56 = vmul.f32 %v2946_v23, %v5350_v52  ;;  %2928 = vst.msk [vmem:[%s4776_s23 + $0x38] sm:$0xff] %vm2920_vm9, %v2908_v45  ;;  %v2739_v35 = vmul.f32 %v3948_v43, %v2738_v36  ;;  %v5446_v49 = vadd.f32 %v5298_v58, %v2516_v16 }
 0x2ab   : > { %v3002_v57 = vld [vmem:[%s4776_s23 + $0x28] sm:$0xff] }
 0x2ac   : > { %v3950_v4 = vpop.eup %3949  ;;  %2984 = vst.msk [vmem:[%s4776_s23 + $0x30] sm:$0xff] %vm695_vm5, %v2965_v56  ;;  %v2740_v51 = vadd.f32 %v3948_v43, %v2739_v35  ;;  %v3713_v46 = vmul.f32 -1.442695, %v5446_v49  ;;  %3045 = vrot.lane.b32.xlu0 %v3002_v57, %s4053_s25 }
 0x2ad   : > { %v3952_v3 = vpop.eup %3951  ;;  %v5454_v47 = vadd.f32 1.0, %v3950_v4  ;;  %v1427_v35 = vpop.permute.xlu2 %1426 }
 0x2ae   : > { %v2744_v6 = vsel %vm2743_vm2, %v3948_v43, %v2740_v51  ;;  %v2752_v50 = vmul.f32 %v3952_v3, %v5432_v48  ;;  %3953 = vpow2.f32 %v3713_v46  ;;  %vm2757_vm6 = vweird.f32 %v3952_v3  ;;  %1467 = vst.msk [vmem:[%s4776_s23 + $0x88] sm:$0xff] %vm1449_vm14, %v1427_v35 }
 0x2af   : > { %v2749_v11 = vsel %vm2746_vm4, %v2748_v9, %v2744_v6  ;;  %3955 = vrcp.f32 %v5454_v47  ;;  %vm2758_vm7 = vmor %vm2756_vm0, %vm2757_vm6  ;;  %v2775_v18 = vand.u32 2147483647, %v5454_v47  ;;  %v2777_v37 = vand.u32 2147483648, %v5454_v47 }
 0x2b0   : > { %v2909_v5 = vmul.f32 %v2749_v11, %v5381_v19  ;;  %v2753_v20 = vsub.f32 1.0, %v2752_v50  ;;  %vm2771_vm11 = vweird.f32 %v5454_v47 }
 0x2b1   : > { %v2947_v31 = vld [vmem:[%s4776_s23 + $0x38] sm:$0xff]  ;;  %v2519_v28 = vpop.f32.mrf.mxu0  ;;  %v2778_v23 = vor.u32 1.1754944e-38, %v2777_v37  ;;  %vm2776_vm13 = vcmp.eq.f32.partialorder %v2775_v18, 8.507059e+37 }
 0x2b2   : > { %v2966_v26 = vmul.f32 %v2947_v31, %v5363_v8  ;;  %2929 = vst.msk [vmem:[%s4776_s23 + $0x40] sm:$0xff] %vm2920_vm9, %v2909_v5  ;;  %v2754_v13 = vmul.f32 %v3952_v3, %v2753_v20  ;;  %v5468_v53 = vadd.f32 %v5298_v58, %v2519_v28 }
 0x2b3   : > { %v3003_v0 = vld [vmem:[%s4776_s23 + $0x30] sm:$0xff] }
 0x2b4   : > { %v3954_v21 = vpop.eup %3953  ;;  %2985 = vst.msk [vmem:[%s4776_s23 + $0x38] sm:$0xff] %vm695_vm5, %v2966_v26  ;;  %v2755_v59 = vadd.f32 %v3952_v3, %v2754_v13  ;;  %v3714_v10 = vmul.f32 -1.442695, %v5468_v53  ;;  %3047 = vrot.lane.b32.xlu1 %v3003_v0, %s4053_s25 }
 0x2b5   : > { %v3956_v54 = vpop.eup %3955  ;;  %v5476_v17 = vadd.f32 1.0, %v3954_v21  ;;  %v1423_v0 = vpop.permute.xlu0 %1422 }
 0x2b6   : > { %v2759_v2 = vsel %vm2758_vm7, %v3952_v3, %v2755_v59  ;;  %v2767_v62 = vmul.f32 %v3956_v54, %v5454_v47  ;;  %3957 = vpow2.f32 %v3714_v10  ;;  %vm2772_vm10 = vweird.f32 %v3956_v54  ;;  %1465 = vst.msk [vmem:[%s4776_s23 + $0x78] sm:$0xff] %vm1449_vm14, %v1423_v0 }
 0x2b7   : > { %v2764_v33 = vsel %vm2761_vm8, %v2763_v34, %v2759_v2  ;;  %3959 = vrcp.f32 %v5476_v17  ;;  %vm2773_vm12 = vmor %vm2771_vm11, %vm2772_vm10  ;;  %v2790_v51 = vand.u32 2147483647, %v5476_v17  ;;  %v2792_v46 = vand.u32 2147483648, %v5476_v17 }
 0x2b8   : > { %v2910_v25 = vmul.f32 %v2764_v33, %v5402_v22  ;;  %v2768_v40 = vsub.f32 1.0, %v2767_v62  ;;  %vm2786_vm1 = vweird.f32 %v5476_v17 }
 0x2b9   : > { %v2948_v44 = vld [vmem:[%s4776_s23 + $0x40] sm:$0xff]  ;;  %v2522_v43 = vpop.f32.mrf.mxu0  ;;  %v2793_v12 = vor.u32 1.1754944e-38, %v2792_v46  ;;  %vm2791_vm4 = vcmp.eq.f32.partialorder %v2790_v51, 8.507059e+37 }
 0x2ba   : > { %v2967_v61 = vmul.f32 %v2948_v44, %v5381_v19  ;;  %v2769_v48 = vmul.f32 %v3956_v54, %v2768_v40  ;;  %2930 = vst.msk [vmem:[%s4776_s23 + $0x48] sm:$0xff] %vm2920_vm9, %v2910_v25  ;;  %v5490_v29 = vadd.f32 %v5298_v58, %v2522_v43 }
 0x2bb   : > { %v3004_v55 = vld [vmem:[%s4776_s23 + $0x38] sm:$0xff] }
 0x2bc   : > { %v3958_v41 = vpop.eup %3957  ;;  %2986 = vst.msk [vmem:[%s4776_s23 + $0x40] sm:$0xff] %vm695_vm5, %v2967_v61  ;;  %v2770_v60 = vadd.f32 %v3956_v54, %v2769_v48  ;;  %v3715_v45 = vmul.f32 -1.442695, %v5490_v29  ;;  %3049 = vrot.lane.b32.xlu2 %v3004_v55, %s4053_s25 }
 0x2bd   : > { %v3960_v36 = vpop.eup %3959  ;;  %v5498_v7 = vadd.f32 1.0, %v3958_v41  ;;  %v1425_v41 = vpop.permute.xlu1 %1424 }
 0x2be   : > { %v2774_v14 = vsel %vm2773_vm12, %v3956_v54, %v2770_v60  ;;  %v2782_v16 = vmul.f32 %v3960_v36, %v5476_v17  ;;  %3961 = vpow2.f32 %v3715_v45  ;;  %vm2787_vm15 = vweird.f32 %v3960_v36  ;;  %1466 = vst.msk [vmem:[%s4776_s23 + $0x80] sm:$0xff] %vm1449_vm14, %v1425_v41 }
 0x2bf   : > { %v2779_v56 = vsel %vm2776_vm13, %v2778_v23, %v2774_v14  ;;  %3963 = vrcp.f32 %v5498_v7  ;;  %vm2788_vm2 = vmor %vm2786_vm1, %vm2787_vm15  ;;  %v2805_v10 = vand.u32 2147483647, %v5498_v7  ;;  %v2807_v54 = vand.u32 2147483648, %v5498_v7 }
 0x2c0   : > { %v2911_v57 = vmul.f32 %v2779_v56, %v5424_v42  ;;  %v2783_v4 = vsub.f32 1.0, %v2782_v16  ;;  %vm2801_vm0 = vweird.f32 %v5498_v7 }
 0x2c1   : > { %v2949_v3 = vld [vmem:[%s4776_s23 + $0x48] sm:$0xff]  ;;  %v2525_v9 = vpop.f32.mrf.mxu0  ;;  %v2808_v37 = vor.u32 1.1754944e-38, %v2807_v54  ;;  %vm2806_vm8 = vcmp.eq.f32.partialorder %v2805_v10, 8.507059e+37 }
 0x2c2   : > { %v2784_v47 = vmul.f32 %v3960_v36, %v2783_v4  ;;  %v2968_v6 = vmul.f32 %v2949_v3, %v5402_v22  ;;  %2931 = vst.msk [vmem:[%s4776_s23 + $0x50] sm:$0xff] %vm2920_vm9, %v2911_v57  ;;  %v5512_v50 = vadd.f32 %v5298_v58, %v2525_v9 }
 0x2c3   : > { %v3005_v11 = vld [vmem:[%s4776_s23 + $0x40] sm:$0xff] }
 0x2c4   : > { %v3962_v27 = vpop.eup %3961  ;;  %v2785_v5 = vadd.f32 %v3960_v36, %v2784_v47  ;;  %2987 = vst.msk [vmem:[%s4776_s23 + $0x48] sm:$0xff] %vm695_vm5, %v2968_v6  ;;  %v3716_v20 = vmul.f32 -1.442695, %v5512_v50  ;;  %3051 = vrot.lane.b32.xlu0 %v3005_v11, %s4053_s25 }
 0x2c5   : > { %v3964_v31 = vpop.eup %3963  ;;  %v5520_v32 = vadd.f32 1.0, %v3962_v27 }
 0x2c6   : > { %v2789_v28 = vsel %vm2788_vm2, %v3960_v36, %v2785_v5  ;;  %v2797_v26 = vmul.f32 %v3964_v31, %v5498_v7  ;;  %3965 = vpow2.f32 %v3716_v20  ;;  %vm2802_vm6 = vweird.f32 %v3964_v31 }
 0x2c7   : > { %v2794_v13 = vsel %vm2791_vm4, %v2793_v12, %v2789_v28  ;;  %3967 = vrcp.f32 %v5520_v32  ;;  %vm2803_vm7 = vmor %vm2801_vm0, %vm2802_vm6  ;;  %v2820_v23 = vand.u32 2147483647, %v5520_v32  ;;  %v2822_v7 = vand.u32 2147483648, %v5520_v32 }
 0x2c8   : > { %v2912_v21 = vmul.f32 %v2794_v13, %v5446_v49  ;;  %v2798_v59 = vsub.f32 1.0, %v2797_v26  ;;  %vm2816_vm11 = vweird.f32 %v5520_v32 }
 0x2c9   : > { %v2950_v34 = vld [vmem:[%s4776_s23 + $0x50] sm:$0xff]  ;;  %v2528_v17 = vpop.f32.mrf.mxu0  ;;  %v2823_v9 = vor.u32 1.1754944e-38, %v2822_v7  ;;  %vm2821_vm13 = vcmp.eq.f32.partialorder %v2820_v23, 8.507059e+37 }
 0x2ca   : > { %2932 = vst.msk [vmem:[%s4776_s23 + $0x58] sm:$0xff] %vm2920_vm9, %v2912_v21  ;;  %v2799_v2 = vmul.f32 %v3964_v31, %v2798_v59  ;;  %v2969_v62 = vmul.f32 %v2950_v34, %v5424_v42  ;;  %v5534_v33 = vadd.f32 %v5298_v58, %v2528_v17 }
 0x2cb   : > { %v3006_v38 = vld [vmem:[%s4776_s23 + $0x48] sm:$0xff] }
 0x2cc   : > { %v3966_v25 = vpop.eup %3965  ;;  %v2800_v40 = vadd.f32 %v3964_v31, %v2799_v2  ;;  %2988 = vst.msk [vmem:[%s4776_s23 + $0x50] sm:$0xff] %vm695_vm5, %v2969_v62  ;;  %v3717_v44 = vmul.f32 -1.442695, %v5534_v33  ;;  %3053 = vrot.lane.b32.xlu1 %v3006_v38, %s4053_s25 }
 0x2cd   : > { %v3968_v18 = vpop.eup %3967  ;;  %v2611_v43 = vadd.f32 1.0, %v3966_v25 }
 0x2ce   : > { %v2804_v61 = vsel %vm2803_vm7, %v3964_v31, %v2800_v40  ;;  %v2812_v48 = vmul.f32 %v3968_v18, %v5520_v32  ;;  %3969 = vpow2.f32 %v3717_v44  ;;  %vm2817_vm10 = vweird.f32 %v3968_v18  ;;  %v1429_v40 = vpop.permute.xlu0 %1428 }
 0x2cf   : > { %v2809_v55 = vsel %vm2806_vm8, %v2808_v37, %v2804_v61  ;;  %3971 = vrcp.f32 %v2611_v43  ;;  %vm2818_vm12 = vmor %vm2816_vm11, %vm2817_vm10  ;;  %v2835_v31 = vand.u32 2147483647, %v2611_v43  ;;  %v2837_v12 = vand.u32 2147483648, %v2611_v43  ;;  %1468 = vst.msk [vmem:[%s4776_s23 + $0x90] sm:$0xff] %vm1449_vm14, %v1429_v40 }
 0x2d0   : > { %v2913_v60 = vmul.f32 %v2809_v55, %v5468_v53  ;;  %v2813_v45 = vsub.f32 1.0, %v2812_v48  ;;  %vm2831_vm1 = vweird.f32 %v2611_v43 }
 0x2d1   : > { %v2951_v36 = vld [vmem:[%s4776_s23 + $0x58] sm:$0xff]  ;;  %v2531_v14 = vpop.f32.mrf.mxu0  ;;  %v2838_v17 = vor.u32 1.1754944e-38, %v2837_v12  ;;  %vm2836_vm4 = vcmp.eq.f32.partialorder %v2835_v31, 8.507059e+37 }
 0x2d2   : > { %v2970_v16 = vmul.f32 %v2951_v36, %v5446_v49  ;;  %v2814_v56 = vmul.f32 %v3968_v18, %v2813_v45  ;;  %2933 = vst.msk [vmem:[%s4776_s23 + $0x60] sm:$0xff] %vm2920_vm9, %v2913_v60  ;;  %v5553_v35 = vadd.f32 %v5298_v58, %v2531_v14 }
 0x2d3   : > { %v3007_v57 = vld [vmem:[%s4776_s23 + $0x50] sm:$0xff] }
 0x2d4   : > { %v3970_v4 = vpop.eup %3969  ;;  %2989 = vst.msk [vmem:[%s4776_s23 + $0x58] sm:$0xff] %vm695_vm5, %v2970_v16  ;;  %v2815_v51 = vadd.f32 %v3968_v18, %v2814_v56  ;;  %v3718_v46 = vmul.f32 -1.442695, %v5553_v35  ;;  %3055 = vrot.lane.b32.xlu2 %v3007_v57, %s4053_s25 }
 0x2d5   : > { %v3972_v3 = vpop.eup %3971  ;;  %v2612_v47 = vadd.f32 1.0, %v3970_v4 }
 0x2d6   : > { %v2819_v6 = vsel %vm2818_vm12, %v3968_v18, %v2815_v51  ;;  %v2827_v11 = vmul.f32 %v3972_v3, %v2611_v43  ;;  %3973 = vpow2.f32 %v3718_v46  ;;  %vm2832_vm15 = vweird.f32 %v3972_v3 }
 0x2d7   : > { %v2824_v27 = vsel %vm2821_vm13, %v2823_v9, %v2819_v6  ;;  %3975 = vrcp.f32 %v2612_v47  ;;  %vm2833_vm2 = vmor %vm2831_vm1, %vm2832_vm15  ;;  %v2850_v37 = vand.u32 2147483647, %v2612_v47  ;;  %v2852_v43 = vand.u32 2147483648, %v2612_v47 }
 0x2d8   : > { %v2914_v5 = vmul.f32 %v2824_v27, %v5490_v29  ;;  %v2828_v20 = vsub.f32 1.0, %v2827_v11  ;;  %vm2846_vm0 = vweird.f32 %v2612_v47 }
 0x2d9   : > { %v2952_v32 = vld [vmem:[%s4776_s23 + $0x60] sm:$0xff]  ;;  %v2534_v28 = vpop.f32.mrf.mxu0  ;;  %v2853_v16 = vor.u32 1.1754944e-38, %v2852_v43  ;;  %vm2851_vm8 = vcmp.eq.f32.partialorder %v2850_v37, 8.507059e+37 }
 0x2da   : > { %v2829_v26 = vmul.f32 %v3972_v3, %v2828_v20  ;;  %v2971_v13 = vmul.f32 %v2952_v32, %v5468_v53  ;;  %2934 = vst.msk [vmem:[%s4776_s23 + $0x68] sm:$0xff] %vm2920_vm9, %v2914_v5  ;;  %v5567_v0 = vadd.f32 %v5298_v58, %v2534_v28 }
 0x2db   : > { %v3008_v21 = vld [vmem:[%s4776_s23 + $0x58] sm:$0xff] }
 0x2dc   : > { %v3974_v59 = vpop.eup %3973  ;;  %v2830_v10 = vadd.f32 %v3972_v3, %v2829_v26  ;;  %2990 = vst.msk [vmem:[%s4776_s23 + $0x60] sm:$0xff] %vm695_vm5, %v2971_v13  ;;  %v3719_v54 = vmul.f32 -1.442695, %v5567_v0  ;;  %3057 = vrot.lane.b32.xlu0 %v3008_v21, %s4053_s25 }
 0x2dd   : > { %v3976_v34 = vpop.eup %3975  ;;  %v2613_v2 = vadd.f32 1.0, %v3974_v59 }
 0x2de   : > { %v2834_v62 = vsel %vm2833_vm2, %v3972_v3, %v2830_v10  ;;  %v2842_v38 = vmul.f32 %v3976_v34, %v2612_v47  ;;  %3977 = vpow2.f32 %v3719_v54  ;;  %vm2847_vm6 = vweird.f32 %v3976_v34 }
 0x2df   : > { %v2839_v25 = vsel %vm2836_vm4, %v2838_v17, %v2834_v62  ;;  %3979 = vrcp.f32 %v2613_v2  ;;  %vm2848_vm7 = vmor %vm2846_vm0, %vm2847_vm6  ;;  %v2867_v9 = vand.u32 2147483648, %v2613_v2  ;;  %v2865_v11 = vand.u32 2147483647, %v2613_v2 }
 0x2e0   : > { %v2915_v44 = vmul.f32 %v2839_v25, %v5512_v50  ;;  %v2843_v18 = vsub.f32 1.0, %v2842_v38  ;;  %vm2861_vm11 = vweird.f32 %v2613_v2 }
 0x2e1   : > { %v2953_v61 = vld [vmem:[%s4776_s23 + $0x68] sm:$0xff]  ;;  %v2537_v48 = vpop.f32.mrf.mxu0  ;;  %v2868_v12 = vor.u32 1.1754944e-38, %v2867_v9  ;;  %vm2866_vm13 = vcmp.eq.f32.partialorder %v2865_v11, 8.507059e+37 }
 0x2e2   : > { %2935 = vst.msk [vmem:[%s4776_s23 + $0x70] sm:$0xff] %vm2920_vm9, %v2915_v44  ;;  %v2844_v55 = vmul.f32 %v3976_v34, %v2843_v18  ;;  %v2972_v41 = vmul.f32 %v2953_v61, %v5490_v29  ;;  %v5582_v60 = vadd.f32 %v5298_v58, %v2537_v48 }
 0x2e3   : > { %v3009_v45 = vld [vmem:[%s4776_s23 + $0x60] sm:$0xff] }
 0x2e4   : > { %v3978_v36 = vpop.eup %3977  ;;  %v2845_v23 = vadd.f32 %v3976_v34, %v2844_v55  ;;  %2991 = vst.msk [vmem:[%s4776_s23 + $0x68] sm:$0xff] %vm695_vm5, %v2972_v41  ;;  %v3720_v7 = vmul.f32 -1.442695, %v5582_v60  ;;  %3059 = vrot.lane.b32.xlu1 %v3009_v45, %s4053_s25 }
 0x2e5   : > { %v3980_v14 = vpop.eup %3979  ;;  %v2614_v56 = vadd.f32 1.0, %v3978_v36 }
 0x2e6   : > { %v2849_v57 = vsel %vm2848_vm7, %v3976_v34, %v2845_v23  ;;  %v2857_v58 = vmul.f32 %v3980_v14, %v2613_v2  ;;  %3981 = vpow2.f32 %v3720_v7  ;;  %vm2862_vm10 = vweird.f32 %v3980_v14  ;;  %v3038_v37 = vpop.permute.xlu2 %3037 }
 0x2e7   : > { %v2854_v4 = vsel %vm2851_vm8, %v2853_v16, %v2849_v57  ;;  %3983 = vrcp.f32 %v2614_v56  ;;  %vm2863_vm12 = vmor %vm2861_vm11, %vm2862_vm10  ;;  %v2882_v10 = vand.u32 2147483648, %v2614_v56  ;;  %v2880_v17 = vand.u32 2147483647, %v2614_v56 }
 0x2e8   : > { %v2916_v51 = vmul.f32 %v2854_v4, %v5534_v33  ;;  %v2858_v46 = vsub.f32 1.0, %v2857_v58  ;;  %vm2876_vm1 = vweird.f32 %v2614_v56  ;;  %v3093_v36 = vmul.f32 %v3038_v37, %v5309_v1 }
 0x2e9   : > { %v2954_v3 = vld [vmem:[%s4776_s23 + $0x70] sm:$0xff]  ;;  %v2883_v40 = vor.u32 1.1754944e-38, %v2882_v10  ;;  %vm2881_vm4 = vcmp.eq.f32.partialorder %v2880_v17, 8.507059e+37 }
 0x2ea   : > { %v2973_v47 = vmul.f32 %v2954_v3, %v5512_v50  ;;  %v2859_v6 = vmul.f32 %v3980_v14, %v2858_v46  ;;  %2936 = vst.msk [vmem:[%s4776_s23 + $0x78] sm:$0xff] %vm2920_vm9, %v2916_v51 }
 0x2eb   : > { %v3010_v27 = vld [vmem:[%s4776_s23 + $0x68] sm:$0xff] }
 0x2ec   : > { %v3982_v5 = vpop.eup %3981  ;;  %2992 = vst.msk [vmem:[%s4776_s23 + $0x70] sm:$0xff] %vm695_vm5, %v2973_v47  ;;  %v2860_v20 = vadd.f32 %v3980_v14, %v2859_v6  ;;  %3061 = vrot.lane.b32.xlu2 %v3010_v27, %s4053_s25 }
 0x2ed   : > { %v3984_v31 = vpop.eup %3983  ;;  %v2615_v32 = vadd.f32 1.0, %v3982_v5 }
 0x2ee   : > { %v2864_v28 = vsel %vm2863_vm12, %v3980_v14, %v2860_v20  ;;  %v2872_v26 = vmul.f32 %v3984_v31, %v2614_v56  ;;  %vm2877_vm15 = vweird.f32 %v3984_v31 }
 0x2ef   : > { %v2869_v13 = vsel %vm2866_vm13, %v2868_v12, %v2864_v28  ;;  %3985 = vrcp.f32 %v2615_v32  ;;  %vm2878_vm2 = vmor %vm2876_vm1, %vm2877_vm15  ;;  %v2897_v45 = vand.u32 2147483648, %v2615_v32  ;;  %v2895_v14 = vand.u32 2147483647, %v2615_v32 }
 0x2f0   : > { %v2917_v21 = vmul.f32 %v2869_v13, %v5553_v35  ;;  %v2873_v59 = vsub.f32 1.0, %v2872_v26  ;;  %vm2891_vm0 = vweird.f32 %v2615_v32 }
 0x2f1   : > { %v2955_v54 = vld [vmem:[%s4776_s23 + $0x78] sm:$0xff]  ;;  %v2898_v58 = vor.u32 1.1754944e-38, %v2897_v45  ;;  %vm2896_vm8 = vcmp.eq.f32.partialorder %v2895_v14, 8.507059e+37 }
 0x2f2   : > { %v2874_v34 = vmul.f32 %v3984_v31, %v2873_v59  ;;  %v2974_v2 = vmul.f32 %v2955_v54, %v5534_v33  ;;  %2937 = vst.msk [vmem:[%s4776_s23 + $0x80] sm:$0xff] %vm2920_vm9, %v2917_v21 }
 0x2f3   : > { %v3011_v62 = vld [vmem:[%s4776_s23 + $0x70] sm:$0xff] }
 0x2f4   : > { %v2875_v38 = vadd.f32 %v3984_v31, %v2874_v34  ;;  %2993 = vst.msk [vmem:[%s4776_s23 + $0x78] sm:$0xff] %vm695_vm5, %v2974_v2  ;;  %3063 = vrot.lane.b32.xlu0 %v3011_v62, %s4053_s25 }
 0x2f5   : > { %v3986_v25 = vpop.eup %3985 }
 0x2f6   : > { %v2879_v44 = vsel %vm2878_vm2, %v3984_v31, %v2875_v38  ;;  %v2887_v18 = vmul.f32 %v3986_v25, %v2615_v32  ;;  %v3036_v43 = vpop.permute.xlu1 %3035  ;;  %vm2892_vm6 = vweird.f32 %v3986_v25 }
 0x2f7   : > { %v2884_v61 = vsel %vm2881_vm4, %v2883_v40, %v2879_v44  ;;  %v3092_v48 = vmul.f32 %v3036_v43, %v5302_v24  ;;  %vm2893_vm7 = vmor %vm2891_vm0, %vm2892_vm6 }
 0x2f8   : > { %v2918_v55 = vmul.f32 %v2884_v61, %v5567_v0  ;;  %v2888_v41 = vsub.f32 1.0, %v2887_v18 }
 0x2f9   : > { %v2956_v23 = vld [vmem:[%s4776_s23 + $0x80] sm:$0xff]  ;;  %3130 = vrot.lane.b32.xlu2 %v3092_v48, %s4052_s17 }
 0x2fa   : > { %2938 = vst.msk [vmem:[%s4776_s23 + $0x88] sm:$0xff] %vm2920_vm9, %v2918_v55  ;;  %v2889_v7 = vmul.f32 %v3986_v25, %v2888_v41  ;;  %v2975_v16 = vmul.f32 %v2956_v23, %v5553_v35 }
 0x2fb   : > { %v3012_v56 = vld [vmem:[%s4776_s23 + $0x78] sm:$0xff] }
 0x2fc   : > { %v2890_v57 = vadd.f32 %v3986_v25, %v2889_v7  ;;  %2994 = vst.msk [vmem:[%s4776_s23 + $0x80] sm:$0xff] %vm695_vm5, %v2975_v16  ;;  %3132 = vrot.lane.b32.xlu0 %v3093_v36, %s4052_s17  ;;  %3065 = vrot.lane.b32.xlu1 %v3012_v56, %s4053_s25 }
 0x2fe   : > { %v2894_v4 = vsel %vm2893_vm7, %v3986_v25, %v2890_v57  ;;  %v3044_v12 = vpop.permute.xlu2 %3043 }
 0x2ff   : > { %v2899_v51 = vsel %vm2896_vm8, %v2898_v58, %v2894_v4  ;;  %v3096_v28 = vmul.f32 %v3044_v12, %v5330_v39 }
 0x300   : > { %v2919_v46 = vmul.f32 %v2899_v51, %v5582_v60 }
 0x301   : > { %v2957_v3 = vld [vmem:[%s4776_s23 + $0x88] sm:$0xff] }
 0x302   : > { %v2976_v9 = vmul.f32 %v2957_v3, %v5567_v0  ;;  %2939 = vst.msk [vmem:[%s4776_s23 + $0x90] sm:$0xff] %vm2920_vm9, %v2919_v46 }
 0x303   : > { %v3013_v47 = vld [vmem:[%s4776_s23 + $0x80] sm:$0xff] }
 0x304   : > { %2995 = vst.msk [vmem:[%s4776_s23 + $0x88] sm:$0xff] %vm695_vm5, %v2976_v9  ;;  %3067 = vrot.lane.b32.xlu2 %v3013_v47, %s4053_s25 }
 0x306   : > { %v3040_v6 = vpop.permute.xlu0 %3039 }
 0x307   : > { %v3094_v11 = vmul.f32 %v3040_v6, %v5316_v15 }
 0x309   : > { %v2958_v27 = vld [vmem:[%s4776_s23 + $0x90] sm:$0xff]  ;;  %3134 = vrot.lane.b32.xlu1 %v3094_v11, %s4052_s17 }
 0x30a   : > { %v2977_v5 = vmul.f32 %v2958_v27, %v5582_v60 }
 0x30b   : > { %v3014_v20 = vld [vmem:[%s4776_s23 + $0x88] sm:$0xff] }
 0x30c   : > { %2996 = vst.msk [vmem:[%s4776_s23 + $0x90] sm:$0xff] %vm695_vm5, %v2977_v5  ;;  %3069 = vrot.lane.b32.xlu0 %v3014_v20, %s4053_s25 }
 0x30e   : > { %v3042_v31 = vpop.permute.xlu1 %3041 }
 0x30f   : > { %v3095_v32 = vmul.f32 %v3042_v31, %v5322_v63 }
 0x311   : > { %3136 = vrot.lane.b32.xlu2 %v3095_v32, %s4052_s17 }
 0x313   : > { %v3015_v26 = vld [vmem:[%s4776_s23 + $0x90] sm:$0xff] }
 0x314   : > { %3138 = vrot.lane.b32.xlu0 %v3096_v28, %s4052_s17  ;;  %3071 = vrot.lane.b32.xlu1 %v3015_v26, %s4053_s25 }
 0x316   : > { %v3050_v13 = vpop.permute.xlu2 %3049 }
 0x317   : > { %v3099_v21 = vmul.f32 %v3050_v13, %v5363_v8 }
 0x31c   : > { %3144 = vrot.lane.b32.xlu0 %v3099_v21, %s4052_s17 }
 0x31e   : > { %v3046_v59 = vpop.permute.xlu0 %3045 }
 0x31f   : > { %v3097_v10 = vmul.f32 %v3046_v59, %v5339_v30 }
 0x321   : > { %3140 = vrot.lane.b32.xlu1 %v3097_v10, %s4052_s17 }
 0x326   : > { %v3048_v54 = vpop.permute.xlu1 %3047 }
 0x327   : > { %v3098_v34 = vmul.f32 %v3048_v54, %v5350_v52 }
 0x329   : > { %3142 = vrot.lane.b32.xlu2 %v3098_v34, %s4052_s17 }
 0x32e   : > { %v3056_v17 = vpop.permute.xlu2 %3055 }
 0x32f   : > { %v3102_v2 = vmul.f32 %v3056_v17, %v5424_v42 }
 0x331   : > { %3150 = vrot.lane.b32.xlu0 %v3102_v2, %s4052_s17 }
 0x336   : > { %v3052_v62 = vpop.permute.xlu0 %3051 }
 0x337   : > { %v3100_v38 = vmul.f32 %v3052_v62, %v5381_v19 }
 0x339   : > { %3146 = vrot.lane.b32.xlu1 %v3100_v38, %s4052_s17 }
 0x33e   : > { %v3054_v25 = vpop.permute.xlu1 %3053 }
 0x33f   : > { %v3101_v40 = vmul.f32 %v3054_v25, %v5402_v22 }
 0x341   : > { %3148 = vrot.lane.b32.xlu2 %v3101_v40, %s4052_s17 }
 0x346   : > { %v3062_v44 = vpop.permute.xlu2 %3061 }
 0x347   : > { %v3105_v18 = vmul.f32 %v3062_v44, %v5490_v29 }
 0x349   : > { %3156 = vrot.lane.b32.xlu0 %v3105_v18, %s4052_s17 }
 0x34e   : > { %v3058_v37 = vpop.permute.xlu0 %3057 }
 0x34f   : > { %v3103_v43 = vmul.f32 %v3058_v37, %v5446_v49 }
 0x351   : > { %3152 = vrot.lane.b32.xlu1 %v3103_v43, %s4052_s17 }
 0x353   : > { %v3131_v61 = vpop.permute.xlu2 %3130 }
 0x354   : > { %3187 = vst.msk [vmem:[%s4776_s23] sm:$0xff] %vm1091_vm3, %v3131_v61 }
 0x356   : > { %v3060_v48 = vpop.permute.xlu1 %3059 }
 0x357   : > { %v3104_v55 = vmul.f32 %v3060_v48, %v5468_v53 }
 0x359   : > { %3154 = vrot.lane.b32.xlu2 %v3104_v55, %s4052_s17 }
 0x35b   : > { %v3206_v41 = vld [vmem:[%s4776_s23] sm:$0xff] }
 0x35c   : > { %3244 = vrot.lane.b32.xlu0 %v3206_v41, %s4051_s27 }
 0x35e   : > { %v3068_v45 = vpop.permute.xlu2 %3067 }
 0x35f   : > { %v3108_v36 = vmul.f32 %v3068_v45, %v5553_v35 }
 0x364   : > { %3162 = vrot.lane.b32.xlu0 %v3108_v36, %s4052_s17 }
 0x366   : > { %v3064_v23 = vpop.permute.xlu0 %3063 }
 0x367   : > { %v3106_v7 = vmul.f32 %v3064_v23, %v5512_v50 }
 0x369   : > { %3158 = vrot.lane.b32.xlu1 %v3106_v7, %s4052_s17 }
 0x36b   : > { %v3137_v14 = vpop.permute.xlu2 %3136 }
 0x36c   : > { %3190 = vst.msk [vmem:[%s4776_s23 + $0x18] sm:$0xff] %vm1091_vm3, %v3137_v14 }
 0x36e   : > { %v3133_v16 = vpop.permute.xlu0 %3132  ;;  %v3066_v56 = vpop.permute.xlu1 %3065 }
 0x36f   : > { %3188 = vst.msk [vmem:[%s4776_s23 + $0x8] sm:$0xff] %vm1091_vm3, %v3133_v16  ;;  %v3107_v57 = vmul.f32 %v3066_v56, %v5534_v33 }
 0x371   : > { %3160 = vrot.lane.b32.xlu2 %v3107_v57, %s4052_s17 }
 0x373   : > { %v3209_v58 = vld [vmem:[%s4776_s23 + $0x18] sm:$0xff] }
 0x374   : > { %3250 = vrot.lane.b32.xlu0 %v3209_v58, %s4051_s27 }
 0x376   : > { %v3207_v4 = vld [vmem:[%s4776_s23 + $0x8] sm:$0xff] }
 0x377   : > { %3246 = vrot.lane.b32.xlu1 %v3207_v4, %s4051_s27 }
 0x37b   : > { %v3135_v51 = vpop.permute.xlu1 %3134 }
 0x37c   : > { %3189 = vst.msk [vmem:[%s4776_s23 + $0x10] sm:$0xff] %vm1091_vm3, %v3135_v51 }
 0x37e   : > { %v3070_v46 = vpop.permute.xlu0 %3069 }
 0x37f   : > { %v3109_v3 = vmul.f32 %v3070_v46, %v5567_v0 }
 0x381   : > { %3164 = vrot.lane.b32.xlu1 %v3109_v3, %s4052_s17 }
 0x383   : > { %v3143_v9 = vpop.permute.xlu2 %3142  ;;  %v3208_v47 = vld [vmem:[%s4776_s23 + $0x10] sm:$0xff] }
 0x384   : > { %3193 = vst.msk [vmem:[%s4776_s23 + $0x30] sm:$0xff] %vm1091_vm3, %v3143_v9  ;;  %3248 = vrot.lane.b32.xlu2 %v3208_v47, %s4051_s27 }
 0x386   : > { %v3139_v6 = vpop.permute.xlu0 %3138  ;;  %v3072_v11 = vpop.permute.xlu1 %3071 }
 0x387   : > { %3191 = vst.msk [vmem:[%s4776_s23 + $0x20] sm:$0xff] %vm1091_vm3, %v3139_v6  ;;  %v3110_v27 = vmul.f32 %v3072_v11, %v5582_v60 }
 0x38b   : > { %v3212_v5 = vld [vmem:[%s4776_s23 + $0x30] sm:$0xff] }
 0x38c   : > { %3256 = vrot.lane.b32.xlu0 %v3212_v5, %s4051_s27  ;;  %3166 = vrot.lane.b32.xlu2 %v3110_v27, %s4052_s17 }
 0x38e   : > { %v3145_v20 = vpop.permute.xlu0 %3144  ;;  %v3210_v31 = vld [vmem:[%s4776_s23 + $0x20] sm:$0xff] }
 0x38f   : > { %3194 = vst.msk [vmem:[%s4776_s23 + $0x38] sm:$0xff] %vm1091_vm3, %v3145_v20  ;;  %3252 = vrot.lane.b32.xlu1 %v3210_v31, %s4051_s27 }
 0x393   : > { %v3141_v12 = vpop.permute.xlu1 %3140 }
 0x394   : > { %3192 = vst.msk [vmem:[%s4776_s23 + $0x28] sm:$0xff] %vm1091_vm3, %v3141_v12 }
 0x396   : > { %v3213_v32 = vld [vmem:[%s4776_s23 + $0x38] sm:$0xff] }
 0x397   : > { %3258 = vrot.lane.b32.xlu1 %v3213_v32, %s4051_s27 }
 0x39b   : > { %v3149_v28 = vpop.permute.xlu2 %3148  ;;  %v3211_v26 = vld [vmem:[%s4776_s23 + $0x28] sm:$0xff] }
 0x39c   : > { %3196 = vst.msk [vmem:[%s4776_s23 + $0x48] sm:$0xff] %vm1091_vm3, %v3149_v28  ;;  %3254 = vrot.lane.b32.xlu2 %v3211_v26, %s4051_s27 }
 0x3a3   : > { %v3151_v13 = vpop.permute.xlu0 %3150  ;;  %v3215_v21 = vld [vmem:[%s4776_s23 + $0x48] sm:$0xff] }
 0x3a4   : > { %3197 = vst.msk [vmem:[%s4776_s23 + $0x50] sm:$0xff] %vm1091_vm3, %v3151_v13  ;;  %3262 = vrot.lane.b32.xlu0 %v3215_v21, %s4051_s27 }
 0x3ab   : > { %v3147_v59 = vpop.permute.xlu1 %3146  ;;  %v3216_v10 = vld [vmem:[%s4776_s23 + $0x50] sm:$0xff] }
 0x3ac   : > { %3195 = vst.msk [vmem:[%s4776_s23 + $0x40] sm:$0xff] %vm1091_vm3, %v3147_v59  ;;  %3264 = vrot.lane.b32.xlu1 %v3216_v10, %s4051_s27 }
 0x3b3   : > { %v3155_v54 = vpop.permute.xlu2 %3154  ;;  %v3214_v34 = vld [vmem:[%s4776_s23 + $0x40] sm:$0xff] }
 0x3b4   : > { %3199 = vst.msk [vmem:[%s4776_s23 + $0x60] sm:$0xff] %vm1091_vm3, %v3155_v54  ;;  %3260 = vrot.lane.b32.xlu2 %v3214_v34, %s4051_s27 }
 0x3bb   : > { %v3157_v17 = vpop.permute.xlu0 %3156  ;;  %v3218_v2 = vld [vmem:[%s4776_s23 + $0x60] sm:$0xff] }
 0x3bc   : > { %3200 = vst.msk [vmem:[%s4776_s23 + $0x68] sm:$0xff] %vm1091_vm3, %v3157_v17  ;;  %3268 = vrot.lane.b32.xlu0 %v3218_v2, %s4051_s27 }
 0x3c3   : > { %v3153_v62 = vpop.permute.xlu1 %3152  ;;  %v3219_v38 = vld [vmem:[%s4776_s23 + $0x68] sm:$0xff] }
 0x3c4   : > { %3198 = vst.msk [vmem:[%s4776_s23 + $0x58] sm:$0xff] %vm1091_vm3, %v3153_v62  ;;  %3270 = vrot.lane.b32.xlu1 %v3219_v38, %s4051_s27 }
 0x3cb   : > { %v3161_v25 = vpop.permute.xlu2 %3160  ;;  %v3217_v40 = vld [vmem:[%s4776_s23 + $0x58] sm:$0xff] }
 0x3cc   : > { %3202 = vst.msk [vmem:[%s4776_s23 + $0x78] sm:$0xff] %vm1091_vm3, %v3161_v25  ;;  %3266 = vrot.lane.b32.xlu2 %v3217_v40, %s4051_s27 }
 0x3ce   : > { %v3245_v44 = vpop.permute.xlu0 %3244 }
 0x3cf   : > { %v3301_v18 = vmul.f32 %v3245_v44, %v5302_v24 }
 0x3d1   : > { %3339 = vrot.lane.b32.xlu1 %v3301_v18, %s4051_s27 }
 0x3d3   : > { %v3221_v37 = vld [vmem:[%s4776_s23 + $0x78] sm:$0xff] }
 0x3d4   : > { %3274 = vrot.lane.b32.xlu0 %v3221_v37, %s4051_s27 }
 0x3d6   : > { %v3163_v43 = vpop.permute.xlu0 %3162 }
 0x3d7   : > { %3203 = vst.msk [vmem:[%s4776_s23 + $0x80] sm:$0xff] %vm1091_vm3, %v3163_v43 }
 0x3db   : > { %v3159_v61 = vpop.permute.xlu1 %3158 }
 0x3dc   : > { %3201 = vst.msk [vmem:[%s4776_s23 + $0x70] sm:$0xff] %vm1091_vm3, %v3159_v61 }
 0x3de   : > { %v3249_v48 = vpop.permute.xlu2 %3248  ;;  %v3222_v55 = vld [vmem:[%s4776_s23 + $0x80] sm:$0xff] }
 0x3df   : > { %3276 = vrot.lane.b32.xlu1 %v3222_v55, %s4051_s27  ;;  %v3303_v16 = vmul.f32 %v3249_v48, %v5316_v15 }
 0x3e3   : > { %v3220_v24 = vld [vmem:[%s4776_s23 + $0x70] sm:$0xff] }
 0x3e4   : > { %3272 = vrot.lane.b32.xlu2 %v3220_v24, %s4051_s27 }
 0x3e6   : > { %v3251_v41 = vpop.permute.xlu0 %3250  ;;  %v3167_v45 = vpop.permute.xlu2 %3166 }
 0x3e7   : > { %v3304_v36 = vmul.f32 %v3251_v41, %v5322_v63  ;;  %3205 = vst.msk [vmem:[%s4776_s23 + $0x90] sm:$0xff] %vm1091_vm3, %v3167_v45 }
 0x3e9   : > { %3345 = vrot.lane.b32.xlu1 %v3304_v36, %s4051_s27  ;;  %v3247_v23 = vpop.permute.xlu1 %3246 }
 0x3ea   : > { %v3302_v51 = vmul.f32 %v3247_v23, %v5309_v1 }
 0x3ee   : > { %v3224_v7 = vld [vmem:[%s4776_s23 + $0x90] sm:$0xff] }
 0x3ef   : > { %3280 = vrot.lane.b32.xlu0 %v3224_v7, %s4051_s27 }
 0x3f3   : > { %v3165_v14 = vpop.permute.xlu1 %3164 }
 0x3f4   : > { %3204 = vst.msk [vmem:[%s4776_s23 + $0x88] sm:$0xff] %vm1091_vm3, %v3165_v14 }
 0x3f6   : > { %v3255_v56 = vpop.permute.xlu2 %3254 }
 0x3f7   : > { %3343 = vrot.lane.b32.xlu0 %v3303_v16, %s4051_s27  ;;  %v3306_v63 = vmul.f32 %v3255_v56, %v5339_v30 }
 0x3fb   : > { %v3223_v57 = vld [vmem:[%s4776_s23 + $0x88] sm:$0xff] }
 0x3fc   : > { %3278 = vrot.lane.b32.xlu2 %v3223_v57, %s4051_s27 }
 0x3fe   : > { %v3257_v58 = vpop.permute.xlu0 %3256 }
 0x3ff   : > { %v3307_v4 = vmul.f32 %v3257_v58, %v5350_v52  ;;  %3349 = vrot.lane.b32.xlu0 %v3306_v63, %s4051_s27 }
 0x401   : > { %3351 = vrot.lane.b32.xlu1 %v3307_v4, %s4051_s27  ;;  %v3253_v15 = vpop.permute.xlu1 %3252 }
 0x402   : > { %v3305_v46 = vmul.f32 %v3253_v15, %v5330_v39 }
 0x404   : > { %3341 = vrot.lane.b32.xlu2 %v3302_v51, %s4051_s27 }
 0x409   : > { %v3259_v9 = vpop.permute.xlu1 %3258 }
 0x40a   : > { %v3308_v52 = vmul.f32 %v3259_v9, %v5363_v8 }
 0x40c   : > { %3347 = vrot.lane.b32.xlu2 %v3305_v46, %s4051_s27 }
 0x40e   : > { %v3261_v3 = vpop.permute.xlu2 %3260 }
 0x40f   : > { %v3309_v30 = vmul.f32 %v3261_v3, %v5381_v19 }
 0x411   : > { %3355 = vrot.lane.b32.xlu0 %v3309_v30, %s4051_s27 }
 0x414   : > { %3353 = vrot.lane.b32.xlu2 %v3308_v52, %s4051_s27 }
 0x416   : > { %v3263_v47 = vpop.permute.xlu0 %3262 }
 0x417   : > { %v3310_v1 = vmul.f32 %v3263_v47, %v5402_v22 }
 0x419   : > { %3357 = vrot.lane.b32.xlu1 %v3310_v1, %s4051_s27 }
 0x41e   : > { %v3265_v6 = vpop.permute.xlu1 %3264 }
 0x41f   : > { %v3311_v39 = vmul.f32 %v3265_v6, %v5424_v42 }
 0x421   : > { %3359 = vrot.lane.b32.xlu2 %v3311_v39, %s4051_s27 }
 0x426   : > { %v3267_v11 = vpop.permute.xlu2 %3266 }
 0x427   : > { %v3312_v19 = vmul.f32 %v3267_v11, %v5446_v49 }
 0x429   : > { %3361 = vrot.lane.b32.xlu0 %v3312_v19, %s4051_s27 }
 0x42e   : > { %v3269_v27 = vpop.permute.xlu0 %3268 }
 0x42f   : > { %v3313_v8 = vmul.f32 %v3269_v27, %v5468_v53 }
 0x431   : > { %3363 = vrot.lane.b32.xlu1 %v3313_v8, %s4051_s27 }
 0x436   : > { %v3271_v5 = vpop.permute.xlu1 %3270 }
 0x437   : > { %v3314_v22 = vmul.f32 %v3271_v5, %v5490_v29 }
 0x439   : > { %3365 = vrot.lane.b32.xlu2 %v3314_v22, %s4051_s27 }
 0x43e   : > { %v3273_v20 = vpop.permute.xlu2 %3272 }
 0x43f   : > { %v3315_v42 = vmul.f32 %v3273_v20, %v5512_v50 }
 0x441   : > { %3367 = vrot.lane.b32.xlu0 %v3315_v42, %s4051_s27 }
 0x443   : > { %v3340_v49 = vpop.permute.xlu1 %3339 }
 0x444   : > { %3396 = vst.msk [vmem:[%s4776_s23] sm:$0xff] %vm1449_vm14, %v3340_v49 }
 0x446   : > { %v3275_v31 = vpop.permute.xlu0 %3274 }
 0x447   : > { %v3316_v53 = vmul.f32 %v3275_v31, %v5534_v33 }
 0x449   : > { %3369 = vrot.lane.b32.xlu1 %v3316_v53, %s4051_s27 }
 0x451   : > { %v3277_v12 = vpop.permute.xlu1 %3276 }
 0x452   : > { %v3317_v29 = vmul.f32 %v3277_v12, %v5553_v35 }
 0x454   : > { %3371 = vrot.lane.b32.xlu2 %v3317_v29, %s4051_s27 }
 0x456   : > { %v3279_v50 = vpop.permute.xlu2 %3278 }
 0x457   : > { %v3318_v32 = vmul.f32 %v3279_v50, %v5567_v0 }
 0x459   : > { %3373 = vrot.lane.b32.xlu0 %v3318_v32, %s4051_s27 }
 0x45b   : > { %v3346_v28 = vpop.permute.xlu1 %3345 }
 0x45c   : > { %3399 = vst.msk [vmem:[%s4776_s23 + $0x18] sm:$0xff] %vm1449_vm14, %v3346_v28 }
 0x45e   : > { %v3342_v33 = vpop.permute.xlu2 %3341 }
 0x45f   : > { %3397 = vst.msk [vmem:[%s4776_s23 + $0x8] sm:$0xff] %vm1449_vm14, %v3342_v33 }
 0x461   : > { %v3281_v26 = vpop.permute.xlu0 %3280 }
 0x462   : > { %v3319_v35 = vmul.f32 %v3281_v26, %v5582_v60 }
 0x464   : > { %3375 = vrot.lane.b32.xlu1 %v3319_v35, %s4051_s27  ;;  %s3725_s27 = smul.u32 152, %s4127_s13 }
 0x466   : > { %v3348_v13 = vpop.permute.xlu2 %3347  ;;  %s3427_s16 = scalar_lea.hbm %s5866_s9, %s3725_s27  ;;  %s4007_s27 = scalar_lea.hbm %s5866_s9, 304 }
 0x467   : > { %3400 = vst.msk [vmem:[%s4776_s23 + $0x20] sm:$0xff] %vm1449_vm14, %v3348_v13  ;;  %s3430_s26 = sshll.u32 %s3427_s16, 4  ;;  %s3431_s26 = int_to_ptr.hbm [resolvable:$true] %s3430_s26 }
 0x468   : > { %s4001_s29 = sshra.s32 %s3431_s26, 4  ;;  %s4002_s29 = int_to_ptr.hbm [resolvable:$true] %s4001_s29 }
 0x469   : > { %v3344_v0 = vpop.permute.xlu0 %3343  ;;  %s4003_s21 = scalar_lea.hbm %s4002_s29, 152  ;;  %p4008_p0 = scmp.lt.s32.totalorder %s4002_s29, %s5866_s9 }
 0x46a   : > { %3398 = vst.msk [vmem:[%s4776_s23 + $0x10] sm:$0xff] %vm1449_vm14, %v3344_v0  ;;  %p4004_p11 = scmp.ne.s32.totalorder %s4002_s29, %s4003_s21  ;;  %p4009_p1 = scmp.lt.s32.totalorder %s4007_s27, %s4003_s21 }
 0x46c   : > { %p4005_p12 = pnand %p4004_p11, %p4144_p5  ;;  %p4010_p2 = por %p4009_p1, %p4008_p0 }
 0x46e   : > { %v3354_v21 = vpop.permute.xlu2 %3353  ;;  %p4006_p13 = pneg %p4005_p12 }
 0x46f   : > { %3403 = vst.msk [vmem:[%s4776_s23 + $0x38] sm:$0xff] %vm1449_vm14, %v3354_v21 }
 0x470   : > { %p4011_p3 = pnand %p4010_p2, %p4006_p13 }
 0x471   : > { %v3350_v59 = vpop.permute.xlu0 %3349 }
 0x472   : > { %3401 = vst.msk [vmem:[%s4776_s23 + $0x28] sm:$0xff] %vm1449_vm14, %v3350_v59 }
 0x473   : > { %v3352_v60 = vpop.permute.xlu1 %3351 }
 0x474   : > { %3402 = vst.msk [vmem:[%s4776_s23 + $0x30] sm:$0xff] %vm1449_vm14, %v3352_v60 }
 0x47b   : > { %v3360_v10 = vpop.permute.xlu2 %3359 }
 0x47c   : > { %3406 = vst.msk [vmem:[%s4776_s23 + $0x50] sm:$0xff] %vm1449_vm14, %v3360_v10 }
 0x483   : > { %v3356_v54 = vpop.permute.xlu0 %3355 }
 0x484   : > { %3404 = vst.msk [vmem:[%s4776_s23 + $0x40] sm:$0xff] %vm1449_vm14, %v3356_v54 }
 0x48b   : > { %v3358_v34 = vpop.permute.xlu1 %3357 }
 0x48c   : > { %3405 = vst.msk [vmem:[%s4776_s23 + $0x48] sm:$0xff] %vm1449_vm14, %v3358_v34 }
 0x493   : > { %v3366_v17 = vpop.permute.xlu2 %3365 }
 0x494   : > { %3409 = vst.msk [vmem:[%s4776_s23 + $0x68] sm:$0xff] %vm1449_vm14, %v3366_v17 }
 0x49b   : > { %v3362_v2 = vpop.permute.xlu0 %3361 }
 0x49c   : > { %3407 = vst.msk [vmem:[%s4776_s23 + $0x58] sm:$0xff] %vm1449_vm14, %v3362_v2 }
 0x4a3   : > { %v3364_v62 = vpop.permute.xlu1 %3363 }
 0x4a4   : > { %3408 = vst.msk [vmem:[%s4776_s23 + $0x60] sm:$0xff] %vm1449_vm14, %v3364_v62 }
 0x4ae   : > { %v3372_v38 = vpop.permute.xlu2 %3371 }
 0x4af   : > { %3412 = vst.msk [vmem:[%s4776_s23 + $0x80] sm:$0xff] %vm1449_vm14, %v3372_v38 }
 0x4b3   : > { %v3368_v25 = vpop.permute.xlu0 %3367 }
 0x4b4   : > { %3410 = vst.msk [vmem:[%s4776_s23 + $0x70] sm:$0xff] %vm1449_vm14, %v3368_v25 }
 0x4bb   : > { %v3370_v40 = vpop.permute.xlu1 %3369 }
 0x4bc   : > { %3411 = vst.msk [vmem:[%s4776_s23 + $0x78] sm:$0xff] %vm1449_vm14, %v3370_v40 }
 0x4cb   : > { %v3374_v44 = vpop.permute.xlu0 %3373 }
 0x4cc   : > { %3413 = vst.msk [vmem:[%s4776_s23 + $0x88] sm:$0xff] %vm1449_vm14, %v3374_v44 }
 0x4d6   : > { %v3376_v18 = vpop.permute.xlu1 %3375 }
 0x4d7   : > { %3414 = vst.msk [vmem:[%s4776_s23 + $0x90] sm:$0xff] %vm1449_vm14, %v3376_v18 }
 0x4d8   : > { %4014 = shalt.err (!%p4011_p3)
}
 0x4d9   : > { %s4054_s24 = smov 128   ;;  %s4055_s23 = smov 8  }
 0x4da   : > { %3751 = dma.vmem_to_hbm [thread:$0]  (%p4144_p5), %s3429_s22, 2432, %s3431_s26, %s3416_s28, %s4054_s24, %s4054_s24, %s4055_s23  }
 0x4db PF: > { %p3757_p4 = scmp.ge.s32.totalorder %s4049_s12, 2  ;;  %s3445_s16 = sand.u32 1, %s4037_s30  }
 0x4dc   : > { %s3446_s13 = scalar_lea.sflag [#allocation3], %s3445_s16 }
 0x4dd   : > { %p3754_p7 = pnand %p3757_p4, %p4148_p6 }
 0x4df   : > { %p3755_p8 = pneg %p3754_p7 }
 0x4e1   : > { %4032 = dma.done.wait (%p3755_p8), %s3446_s13, 2432  }
 0x4e2   : > { %4034 = vsyncadd (%p3755_p8), %s3446_s13, 4294964864  ;;  %p19_p9 = scmp.ge.s32.totalorder %s4131_s15, 4   ;;  %s5869_s30 = smov %s4041_s10 }
 0x4e3   : > { %s5870_s10 = smov %s4045_s11  ;;  %s5871_s11 = smov %s4142_s18 }
 0x4e4   : > { %s5872_s12 = smov %s4131_s15  ;;  %21 = sbr.rel (!%p19_p9) target bundleno = 3 (0x3), region = 94 }
 0x4e9   :  { %3452 = vsyncpa [#allocation3], 1 }
 0x4ea   :  { %3454 = vsyncpa [#allocation3 + $0x1], 1 }

// kernel: tpu_custom_call.1
= control target key start
LH: loop header
LB: loop body
LE: loop exit
PB: predicated region body
PF: predicated region fallthrough
CT: control target
= control target key end

     0   :  { %14 = vsyncpa [#allocation3], 0  ;;  %s5857_s0 = inlined_call_operand.vmem [shape: f32[300,64], index: 0, kind: input, shape index: {}]   ;;  %s5858_s1 = inlined_call_operand.vmem [shape: f32[300,192], index: 1, kind: input, shape index: {}]   ;;  %s5859_s2 = inlined_call_operand.vmem [shape: f32[64,64], index: 2, kind: input, shape index: {}]   ;;  %s5860_s3 = inlined_call_operand.vmem [shape: f32[64,32], index: 3, kind: input, shape index: {}]   ;;  %s5861_s4 = inlined_call_operand.vmem [shape: f32[64,64], index: 4, kind: input, shape index: {}]   ;;  %s5862_s5 = inlined_call_operand.vmem [shape: f32[64,64], index: 5, kind: input, shape index: {}]   ;;  %s5863_s6 = inlined_call_operand.vmem [shape: f32[1,64], index: 6, kind: input, shape index: {}]   ;;  %s5864_s7 = inlined_call_operand.vmem [shape: f32[64,64], index: 7, kind: input, shape index: {}]   ;;  %s5865_s8 = inlined_call_operand.vmem [shape: f32[1,64], index: 8, kind: input, shape index: {}]   ;;  %s5866_s9 = inlined_call_operand.hbm [shape: f32[300,128], index: 9, kind: output, shape index: {}]  }
   0x1   :  { %16 = vsyncpa [#allocation3 + $0x1], 0  ;;  %s4106_s30 = smov 0   ;;  %s4108_s10 = smov 0  }
   0x2   :  { %s4110_s11 = smov 0   ;;  %s4112_s12 = smov 0  }
   0x3 LB: > { %s4127_s13 = sadd.s32 4294967295, %s4049_s12   ;;  %s3505_s14 = sadd.s32 4294967294, %s4049_s12   ;;  %s4049_s12 = sphi %s4112_s12, %s5872_s12   ;;  %s4045_s11 = sphi %s4110_s11, %s5871_s11   ;;  %s4041_s10 = sphi %s4108_s10, %s5870_s10   ;;  %s4037_s30 = sphi %s4106_s30, %s5869_s30  }
   0x4   : > { %s4131_s15 = sadd.s32 1, %s4049_s12   ;;  %s228_s16 = sadd.s32 1, %s4045_s11 }
   0x5   : > { %s225_s17 = ssub.s32 %s4049_s12, %s4131_s15  ;;  %p238_p0 = scmp.ne.s32.totalorder %s4045_s11, %s4041_s10 }
   0x6   : > { %p226_p1 = scmp.eq.s32.totalorder %s225_s17, 0  ;;  %p239_p2 = scmp.eq.s32.totalorder %s4127_s13, 1 }
   0x7   : > { %p244_p3 = scmp.ne.s32.totalorder %s4041_s10, %s4037_s30  ;;  %p245_p4 = scmp.eq.s32.totalorder %s3505_s14, 1 }
   0x8   : > { %s4142_s18 = scalar_select %p226_p1, %s4045_s11, %s228_s16  }
   0x9   : > { %p4144_p5 = por %p239_p2, %p238_p0  ;;  %p4148_p6 = por %p245_p4, %p244_p3 }
   0xa   : > { %p3508_p7 = scmp.ge.s32.totalorder %s4049_s12, 1  ;;  %p303_p8 = scmp.lt.s32.totalorder %s4049_s12, 3 }
   0xc   : > { %p304_p9 = pnand %p3508_p7, %p303_p8 }
   0xd   : > { %s345_s25 = smul.u32 (!%p304_p9), 19, %s4127_s13  ;;  %s4051_s27 = smov (!%p304_p9), 64  }
   0xe   : > { %307 = sbr.rel (%p304_p9) target bundleno = 1243 (0x4db), region = 56  ;;  %s342_s24 = sand.u32 (!%p304_p9), 1, %s4041_s10  }
   0xf   : > { %p346_p10 = scmp.lt.s32.totalorder (!%p304_p9), %s345_s25, 37  ;;  %s3750_s26 = smul.u32 (!%p304_p9), 152, %s342_s24 }
  0x10   : > { %s3416_s28 = scalar_lea.sflag (!%p304_p9), [#allocation3], %s342_s24 }
  0x13   : > { %v4157_v0 = vld [vmem:[%s5859_s2 + $0x38] sm:$0xff]  ;;  %v4162_v1 = vld [vmem:[%s5859_s2 + $0x30] sm:$0xff]  ;;  %v4170_v2 = vld [vmem:[%s5859_s2 + $0x28] sm:$0xff]  ;;  %s5874_s25 = smov (!%p346_p10, %s345_s25), 37  ;;  %vm394_vm0 = vcmask 523264   ;;  %vm695_vm5 = vcmask 523520  }
  0x14   : > { %3726 = vmatpush.msra.mxu1 %v4157_v0  ;;  %3727 = vmatpush.msra.mxu2 %v4157_v0  ;;  %v4179_v3 = vld [vmem:[%s5859_s2 + $0x20] sm:$0xff]  ;;  %v4190_v4 = vld [vmem:[%s5859_s2 + $0x18] sm:$0xff]  ;;  %s3724_s17 = sshll.u32 %s5874_s25, 4  ;;  %v4208_v6 = vld [vmem:[%s5859_s2 + $0x10] sm:$0xff] }
  0x15   : > { %460 = vmatpush.msra.mxu0 %v4157_v0  ;;  %3728 = vmatpush.msra.mxu3 %v4157_v0  ;;  %s4199_s23 = scalar_lea.vmem %s5858_s1, %s3724_s17  ;;  %v4221_v8 = vld [vmem:[%s5859_s2 + $0x8] sm:$0xff]  ;;  %v4231_v9 = vld [vmem:[%s5859_s2] sm:$0xff]  ;;  %v374_v12 = vld [vmem:[%s5860_s3 + $0x38] sm:$0xff]  ;;  %s4052_s17 = smov 32  }
  0x16   : > { %3729 = vmatpush.msra.mxu1 %v4162_v1  ;;  %3730 = vmatpush.msra.mxu2 %v4162_v1  ;;  %v4203_v5 = vld [vmem:[%s4199_s23] sm:$0xff]  ;;  %v4237_v10 = vld [vmem:[%s4199_s23 + $0x50] sm:$0xff]  ;;  %v372_v15 = vld [vmem:[%s5860_s3 + $0x28] sm:$0xff] }
  0x17   : > { %461 = vmatpush.msra.mxu0 %v4162_v1  ;;  %3731 = vmatpush.msra.mxu3 %v4162_v1  ;;  %v4216_v7 = vld [vmem:[%s4199_s23 + $0x20] sm:$0xff]  ;;  %v4241_v11 = vld [vmem:[%s4199_s23 + $0x10] sm:$0xff]  ;;  %v370_v18 = vld [vmem:[%s5860_s3 + $0x18] sm:$0xff] }
  0x18   : > { %3732 = vmatpush.msra.mxu1 %v4170_v2  ;;  %3733 = vmatpush.msra.mxu2 %v4170_v2  ;;  %v4250_v13 = vld [vmem:[%s4199_s23 + $0x30] sm:$0xff]  ;;  %v371_v16 = vld [vmem:[%s5860_s3 + $0x20] sm:$0xff]  ;;  %v368_v21 = vld [vmem:[%s5860_s3 + $0x8] sm:$0xff] }
  0x19   : > { %462 = vmatpush.msra.mxu0 %v4170_v2  ;;  %3734 = vmatpush.msra.mxu3 %v4170_v2  ;;  %v373_v14 = vld [vmem:[%s5860_s3 + $0x30] sm:$0xff]  ;;  %v4274_v17 = vld [vmem:[%s4199_s23 + $0x60] sm:$0xff]  ;;  %v1731_v35 = vld [vmem:[%s5862_s5 + $0x38] sm:$0xff] }
  0x1a   : > { %3735 = vmatpush.msra.mxu1 %v4179_v3  ;;  %3736 = vmatpush.msra.mxu2 %v4179_v3  ;;  %v369_v19 = vld [vmem:[%s5860_s3 + $0x10] sm:$0xff]  ;;  %v367_v22 = vld [vmem:[%s5860_s3] sm:$0xff]  ;;  %v1723_v36 = vld [vmem:[%s5861_s4 + $0x38] sm:$0xff] }
  0x1b   : > { %463 = vmatpush.msra.mxu0 %v4179_v3  ;;  %3737 = vmatpush.msra.mxu3 %v4179_v3  ;;  %v4291_v20 = vld [vmem:[%s4199_s23 + $0x70] sm:$0xff]  ;;  %v719_v24 = vld [vmem:[%s4199_s23 + $0x40] sm:$0xff]  ;;  %v4422_v37 = vld [vmem:[%s4199_s23 + $0x8] sm:$0xff] }
  0x1c   : > { %3738 = vmatpush.msra.mxu1 %v4190_v4  ;;  %753 = vrot.lane.b32.xlu0 %v4203_v5, %s4051_s27  ;;  %v4312_v23 = vld [vmem:[%s4199_s23 + $0x90] sm:$0xff]  ;;  %v4323_v25 = vld [vmem:[%s4199_s23 + $0x80] sm:$0xff]  ;;  %v4429_v38 = vld [vmem:[%s4199_s23 + $0x18] sm:$0xff] }
  0x1d   : > { %757 = vrot.lane.b32.xlu1 %v4216_v7, %s4051_s27  ;;  %3739 = vmatpush.msra.mxu2 %v4190_v4  ;;  %v4339_v26 = vld [vmem:[%s4199_s23 + $0xa0] sm:$0xff]  ;;  %v4351_v27 = vld [vmem:[%s4199_s23 + $0xb0] sm:$0xff]  ;;  %v4436_v39 = vld [vmem:[%s4199_s23 + $0x28] sm:$0xff] }
  0x1e   : > { %3741 = vmatpush.msra.mxu1 %v4208_v6  ;;  %464 = vmatpush.msra.mxu0 %v4190_v4  ;;  %v4354_v28 = vld [vmem:[%s4199_s23 + $0xf0] sm:$0xff]  ;;  %v4365_v29 = vld [vmem:[%s4199_s23 + $0xc0] sm:$0xff]  ;;  %v4449_v43 = vld [vmem:[%s4199_s23 + $0x38] sm:$0xff] }
  0x1f   : > { %3742 = vmatpush.msra.mxu2 %v4208_v6  ;;  %3740 = vmatpush.msra.mxu3 %v4190_v4  ;;  %v4368_v30 = vld [vmem:[%s4199_s23 + $0x100] sm:$0xff]  ;;  %v4379_v31 = vld [vmem:[%s4199_s23 + $0xd0] sm:$0xff]  ;;  %v4458_v45 = vld [vmem:[%s4199_s23 + $0x48] sm:$0xff] }
  0x20   : > { %3744 = vmatpush.msra.mxu1 %v4221_v8  ;;  %465 = vmatpush.msra.mxu0 %v4208_v6  ;;  %v4382_v32 = vld [vmem:[%s4199_s23 + $0x110] sm:$0xff]  ;;  %v4395_v33 = vld [vmem:[%s4199_s23 + $0xe0] sm:$0xff]  ;;  %v1729_v47 = vld [vmem:[%s5862_s5 + $0x28] sm:$0xff] }
  0x21   : > { %3745 = vmatpush.msra.mxu2 %v4221_v8  ;;  %3743 = vmatpush.msra.mxu3 %v4208_v6  ;;  %v4398_v34 = vld [vmem:[%s4199_s23 + $0x120] sm:$0xff]  ;;  %v1730_v40 = vld [vmem:[%s5862_s5 + $0x30] sm:$0xff]  ;;  %v1721_v48 = vld [vmem:[%s5861_s4 + $0x28] sm:$0xff] }
  0x22   : > { %3747 = vmatpush.msra.mxu1 %v4231_v9  ;;  %466 = vmatpush.msra.mxu0 %v4221_v8  ;;  %v1722_v41 = vld [vmem:[%s5861_s4 + $0x30] sm:$0xff]  ;;  %v4473_v49 = vld [vmem:[%s4199_s23 + $0x58] sm:$0xff]  ;;  %v4484_v52 = vld [vmem:[%s4199_s23 + $0x68] sm:$0xff] }
  0x23   : > { %3517 = vmatmul.msk.f32.vlgmr.msra.gmra.mxu1 %vm394_vm0, %v4237_v10  ;;  %3748 = vmatpush.msra.mxu2 %v4231_v9  ;;  %v4495_v55 = vld [vmem:[%s4199_s23 + $0x78] sm:$0xff]  ;;  %v1728_v56 = vld [vmem:[%s5862_s5 + $0x20] sm:$0xff]  ;;  %v4512_v60 = vld [vmem:[%s4199_s23 + $0x88] sm:$0xff] }
  0x24   : > { %755 = vrot.lane.b32.xlu0 %v4241_v11, %s4051_s27  ;;  %553 = vmatpush.msrb.mxu1 %v374_v12  ;;  %v1720_v57 = vld [vmem:[%s5861_s4 + $0x20] sm:$0xff]  ;;  %v4523_v63 = vld [vmem:[%s4199_s23 + $0x98] sm:$0xff] }
  0x25   : > { %759 = vrot.lane.b32.xlu1 %v4250_v13, %s4051_s27  ;;  %837 = vmatpush.msrb.mxu2 %v4157_v0 }
  0x26   : > { %554 = vmatpush.msrb.mxu1 %v373_v14  ;;  %3746 = vmatpush.msra.mxu3 %v4221_v8 }
  0x27   : > { %838 = vmatpush.msrb.mxu2 %v4162_v1  ;;  %467 = vmatpush.msra.mxu0 %v4231_v9 }
  0x28   : > { %555 = vmatpush.msrb.mxu1 %v372_v15  ;;  %3749 = vmatpush.msra.mxu3 %v4231_v9 }
  0x29   : > { %3512 = vmatmul.msk.f32.vlgmr.msra.gmra.mxu0 %vm394_vm0, %v4203_v5  ;;  %839 = vmatpush.msrb.mxu2 %v4170_v2 }
  0x2a   : > { %556 = vmatpush.msrb.mxu1 %v371_v16  ;;  %1195 = vmatpush.msrb.mxu0 %v4157_v0 }
  0x2b   : > { %3518 = vmatmul.msk.f32.gmra.mxu1 %vm394_vm0, %v4274_v17  ;;  %840 = vmatpush.msrb.mxu2 %v4179_v3 }
  0x2c   : > { %557 = vmatpush.msrb.mxu1 %v370_v18  ;;  %765 = vrot.lane.b32.xlu0 %v4274_v17, %s4051_s27 }
  0x2d   : > { %767 = vrot.lane.b32.xlu1 %v4291_v20, %s4051_s27  ;;  %1196 = vmatpush.msrb.mxu0 %v4162_v1  ;;  %v1727_v1 = vld [vmem:[%s5862_s5 + $0x18] sm:$0xff] }
  0x2e   : > { %558 = vmatpush.msrb.mxu1 %v369_v19  ;;  %949 = vmatpush.msrb.mxu3 %v374_v12 }
  0x2f   : > { %1197 = vmatpush.msrb.mxu0 %v4170_v2  ;;  %841 = vmatpush.msrb.mxu2 %v4190_v4  ;;  %v1719_v2 = vld [vmem:[%s5861_s4 + $0x18] sm:$0xff] }
  0x30   : > { %559 = vmatpush.msrb.mxu1 %v368_v21  ;;  %950 = vmatpush.msrb.mxu3 %v373_v14 }
  0x31   : > { %3513 = vmatmul.msk.f32.gmra.mxu0 %vm394_vm0, %v4241_v11  ;;  %842 = vmatpush.msrb.mxu2 %v4208_v6 }
  0x32   : > { %560 = vmatpush.msrb.mxu1 %v367_v22  ;;  %951 = vmatpush.msrb.mxu3 %v372_v15 }
  0x33   : > { %3519 = vmatmul.msk.f32.gmra.mxu1 %vm394_vm0, %v4291_v20  ;;  %1198 = vmatpush.msrb.mxu0 %v4179_v3 }
  0x34   : > { %761 = vrot.lane.b32.xlu2 %v719_v24, %s4051_s27  ;;  %771 = vrot.lane.b32.xlu0 %v4312_v23, %s4051_s27 }
  0x35   : > { %952 = vmatpush.msrb.mxu3 %v371_v16  ;;  %1199 = vmatpush.msrb.mxu0 %v4190_v4  ;;  %v4540_v4 = vld [vmem:[%s4199_s23 + $0xa8] sm:$0xff] }
  0x36   : > { %843 = vmatpush.msrb.mxu2 %v4221_v8  ;;  %1307 = vmatpush.msra.mxu1 %v374_v12  ;;  %v1718_v12 = vld [vmem:[%s5861_s4 + $0x10] sm:$0xff] }
  0x37   : > { %953 = vmatpush.msrb.mxu3 %v370_v18  ;;  %1200 = vmatpush.msrb.mxu0 %v4208_v6 }
  0x38   : > { %844 = vmatpush.msrb.mxu2 %v4231_v9  ;;  %1308 = vmatpush.msra.mxu1 %v373_v14  ;;  %v4570_v14 = vld [vmem:[%s4199_s23 + $0xc8] sm:$0xff] }
  0x39   : > { %3514 = vmatmul.msk.f32.gmra.mxu0 %vm394_vm0, %v4216_v7  ;;  %954 = vmatpush.msrb.mxu3 %v369_v19 }
  0x3a   : > { %1201 = vmatpush.msrb.mxu0 %v4221_v8  ;;  %1309 = vmatpush.msra.mxu1 %v372_v15  ;;  %v4552_v8 = vld [vmem:[%s4199_s23 + $0xb8] sm:$0xff] }
  0x3b   : > { %3520 = vmatmul.msk.f32.gmra.mxu1 %vm394_vm0, %v4323_v25  ;;  %955 = vmatpush.msrb.mxu3 %v368_v21 }
  0x3c   : > { %763 = vrot.lane.b32.xlu2 %v4237_v10, %s4051_s27  ;;  %1202 = vmatpush.msrb.mxu0 %v4231_v9 }
  0x3d   : > { %956 = vmatpush.msrb.mxu3 %v367_v22  ;;  %1310 = vmatpush.msra.mxu1 %v371_v16 }
  0x3e   : > { %3522 = vmatmul.msk.f32.vlgmr.msra.gmra.mxu2 %vm394_vm0, %v4339_v26  ;;  %773 = vrot.lane.b32.xlu1 %v4339_v26, %s4051_s27 }
  0x3f   : > { %1311 = vmatpush.msra.mxu1 %v370_v18  ;;  %3527 = vmatmul.msk.f32.vlgmr.msra.gmra.mxu3 %vm394_vm0, %v4354_v28  ;;  %v4582_v18 = vld [vmem:[%s4199_s23 + $0xd8] sm:$0xff] }
  0x40   : > { %777 = vrot.lane.b32.xlu0 %v4365_v29, %s4051_s27  ;;  %1797 = vmatpush.msra.mxu2 %v1731_v35 }
  0x41   : > { %3515 = vmatmul.msk.f32.gmra.mxu0 %vm394_vm0, %v4250_v13  ;;  %1312 = vmatpush.msra.mxu1 %v369_v19 }
  0x42   : > { %1928 = vmatpush.msra.mxu3 %v1723_v36  ;;  %1798 = vmatpush.msra.mxu2 %v1730_v40 }
  0x43   : > { %3521 = vmatmul.msk.f32.gmra.mxu1 %vm394_vm0, %v4312_v23 }
  0x44   : > { %769 = vrot.lane.b32.xlu2 %v4323_v25, %s4051_s27  ;;  %1313 = vmatpush.msra.mxu1 %v368_v21 }
  0x45   : > { %1929 = vmatpush.msra.mxu3 %v1722_v41  ;;  %1799 = vmatpush.msra.mxu2 %v1729_v47  ;;  %v1724_v41 = vld [vmem:[%s5862_s5] sm:$0xff]  ;;  %v4652_v47 = vld [vmem:[%s4199_s23 + $0x118] sm:$0xff] }
  0x46   : > { %1314 = vmatpush.msra.mxu1 %v367_v22  ;;  %3523 = vmatmul.msk.f32.gmra.mxu2 %vm394_vm0, %v4351_v27 }
  0x47   : > { %3528 = vmatmul.msk.f32.gmra.mxu3 %vm394_vm0, %v4368_v30  ;;  %779 = vrot.lane.b32.xlu1 %v4379_v31, %s4051_s27 }
  0x48   : > { %783 = vrot.lane.b32.xlu0 %v4354_v28, %s4051_s27  ;;  %1930 = vmatpush.msra.mxu3 %v1721_v48 }
  0x49   : > { %3516 = vmatmul.msk.f32.gmra.mxu0 %vm394_vm0, %v719_v24  ;;  %1800 = vmatpush.msra.mxu2 %v1728_v56 }
  0x4a   : > { %1931 = vmatpush.msra.mxu3 %v1720_v57 }
  0x4b   : > { %3531 = vmatmul.msk.f32.vlgmr.msrb.gmra.mxu1 %vm394_vm0, %v4203_v5  ;;  %1801 = vmatpush.msra.mxu2 %v1727_v1 }
  0x4c   : > { %775 = vrot.lane.b32.xlu2 %v4351_v27, %s4051_s27  ;;  %1932 = vmatpush.msra.mxu3 %v1719_v2 }
  0x4e   : > { %3524 = vmatmul.msk.f32.gmra.mxu2 %vm394_vm0, %v4365_v29  ;;  %1933 = vmatpush.msra.mxu3 %v1718_v12 }
  0x4f   : > { %3529 = vmatmul.msk.f32.gmra.mxu3 %vm394_vm0, %v4382_v32  ;;  %785 = vrot.lane.b32.xlu1 %v4368_v30, %s4051_s27 }
  0x50   : > { %789 = vrot.lane.b32.xlu0 %v4398_v34, %s4051_s27 }
  0x51   : > { %3588 = vmatmul.msk.f32.vlgmr.msrb.gmra.mxu0 %vm394_vm0, %v4422_v37 }
  0x53   : > { %3532 = vmatmul.msk.f32.gmra.mxu1 %vm394_vm0, %v4241_v11  ;;  %v1726_v11 = vld [vmem:[%s5862_s5 + $0x10] sm:$0xff] }
  0x54   : > { %781 = vrot.lane.b32.xlu2 %v4395_v33, %s4051_s27  ;;  %1802 = vmatpush.msra.mxu2 %v1726_v11 }
  0x56   : > { %3525 = vmatmul.msk.f32.gmra.mxu2 %vm394_vm0, %v4379_v31 }
  0x57   : > { %3530 = vmatmul.msk.f32.gmra.mxu3 %vm394_vm0, %v4398_v34 }
  0x59   : > { %3589 = vmatmul.msk.f32.gmra.mxu0 %vm394_vm0, %v4429_v38 }
  0x5b   : > { %3533 = vmatmul.msk.f32.gmra.mxu1 %vm394_vm0, %v4216_v7 }
  0x5c   : > { %787 = vrot.lane.b32.xlu2 %v4382_v32, %s4051_s27 }
  0x5e   : > { %3526 = vmatmul.msk.f32.gmra.mxu2 %vm394_vm0, %v4395_v33 }
  0x61   : > { %3590 = vmatmul.msk.f32.gmra.mxu0 %vm394_vm0, %v4436_v39 }
  0x63   : > { %3534 = vmatmul.msk.f32.gmra.mxu1 %vm394_vm0, %v4250_v13 }
  0x69   : > { %3591 = vmatmul.msk.f32.gmra.mxu0 %vm394_vm0, %v4449_v43 }
  0x6b   : > { %3535 = vmatmul.msk.f32.gmra.mxu1 %vm394_vm0, %v719_v24 }
  0x71   : > { %3592 = vmatmul.msk.f32.gmra.mxu0 %vm394_vm0, %v4458_v45 }
  0x73   : > { %3536 = vmatmul.msk.f32.gmra.mxu1 %vm394_vm0, %v4237_v10 }
  0x79   : > { %3593 = vmatmul.msk.f32.gmra.mxu0 %vm394_vm0, %v4473_v49 }
  0x7b   : > { %3537 = vmatmul.msk.f32.gmra.mxu1 %vm394_vm0, %v4274_v17 }
  0x81   : > { %3594 = vmatmul.msk.f32.gmra.mxu0 %vm394_vm0, %v4484_v52 }
  0x83   : > { %3538 = vmatmul.msk.f32.gmra.mxu1 %vm394_vm0, %v4291_v20 }
  0x89   : > { %3595 = vmatmul.msk.f32.gmra.mxu0 %vm394_vm0, %v4495_v55 }
  0x8b   : > { %3539 = vmatmul.msk.f32.gmra.mxu1 %vm394_vm0, %v4323_v25  ;;  %v1725_v25 = vld [vmem:[%s5862_s5 + $0x8] sm:$0xff] }
  0x8c   : > { %1803 = vmatpush.msra.mxu2 %v1725_v25 }
  0x8e   : > { %v754_v42 = vpop.permute.xlu0 %753  ;;  %v762_v54 = vpop.permute.xlu2 %761  ;;  %1804 = vmatpush.msra.mxu2 %v1724_v41 }
  0x8f   : > { %3550 = vmatmul.msk.f32.vlgmr.msrb.gmra.mxu2 %vm394_vm0, %v754_v42  ;;  %3569 = vmatmul.msk.f32.vlgmr.msrb.gmra.mxu3 %vm394_vm0, %v754_v42  ;;  %v758_v46 = vpop.permute.xlu1 %757  ;;  %v1716_v42 = vld [vmem:[%s5861_s4] sm:$0xff] }
  0x91   : > { %3596 = vmatmul.msk.f32.gmra.mxu0 %vm394_vm0, %v4512_v60 }
  0x93   : > { %3540 = vmatmul.msk.f32.gmra.mxu1 %vm394_vm0, %v4312_v23  ;;  %v4596_v23 = vld [vmem:[%s4199_s23 + $0xe8] sm:$0xff] }
  0x96   : > { %v756_v44 = vpop.permute.xlu0 %755  ;;  %v764_v59 = vpop.permute.xlu2 %763 }
  0x97   : > { %3551 = vmatmul.msk.f32.gmra.mxu2 %vm394_vm0, %v756_v44  ;;  %3570 = vmatmul.msk.f32.gmra.mxu3 %vm394_vm0, %v756_v44  ;;  %v760_v51 = vpop.permute.xlu1 %759 }
  0x99   : > { %3597 = vmatmul.msk.f32.gmra.mxu0 %vm394_vm0, %v4523_v63 }
  0x9b   : > { %3541 = vmatmul.msk.f32.gmra.mxu1 %vm394_vm0, %v4339_v26  ;;  %v1717_v26 = vld [vmem:[%s5861_s4 + $0x8] sm:$0xff] }
  0x9c   : > { %1934 = vmatpush.msra.mxu3 %v1717_v26 }
  0x9e   : > { %v766_v62 = vpop.permute.xlu0 %765  ;;  %v770_v7 = vpop.permute.xlu2 %769  ;;  %1935 = vmatpush.msra.mxu3 %v1716_v42 }
  0x9f   : > { %3552 = vmatmul.msk.f32.gmra.mxu2 %vm394_vm0, %v758_v46  ;;  %3571 = vmatmul.msk.f32.gmra.mxu3 %vm394_vm0, %v758_v46  ;;  %v768_v3 = vpop.permute.xlu1 %767 }
  0xa0   : > { %v4477_v50 = vpop.f32.mrf.mxu1 }
  0xa1   : > { %3598 = vmatmul.msk.f32.gmra.mxu0 %vm394_vm0, %v4540_v4 }
  0xa3   : > { %3542 = vmatmul.msk.f32.gmra.mxu1 %vm394_vm0, %v4351_v27 }
  0xa6   : > { %v4549_v6 = vpop.f32.mrf.mxu0  ;;  %v772_v13 = vpop.permute.xlu0 %771 }
  0xa7   : > { %3553 = vmatmul.msk.f32.gmra.mxu2 %vm394_vm0, %v760_v51  ;;  %3572 = vmatmul.msk.f32.gmra.mxu3 %vm394_vm0, %v760_v51  ;;  %v776_v22 = vpop.permute.xlu2 %775 }
  0xa8   : > { %v4488_v53 = vpop.f32.mrf.mxu1 }
  0xa9   : > { %3599 = vmatmul.msk.f32.gmra.mxu0 %vm394_vm0, %v4552_v8 }
  0xab   : > { %3543 = vmatmul.msk.f32.gmra.mxu1 %vm394_vm0, %v4365_v29 }
  0xae   : > { %v4561_v10 = vpop.f32.mrf.mxu0 }
  0xaf   : > { %3554 = vmatmul.msk.f32.gmra.mxu2 %vm394_vm0, %v762_v54  ;;  %3573 = vmatmul.msk.f32.gmra.mxu3 %vm394_vm0, %v762_v54  ;;  %v4662_v54 = vld [vmem:[%s4199_s23 + $0x128] sm:$0xff] }
  0xb0   : > { %v4505_v58 = vpop.f32.mrf.mxu1  ;;  %v774_v17 = vpop.permute.xlu1 %773 }
  0xb1   : > { %3600 = vmatmul.msk.f32.gmra.mxu0 %vm394_vm0, %v4570_v14 }
  0xb3   : > { %3544 = vmatmul.msk.f32.gmra.mxu1 %vm394_vm0, %v4379_v31  ;;  %v4618_v31 = vld [vmem:[%s4199_s23 + $0xf8] sm:$0xff] }
  0xb6   : > { %v4579_v16 = vpop.f32.mrf.mxu0 }
  0xb7   : > { %3555 = vmatmul.msk.f32.gmra.mxu2 %vm394_vm0, %v764_v59  ;;  %3574 = vmatmul.msk.f32.gmra.mxu3 %vm394_vm0, %v764_v59  ;;  %v528_v41 = vmul.f32 %v4579_v16, %v4579_v16 }
  0xb8   : > { %v4516_v61 = vpop.f32.mrf.mxu1 }
  0xb9   : > { %3601 = vmatmul.msk.f32.gmra.mxu0 %vm394_vm0, %v4582_v18 }
  0xbb   : > { %3545 = vmatmul.msk.f32.gmra.mxu1 %vm394_vm0, %v4395_v33 }
  0xbe   : > { %v4593_v21 = vpop.f32.mrf.mxu0 }
  0xbf   : > { %3556 = vmatmul.msk.f32.gmra.mxu2 %vm394_vm0, %v766_v62  ;;  %3575 = vmatmul.msk.f32.gmra.mxu3 %vm394_vm0, %v766_v62 }
  0xc0   : > { %v4527_v0 = vpop.f32.mrf.mxu1 }
  0xc1   : > { %v4586_v19 = vpop.f32.mrf.mxu2  ;;  %3602 = vmatmul.msk.f32.gmra.mxu0 %vm394_vm0, %v4596_v23 }
  0xc3   : > { %3546 = vmatmul.msk.f32.gmra.mxu1 %vm394_vm0, %v4354_v28  ;;  %v4611_v28 = vpop.f32.mrf.mxu3 }
  0xc6   : > { %v4615_v29 = vpop.f32.mrf.mxu0 }
  0xc7   : > { %3557 = vmatmul.msk.f32.gmra.mxu2 %vm394_vm0, %v768_v3  ;;  %3576 = vmatmul.msk.f32.gmra.mxu3 %vm394_vm0, %v768_v3 }
  0xc8   : > { %v562_v5 = vpop.f32.mrf.mxu1 }
  0xc9   : > { %638 = vrot.lane.b32.xlu1 %v562_v5, %s4052_s17  ;;  %v4608_v27 = vpop.f32.mrf.mxu2  ;;  %3603 = vmatmul.msk.f32.gmra.mxu0 %vm394_vm0, %v4618_v31  ;;  %v526_v5 = vmul.f32 %v4549_v6, %v4549_v6 }
  0xcb   : > { %3547 = vmatmul.msk.f32.gmra.mxu1 %vm394_vm0, %v4368_v30  ;;  %v778_v30 = vpop.permute.xlu0 %777  ;;  %v4629_v35 = vpop.f32.mrf.mxu3 }
  0xce   : > { %v1204_v36 = vpop.f32.mrf.mxu0 }
  0xcf   : > { %3558 = vmatmul.msk.f32.gmra.mxu2 %vm394_vm0, %v770_v7  ;;  %3577 = vmatmul.msk.f32.gmra.mxu3 %vm394_vm0, %v770_v7 }
  0xd0   : > { %v565_v9 = vpop.f32.mrf.mxu1 }
  0xd1   : > { %640 = vrot.lane.b32.xlu2 %v565_v9, %s4052_s17  ;;  %v4627_v33 = vpop.f32.mrf.mxu2 }
  0xd3   : > { %3548 = vmatmul.msk.f32.gmra.mxu1 %vm394_vm0, %v4382_v32  ;;  %v4649_v46 = vpop.f32.mrf.mxu3  ;;  %v784_v48 = vpop.permute.xlu0 %783 }
  0xd6   : > { %v1207_v44 = vpop.f32.mrf.mxu0 }
  0xd7   : > { %3559 = vmatmul.msk.f32.gmra.mxu2 %vm394_vm0, %v772_v13  ;;  %3578 = vmatmul.msk.f32.gmra.mxu3 %vm394_vm0, %v772_v13 }
  0xd8   : > { %v568_v15 = vpop.f32.mrf.mxu1 }
  0xd9   : > { %642 = vrot.lane.b32.xlu0 %v568_v15, %s4052_s17  ;;  %v4641_v40 = vpop.f32.mrf.mxu2 }
  0xdb   : > { %3549 = vmatmul.msk.f32.gmra.mxu1 %vm394_vm0, %v4398_v34  ;;  %v780_v34 = vpop.permute.xlu1 %779  ;;  %v4668_v59 = vpop.f32.mrf.mxu3 }
  0xde   : > { %v1210_v51 = vpop.f32.mrf.mxu0 }
  0xdf   : > { %3560 = vmatmul.msk.f32.gmra.mxu2 %vm394_vm0, %v774_v17  ;;  %3579 = vmatmul.msk.f32.gmra.mxu3 %vm394_vm0, %v774_v17 }
  0xe0   : > { %v571_v20 = vpop.f32.mrf.mxu1 }
  0xe1   : > { %644 = vrot.lane.b32.xlu1 %v571_v20, %s4052_s17  ;;  %v4665_v56 = vpop.f32.mrf.mxu2 }
  0xe3   : > { %3607 = vmatmul.msk.f32.vlgmr.msra.gmra.mxu1 %vm394_vm0, %v4422_v37  ;;  %v4632_v37 = vld [vmem:[%s4199_s23 + $0x108] sm:$0xff]  ;;  %s3509_s23 = sshll.u32 %s5874_s25, 3  ;;  %s4053_s25 = smov 96  }
  0xe4   : > { %3604 = vmatmul.msk.f32.gmra.mxu0 %vm394_vm0, %v4632_v37  ;;  %s4712_s21 = scalar_lea.vmem %s5857_s0, %s3509_s23  ;;  %s4776_s23 = scalar_lea.vmem [#allocation2], %s3750_s26 }
  0xe5   : > { %s3428_s22 = sshll.u32 %s4776_s23, 4  ;;  %s3429_s22 = int_to_ptr.vmem [resolvable:$true] %s3428_s22 }
  0xe6   : > { %v4675_v62 = vpop.f32.mrf.mxu0 }
  0xe7   : > { %3561 = vmatmul.msk.f32.gmra.mxu2 %vm394_vm0, %v776_v22  ;;  %3580 = vmatmul.msk.f32.gmra.mxu3 %vm394_vm0, %v776_v22  ;;  %v1262_v22 = vmul.f32 %v1207_v44, %v1207_v44  ;;  %v1263_v44 = vmul.f32 %v1210_v51, %v1210_v51  ;;  %v529_v51 = vmul.f32 %v4593_v21, %v4593_v21 }
  0xe8   : > { %v574_v24 = vpop.f32.mrf.mxu1 }
  0xe9   : > { %646 = vrot.lane.b32.xlu2 %v574_v24, %s4052_s17  ;;  %v790_v24 = vpop.permute.xlu0 %789 }
  0xeb   : > { %3608 = vmatmul.msk.f32.gmra.mxu1 %vm394_vm0, %v4429_v38 }
  0xec   : > { %3605 = vmatmul.msk.f32.gmra.mxu0 %vm394_vm0, %v4652_v47 }
  0xee   : > { %v4685_v12 = vpop.f32.mrf.mxu0 }
  0xef   : > { %3562 = vmatmul.msk.f32.gmra.mxu2 %vm394_vm0, %v778_v30  ;;  %3581 = vmatmul.msk.f32.gmra.mxu3 %vm394_vm0, %v778_v30 }
  0xf0   : > { %v577_v32 = vpop.f32.mrf.mxu1 }
  0xf1   : > { %648 = vrot.lane.b32.xlu0 %v577_v32, %s4052_s17 }
  0xf3   : > { %3609 = vmatmul.msk.f32.gmra.mxu1 %vm394_vm0, %v4436_v39  ;;  %v782_v39 = vpop.permute.xlu2 %781 }
  0xf4   : > { %3606 = vmatmul.msk.f32.gmra.mxu0 %vm394_vm0, %v4662_v54 }
  0xf6   : > { %v4698_v26 = vpop.f32.mrf.mxu0 }
  0xf7   : > { %3563 = vmatmul.msk.f32.gmra.mxu2 %vm394_vm0, %v780_v34  ;;  %3582 = vmatmul.msk.f32.gmra.mxu3 %vm394_vm0, %v780_v34 }
  0xf8   : > { %v580_v38 = vpop.f32.mrf.mxu1 }
  0xf9   : > { %650 = vrot.lane.b32.xlu1 %v580_v38, %s4052_s17 }
  0xfb   : > { %3610 = vmatmul.msk.f32.gmra.mxu1 %vm394_vm0, %v4449_v43  ;;  %v788_v9 = vpop.permute.xlu2 %787 }
  0xff   : > { %3564 = vmatmul.msk.f32.gmra.mxu2 %vm394_vm0, %v782_v39  ;;  %3583 = vmatmul.msk.f32.gmra.mxu3 %vm394_vm0, %v782_v39 }
 0x100   : > { %v583_v43 = vpop.f32.mrf.mxu1 }
 0x101   : > { %652 = vrot.lane.b32.xlu2 %v583_v43, %s4052_s17 }
 0x103   : > { %3611 = vmatmul.msk.f32.gmra.mxu1 %vm394_vm0, %v4458_v45  ;;  %v786_v45 = vpop.permute.xlu1 %785 }
 0x107   : > { %3565 = vmatmul.msk.f32.gmra.mxu2 %vm394_vm0, %v784_v48  ;;  %3584 = vmatmul.msk.f32.gmra.mxu3 %vm394_vm0, %v784_v48  ;;  %v1697_v48 = vld [vmem:[%s4712_s21] sm:$0xff] }
 0x108   : > { %v586_v57 = vpop.f32.mrf.mxu1 }
 0x109   : > { %654 = vrot.lane.b32.xlu0 %v586_v57, %s4052_s17 }
 0x10b   : > { %3612 = vmatmul.msk.f32.gmra.mxu1 %vm394_vm0, %v4473_v49  ;;  %v1261_v49 = vmul.f32 %v1204_v36, %v1204_v36 }
 0x10f   : > { %3566 = vmatmul.msk.f32.gmra.mxu2 %vm394_vm0, %v786_v45  ;;  %3585 = vmatmul.msk.f32.gmra.mxu3 %vm394_vm0, %v786_v45 }
 0x110   : > { %v589_v1 = vpop.f32.mrf.mxu1 }
 0x111   : > { %656 = vrot.lane.b32.xlu1 %v589_v1, %s4052_s17 }
 0x112   : > { %v846_v2 = vpop.f32.mrf.mxu2  ;;  %v958_v3 = vpop.f32.mrf.mxu3 }
 0x113   : > { %v903_v7 = vmul.f32 %v846_v2, %v846_v2  ;;  %3613 = vmatmul.msk.f32.gmra.mxu1 %vm394_vm0, %v4484_v52  ;;  %1034 = vrot.lane.b32.xlu2 %v958_v3, %s4051_s27  ;;  %v527_v52 = vmul.f32 %v4561_v10, %v4561_v10  ;;  %v4725_v3 = vpop.f32.mrf.mxu0 }
 0x115   : > { %v922_v11 = vadd.f32 %v903_v7, %v526_v5 }
 0x117   : > { %v4687_v13 = vadd.f32 %v1261_v49, %v922_v11  ;;  %3567 = vmatmul.msk.f32.gmra.mxu2 %vm394_vm0, %v788_v9  ;;  %3586 = vmatmul.msk.f32.gmra.mxu3 %vm394_vm0, %v788_v9 }
 0x118   : > { %v592_v15 = vpop.f32.mrf.mxu1 }
 0x119   : > { %3797 = vrsqrt.f32 %v4687_v13  ;;  %vm1476_vm1 = vcmp.eq.f32.partialorder %v4687_v13, inf  ;;  %vm1478_vm2 = vcmp.eq.f32.partialorder %v4687_v13, 0.0 }
 0x11a   : > { %v849_v6 = vpop.f32.mrf.mxu2  ;;  %v961_v17 = vpop.f32.mrf.mxu3 }
 0x11b   : > { %v904_v20 = vmul.f32 %v849_v6, %v849_v6  ;;  %3614 = vmatmul.msk.f32.gmra.mxu1 %vm394_vm0, %v4495_v55  ;;  %1036 = vrot.lane.b32.xlu0 %v961_v17, %s4051_s27  ;;  %v2404_v55 = vld [vmem:[%s5864_s7 + $0x38] sm:$0xff]  ;;  %v1264_v6 = vmul.f32 %v4675_v62, %v4675_v62  ;;  %v1479_v17 = vand.u32 2147483648, %v4687_v13 }
 0x11c   : > { %658 = vrot.lane.b32.xlu2 %v592_v15, %s4052_s17  ;;  %2474 = vmatpush.msra.mxu0 %v2404_v55 }
 0x11d   : > { %v923_v25 = vadd.f32 %v904_v20, %v527_v52  ;;  %v1698_v20 = vld [vmem:[%s4712_s21 + $0x8] sm:$0xff] }
 0x11f   : > { %v3798_v30 = vpop.eup %3797  ;;  %v4701_v32 = vadd.f32 %v1262_v22, %v923_v25  ;;  %3568 = vmatmul.msk.f32.gmra.mxu2 %vm394_vm0, %v790_v24  ;;  %3587 = vmatmul.msk.f32.gmra.mxu3 %vm394_vm0, %v790_v24 }
 0x120   : > { %v595_v10 = vpop.f32.mrf.mxu1  ;;  %v1470_v34 = vmul.f32 %v3798_v30, %v4687_v13 }
 0x121   : > { %3799 = vrsqrt.f32 %v4701_v32  ;;  %vm1488_vm3 = vcmp.eq.f32.partialorder %v4701_v32, inf  ;;  %vm1490_vm4 = vcmp.eq.f32.partialorder %v4701_v32, 0.0 }
 0x122   : > { %v852_v36 = vpop.f32.mrf.mxu2  ;;  %v964_v38 = vpop.f32.mrf.mxu3  ;;  %v1471_v39 = vmul.f32 %v3798_v30, %v1470_v34 }
 0x123   : > { %v905_v42 = vmul.f32 %v852_v36, %v852_v36  ;;  %3615 = vmatmul.msk.f32.gmra.mxu1 %vm394_vm0, %v4512_v60  ;;  %1038 = vrot.lane.b32.xlu1 %v964_v38, %s4051_s27  ;;  %v530_v36 = vmul.f32 %v4615_v29, %v4615_v29 }
 0x124   : > { %660 = vrot.lane.b32.xlu0 %v595_v10, %s4052_s17  ;;  %v1472_v43 = vmul.f32 0.5, %v1471_v39 }
 0x125   : > { %v924_v57 = vadd.f32 %v905_v42, %v528_v41 }
 0x126   : > { %v1473_v45 = vsub.f32 1.5, %v1472_v43  ;;  %v1265_v43 = vmul.f32 %v4685_v12, %v4685_v12 }
 0x127   : > { %v3800_v1 = vpop.eup %3799  ;;  %v4722_v2 = vadd.f32 %v1263_v44, %v924_v57  ;;  %3645 = vmatmul.msk.f32.vlgmr.msra.gmra.mxu3 %vm394_vm0, %v1697_v48  ;;  %v1491_v48 = vand.u32 2147483648, %v4701_v32 }
 0x128   : > { %v598_v16 = vpop.f32.mrf.mxu1  ;;  %v1474_v5 = vmul.f32 %v3798_v30, %v1473_v45  ;;  %v1482_v60 = vmul.f32 %v3800_v1, %v4701_v32  ;;  %v1699_v45 = vld [vmem:[%s4712_s21 + $0x10] sm:$0xff] }
 0x129   : > { %3801 = vrsqrt.f32 %v4722_v2  ;;  %vm1500_vm6 = vcmp.eq.f32.partialorder %v4722_v2, inf  ;;  %vm1502_vm7 = vcmp.eq.f32.partialorder %v4722_v2, 0.0 }
 0x12a   : > { %v855_v7 = vpop.f32.mrf.mxu2  ;;  %v967_v49 = vpop.f32.mrf.mxu3  ;;  %v1475_v9 = vmul.f32 %v1474_v5, %v4687_v13  ;;  %v1483_v11 = vmul.f32 %v3800_v1, %v1482_v60 }
 0x12b   : > { %v906_v15 = vmul.f32 %v855_v7, %v855_v7  ;;  %1040 = vrot.lane.b32.xlu2 %v967_v49, %s4051_s27  ;;  %662 = vrot.lane.b32.xlu1 %v598_v16, %s4052_s17 }
 0x12c   : > { %v1477_v52 = vsel %vm1476_vm1, %v4687_v13, %v1475_v9  ;;  %v1484_v21 = vmul.f32 0.5, %v1483_v11  ;;  %3616 = vmatmul.msk.f32.gmra.mxu1 %vm394_vm0, %v4523_v63  ;;  %v2403_v13 = vld [vmem:[%s5864_s7 + $0x30] sm:$0xff]  ;;  %v4753_v63 = vpop.f32.mrf.mxu0 }
 0x12d   : > { %v925_v22 = vadd.f32 %v906_v15, %v529_v51  ;;  %v1480_v62 = vsel %vm1478_vm2, %v1479_v17, %v1477_v52  ;;  %2475 = vmatpush.msra.mxu0 %v2403_v13  ;;  %v641_v51 = vpop.permute.xlu2 %640  ;;  %v1266_v52 = vmul.f32 %v4698_v26, %v4698_v26 }
 0x12e   : > { %3626 = vmatmul.msk.f32.vlgmr.msra.gmra.mxu2 %vm394_vm0, %v1480_v62  ;;  %v1485_v24 = vsub.f32 1.5, %v1484_v21  ;;  %697 = vst.msk [vmem:[%s4776_s23 + $0x8] sm:$0xff] %vm695_vm5, %v641_v51  ;;  %v1503_v21 = vand.u32 2147483648, %v4722_v2  ;;  %v1700_v62 = vld [vmem:[%s4712_s21 + $0x18] sm:$0xff] }
 0x12f   : > { %v3802_v25 = vpop.eup %3801  ;;  %v4744_v30 = vadd.f32 %v1264_v6, %v925_v22  ;;  %3646 = vmatmul.msk.f32.gmra.mxu3 %vm394_vm0, %v1698_v20 }
 0x130   : > { %v601_v55 = vpop.f32.mrf.mxu1  ;;  %v1486_v10 = vmul.f32 %v3800_v1, %v1485_v24  ;;  %v1494_v34 = vmul.f32 %v3802_v25, %v4722_v2 }
 0x131   : > { %3803 = vrsqrt.f32 %v4744_v30  ;;  %vm1512_vm8 = vcmp.eq.f32.partialorder %v4744_v30, inf  ;;  %vm1514_vm9 = vcmp.eq.f32.partialorder %v4744_v30, 0.0 }
 0x132   : > { %v858_v38 = vpop.f32.mrf.mxu2  ;;  %v970_v39 = vpop.f32.mrf.mxu3  ;;  %v1487_v41 = vmul.f32 %v1486_v10, %v4701_v32  ;;  %v1495_v42 = vmul.f32 %v3802_v25, %v1494_v34 }
 0x133   : > { %v907_v44 = vmul.f32 %v858_v38, %v858_v38  ;;  %1042 = vrot.lane.b32.xlu0 %v970_v39, %s4051_s27  ;;  %664 = vrot.lane.b32.xlu2 %v601_v55, %s4052_s17 }
 0x134   : > { %v1489_v29 = vsel %vm1488_vm3, %v4701_v32, %v1487_v41  ;;  %v1496_v57 = vmul.f32 0.5, %v1495_v42  ;;  %3617 = vmatmul.msk.f32.gmra.mxu1 %vm394_vm0, %v4540_v4  ;;  %v531_v4 = vmul.f32 %v4477_v50, %v4477_v50  ;;  %v4790_v50 = vpop.f32.mrf.mxu0  ;;  %vm1091_vm3 = vcmask 785920  }
 0x135   : > { %v926_v12 = vadd.f32 %v907_v44, %v530_v36  ;;  %v1492_v1 = vsel %vm1490_vm4, %v1491_v48, %v1489_v29  ;;  %v1267_v44 = vmul.f32 %v4725_v3, %v4725_v3 }
 0x136   : > { %3627 = vmatmul.msk.f32.gmra.mxu2 %vm394_vm0, %v1492_v1  ;;  %v1497_v16 = vsub.f32 1.5, %v1496_v57  ;;  %v1701_v57 = vld [vmem:[%s4712_s21 + $0x20] sm:$0xff]  ;;  %v2402_v1 = vld [vmem:[%s5864_s7 + $0x28] sm:$0xff] }
 0x137   : > { %v3804_v5 = vpop.eup %3803  ;;  %v4772_v60 = vadd.f32 %v1265_v43, %v926_v12  ;;  %3647 = vmatmul.msk.f32.gmra.mxu3 %vm394_vm0, %v1699_v45  ;;  %v1515_v43 = vand.u32 2147483648, %v4744_v30  ;;  %2476 = vmatpush.msra.mxu0 %v2402_v1  ;;  %v535_v1 = vmul.f32 %v4527_v0, %v4527_v0 }
 0x138   : > { %v604_v7 = vpop.f32.mrf.mxu1  ;;  %v1498_v49 = vmul.f32 %v3802_v25, %v1497_v16  ;;  %v1506_v32 = vmul.f32 %v3804_v5, %v4744_v30 }
 0x139   : > { %3805 = vrsqrt.f32 %v4772_v60  ;;  %vm1524_vm10 = vcmp.eq.f32.partialorder %v4772_v60, inf  ;;  %vm1526_vm11 = vcmp.eq.f32.partialorder %v4772_v60, 0.0 }
 0x13a   : > { %v861_v9 = vpop.f32.mrf.mxu2  ;;  %v973_v11 = vpop.f32.mrf.mxu3  ;;  %v1499_v15 = vmul.f32 %v1498_v49, %v4722_v2  ;;  %v1507_v6 = vmul.f32 %v3804_v5, %v1506_v32  ;;  %v533_v49 = vmul.f32 %v4505_v58, %v4505_v58 }
 0x13b   : > { %v908_v17 = vmul.f32 %v861_v9, %v861_v9  ;;  %1044 = vrot.lane.b32.xlu1 %v973_v11, %s4051_s27  ;;  %666 = vrot.lane.b32.xlu0 %v604_v7, %s4052_s17 }
 0x13c   : > { %v1501_v20 = vsel %vm1500_vm6, %v4722_v2, %v1499_v15  ;;  %v1508_v22 = vmul.f32 0.5, %v1507_v6  ;;  %3618 = vmatmul.msk.f32.gmra.mxu1 %vm394_vm0, %v4552_v8  ;;  %v532_v2 = vmul.f32 %v4488_v53, %v4488_v53  ;;  %v4819_v12 = vpop.f32.mrf.mxu0  ;;  %v1268_v6 = vmul.f32 %v4753_v63, %v4753_v63 }
 0x13d   : > { %v927_v26 = vadd.f32 %v908_v17, %v531_v4  ;;  %v1504_v24 = vsel %vm1502_vm7, %v1503_v21, %v1501_v20  ;;  %v1527_v17 = vand.u32 2147483648, %v4772_v60  ;;  %v1702_v21 = vld [vmem:[%s4712_s21 + $0x28] sm:$0xff]  ;;  %v639_v20 = vpop.permute.xlu1 %638 }
 0x13e   : > { %3628 = vmatmul.msk.f32.gmra.mxu2 %vm394_vm0, %v1504_v24  ;;  %v1509_v25 = vsub.f32 1.5, %v1508_v22  ;;  %696 = vst.msk [vmem:[%s4776_s23] sm:$0xff] %vm695_vm5, %v639_v20 }
 0x13f   : > { %v3806_v13 = vpop.eup %3805  ;;  %v4798_v55 = vadd.f32 %v1266_v52, %v927_v26  ;;  %3648 = vmatmul.msk.f32.gmra.mxu3 %vm394_vm0, %v1700_v62 }
 0x140   : > { %v607_v10 = vpop.f32.mrf.mxu1  ;;  %v1510_v34 = vmul.f32 %v3804_v5, %v1509_v25  ;;  %v1518_v36 = vmul.f32 %v3806_v13, %v4772_v60 }
 0x141   : > { %3807 = vrsqrt.f32 %v4798_v55  ;;  %vm1536_vm12 = vcmp.eq.f32.partialorder %v4798_v55, inf  ;;  %vm1538_vm13 = vcmp.eq.f32.partialorder %v4798_v55, 0.0 }
 0x142   : > { %v864_v8 = vpop.f32.mrf.mxu2  ;;  %v976_v38 = vpop.f32.mrf.mxu3  ;;  %v1511_v39 = vmul.f32 %v1510_v34, %v4744_v30  ;;  %v1519_v41 = vmul.f32 %v3806_v13, %v1518_v36 }
 0x143   : > { %v909_v42 = vmul.f32 %v864_v8, %v864_v8  ;;  %1046 = vrot.lane.b32.xlu2 %v976_v38, %s4051_s27  ;;  %668 = vrot.lane.b32.xlu1 %v607_v10, %s4052_s17  ;;  %v647_v53 = vpop.permute.xlu2 %646 }
 0x144   : > { %v1513_v48 = vsel %vm1512_vm8, %v4744_v30, %v1511_v39  ;;  %v1520_v29 = vmul.f32 0.5, %v1519_v41  ;;  %700 = vst.msk [vmem:[%s4776_s23 + $0x20] sm:$0xff] %vm695_vm5, %v647_v53  ;;  %3619 = vmatmul.msk.f32.gmra.mxu1 %vm394_vm0, %v4570_v14  ;;  %v4850_v25 = vpop.f32.mrf.mxu0  ;;  %v1269_v39 = vmul.f32 %v4790_v50, %v4790_v50  ;;  %v1539_v41 = vand.u32 2147483648, %v4798_v55 }
 0x145   : > { %v928_v3 = vadd.f32 %v909_v42, %v532_v2  ;;  %v1516_v45 = vsel %vm1514_vm9, %v1515_v43, %v1513_v48 }
 0x146   : > { %3629 = vmatmul.msk.f32.gmra.mxu2 %vm394_vm0, %v1516_v45  ;;  %v1521_v16 = vsub.f32 1.5, %v1520_v29 }
 0x147   : > { %v3808_v30 = vpop.eup %3807  ;;  %v4825_v5 = vadd.f32 %v1267_v44, %v928_v3  ;;  %3649 = vmatmul.msk.f32.gmra.mxu3 %vm394_vm0, %v1701_v57  ;;  %v1703_v44 = vld [vmem:[%s4712_s21 + $0x30] sm:$0xff] }
 0x148   : > { %v610_v51 = vpop.f32.mrf.mxu1  ;;  %v1522_v7 = vmul.f32 %v3806_v13, %v1521_v16  ;;  %v1530_v14 = vmul.f32 %v3808_v30, %v4798_v55 }
 0x149   : > { %3809 = vrsqrt.f32 %v4825_v5  ;;  %vm1548_vm14 = vcmp.eq.f32.partialorder %v4825_v5, inf  ;;  %v1551_v0 = vand.u32 2147483648, %v4825_v5  ;;  %vm1550_vm15 = vcmp.eq.f32.partialorder %v4825_v5, 0.0 }
 0x14a   : > { %v867_v32 = vpop.f32.mrf.mxu2  ;;  %v979_v4 = vpop.f32.mrf.mxu3  ;;  %v1523_v9 = vmul.f32 %v1522_v7, %v4772_v60  ;;  %v1531_v11 = vmul.f32 %v3808_v30, %v1530_v14 }
 0x14b   : > { %v910_v15 = vmul.f32 %v867_v32, %v867_v32  ;;  %1048 = vrot.lane.b32.xlu0 %v979_v4, %s4051_s27  ;;  %670 = vrot.lane.b32.xlu2 %v610_v51, %s4052_s17  ;;  %v643_v50 = vpop.permute.xlu0 %642  ;;  %v1270_v32 = vmul.f32 %v4819_v12, %v4819_v12 }
 0x14c   : > { %v1525_v58 = vsel %vm1524_vm10, %v4772_v60, %v1523_v9  ;;  %v1532_v52 = vmul.f32 0.5, %v1531_v11  ;;  %3620 = vmatmul.msk.f32.gmra.mxu1 %vm394_vm0, %v4582_v18  ;;  %v534_v18 = vmul.f32 %v4516_v61, %v4516_v61  ;;  %698 = vst.msk [vmem:[%s4776_s23 + $0x10] sm:$0xff] %vm695_vm5, %v643_v50  ;;  %v4880_v16 = vpop.f32.mrf.mxu0 }
 0x14d   : > { %v929_v22 = vadd.f32 %v910_v15, %v533_v49  ;;  %v1528_v63 = vsel %vm1526_vm11, %v1527_v17, %v1525_v58  ;;  %v1704_v15 = vld [vmem:[%s4712_s21 + $0x38] sm:$0xff] }
 0x14e   : > { %3630 = vmatmul.msk.f32.gmra.mxu2 %vm394_vm0, %v1528_v63  ;;  %v1533_v62 = vsub.f32 1.5, %v1532_v52 }
 0x14f   : > { %v3810_v26 = vpop.eup %3809  ;;  %v4847_v24 = vadd.f32 %v1268_v6, %v929_v22  ;;  %3650 = vmatmul.msk.f32.gmra.mxu3 %vm394_vm0, %v1702_v21 }
 0x150   : > { %v613_v60 = vpop.f32.mrf.mxu1  ;;  %v1534_v13 = vmul.f32 %v3808_v30, %v1533_v62  ;;  %v1542_v10 = vmul.f32 %v3810_v26, %v4825_v5 }
 0x151   : > { %3811 = vrsqrt.f32 %v4847_v24  ;;  %vm1560_vm1 = vcmp.eq.f32.partialorder %v4847_v24, inf  ;;  %vm1562_vm2 = vcmp.eq.f32.partialorder %v4847_v24, 0.0 }
 0x152   : > { %v870_v34 = vpop.f32.mrf.mxu2  ;;  %v982_v36 = vpop.f32.mrf.mxu3  ;;  %v1535_v2 = vmul.f32 %v1534_v13, %v4798_v55  ;;  %v1543_v8 = vmul.f32 %v3810_v26, %v1542_v10  ;;  %v1271_v10 = vmul.f32 %v4850_v25, %v4850_v25 }
 0x153   : > { %v911_v38 = vmul.f32 %v870_v34, %v870_v34  ;;  %1050 = vrot.lane.b32.xlu1 %v982_v36, %s4051_s27  ;;  %672 = vrot.lane.b32.xlu0 %v613_v60, %s4052_s17  ;;  %v645_v17 = vpop.permute.xlu1 %644 }
 0x154   : > { %v1537_v61 = vsel %vm1536_vm12, %v4798_v55, %v1535_v2  ;;  %v1544_v42 = vmul.f32 0.5, %v1543_v8  ;;  %3621 = vmatmul.msk.f32.gmra.mxu1 %vm394_vm0, %v4596_v23  ;;  %v2401_v55 = vld [vmem:[%s5864_s7 + $0x20] sm:$0xff]  ;;  %699 = vst.msk [vmem:[%s4776_s23 + $0x18] sm:$0xff] %vm695_vm5, %v645_v17  ;;  %v1240_v34 = vpop.f32.mrf.mxu0 }
 0x155   : > { %v930_v43 = vadd.f32 %v911_v38, %v534_v18  ;;  %v1540_v53 = vsel %vm1538_vm13, %v1539_v41, %v1537_v61  ;;  %2477 = vmatpush.msra.mxu0 %v2401_v55  ;;  %v1563_v18 = vand.u32 2147483648, %v4847_v24  ;;  %v1705_v8 = vld [vmem:[%s4712_s21 + $0x40] sm:$0xff] }
 0x156   : > { %3631 = vmatmul.msk.f32.gmra.mxu2 %vm394_vm0, %v1540_v53  ;;  %v1545_v48 = vsub.f32 1.5, %v1544_v42 }
 0x157   : > { %v3812_v29 = vpop.eup %3811  ;;  %v4871_v57 = vadd.f32 %v1269_v39, %v930_v43  ;;  %3651 = vmatmul.msk.f32.gmra.mxu3 %vm394_vm0, %v1703_v44  ;;  %v537_v43 = vmul.f32 %v4608_v27, %v4608_v27 }
 0x158   : > { %v616_v3 = vpop.f32.mrf.mxu1  ;;  %v1546_v45 = vmul.f32 %v3810_v26, %v1545_v48  ;;  %v1554_v23 = vmul.f32 %v3812_v29, %v4847_v24 }
 0x159   : > { %3813 = vrsqrt.f32 %v4871_v57  ;;  %vm1572_vm4 = vcmp.eq.f32.partialorder %v4871_v57, inf  ;;  %vm1574_vm6 = vcmp.eq.f32.partialorder %v4871_v57, 0.0 }
 0x15a   : > { %v873_v30 = vpop.f32.mrf.mxu2  ;;  %v985_v51 = vpop.f32.mrf.mxu3  ;;  %v1547_v7 = vmul.f32 %v1546_v45, %v4825_v5  ;;  %v1555_v14 = vmul.f32 %v3812_v29, %v1554_v23  ;;  %v1575_v45 = vand.u32 2147483648, %v4871_v57 }
 0x15b   : > { %v912_v49 = vmul.f32 %v873_v30, %v873_v30  ;;  %1052 = vrot.lane.b32.xlu2 %v985_v51, %s4051_s27  ;;  %674 = vrot.lane.b32.xlu1 %v616_v3, %s4052_s17  ;;  %v653_v4 = vpop.permute.xlu2 %652  ;;  %v1272_v3 = vmul.f32 %v4880_v16, %v4880_v16  ;;  %v1706_v30 = vld [vmem:[%s4712_s21 + $0x48] sm:$0xff] }
 0x15c   : > { %v1549_v9 = vsel %vm1548_vm14, %v4825_v5, %v1547_v7  ;;  %703 = vst.msk [vmem:[%s4776_s23 + $0x38] sm:$0xff] %vm695_vm5, %v653_v4  ;;  %v1556_v11 = vmul.f32 0.5, %v1555_v14  ;;  %3622 = vmatmul.msk.f32.gmra.mxu1 %vm394_vm0, %v4618_v31  ;;  %v536_v31 = vmul.f32 %v4586_v19, %v4586_v19  ;;  %v1243_v16 = vpop.f32.mrf.mxu0 }
 0x15d   : > { %v931_v12 = vadd.f32 %v912_v49, %v535_v1  ;;  %v1552_v6 = vsel %vm1550_vm15, %v1551_v0, %v1549_v9 }
 0x15e   : > { %3632 = vmatmul.msk.f32.gmra.mxu2 %vm394_vm0, %v1552_v6  ;;  %v1557_v58 = vsub.f32 1.5, %v1556_v11 }
 0x15f   : > { %v3814_v52 = vpop.eup %3813  ;;  %v4900_v21 = vadd.f32 %v1270_v32, %v931_v12  ;;  %3652 = vmatmul.msk.f32.gmra.mxu3 %vm394_vm0, %v1704_v15 }
 0x160   : > { %v1316_v5 = vpop.f32.mrf.mxu1  ;;  %v1558_v20 = vmul.f32 %v3812_v29, %v1557_v58  ;;  %v1566_v22 = vmul.f32 %v3814_v52, %v4871_v57  ;;  %v1273_v58 = vmul.f32 %v1240_v34, %v1240_v34 }
 0x161   : > { %1392 = vrot.lane.b32.xlu0 %v1316_v5, %s4053_s25  ;;  %3815 = vrsqrt.f32 %v4900_v21  ;;  %vm1584_vm7 = vcmp.eq.f32.partialorder %v4900_v21, inf  ;;  %vm1586_vm8 = vcmp.eq.f32.partialorder %v4900_v21, 0.0 }
 0x162   : > { %v876_v63 = vpop.f32.mrf.mxu2  ;;  %v988_v62 = vpop.f32.mrf.mxu3  ;;  %v1559_v26 = vmul.f32 %v1558_v20, %v4847_v24  ;;  %v1567_v60 = vmul.f32 %v3814_v52, %v1566_v22  ;;  %v1707_v22 = vld [vmem:[%s4712_s21 + $0x50] sm:$0xff] }
 0x163   : > { %v913_v13 = vmul.f32 %v876_v63, %v876_v63  ;;  %v649_v36 = vpop.permute.xlu0 %648 }
 0x164   : > { %v1561_v2 = vsel %vm1560_vm1, %v4847_v24, %v1559_v26  ;;  %v1568_v19 = vmul.f32 0.5, %v1567_v60  ;;  %701 = vst.msk [vmem:[%s4776_s23 + $0x28] sm:$0xff] %vm695_vm5, %v649_v36  ;;  %3623 = vmatmul.msk.f32.gmra.mxu1 %vm394_vm0, %v4632_v37  ;;  %v2400_v37 = vld [vmem:[%s5864_s7 + $0x18] sm:$0xff] }
 0x165   : > { %v932_v38 = vadd.f32 %v913_v13, %v536_v31  ;;  %v1564_v39 = vsel %vm1562_vm2, %v1563_v18, %v1561_v2  ;;  %2478 = vmatpush.msra.mxu0 %v2400_v37  ;;  %v1246_v13 = vpop.f32.mrf.mxu0  ;;  %v2399_v37 = vld [vmem:[%s5864_s7 + $0x10] sm:$0xff] }
 0x166   : > { %3633 = vmatmul.msk.f32.gmra.mxu2 %vm394_vm0, %v1564_v39  ;;  %v1569_v25 = vsub.f32 1.5, %v1568_v19 }
 0x167   : > { %v3816_v41 = vpop.eup %3815  ;;  %v4921_v61 = vadd.f32 %v1271_v10, %v932_v38  ;;  %3653 = vmatmul.msk.f32.gmra.mxu3 %vm394_vm0, %v1705_v8  ;;  %v1274_v38 = vmul.f32 %v1243_v16, %v1243_v16  ;;  %2479 = vmatpush.msra.mxu0 %v2399_v37 }
 0x168   : > { %v1319_v42 = vpop.f32.mrf.mxu1  ;;  %v1570_v44 = vmul.f32 %v3814_v52, %v1569_v25  ;;  %v1578_v24 = vmul.f32 %v3816_v41, %v4900_v21  ;;  %v1587_v52 = vand.u32 2147483648, %v4900_v21 }
 0x169   : > { %1054 = vrot.lane.b32.xlu0 %v988_v62, %s4051_s27  ;;  %1394 = vrot.lane.b32.xlu1 %v1319_v42, %s4053_s25  ;;  %3817 = vrsqrt.f32 %v4921_v61  ;;  %vm1596_vm9 = vcmp.eq.f32.partialorder %v4921_v61, inf  ;;  %v1599_v39 = vand.u32 2147483648, %v4921_v61  ;;  %vm1598_vm10 = vcmp.eq.f32.partialorder %v4921_v61, 0.0 }
 0x16a   : > { %v879_v53 = vpop.f32.mrf.mxu2  ;;  %v991_v50 = vpop.f32.mrf.mxu3  ;;  %v1571_v48 = vmul.f32 %v1570_v44, %v4871_v57  ;;  %v1579_v29 = vmul.f32 %v3816_v41, %v1578_v24 }
 0x16b   : > { %v914_v55 = vmul.f32 %v879_v53, %v879_v53  ;;  %v651_v23 = vpop.permute.xlu1 %650 }
 0x16c   : > { %v1573_v27 = vsel %vm1572_vm4, %v4871_v57, %v1571_v48  ;;  %v1580_v1 = vmul.f32 0.5, %v1579_v29  ;;  %702 = vst.msk [vmem:[%s4776_s23 + $0x30] sm:$0xff] %vm695_vm5, %v651_v23  ;;  %3624 = vmatmul.msk.f32.gmra.mxu1 %vm394_vm0, %v4652_v47  ;;  %v538_v47 = vmul.f32 %v4627_v33, %v4627_v33 }
 0x16d   : > { %v933_v51 = vadd.f32 %v914_v55, %v537_v43  ;;  %v1035_v7 = vpop.permute.xlu2 %1034  ;;  %v1576_v14 = vsel %vm1574_vm6, %v1575_v45, %v1573_v27  ;;  %v1249_v55 = vpop.f32.mrf.mxu0 }
 0x16e   : > { %1092 = vst.msk [vmem:[%s4776_s23] sm:$0xff] %vm1091_vm3, %v1035_v7  ;;  %3634 = vmatmul.msk.f32.gmra.mxu2 %vm394_vm0, %v1576_v14  ;;  %v1581_v49 = vsub.f32 1.5, %v1580_v1 }
 0x16f   : > { %v3818_v32 = vpop.eup %3817  ;;  %v4948_v0 = vadd.f32 %v1272_v3, %v933_v51  ;;  %3654 = vmatmul.msk.f32.gmra.mxu3 %vm394_vm0, %v1706_v30  ;;  %v540_v3 = vmul.f32 %v4665_v56, %v4665_v56  ;;  %v1275_v51 = vmul.f32 %v1246_v13, %v1246_v13 }
 0x170   : > { %v1322_v57 = vpop.f32.mrf.mxu1  ;;  %v1582_v4 = vmul.f32 %v3816_v41, %v1581_v49  ;;  %v1590_v9 = vmul.f32 %v3818_v32, %v4921_v61  ;;  %v1709_v49 = vld [vmem:[%s4712_s21 + $0x60] sm:$0xff] }
 0x171   : > { %1056 = vrot.lane.b32.xlu1 %v991_v50, %s4051_s27  ;;  %1396 = vrot.lane.b32.xlu2 %v1322_v57, %s4053_s25  ;;  %3819 = vrsqrt.f32 %v4948_v0  ;;  %vm1608_vm11 = vcmp.eq.f32.partialorder %v4948_v0, inf  ;;  %v1611_v7 = vand.u32 2147483648, %v4948_v0  ;;  %vm1610_vm12 = vcmp.eq.f32.partialorder %v4948_v0, 0.0 }
 0x172   : > { %v882_v11 = vpop.f32.mrf.mxu2  ;;  %v994_v15 = vpop.f32.mrf.mxu3  ;;  %v1583_v12 = vmul.f32 %v1582_v4, %v4900_v21  ;;  %v1591_v6 = vmul.f32 %v3818_v32, %v1590_v9 }
 0x173   : > { %v915_v17 = vmul.f32 %v882_v11, %v882_v11 }
 0x174   : > { %v1585_v5 = vsel %vm1584_vm7, %v4900_v21, %v1583_v12  ;;  %v1592_v20 = vmul.f32 0.5, %v1591_v6  ;;  %3625 = vmatmul.msk.f32.gmra.mxu1 %vm394_vm0, %v4662_v54  ;;  %v539_v54 = vmul.f32 %v4641_v40, %v4641_v40  ;;  %v1708_v40 = vld [vmem:[%s4712_s21 + $0x58] sm:$0xff]  ;;  %v541_v6 = vmul.f32 %v4611_v28, %v4611_v28  ;;  %v1710_v28 = vld [vmem:[%s4712_s21 + $0x68] sm:$0xff] }
 0x175   : > { %v934_v33 = vadd.f32 %v915_v17, %v538_v47  ;;  %v1588_v31 = vsel %vm1586_vm8, %v1587_v52, %v1585_v5 }
 0x176   : > { %3635 = vmatmul.msk.f32.gmra.mxu2 %vm394_vm0, %v1588_v31  ;;  %v1593_v63 = vsub.f32 1.5, %v1592_v20  ;;  %v659_v62 = vpop.permute.xlu2 %658 }
 0x177   : > { %v3820_v26 = vpop.eup %3819  ;;  %v4966_v60 = vadd.f32 %v1273_v58, %v934_v33  ;;  %3655 = vmatmul.msk.f32.gmra.mxu3 %vm394_vm0, %v1707_v22  ;;  %706 = vst.msk [vmem:[%s4776_s23 + $0x50] sm:$0xff] %vm695_vm5, %v659_v62  ;;  %v1276_v22 = vmul.f32 %v1249_v55, %v1249_v55 }
 0x178   : > { %v1325_v21 = vpop.f32.mrf.mxu1  ;;  %v1594_v10 = vmul.f32 %v3818_v32, %v1593_v63  ;;  %v1602_v18 = vmul.f32 %v3820_v26, %v4948_v0  ;;  %v1252_v63 = vpop.f32.mrf.mxu0 }
 0x179   : > { %1058 = vrot.lane.b32.xlu2 %v994_v15, %s4051_s27  ;;  %1398 = vrot.lane.b32.xlu0 %v1325_v21, %s4053_s25  ;;  %3821 = vrsqrt.f32 %v4966_v60  ;;  %vm1620_vm13 = vcmp.eq.f32.partialorder %v4966_v60, inf  ;;  %v1623_v33 = vand.u32 2147483648, %v4966_v60  ;;  %vm1622_vm14 = vcmp.eq.f32.partialorder %v4966_v60, 0.0 }
 0x17a   : > { %v885_v34 = vpop.f32.mrf.mxu2  ;;  %v997_v36 = vpop.f32.mrf.mxu3  ;;  %v1595_v2 = vmul.f32 %v1594_v10, %v4921_v61  ;;  %v1603_v19 = vmul.f32 %v3820_v26, %v1602_v18 }
 0x17b   : > { %v916_v8 = vmul.f32 %v885_v34, %v885_v34  ;;  %v655_v25 = vpop.permute.xlu0 %654 }
 0x17c   : > { %v1597_v41 = vsel %vm1596_vm9, %v4921_v61, %v1595_v2  ;;  %704 = vst.msk [vmem:[%s4776_s23 + $0x40] sm:$0xff] %vm695_vm5, %v655_v25  ;;  %v1604_v42 = vmul.f32 0.5, %v1603_v19 }
 0x17d   : > { %v935_v44 = vadd.f32 %v916_v8, %v539_v54  ;;  %v1600_v24 = vsel %vm1598_vm10, %v1599_v39, %v1597_v41  ;;  %v2398_v54 = vld [vmem:[%s5864_s7 + $0x8] sm:$0xff]  ;;  %v542_v8 = vmul.f32 %v4629_v35, %v4629_v35 }
 0x17e   : > { %3636 = vmatmul.msk.f32.gmra.mxu2 %vm394_vm0, %v1600_v24  ;;  %v1605_v43 = vsub.f32 1.5, %v1604_v42  ;;  %2480 = vmatpush.msra.mxu0 %v2398_v54 }
 0x17f   : > { %v3822_v53 = vpop.eup %3821  ;;  %v4989_v50 = vadd.f32 %v1274_v38, %v935_v44  ;;  %3656 = vmatmul.msk.f32.gmra.mxu3 %vm394_vm0, %v1708_v40  ;;  %v1277_v40 = vmul.f32 %v1252_v63, %v1252_v63 }
 0x180   : > { %v1328_v61 = vpop.f32.mrf.mxu1  ;;  %v1606_v48 = vmul.f32 %v3820_v26, %v1605_v43  ;;  %v1614_v29 = vmul.f32 %v3822_v53, %v4966_v60  ;;  %v1711_v43 = vld [vmem:[%s4712_s21 + $0x70] sm:$0xff] }
 0x181   : > { %1060 = vrot.lane.b32.xlu0 %v997_v36, %s4051_s27  ;;  %1400 = vrot.lane.b32.xlu1 %v1328_v61, %s4053_s25  ;;  %3823 = vrsqrt.f32 %v4989_v50  ;;  %vm1632_vm15 = vcmp.eq.f32.partialorder %v4989_v50, inf  ;;  %v1635_v44 = vand.u32 2147483648, %v4989_v50  ;;  %vm1634_vm1 = vcmp.eq.f32.partialorder %v4989_v50, 0.0 }
 0x182   : > { %v888_v45 = vpop.f32.mrf.mxu2  ;;  %v1000_v23 = vpop.f32.mrf.mxu3  ;;  %v1607_v27 = vmul.f32 %v1606_v48, %v4948_v0  ;;  %v1615_v1 = vmul.f32 %v3822_v53, %v1614_v29 }
 0x183   : > { %v917_v30 = vmul.f32 %v888_v45, %v888_v45  ;;  %v657_v14 = vpop.permute.xlu1 %656  ;;  %v1255_v48 = vpop.f32.mrf.mxu0 }
 0x184   : > { %v1609_v16 = vsel %vm1608_vm11, %v4948_v0, %v1607_v27  ;;  %705 = vst.msk [vmem:[%s4776_s23 + $0x48] sm:$0xff] %vm695_vm5, %v657_v14  ;;  %v1616_v56 = vmul.f32 0.5, %v1615_v1  ;;  %v543_v1 = vmul.f32 %v4649_v46, %v4649_v46 }
 0x185   : > { %v936_v32 = vadd.f32 %v917_v30, %v540_v3  ;;  %v1612_v57 = vsel %vm1610_vm12, %v1611_v7, %v1609_v16  ;;  %v1041_v4 = vpop.permute.xlu2 %1040 }
 0x186   : > { %3637 = vmatmul.msk.f32.gmra.mxu2 %vm394_vm0, %v1612_v57  ;;  %1095 = vst.msk [vmem:[%s4776_s23 + $0x18] sm:$0xff] %vm1091_vm3, %v1041_v4  ;;  %v1617_v9 = vsub.f32 1.5, %v1616_v56  ;;  %v1278_v56 = vmul.f32 %v1255_v48, %v1255_v48  ;;  %v1712_v4 = vld [vmem:[%s4712_s21 + $0x78] sm:$0xff] }
 0x187   : > { %v3824_v47 = vpop.eup %3823  ;;  %v5009_v11 = vadd.f32 %v1275_v51, %v936_v32  ;;  %3657 = vmatmul.msk.f32.gmra.mxu3 %vm394_vm0, %v1709_v49 }
 0x188   : > { %v1331_v15 = vpop.f32.mrf.mxu1  ;;  %v1618_v12 = vmul.f32 %v3822_v53, %v1617_v9  ;;  %v1626_v0 = vmul.f32 %v3824_v47, %v4989_v50 }
 0x189   : > { %3825 = vrsqrt.f32 %v5009_v11  ;;  %1062 = vrot.lane.b32.xlu1 %v1000_v23, %s4051_s27  ;;  %1402 = vrot.lane.b32.xlu2 %v1331_v15, %s4053_s25  ;;  %vm1644_vm2 = vcmp.eq.f32.partialorder %v5009_v11, inf  ;;  %v1647_v49 = vand.u32 2147483648, %v5009_v11  ;;  %vm1646_vm4 = vcmp.eq.f32.partialorder %v5009_v11, 0.0 }
 0x18a   : > { %v891_v17 = vpop.f32.mrf.mxu2  ;;  %v1003_v58 = vpop.f32.mrf.mxu3  ;;  %v1619_v52 = vmul.f32 %v1618_v12, %v4966_v60  ;;  %v1627_v5 = vmul.f32 %v3824_v47, %v1626_v0 }
 0x18b   : > { %v918_v20 = vmul.f32 %v891_v17, %v891_v17 }
 0x18c   : > { %v1621_v31 = vsel %vm1620_vm13, %v4966_v60, %v1619_v52  ;;  %v1628_v62 = vmul.f32 0.5, %v1627_v5  ;;  %v544_v5 = vmul.f32 %v4668_v59, %v4668_v59 }
 0x18d   : > { %v937_v26 = vadd.f32 %v918_v20, %v541_v6  ;;  %v1037_v13 = vpop.permute.xlu0 %1036  ;;  %v1624_v21 = vsel %vm1622_vm14, %v1623_v33, %v1621_v31  ;;  %v665_v18 = vpop.permute.xlu2 %664  ;;  %vm1449_vm14 = vcmask 1048320  }
 0x18e   : > { %1093 = vst.msk [vmem:[%s4776_s23 + $0x8] sm:$0xff] %vm1091_vm3, %v1037_v13  ;;  %3638 = vmatmul.msk.f32.gmra.mxu2 %vm394_vm0, %v1624_v21  ;;  %v1629_v10 = vsub.f32 1.5, %v1628_v62  ;;  %v1713_v21 = vld [vmem:[%s4712_s21 + $0x80] sm:$0xff] }
 0x18f   : > { %v3826_v34 = vpop.eup %3825  ;;  %v5030_v36 = vadd.f32 %v1276_v22, %v937_v26  ;;  %3658 = vmatmul.msk.f32.gmra.mxu3 %vm394_vm0, %v1710_v28  ;;  %709 = vst.msk [vmem:[%s4776_s23 + $0x68] sm:$0xff] %vm695_vm5, %v665_v18 }
 0x190   : > { %v1334_v60 = vpop.f32.mrf.mxu1  ;;  %v1630_v2 = vmul.f32 %v3824_v47, %v1629_v10  ;;  %v1638_v19 = vmul.f32 %v3826_v34, %v5009_v11 }
 0x191   : > { %3827 = vrsqrt.f32 %v5030_v36  ;;  %1064 = vrot.lane.b32.xlu2 %v1003_v58, %s4051_s27  ;;  %1404 = vrot.lane.b32.xlu0 %v1334_v60, %s4053_s25  ;;  %vm1656_vm6 = vcmp.eq.f32.partialorder %v5030_v36, inf  ;;  %v1659_v28 = vand.u32 2147483648, %v5030_v36  ;;  %vm1658_vm7 = vcmp.eq.f32.partialorder %v5030_v36, 0.0 }
 0x192   : > { %v894_v38 = vpop.f32.mrf.mxu2  ;;  %v1006_v39 = vpop.f32.mrf.mxu3  ;;  %v1631_v25 = vmul.f32 %v1630_v2, %v4989_v50  ;;  %v1639_v41 = vmul.f32 %v3826_v34, %v1638_v19 }
 0x193   : > { %v919_v42 = vmul.f32 %v894_v38, %v894_v38 }
 0x194   : > { %v1633_v24 = vsel %vm1632_vm15, %v4989_v50, %v1631_v25  ;;  %v1640_v37 = vmul.f32 0.5, %v1639_v41 }
 0x195   : > { %v938_v35 = vadd.f32 %v919_v42, %v542_v8  ;;  %v1039_v53 = vpop.permute.xlu1 %1038  ;;  %v1636_v61 = vsel %vm1634_vm1, %v1635_v44, %v1633_v24 }
 0x196   : > { %1094 = vst.msk [vmem:[%s4776_s23 + $0x10] sm:$0xff] %vm1091_vm3, %v1039_v53  ;;  %3639 = vmatmul.msk.f32.gmra.mxu2 %vm394_vm0, %v1636_v61  ;;  %v1641_v29 = vsub.f32 1.5, %v1640_v37  ;;  %v661_v55 = vpop.permute.xlu0 %660  ;;  %v5113_v53 = vld [vmem:[%s5863_s6] ss:$0 sm:$0xff] }
 0x197   : > { %v3828_v3 = vpop.eup %3827  ;;  %v5050_v45 = vadd.f32 %v1277_v40, %v938_v35  ;;  %3659 = vmatmul.msk.f32.gmra.mxu3 %vm394_vm0, %v1711_v43  ;;  %707 = vst.msk [vmem:[%s4776_s23 + $0x58] sm:$0xff] %vm695_vm5, %v661_v55  ;;  %v1714_v40 = vld [vmem:[%s4712_s21 + $0x88] sm:$0xff] }
 0x198   : > { %v1337_v50 = vpop.f32.mrf.mxu1  ;;  %v1642_v23 = vmul.f32 %v3826_v34, %v1641_v29  ;;  %v1650_v27 = vmul.f32 %v3828_v3, %v5030_v36 }
 0x199   : > { %3829 = vrsqrt.f32 %v5050_v45  ;;  %1066 = vrot.lane.b32.xlu0 %v1006_v39, %s4051_s27  ;;  %1406 = vrot.lane.b32.xlu1 %v1337_v50, %s4053_s25  ;;  %vm1668_vm8 = vcmp.eq.f32.partialorder %v5050_v45, inf  ;;  %v1671_v25 = vand.u32 2147483648, %v5050_v45  ;;  %vm1670_vm9 = vcmp.eq.f32.partialorder %v5050_v45, 0.0 }
 0x19a   : > { %v897_v30 = vpop.f32.mrf.mxu2  ;;  %v1009_v51 = vpop.f32.mrf.mxu3  ;;  %v1643_v7 = vmul.f32 %v1642_v23, %v5009_v11  ;;  %v1651_v14 = vmul.f32 %v3828_v3, %v1650_v27  ;;  %v2397_v27 = vld [vmem:[%s5864_s7] sm:$0xff] }
 0x19b   : > { %v920_v16 = vmul.f32 %v897_v30, %v897_v30  ;;  %2481 = vmatpush.msra.mxu0 %v2397_v27 }
 0x19c   : > { %v1645_v32 = vsel %vm1644_vm2, %v5009_v11, %v1643_v7  ;;  %v1652_v57 = vmul.f32 0.5, %v1651_v14  ;;  %v1258_v11 = vpop.f32.mrf.mxu0  ;;  %v1715_v7 = vld [vmem:[%s4712_s21 + $0x90] sm:$0xff] }
 0x19d   : > { %v939_v46 = vadd.f32 %v920_v16, %v543_v1  ;;  %v1648_v9 = vsel %vm1646_vm4, %v1647_v49, %v1645_v32  ;;  %v1047_v47 = vpop.permute.xlu2 %1046  ;;  %v663_v12 = vpop.permute.xlu1 %662  ;;  %v1279_v62 = vmul.f32 %v1258_v11, %v1258_v11 }
 0x19e   : > { %3640 = vmatmul.msk.f32.gmra.mxu2 %vm394_vm0, %v1648_v9  ;;  %1098 = vst.msk [vmem:[%s4776_s23 + $0x30] sm:$0xff] %vm1091_vm3, %v1047_v47  ;;  %v1653_v15 = vsub.f32 1.5, %v1652_v57 }
 0x19f   : > { %v3830_v0 = vpop.eup %3829  ;;  %v5070_v6 = vadd.f32 %v1278_v56, %v939_v46  ;;  %3660 = vmatmul.msk.f32.gmra.mxu3 %vm394_vm0, %v1712_v4  ;;  %708 = vst.msk [vmem:[%s4776_s23 + $0x60] sm:$0xff] %vm695_vm5, %v663_v12 }
 0x1a0   : > { %v1340_v17 = vpop.f32.mrf.mxu1  ;;  %v1654_v58 = vmul.f32 %v3828_v3, %v1653_v15  ;;  %v1662_v52 = vmul.f32 %v3830_v0, %v5050_v45 }
 0x1a1   : > { %3831 = vrsqrt.f32 %v5070_v6  ;;  %1068 = vrot.lane.b32.xlu1 %v1009_v51, %s4051_s27  ;;  %1408 = vrot.lane.b32.xlu2 %v1340_v17, %s4053_s25  ;;  %vm1680_vm10 = vcmp.eq.f32.partialorder %v5070_v6, inf  ;;  %v1683_v23 = vand.u32 2147483648, %v5070_v6  ;;  %vm1682_vm11 = vcmp.eq.f32.partialorder %v5070_v6, 0.0 }
 0x1a2   : > { %v900_v20 = vpop.f32.mrf.mxu2  ;;  %v1012_v22 = vpop.f32.mrf.mxu3  ;;  %v1655_v33 = vmul.f32 %v1654_v58, %v5030_v36  ;;  %v1663_v31 = vmul.f32 %v3830_v0, %v1662_v52 }
 0x1a3   : > { %v921_v63 = vmul.f32 %v900_v20, %v900_v20 }
 0x1a4   : > { %v1657_v26 = vsel %vm1656_vm6, %v5030_v36, %v1655_v33  ;;  %v1664_v13 = vmul.f32 0.5, %v1663_v31 }
 0x1a5   : > { %v940_v59 = vadd.f32 %v921_v63, %v544_v5  ;;  %v1660_v10 = vsel %vm1658_vm7, %v1659_v28, %v1657_v26  ;;  %v1043_v18 = vpop.permute.xlu0 %1042  ;;  %v671_v34 = vpop.permute.xlu2 %670 }
 0x1a6   : > { %3641 = vmatmul.msk.f32.gmra.mxu2 %vm394_vm0, %v1660_v10  ;;  %1096 = vst.msk [vmem:[%s4776_s23 + $0x20] sm:$0xff] %vm1091_vm3, %v1043_v18  ;;  %v1665_v54 = vsub.f32 1.5, %v1664_v13 }
 0x1a7   : > { %v3832_v60 = vpop.eup %3831  ;;  %v5090_v2 = vadd.f32 %v1279_v62, %v940_v59  ;;  %3661 = vmatmul.msk.f32.gmra.mxu3 %vm394_vm0, %v1713_v21  ;;  %712 = vst.msk [vmem:[%s4776_s23 + $0x80] sm:$0xff] %vm695_vm5, %v671_v34 }
 0x1a8   : > { %v1666_v36 = vmul.f32 %v3830_v0, %v1665_v54  ;;  %v1674_v19 = vmul.f32 %v3832_v60, %v5070_v6 }
 0x1a9   : > { %3833 = vrsqrt.f32 %v5090_v2  ;;  %1070 = vrot.lane.b32.xlu2 %v1012_v22, %s4051_s27  ;;  %vm1692_vm12 = vcmp.eq.f32.partialorder %v5090_v2, inf  ;;  %v1695_v15 = vand.u32 2147483648, %v5090_v2  ;;  %vm1694_vm13 = vcmp.eq.f32.partialorder %v5090_v2, 0.0 }
 0x1aa   : > { %v1667_v8 = vmul.f32 %v1666_v36, %v5050_v45  ;;  %v1937_v38 = vpop.f32.mrf.mxu3  ;;  %v1675_v39 = vmul.f32 %v3832_v60, %v1674_v19 }
 0x1ac   : > { %v1669_v41 = vsel %vm1668_vm8, %v5050_v45, %v1667_v8  ;;  %v1676_v42 = vmul.f32 0.5, %v1675_v39 }
 0x1ad   : > { %v1672_v44 = vsel %vm1670_vm9, %v1671_v25, %v1669_v41  ;;  %v1045_v24 = vpop.permute.xlu1 %1044  ;;  %v667_v43 = vpop.permute.xlu0 %666 }
 0x1ae   : > { %3642 = vmatmul.msk.f32.gmra.mxu2 %vm394_vm0, %v1672_v44  ;;  %1097 = vst.msk [vmem:[%s4776_s23 + $0x28] sm:$0xff] %vm1091_vm3, %v1045_v24  ;;  %v1677_v37 = vsub.f32 1.5, %v1676_v42 }
 0x1af   : > { %v3834_v35 = vpop.eup %3833  ;;  %3662 = vmatmul.msk.f32.gmra.mxu3 %vm394_vm0, %v1714_v40  ;;  %710 = vst.msk [vmem:[%s4776_s23 + $0x70] sm:$0xff] %vm695_vm5, %v667_v43 }
 0x1b0   : > { %v1678_v61 = vmul.f32 %v3832_v60, %v1677_v37  ;;  %v1686_v48 = vmul.f32 %v3834_v35, %v5090_v2 }
 0x1b1   : > { %v1806_v29 = vpop.f32.mrf.mxu2 }
 0x1b2   : > { %v1938_v55 = vadd.f32 %v1937_v38, %v1806_v29  ;;  %v1679_v3 = vmul.f32 %v1678_v61, %v5070_v6  ;;  %v1940_v45 = vpop.f32.mrf.mxu3  ;;  %v1687_v50 = vmul.f32 %v3834_v35, %v1686_v48 }
 0x1b4   : > { %v5123_v1 = vadd.f32 %v5113_v53, %v1938_v55  ;;  %v1681_v30 = vsel %vm1680_vm10, %v5070_v6, %v1679_v3  ;;  %v1688_v51 = vmul.f32 0.5, %v1687_v50 }
 0x1b5   : > { %v1684_v14 = vsel %vm1682_vm11, %v1683_v23, %v1681_v30  ;;  %v1053_v16 = vpop.permute.xlu2 %1052  ;;  %v669_v32 = vpop.permute.xlu1 %668 }
 0x1b6   : > { %v3664_v56 = vmul.f32 -1.442695, %v5123_v1  ;;  %3643 = vmatmul.msk.f32.gmra.mxu2 %vm394_vm0, %v1684_v14  ;;  %1101 = vst.msk [vmem:[%s4776_s23 + $0x48] sm:$0xff] %vm1091_vm3, %v1053_v16  ;;  %v1689_v49 = vsub.f32 1.5, %v1688_v51 }
 0x1b7   : > { %3663 = vmatmul.msk.f32.gmra.mxu3 %vm394_vm0, %v1715_v7  ;;  %711 = vst.msk [vmem:[%s4776_s23 + $0x78] sm:$0xff] %vm695_vm5, %v669_v32 }
 0x1b8   : > { %3835 = vpow2.f32 %v3664_v56  ;;  %v1690_v57 = vmul.f32 %v3834_v35, %v1689_v49 }
 0x1b9   : > { %v1809_v4 = vpop.f32.mrf.mxu2 }
 0x1ba   : > { %v1941_v46 = vadd.f32 %v1940_v45, %v1809_v4  ;;  %v1691_v9 = vmul.f32 %v1690_v57, %v5090_v2  ;;  %v1943_v47 = vpop.f32.mrf.mxu3 }
 0x1bc   : > { %v5139_v12 = vadd.f32 %v5113_v53, %v1941_v46  ;;  %v1693_v0 = vsel %vm1692_vm12, %v5090_v2, %v1691_v9 }
 0x1bd   : > { %v1696_v6 = vsel %vm1694_vm13, %v1695_v15, %v1693_v0  ;;  %v1049_v17 = vpop.permute.xlu0 %1048 }
 0x1be   : > { %v3836_v11 = vpop.eup %3835  ;;  %v3665_v58 = vmul.f32 -1.442695, %v5139_v12  ;;  %3644 = vmatmul.msk.f32.gmra.mxu2 %vm394_vm0, %v1696_v6  ;;  %1099 = vst.msk [vmem:[%s4776_s23 + $0x38] sm:$0xff] %vm1091_vm3, %v1049_v17 }
 0x1bf   : > { %v2074_v52 = vadd.f32 1.0, %v3836_v11 }
 0x1c0   : > { %3837 = vpow2.f32 %v3665_v58 }
 0x1c1   : > { %3839 = vrcp.f32 %v2074_v52  ;;  %v1812_v5 = vpop.f32.mrf.mxu2  ;;  %v2104_v34 = vand.u32 2147483648, %v2074_v52  ;;  %v2102_v36 = vand.u32 2147483647, %v2074_v52  ;;  %vm2098_vm1 = vweird.f32 %v2074_v52 }
 0x1c2   : > { %v1944_v20 = vadd.f32 %v1943_v47, %v1812_v5  ;;  %v1946_v22 = vpop.f32.mrf.mxu3 }
 0x1c3   : > { %v2105_v42 = vor.u32 1.1754944e-38, %v2104_v34  ;;  %vm2103_vm4 = vcmp.eq.f32.partialorder %v2102_v36, 8.507059e+37 }
 0x1c4   : > { %v5148_v33 = vadd.f32 %v5113_v53, %v1944_v20 }
 0x1c5   : > { %v1051_v31 = vpop.permute.xlu1 %1050  ;;  %v673_v28 = vpop.permute.xlu0 %672 }
 0x1c6   : > { %v3838_v63 = vpop.eup %3837  ;;  %v3666_v62 = vmul.f32 -1.442695, %v5148_v33  ;;  %1100 = vst.msk [vmem:[%s4776_s23 + $0x40] sm:$0xff] %vm1091_vm3, %v1051_v31 }
 0x1c7   : > { %v3840_v26 = vpop.eup %3839  ;;  %v2075_v13 = vadd.f32 1.0, %v3838_v63  ;;  %713 = vst.msk [vmem:[%s4776_s23 + $0x88] sm:$0xff] %vm695_vm5, %v673_v28 }
 0x1c8   : > { %v2094_v21 = vmul.f32 %v3840_v26, %v2074_v52  ;;  %3841 = vpow2.f32 %v3666_v62  ;;  %vm2099_vm15 = vweird.f32 %v3840_v26 }
 0x1c9   : > { %3843 = vrcp.f32 %v2075_v13  ;;  %v1815_v59 = vpop.f32.mrf.mxu2  ;;  %vm2100_vm2 = vmor %vm2098_vm1, %vm2099_vm15  ;;  %v2119_v55 = vand.u32 2147483648, %v2075_v13  ;;  %v2117_v23 = vand.u32 2147483647, %v2075_v13  ;;  %vm2113_vm7 = vweird.f32 %v2075_v13 }
 0x1ca   : > { %v2095_v10 = vsub.f32 1.0, %v2094_v21  ;;  %v1947_v18 = vadd.f32 %v1946_v22, %v1815_v59  ;;  %v1949_v54 = vpop.f32.mrf.mxu3 }
 0x1cb   : > { %v1397_v60 = vpop.permute.xlu2 %1396  ;;  %v2120_v14 = vor.u32 1.1754944e-38, %v2119_v55  ;;  %vm2118_vm9 = vcmp.eq.f32.partialorder %v2117_v23, 8.507059e+37 }
 0x1cc   : > { %v2096_v2 = vmul.f32 %v3840_v26, %v2095_v10  ;;  %v5156_v19 = vadd.f32 %v5113_v53, %v1947_v18  ;;  %1452 = vst.msk [vmem:[%s4776_s23 + $0x10] sm:$0xff] %vm1449_vm14, %v1397_v60 }
 0x1cd   : > { %v675_v8 = vpop.permute.xlu1 %674 }
 0x1ce   : > { %v3842_v38 = vpop.eup %3841  ;;  %v2097_v39 = vadd.f32 %v3840_v26, %v2096_v2  ;;  %v3667_v25 = vmul.f32 -1.442695, %v5156_v19  ;;  %714 = vst.msk [vmem:[%s4776_s23 + $0x90] sm:$0xff] %vm695_vm5, %v675_v8 }
 0x1cf   : > { %v3844_v41 = vpop.eup %3843  ;;  %v2076_v40 = vadd.f32 1.0, %v3842_v38 }
 0x1d0   : > { %v2101_v44 = vsel %vm2100_vm2, %v3840_v26, %v2097_v39  ;;  %v2109_v24 = vmul.f32 %v3844_v41, %v2075_v13  ;;  %3845 = vpow2.f32 %v3667_v25  ;;  %vm2114_vm6 = vweird.f32 %v3844_v41 }
 0x1d1   : > { %v2106_v37 = vsel %vm2103_vm4, %v2105_v42, %v2101_v44  ;;  %3847 = vrcp.f32 %v2076_v40  ;;  %v1818_v43 = vpop.f32.mrf.mxu2  ;;  %vm2115_vm8 = vmor %vm2113_vm7, %vm2114_vm6  ;;  %v2134_v15 = vand.u32 2147483648, %v2076_v40  ;;  %v2132_v11 = vand.u32 2147483647, %v2076_v40 }
 0x1d2   : > { %v2378_v35 = vmul.f32 %v2106_v37, %v5123_v1  ;;  %v2110_v61 = vsub.f32 1.0, %v2109_v24  ;;  %v1950_v48 = vadd.f32 %v1949_v54, %v1818_v43  ;;  %v1952_v29 = vpop.f32.mrf.mxu3  ;;  %vm2128_vm11 = vweird.f32 %v2076_v40 }
 0x1d3   : > { %v1393_v3 = vpop.permute.xlu0 %1392  ;;  %v1059_v45 = vpop.permute.xlu2 %1058  ;;  %v2135_v22 = vor.u32 1.1754944e-38, %v2134_v15  ;;  %vm2133_vm13 = vcmp.eq.f32.partialorder %v2132_v11, 8.507059e+37 }
 0x1d4   : > { %v2111_v50 = vmul.f32 %v3844_v41, %v2110_v61  ;;  %v5165_v27 = vadd.f32 %v5113_v53, %v1950_v48  ;;  %1450 = vst.msk [vmem:[%s4776_s23] sm:$0xff] %vm1449_vm14, %v1393_v3  ;;  %3683 = vmatmul.msk.f32.vlgmr.msra.gmra.mxu0 %vm394_vm0, %v2378_v35 }
 0x1d5   : > { %1104 = vst.msk [vmem:[%s4776_s23 + $0x60] sm:$0xff] %vm1091_vm3, %v1059_v45 }
 0x1d6   : > { %v3846_v30 = vpop.eup %3845  ;;  %v2112_v1 = vadd.f32 %v3844_v41, %v2111_v50  ;;  %v3668_v51 = vmul.f32 -1.442695, %v5165_v27 }
 0x1d7   : > { %v3848_v7 = vpop.eup %3847  ;;  %v2077_v16 = vadd.f32 1.0, %v3846_v30 }
 0x1d8   : > { %v2116_v56 = vsel %vm2115_vm8, %v3844_v41, %v2112_v1  ;;  %v2124_v49 = vmul.f32 %v3848_v7, %v2076_v40  ;;  %3849 = vpow2.f32 %v3668_v51  ;;  %vm2129_vm10 = vweird.f32 %v3848_v7 }
 0x1d9   : > { %v2121_v32 = vsel %vm2118_vm9, %v2120_v14, %v2116_v56  ;;  %3851 = vrcp.f32 %v2077_v16  ;;  %v1821_v57 = vpop.f32.mrf.mxu2  ;;  %vm2130_vm12 = vmor %vm2128_vm11, %vm2129_vm10  ;;  %v2149_v18 = vand.u32 2147483648, %v2077_v16  ;;  %v2147_v2 = vand.u32 2147483647, %v2077_v16 }
 0x1da   : > { %v2379_v4 = vmul.f32 %v2121_v32, %v5139_v12  ;;  %v2125_v46 = vsub.f32 1.0, %v2124_v49  ;;  %v1953_v9 = vadd.f32 %v1952_v29, %v1821_v57  ;;  %v1955_v47 = vpop.f32.mrf.mxu3  ;;  %vm2143_vm1 = vweird.f32 %v2077_v16 }
 0x1db   : > { %v1055_v0 = vpop.permute.xlu0 %1054  ;;  %v1395_v6 = vpop.permute.xlu1 %1394  ;;  %v2150_v25 = vor.u32 1.1754944e-38, %v2149_v18  ;;  %vm2148_vm4 = vcmp.eq.f32.partialorder %v2147_v2, 8.507059e+37 }
 0x1dc   : > { %v2126_v17 = vmul.f32 %v3848_v7, %v2125_v46  ;;  %v5175_v58 = vadd.f32 %v5113_v53, %v1953_v9  ;;  %1102 = vst.msk [vmem:[%s4776_s23 + $0x50] sm:$0xff] %vm1091_vm3, %v1055_v0  ;;  %3684 = vmatmul.msk.f32.gmra.mxu0 %vm394_vm0, %v2379_v4 }
 0x1dd   : > { %1451 = vst.msk [vmem:[%s4776_s23 + $0x8] sm:$0xff] %vm1449_vm14, %v1395_v6 }
 0x1de   : > { %v3850_v52 = vpop.eup %3849  ;;  %v2127_v12 = vadd.f32 %v3848_v7, %v2126_v17  ;;  %v3669_v5 = vmul.f32 -1.442695, %v5175_v58 }
 0x1df   : > { %v3852_v20 = vpop.eup %3851  ;;  %v2078_v31 = vadd.f32 1.0, %v3850_v52 }
 0x1e0   : > { %v2131_v63 = vsel %vm2130_vm12, %v3848_v7, %v2127_v12  ;;  %v2139_v62 = vmul.f32 %v3852_v20, %v2077_v16  ;;  %3853 = vpow2.f32 %v3669_v5  ;;  %vm2144_vm15 = vweird.f32 %v3852_v20 }
 0x1e1   : > { %v2136_v28 = vsel %vm2133_vm13, %v2135_v22, %v2131_v63  ;;  %3855 = vrcp.f32 %v2078_v31  ;;  %v1824_v26 = vpop.f32.mrf.mxu2  ;;  %vm2145_vm2 = vmor %vm2143_vm1, %vm2144_vm15  ;;  %v2164_v48 = vand.u32 2147483648, %v2078_v31  ;;  %v2162_v45 = vand.u32 2147483647, %v2078_v31 }
 0x1e2   : > { %v2380_v13 = vmul.f32 %v2136_v28, %v5148_v33  ;;  %v2140_v21 = vsub.f32 1.0, %v2139_v62  ;;  %v1956_v59 = vadd.f32 %v1955_v47, %v1824_v26  ;;  %v1958_v10 = vpop.f32.mrf.mxu3  ;;  %vm2158_vm7 = vweird.f32 %v2078_v31 }
 0x1e3   : > { %v1057_v54 = vpop.permute.xlu1 %1056  ;;  %v1403_v34 = vpop.permute.xlu2 %1402  ;;  %v2165_v51 = vor.u32 1.1754944e-38, %v2164_v48  ;;  %vm2163_vm9 = vcmp.eq.f32.partialorder %v2162_v45, 8.507059e+37 }
 0x1e4   : > { %v2141_v60 = vmul.f32 %v3852_v20, %v2140_v21  ;;  %v5185_v36 = vadd.f32 %v5113_v53, %v1956_v59  ;;  %1103 = vst.msk [vmem:[%s4776_s23 + $0x58] sm:$0xff] %vm1091_vm3, %v1057_v54  ;;  %3685 = vmatmul.msk.f32.gmra.mxu0 %vm394_vm0, %v2380_v13 }
 0x1e5   : > { %1455 = vst.msk [vmem:[%s4776_s23 + $0x28] sm:$0xff] %vm1449_vm14, %v1403_v34 }
 0x1e6   : > { %v3854_v8 = vpop.eup %3853  ;;  %v2142_v33 = vadd.f32 %v3852_v20, %v2141_v60  ;;  %v3670_v38 = vmul.f32 -1.442695, %v5185_v36 }
 0x1e7   : > { %v3856_v39 = vpop.eup %3855  ;;  %v2079_v41 = vadd.f32 1.0, %v3854_v8 }
 0x1e8   : > { %v2146_v42 = vsel %vm2145_vm2, %v3852_v20, %v2142_v33  ;;  %v2154_v40 = vmul.f32 %v3856_v39, %v2078_v31  ;;  %3857 = vpow2.f32 %v3670_v38  ;;  %vm2159_vm6 = vweird.f32 %v3856_v39 }
 0x1e9   : > { %v2151_v44 = vsel %vm2148_vm4, %v2150_v25, %v2146_v42  ;;  %3859 = vrcp.f32 %v2079_v41  ;;  %v1827_v24 = vpop.f32.mrf.mxu2  ;;  %vm2160_vm8 = vmor %vm2158_vm7, %vm2159_vm6  ;;  %v2179_v9 = vand.u32 2147483648, %v2079_v41  ;;  %v2177_v6 = vand.u32 2147483647, %v2079_v41 }
 0x1ea   : > { %v2381_v37 = vmul.f32 %v2151_v44, %v5156_v19  ;;  %v2155_v43 = vsub.f32 1.0, %v2154_v40  ;;  %v1959_v35 = vadd.f32 %v1958_v10, %v1827_v24  ;;  %v1961_v61 = vpop.f32.mrf.mxu3  ;;  %vm2173_vm11 = vweird.f32 %v2079_v41 }
 0x1eb   : > { %v1399_v29 = vpop.permute.xlu0 %1398  ;;  %v1065_v55 = vpop.permute.xlu2 %1064  ;;  %v2180_v5 = vor.u32 1.1754944e-38, %v2179_v9  ;;  %vm2178_vm13 = vcmp.eq.f32.partialorder %v2177_v6, 8.507059e+37 }
 0x1ec   : > { %v2156_v3 = vmul.f32 %v3856_v39, %v2155_v43  ;;  %v5195_v50 = vadd.f32 %v5113_v53, %v1959_v35  ;;  %1453 = vst.msk [vmem:[%s4776_s23 + $0x18] sm:$0xff] %vm1449_vm14, %v1399_v29  ;;  %3686 = vmatmul.msk.f32.gmra.mxu0 %vm394_vm0, %v2381_v37 }
 0x1ed   : > { %1107 = vst.msk [vmem:[%s4776_s23 + $0x78] sm:$0xff] %vm1091_vm3, %v1065_v55 }
 0x1ee   : > { %v3858_v23 = vpop.eup %3857  ;;  %v2157_v19 = vadd.f32 %v3856_v39, %v2156_v3  ;;  %v3671_v30 = vmul.f32 -1.442695, %v5195_v50 }
 0x1ef   : > { %v3860_v1 = vpop.eup %3859  ;;  %v2080_v7 = vadd.f32 1.0, %v3858_v23 }
 0x1f0   : > { %v2161_v14 = vsel %vm2160_vm8, %v3856_v39, %v2157_v19  ;;  %v2169_v16 = vmul.f32 %v3860_v1, %v2079_v41  ;;  %3861 = vpow2.f32 %v3671_v30  ;;  %vm2174_vm10 = vweird.f32 %v3860_v1 }
 0x1f1   : > { %v2166_v56 = vsel %vm2163_vm9, %v2165_v51, %v2161_v14  ;;  %3863 = vrcp.f32 %v2080_v7  ;;  %v1830_v49 = vpop.f32.mrf.mxu2  ;;  %vm2175_vm12 = vmor %vm2173_vm11, %vm2174_vm10  ;;  %v2194_v59 = vand.u32 2147483648, %v2080_v7  ;;  %v2192_v34 = vand.u32 2147483647, %v2080_v7 }
 0x1f2   : > { %v2382_v32 = vmul.f32 %v2166_v56, %v5165_v27  ;;  %v2170_v57 = vsub.f32 1.0, %v2169_v16  ;;  %v1962_v4 = vadd.f32 %v1961_v61, %v1830_v49  ;;  %v1964_v46 = vpop.f32.mrf.mxu3  ;;  %vm2188_vm1 = vweird.f32 %v2080_v7 }
 0x1f3   : > { %v1061_v47 = vpop.permute.xlu0 %1060  ;;  %v1401_v15 = vpop.permute.xlu1 %1400  ;;  %v2195_v38 = vor.u32 1.1754944e-38, %v2194_v59  ;;  %vm2193_vm4 = vcmp.eq.f32.partialorder %v2192_v34, 8.507059e+37 }
 0x1f4   : > { %v2171_v0 = vmul.f32 %v3860_v1, %v2170_v57  ;;  %v5205_v17 = vadd.f32 %v5113_v53, %v1962_v4  ;;  %1105 = vst.msk [vmem:[%s4776_s23 + $0x68] sm:$0xff] %vm1091_vm3, %v1061_v47  ;;  %3687 = vmatmul.msk.f32.gmra.mxu0 %vm394_vm0, %v2382_v32 }
 0x1f5   : > { %1454 = vst.msk [vmem:[%s4776_s23 + $0x20] sm:$0xff] %vm1449_vm14, %v1401_v15 }
 0x1f6   : > { %v3862_v11 = vpop.eup %3861  ;;  %v2172_v27 = vadd.f32 %v3860_v1, %v2171_v0  ;;  %v3672_v52 = vmul.f32 -1.442695, %v5205_v17 }
 0x1f7   : > { %v3864_v12 = vpop.eup %3863  ;;  %v2081_v20 = vadd.f32 1.0, %v3862_v11 }
 0x1f8   : > { %v2176_v22 = vsel %vm2175_vm12, %v3860_v1, %v2172_v27  ;;  %v2184_v31 = vmul.f32 %v3864_v12, %v2080_v7  ;;  %3865 = vpow2.f32 %v3672_v52  ;;  %vm2189_vm15 = vweird.f32 %v3864_v12 }
 0x1f9   : > { %v2181_v63 = vsel %vm2178_vm13, %v2180_v5, %v2176_v22  ;;  %3867 = vrcp.f32 %v2081_v20  ;;  %v1833_v62 = vpop.f32.mrf.mxu2  ;;  %vm2190_vm2 = vmor %vm2188_vm1, %vm2189_vm15  ;;  %v2209_v35 = vand.u32 2147483648, %v2081_v20  ;;  %v2207_v55 = vand.u32 2147483647, %v2081_v20 }
 0x1fa   : > { %v2383_v28 = vmul.f32 %v2181_v63, %v5175_v58  ;;  %v2185_v26 = vsub.f32 1.0, %v2184_v31  ;;  %v1965_v13 = vadd.f32 %v1964_v46, %v1833_v62  ;;  %v1967_v21 = vpop.f32.mrf.mxu3  ;;  %vm2203_vm7 = vweird.f32 %v2081_v20 }
 0x1fb   : > { %v1063_v10 = vpop.permute.xlu1 %1062  ;;  %v1409_v18 = vpop.permute.xlu2 %1408  ;;  %v2210_v30 = vor.u32 1.1754944e-38, %v2209_v35  ;;  %vm2208_vm9 = vcmp.eq.f32.partialorder %v2207_v55, 8.507059e+37 }
 0x1fc   : > { %v2186_v54 = vmul.f32 %v3864_v12, %v2185_v26  ;;  %v5215_v60 = vadd.f32 %v5113_v53, %v1965_v13  ;;  %1106 = vst.msk [vmem:[%s4776_s23 + $0x70] sm:$0xff] %vm1091_vm3, %v1063_v10  ;;  %3688 = vmatmul.msk.f32.gmra.mxu0 %vm394_vm0, %v2383_v28 }
 0x1fd   : > { %1458 = vst.msk [vmem:[%s4776_s23 + $0x40] sm:$0xff] %vm1449_vm14, %v1409_v18 }
 0x1fe   : > { %v3866_v2 = vpop.eup %3865  ;;  %v2187_v58 = vadd.f32 %v3864_v12, %v2186_v54  ;;  %v3673_v8 = vmul.f32 -1.442695, %v5215_v60 }
 0x1ff   : > { %v3868_v33 = vpop.eup %3867  ;;  %v2082_v39 = vadd.f32 1.0, %v3866_v2 }
 0x200   : > { %v2191_v25 = vsel %vm2190_vm2, %v3864_v12, %v2187_v58  ;;  %v2199_v41 = vmul.f32 %v3868_v33, %v2081_v20  ;;  %3869 = vpow2.f32 %v3673_v8  ;;  %vm2204_vm6 = vweird.f32 %v3868_v33 }
 0x201   : > { %v2196_v42 = vsel %vm2193_vm4, %v2195_v38, %v2191_v25  ;;  %3871 = vrcp.f32 %v2082_v39  ;;  %v1836_v40 = vpop.f32.mrf.mxu2  ;;  %vm2205_vm8 = vmor %vm2203_vm7, %vm2204_vm6  ;;  %v2224_v4 = vand.u32 2147483648, %v2082_v39  ;;  %v2222_v15 = vand.u32 2147483647, %v2082_v39 }
 0x202   : > { %v2384_v44 = vmul.f32 %v2196_v42, %v5185_v36  ;;  %v2200_v24 = vsub.f32 1.0, %v2199_v41  ;;  %v1968_v37 = vadd.f32 %v1967_v21, %v1836_v40  ;;  %v1970_v43 = vpop.f32.mrf.mxu3  ;;  %vm2218_vm11 = vweird.f32 %v2082_v39 }
 0x203   : > { %v1405_v61 = vpop.permute.xlu0 %1404  ;;  %v1071_v48 = vpop.permute.xlu2 %1070  ;;  %v2225_v52 = vor.u32 1.1754944e-38, %v2224_v4  ;;  %vm2223_vm13 = vcmp.eq.f32.partialorder %v2222_v15, 8.507059e+37 }
 0x204   : > { %v2201_v29 = vmul.f32 %v3868_v33, %v2200_v24  ;;  %v5225_v3 = vadd.f32 %v5113_v53, %v1968_v37  ;;  %1456 = vst.msk [vmem:[%s4776_s23 + $0x30] sm:$0xff] %vm1449_vm14, %v1405_v61  ;;  %3689 = vmatmul.msk.f32.gmra.mxu0 %vm394_vm0, %v2384_v44 }
 0x205   : > { %1110 = vst.msk [vmem:[%s4776_s23 + $0x90] sm:$0xff] %vm1091_vm3, %v1071_v48 }
 0x206   : > { %v3870_v45 = vpop.eup %3869  ;;  %v2202_v36 = vadd.f32 %v3868_v33, %v2201_v29  ;;  %v3674_v23 = vmul.f32 -1.442695, %v5225_v3 }
 0x207   : > { %v3872_v19 = vpop.eup %3871  ;;  %v2083_v1 = vadd.f32 1.0, %v3870_v45 }
 0x208   : > { %v2206_v51 = vsel %vm2205_vm8, %v3868_v33, %v2202_v36  ;;  %v2214_v7 = vmul.f32 %v3872_v19, %v2082_v39  ;;  %3873 = vpow2.f32 %v3674_v23  ;;  %vm2219_vm10 = vweird.f32 %v3872_v19 }
 0x209   : > { %v2211_v14 = vsel %vm2208_vm9, %v2210_v30, %v2206_v51  ;;  %3875 = vrcp.f32 %v2083_v1  ;;  %v1839_v16 = vpop.f32.mrf.mxu2  ;;  %vm2220_vm12 = vmor %vm2218_vm11, %vm2219_vm10  ;;  %v2239_v13 = vand.u32 2147483648, %v2083_v1  ;;  %v2237_v10 = vand.u32 2147483647, %v2083_v1 }
 0x20a   : > { %v2385_v56 = vmul.f32 %v2211_v14, %v5195_v50  ;;  %v2215_v49 = vsub.f32 1.0, %v2214_v7  ;;  %v1971_v32 = vadd.f32 %v1970_v43, %v1839_v16  ;;  %v1973_v57 = vpop.f32.mrf.mxu3  ;;  %vm2233_vm1 = vweird.f32 %v2083_v1 }
 0x20b   : > { %v1067_v46 = vpop.permute.xlu0 %1066  ;;  %v1407_v9 = vpop.permute.xlu1 %1406  ;;  %v2240_v58 = vor.u32 1.1754944e-38, %v2239_v13  ;;  %vm2238_vm4 = vcmp.eq.f32.partialorder %v2237_v10, 8.507059e+37 }
 0x20c   : > { %v2216_v47 = vmul.f32 %v3872_v19, %v2215_v49  ;;  %v5235_v0 = vadd.f32 %v5113_v53, %v1971_v32  ;;  %1108 = vst.msk [vmem:[%s4776_s23 + $0x80] sm:$0xff] %vm1091_vm3, %v1067_v46  ;;  %3690 = vmatmul.msk.f32.gmra.mxu0 %vm394_vm0, %v2385_v56 }
 0x20d   : > { %1457 = vst.msk [vmem:[%s4776_s23 + $0x38] sm:$0xff] %vm1449_vm14, %v1407_v9 }
 0x20e   : > { %v3874_v6 = vpop.eup %3873  ;;  %v2217_v50 = vadd.f32 %v3872_v19, %v2216_v47  ;;  %v3675_v11 = vmul.f32 -1.442695, %v5235_v0 }
 0x20f   : > { %v3876_v27 = vpop.eup %3875  ;;  %v2084_v12 = vadd.f32 1.0, %v3874_v6 }
 0x210   : > { %v2221_v5 = vsel %vm2220_vm12, %v3872_v19, %v2217_v50  ;;  %v2229_v20 = vmul.f32 %v3876_v27, %v2083_v1  ;;  %3877 = vpow2.f32 %v3675_v11  ;;  %vm2234_vm15 = vweird.f32 %v3876_v27 }
 0x211   : > { %v2226_v22 = vsel %vm2223_vm13, %v2225_v52, %v2221_v5  ;;  %3879 = vrcp.f32 %v2084_v12  ;;  %v1842_v31 = vpop.f32.mrf.mxu2  ;;  %vm2235_vm2 = vmor %vm2233_vm1, %vm2234_vm15  ;;  %v2254_v24 = vand.u32 2147483648, %v2084_v12  ;;  %v2252_v43 = vand.u32 2147483647, %v2084_v12 }
 0x212   : > { %v2386_v63 = vmul.f32 %v2226_v22, %v5205_v17  ;;  %v2230_v62 = vsub.f32 1.0, %v2229_v20  ;;  %v1974_v28 = vadd.f32 %v1973_v57, %v1842_v31  ;;  %v1976_v26 = vpop.f32.mrf.mxu3  ;;  %vm2248_vm7 = vweird.f32 %v2084_v12  ;;  %v1343_v57 = vpop.f32.mrf.mxu1 }
 0x213   : > { %v1069_v21 = vpop.permute.xlu1 %1068  ;;  %vm2253_vm9 = vcmp.eq.f32.partialorder %v2252_v43, 8.507059e+37  ;;  %1410 = vrot.lane.b32.xlu0 %v1343_v57, %s4053_s25 }
 0x214   : > { %v2231_v59 = vmul.f32 %v3876_v27, %v2230_v62  ;;  %v5245_v18 = vadd.f32 %v5113_v53, %v1974_v28  ;;  %1109 = vst.msk [vmem:[%s4776_s23 + $0x88] sm:$0xff] %vm1091_vm3, %v1069_v21  ;;  %3691 = vmatmul.msk.f32.gmra.mxu0 %vm394_vm0, %v2386_v63 }
 0x216   : > { %v3878_v54 = vpop.eup %3877  ;;  %v2232_v34 = vadd.f32 %v3876_v27, %v2231_v59  ;;  %v3676_v17 = vmul.f32 -1.442695, %v5245_v18 }
 0x217   : > { %v3880_v2 = vpop.eup %3879  ;;  %v2085_v8 = vadd.f32 1.0, %v3878_v54 }
 0x218   : > { %v2236_v33 = vsel %vm2235_vm2, %v3876_v27, %v2232_v34  ;;  %v2244_v38 = vmul.f32 %v3880_v2, %v2084_v12  ;;  %3881 = vpow2.f32 %v3676_v17  ;;  %vm2249_vm6 = vweird.f32 %v3880_v2 }
 0x219   : > { %v2241_v39 = vsel %vm2238_vm4, %v2240_v58, %v2236_v33  ;;  %3883 = vrcp.f32 %v2085_v8  ;;  %v1845_v25 = vpop.f32.mrf.mxu2  ;;  %vm2250_vm8 = vmor %vm2248_vm7, %vm2249_vm6  ;;  %v2269_v16 = vand.u32 2147483648, %v2085_v8  ;;  %v2267_v49 = vand.u32 2147483647, %v2085_v8 }
 0x21a   : > { %v2387_v41 = vmul.f32 %v2241_v39, %v5215_v60  ;;  %v2245_v42 = vsub.f32 1.0, %v2244_v38  ;;  %v1977_v40 = vadd.f32 %v1976_v26, %v1845_v25  ;;  %v1979_v44 = vpop.f32.mrf.mxu3  ;;  %v2255_v60 = vor.u32 1.1754944e-38, %v2254_v24  ;;  %v1346_v28 = vpop.f32.mrf.mxu1 }
 0x21b   : > { %vm2263_vm11 = vweird.f32 %v2085_v8  ;;  %v2270_v47 = vor.u32 1.1754944e-38, %v2269_v16  ;;  %vm2268_vm13 = vcmp.eq.f32.partialorder %v2267_v49, 8.507059e+37  ;;  %1412 = vrot.lane.b32.xlu1 %v1346_v28, %s4053_s25 }
 0x21c   : > { %v2246_v37 = vmul.f32 %v3880_v2, %v2245_v42  ;;  %v5253_v35 = vadd.f32 %v5113_v53, %v1977_v40  ;;  %3692 = vmatmul.msk.f32.gmra.mxu0 %vm394_vm0, %v2387_v41 }
 0x21e   : > { %v3882_v61 = vpop.eup %3881  ;;  %v2247_v48 = vadd.f32 %v3880_v2, %v2246_v37  ;;  %v3677_v29 = vmul.f32 -1.442695, %v5253_v35 }
 0x21f   : > { %v3884_v55 = vpop.eup %3883  ;;  %v2086_v45 = vadd.f32 1.0, %v3882_v61 }
 0x220   : > { %v2251_v36 = vsel %vm2250_vm8, %v3880_v2, %v2247_v48  ;;  %v2259_v23 = vmul.f32 %v3884_v55, %v2085_v8  ;;  %3885 = vpow2.f32 %v3677_v29  ;;  %vm2264_vm10 = vweird.f32 %v3884_v55 }
 0x221   : > { %v2256_v19 = vsel %vm2253_vm9, %v2255_v60, %v2251_v36  ;;  %3887 = vrcp.f32 %v2086_v45  ;;  %v1848_v30 = vpop.f32.mrf.mxu2  ;;  %vm2265_vm12 = vmor %vm2263_vm11, %vm2264_vm10  ;;  %v2284_v20 = vand.u32 2147483648, %v2086_v45  ;;  %v2282_v63 = vand.u32 2147483647, %v2086_v45 }
 0x222   : > { %v2388_v1 = vmul.f32 %v2256_v19, %v5225_v3  ;;  %v2260_v51 = vsub.f32 1.0, %v2259_v23  ;;  %v1980_v7 = vadd.f32 %v1979_v44, %v1848_v30  ;;  %v1982_v14 = vpop.f32.mrf.mxu3  ;;  %vm2278_vm1 = vweird.f32 %v2086_v45  ;;  %v1349_v42 = vpop.f32.mrf.mxu1 }
 0x223   : > { %v2285_v59 = vor.u32 1.1754944e-38, %v2284_v20  ;;  %vm2283_vm4 = vcmp.eq.f32.partialorder %v2282_v63, 8.507059e+37  ;;  %1414 = vrot.lane.b32.xlu2 %v1349_v42, %s4053_s25 }
 0x224   : > { %v2261_v56 = vmul.f32 %v3884_v55, %v2260_v51  ;;  %v5259_v32 = vadd.f32 %v5113_v53, %v1980_v7  ;;  %3693 = vmatmul.msk.f32.gmra.mxu0 %vm394_vm0, %v2388_v1 }
 0x226   : > { %v3886_v4 = vpop.eup %3885  ;;  %v2262_v46 = vadd.f32 %v3884_v55, %v2261_v56  ;;  %v3678_v3 = vmul.f32 -1.442695, %v5259_v32 }
 0x227   : > { %v3888_v9 = vpop.eup %3887  ;;  %v2087_v15 = vadd.f32 1.0, %v3886_v4 }
 0x228   : > { %v2266_v6 = vsel %vm2265_vm12, %v3884_v55, %v2262_v46  ;;  %v2274_v50 = vmul.f32 %v3888_v9, %v2086_v45  ;;  %3889 = vpow2.f32 %v3678_v3  ;;  %vm2279_vm15 = vweird.f32 %v3888_v9 }
 0x229   : > { %v2271_v11 = vsel %vm2268_vm13, %v2270_v47, %v2266_v6  ;;  %3891 = vrcp.f32 %v2087_v15  ;;  %v1851_v27 = vpop.f32.mrf.mxu2  ;;  %vm2280_vm2 = vmor %vm2278_vm1, %vm2279_vm15  ;;  %v2299_v38 = vand.u32 2147483648, %v2087_v15  ;;  %v2297_v25 = vand.u32 2147483647, %v2087_v15 }
 0x22a   : > { %v2389_v52 = vmul.f32 %v2271_v11, %v5235_v0  ;;  %v2275_v12 = vsub.f32 1.0, %v2274_v50  ;;  %v1983_v5 = vadd.f32 %v1982_v14, %v1851_v27  ;;  %v1985_v22 = vpop.f32.mrf.mxu3  ;;  %vm2293_vm7 = vweird.f32 %v2087_v15  ;;  %v1352_v7 = vpop.f32.mrf.mxu1 }
 0x22b   : > { %v2300_v43 = vor.u32 1.1754944e-38, %v2299_v38  ;;  %vm2298_vm9 = vcmp.eq.f32.partialorder %v2297_v25, 8.507059e+37  ;;  %1416 = vrot.lane.b32.xlu0 %v1352_v7, %s4053_s25 }
 0x22c   : > { %v2276_v31 = vmul.f32 %v3888_v9, %v2275_v12  ;;  %v5266_v62 = vadd.f32 %v5113_v53, %v1983_v5  ;;  %3694 = vmatmul.msk.f32.gmra.mxu0 %vm394_vm0, %v2389_v52 }
 0x22e   : > { %v3890_v26 = vpop.eup %3889  ;;  %v2277_v13 = vadd.f32 %v3888_v9, %v2276_v31  ;;  %v3679_v0 = vmul.f32 -1.442695, %v5266_v62 }
 0x22f   : > { %v3892_v21 = vpop.eup %3891  ;;  %v2088_v10 = vadd.f32 1.0, %v3890_v26 }
 0x230   : > { %v2281_v54 = vsel %vm2280_vm2, %v3888_v9, %v2277_v13  ;;  %v2289_v34 = vmul.f32 %v3892_v21, %v2087_v15  ;;  %3893 = vpow2.f32 %v3679_v0  ;;  %vm2294_vm6 = vweird.f32 %v3892_v21 }
 0x231   : > { %v2286_v17 = vsel %vm2283_vm4, %v2285_v59, %v2281_v54  ;;  %3895 = vrcp.f32 %v2088_v10  ;;  %v1854_v2 = vpop.f32.mrf.mxu2  ;;  %vm2295_vm8 = vmor %vm2293_vm7, %vm2294_vm6  ;;  %v2314_v19 = vand.u32 2147483648, %v2088_v10  ;;  %v2312_v1 = vand.u32 2147483647, %v2088_v10 }
 0x232   : > { %v2390_v58 = vmul.f32 %v2286_v17, %v5245_v18  ;;  %v2290_v8 = vsub.f32 1.0, %v2289_v34  ;;  %v1986_v33 = vadd.f32 %v1985_v22, %v1854_v2  ;;  %v1988_v40 = vpop.f32.mrf.mxu3  ;;  %vm2308_vm11 = vweird.f32 %v2088_v10  ;;  %v1355_v5 = vpop.f32.mrf.mxu1 }
 0x233   : > { %v2315_v49 = vor.u32 1.1754944e-38, %v2314_v19  ;;  %vm2313_vm13 = vcmp.eq.f32.partialorder %v2312_v1, 8.507059e+37  ;;  %1418 = vrot.lane.b32.xlu1 %v1355_v5, %s4053_s25 }
 0x234   : > { %v2291_v39 = vmul.f32 %v3892_v21, %v2290_v8  ;;  %v5273_v41 = vadd.f32 %v5113_v53, %v1986_v33  ;;  %3695 = vmatmul.msk.f32.gmra.mxu0 %vm394_vm0, %v2390_v58  ;;  %v5298_v58 = vld [vmem:[%s5865_s8] ss:$0 sm:$0xff] }
 0x236   : > { %v3894_v44 = vpop.eup %3893  ;;  %v2292_v24 = vadd.f32 %v3892_v21, %v2291_v39  ;;  %v3680_v18 = vmul.f32 -1.442695, %v5273_v41 }
 0x237   : > { %v3896_v37 = vpop.eup %3895  ;;  %v2089_v61 = vadd.f32 1.0, %v3894_v44 }
 0x238   : > { %v2296_v48 = vsel %vm2295_vm8, %v3892_v21, %v2292_v24  ;;  %v2304_v29 = vmul.f32 %v3896_v37, %v2088_v10  ;;  %3897 = vpow2.f32 %v3680_v18  ;;  %vm2309_vm10 = vweird.f32 %v3896_v37 }
 0x239   : > { %v2301_v55 = vsel %vm2298_vm9, %v2300_v43, %v2296_v48  ;;  %3899 = vrcp.f32 %v2089_v61  ;;  %v1857_v60 = vpop.f32.mrf.mxu2  ;;  %vm2310_vm12 = vmor %vm2308_vm11, %vm2309_vm10  ;;  %v2329_v11 = vand.u32 2147483648, %v2089_v61  ;;  %v2327_v52 = vand.u32 2147483647, %v2089_v61 }
 0x23a   : > { %v2391_v45 = vmul.f32 %v2301_v55, %v5253_v35  ;;  %v2305_v36 = vsub.f32 1.0, %v2304_v29  ;;  %v1989_v23 = vadd.f32 %v1988_v40, %v1857_v60  ;;  %v1991_v4 = vpop.f32.mrf.mxu3  ;;  %vm2323_vm1 = vweird.f32 %v2089_v61  ;;  %v1358_v34 = vpop.f32.mrf.mxu1 }
 0x23b   : > { %v2330_v63 = vor.u32 1.1754944e-38, %v2329_v11  ;;  %vm2328_vm4 = vcmp.eq.f32.partialorder %v2327_v52, 8.507059e+37  ;;  %1420 = vrot.lane.b32.xlu2 %v1358_v34, %s4053_s25 }
 0x23c   : > { %v2306_v30 = vmul.f32 %v3896_v37, %v2305_v36  ;;  %v5280_v51 = vadd.f32 %v5113_v53, %v1989_v23  ;;  %3696 = vmatmul.msk.f32.gmra.mxu0 %vm394_vm0, %v2391_v45 }
 0x23e   : > { %v3898_v14 = vpop.eup %3897  ;;  %v2307_v16 = vadd.f32 %v3896_v37, %v2306_v30  ;;  %v3681_v56 = vmul.f32 -1.442695, %v5280_v51 }
 0x23f   : > { %v3900_v35 = vpop.eup %3899  ;;  %v2090_v57 = vadd.f32 1.0, %v3898_v14 }
 0x240   : > { %v2311_v46 = vsel %vm2310_vm12, %v3896_v37, %v2307_v16  ;;  %v2319_v3 = vmul.f32 %v3900_v35, %v2089_v61  ;;  %3901 = vpow2.f32 %v3681_v56  ;;  %vm2324_vm15 = vweird.f32 %v3900_v35 }
 0x241   : > { %v2316_v9 = vsel %vm2313_vm13, %v2315_v49, %v2311_v46  ;;  %3903 = vrcp.f32 %v2090_v57  ;;  %v1860_v47 = vpop.f32.mrf.mxu2  ;;  %vm2325_vm2 = vmor %vm2323_vm1, %vm2324_vm15  ;;  %v2344_v59 = vand.u32 2147483648, %v2090_v57  ;;  %v2342_v54 = vand.u32 2147483647, %v2090_v57 }
 0x242   : > { %v2392_v15 = vmul.f32 %v2316_v9, %v5259_v32  ;;  %v2320_v6 = vsub.f32 1.0, %v2319_v3  ;;  %v1992_v50 = vadd.f32 %v1991_v4, %v1860_v47  ;;  %vm2338_vm7 = vweird.f32 %v2090_v57  ;;  %v1361_v48 = vpop.f32.mrf.mxu1 }
 0x243   : > { %vm2343_vm9 = vcmp.eq.f32.partialorder %v2342_v54, 8.507059e+37  ;;  %1422 = vrot.lane.b32.xlu0 %v1361_v48, %s4053_s25 }
 0x244   : > { %v2321_v27 = vmul.f32 %v3900_v35, %v2320_v6  ;;  %v5287_v12 = vadd.f32 %v5113_v53, %v1992_v50  ;;  %3697 = vmatmul.msk.f32.gmra.mxu0 %vm394_vm0, %v2392_v15 }
 0x246   : > { %v3902_v20 = vpop.eup %3901  ;;  %v2322_v22 = vadd.f32 %v3900_v35, %v2321_v27  ;;  %v3682_v31 = vmul.f32 -1.442695, %v5287_v12 }
 0x247   : > { %v3904_v32 = vpop.eup %3903  ;;  %v2091_v28 = vadd.f32 1.0, %v3902_v20 }
 0x248   : > { %v2326_v26 = vsel %vm2325_vm2, %v3900_v35, %v2322_v22  ;;  %v2334_v13 = vmul.f32 %v3904_v32, %v2090_v57  ;;  %3905 = vpow2.f32 %v3682_v31  ;;  %vm2339_vm6 = vweird.f32 %v3904_v32 }
 0x249   : > { %v2331_v53 = vsel %vm2328_vm4, %v2330_v63, %v2326_v26  ;;  %3907 = vrcp.f32 %v2091_v28  ;;  %vm2340_vm8 = vmor %vm2338_vm7, %vm2339_vm6  ;;  %v2359_v18 = vand.u32 2147483648, %v2091_v28  ;;  %v2357_v43 = vand.u32 2147483647, %v2091_v28 }
 0x24a   : > { %v2393_v0 = vmul.f32 %v2331_v53, %v5266_v62  ;;  %v2335_v21 = vsub.f32 1.0, %v2334_v13  ;;  %v2345_v62 = vor.u32 1.1754944e-38, %v2344_v59  ;;  %vm2353_vm11 = vweird.f32 %v2091_v28  ;;  %v1364_v49 = vpop.f32.mrf.mxu1 }
 0x24b   : > { %vm2358_vm13 = vcmp.eq.f32.partialorder %v2357_v43, 8.507059e+37  ;;  %1424 = vrot.lane.b32.xlu1 %v1364_v49, %s4053_s25 }
 0x24c   : > { %v2336_v10 = vmul.f32 %v3904_v32, %v2335_v21  ;;  %3698 = vmatmul.msk.f32.gmra.mxu0 %vm394_vm0, %v2393_v0 }
 0x24e   : > { %v3906_v17 = vpop.eup %3905  ;;  %v2337_v2 = vadd.f32 %v3904_v32, %v2336_v10 }
 0x24f   : > { %v3908_v8 = vpop.eup %3907  ;;  %v2092_v33 = vadd.f32 1.0, %v3906_v17 }
 0x250   : > { %v2341_v38 = vsel %vm2340_vm8, %v3904_v32, %v2337_v2  ;;  %v2349_v39 = vmul.f32 %v3908_v8, %v2091_v28  ;;  %vm2354_vm10 = vweird.f32 %v3908_v8 }
 0x251   : > { %v2346_v25 = vsel %vm2343_vm9, %v2345_v62, %v2341_v38  ;;  %3909 = vrcp.f32 %v2092_v33  ;;  %v2483_v42 = vpop.f32.mrf.mxu0  ;;  %vm2355_vm12 = vmor %vm2353_vm11, %vm2354_vm10  ;;  %v2374_v7 = vand.u32 2147483648, %v2092_v33  ;;  %v2372_v56 = vand.u32 2147483647, %v2092_v33 }
 0x252   : > { %v2394_v40 = vmul.f32 %v2346_v25, %v5273_v41  ;;  %v2350_v44 = vsub.f32 1.0, %v2349_v39  ;;  %v5302_v24 = vadd.f32 %v5298_v58, %v2483_v42  ;;  %v2360_v41 = vor.u32 1.1754944e-38, %v2359_v18  ;;  %v1367_v11 = vpop.f32.mrf.mxu1 }
 0x253   : > { %vm2368_vm1 = vweird.f32 %v2092_v33  ;;  %vm2373_vm4 = vcmp.eq.f32.partialorder %v2372_v56, 8.507059e+37  ;;  %1426 = vrot.lane.b32.xlu2 %v1367_v11, %s4053_s25  ;;  %vm2920_vm9 = vcmask 261120  }
 0x254   : > { %v2351_v37 = vmul.f32 %v3908_v8, %v2350_v44  ;;  %v3702_v61 = vmul.f32 -1.442695, %v5302_v24  ;;  %3699 = vmatmul.msk.f32.gmra.mxu0 %vm394_vm0, %v2394_v40 }
 0x256   : > { %v2352_v29 = vadd.f32 %v3908_v8, %v2351_v37  ;;  %3911 = vpow2.f32 %v3702_v61 }
 0x257   : > { %v3910_v55 = vpop.eup %3909 }
 0x258   : > { %v2356_v60 = vsel %vm2355_vm12, %v3908_v8, %v2352_v29  ;;  %v2364_v45 = vmul.f32 %v3910_v55, %v2092_v33  ;;  %vm2369_vm15 = vweird.f32 %v3910_v55 }
 0x259   : > { %v2361_v36 = vsel %vm2358_vm13, %v2360_v41, %v2356_v60  ;;  %v2486_v23 = vpop.f32.mrf.mxu0  ;;  %vm2370_vm2 = vmor %vm2368_vm1, %vm2369_vm15 }
 0x25a   : > { %v2395_v19 = vmul.f32 %v2361_v36, %v5280_v51  ;;  %v2365_v30 = vsub.f32 1.0, %v2364_v45  ;;  %v5309_v1 = vadd.f32 %v5298_v58, %v2486_v23  ;;  %v2375_v51 = vor.u32 1.1754944e-38, %v2374_v7  ;;  %v1370_v53 = vpop.f32.mrf.mxu1 }
 0x25b   : > { %1428 = vrot.lane.b32.xlu0 %v1370_v53, %s4053_s25 }
 0x25c   : > { %v3912_v14 = vpop.eup %3911  ;;  %v2366_v16 = vmul.f32 %v3910_v55, %v2365_v30  ;;  %v3703_v35 = vmul.f32 -1.442695, %v5309_v1  ;;  %3700 = vmatmul.msk.f32.gmra.mxu0 %vm394_vm0, %v2395_v19 }
 0x25d   : > { %v2597_v57 = vadd.f32 1.0, %v3912_v14 }
 0x25e   : > { %v2367_v4 = vadd.f32 %v3910_v55, %v2366_v16  ;;  %3913 = vpow2.f32 %v3703_v35 }
 0x25f   : > { %3915 = vrcp.f32 %v2597_v57  ;;  %v2627_v22 = vand.u32 2147483648, %v2597_v57  ;;  %v2625_v32 = vand.u32 2147483647, %v2597_v57 }
 0x260   : > { %v2371_v46 = vsel %vm2370_vm2, %v3910_v55, %v2367_v4 }
 0x261   : > { %v2376_v3 = vsel %vm2373_vm4, %v2375_v51, %v2371_v46  ;;  %v2489_v9 = vpop.f32.mrf.mxu0  ;;  %v2628_v21 = vor.u32 1.1754944e-38, %v2627_v22  ;;  %vm2626_vm8 = vcmp.eq.f32.partialorder %v2625_v32, 8.507059e+37 }
 0x262   : > { %v2396_v47 = vmul.f32 %v2376_v3, %v5287_v12  ;;  %v5316_v15 = vadd.f32 %v5298_v58, %v2489_v9 }
 0x264   : > { %v3914_v6 = vpop.eup %3913  ;;  %v3704_v50 = vmul.f32 -1.442695, %v5316_v15  ;;  %3701 = vmatmul.msk.f32.gmra.mxu0 %vm394_vm0, %v2396_v47  ;;  %vm2621_vm0 = vweird.f32 %v2597_v57 }
 0x265   : > { %v3916_v27 = vpop.eup %3915  ;;  %v2598_v52 = vadd.f32 1.0, %v3914_v6 }
 0x266   : > { %v2617_v5 = vmul.f32 %v3916_v27, %v2597_v57  ;;  %3917 = vpow2.f32 %v3704_v50  ;;  %vm2622_vm6 = vweird.f32 %v3916_v27 }
 0x267   : > { %3919 = vrcp.f32 %v2598_v52  ;;  %vm2623_vm7 = vmor %vm2621_vm0, %vm2622_vm6  ;;  %v2642_v8 = vand.u32 2147483648, %v2598_v52  ;;  %v2640_v38 = vand.u32 2147483647, %v2598_v52  ;;  %vm2636_vm11 = vweird.f32 %v2598_v52 }
 0x268   : > { %v2618_v20 = vsub.f32 1.0, %v2617_v5 }
 0x269   : > { %v2492_v31 = vpop.f32.mrf.mxu0  ;;  %v2643_v18 = vor.u32 1.1754944e-38, %v2642_v8  ;;  %vm2641_vm13 = vcmp.eq.f32.partialorder %v2640_v38, 8.507059e+37 }
 0x26a   : > { %v2619_v12 = vmul.f32 %v3916_v27, %v2618_v20  ;;  %v5322_v63 = vadd.f32 %v5298_v58, %v2492_v31 }
 0x26c   : > { %v3918_v28 = vpop.eup %3917  ;;  %v2620_v26 = vadd.f32 %v3916_v27, %v2619_v12  ;;  %v3705_v13 = vmul.f32 -1.442695, %v5322_v63 }
 0x26d   : > { %v3920_v0 = vpop.eup %3919  ;;  %v2599_v59 = vadd.f32 1.0, %v3918_v28 }
 0x26e   : > { %v2624_v10 = vsel %vm2623_vm7, %v3916_v27, %v2620_v26  ;;  %v2632_v54 = vmul.f32 %v3920_v0, %v2598_v52  ;;  %3921 = vpow2.f32 %v3705_v13  ;;  %vm2637_vm10 = vweird.f32 %v3920_v0 }
 0x26f   : > { %v2629_v34 = vsel %vm2626_vm8, %v2628_v21, %v2624_v10  ;;  %3923 = vrcp.f32 %v2599_v59  ;;  %vm2638_vm12 = vmor %vm2636_vm11, %vm2637_vm10  ;;  %v2655_v60 = vand.u32 2147483647, %v2599_v59  ;;  %v2657_v45 = vand.u32 2147483648, %v2599_v59 }
 0x270   : > { %v2901_v17 = vmul.f32 %v2629_v34, %v5302_v24  ;;  %v2633_v2 = vsub.f32 1.0, %v2632_v54  ;;  %vm2651_vm1 = vweird.f32 %v2599_v59 }
 0x271   : > { %v2495_v62 = vpop.f32.mrf.mxu0  ;;  %v2658_v35 = vor.u32 1.1754944e-38, %v2657_v45  ;;  %vm2656_vm4 = vcmp.eq.f32.partialorder %v2655_v60, 8.507059e+37 }
 0x272   : > { %2921 = vst.msk [vmem:[%s4776_s23] sm:$0xff] %vm2920_vm9, %v2901_v17  ;;  %v2634_v33 = vmul.f32 %v3920_v0, %v2633_v2  ;;  %v5330_v39 = vadd.f32 %v5298_v58, %v2495_v62 }
 0x274   : > { %v3922_v25 = vpop.eup %3921  ;;  %v2635_v42 = vadd.f32 %v3920_v0, %v2634_v33  ;;  %v3706_v40 = vmul.f32 -1.442695, %v5330_v39 }
 0x275   : > { %v3924_v44 = vpop.eup %3923  ;;  %v2600_v37 = vadd.f32 1.0, %v3922_v25 }
 0x276   : > { %v2639_v43 = vsel %vm2638_vm12, %v3920_v0, %v2635_v42  ;;  %v2647_v61 = vmul.f32 %v3924_v44, %v2599_v59  ;;  %3925 = vpow2.f32 %v3706_v40  ;;  %vm2652_vm15 = vweird.f32 %v3924_v44 }
 0x277   : > { %v2644_v48 = vsel %vm2641_vm13, %v2643_v18, %v2639_v43  ;;  %3927 = vrcp.f32 %v2600_v37  ;;  %vm2653_vm2 = vmor %vm2651_vm1, %vm2652_vm15  ;;  %v2670_v47 = vand.u32 2147483647, %v2600_v37  ;;  %v2672_v6 = vand.u32 2147483648, %v2600_v37 }
 0x278   : > { %v2902_v29 = vmul.f32 %v2644_v48, %v5309_v1  ;;  %v2648_v55 = vsub.f32 1.0, %v2647_v61  ;;  %vm2666_vm0 = vweird.f32 %v2600_v37 }
 0x279   : > { %v2940_v41 = vld [vmem:[%s4776_s23] sm:$0xff]  ;;  %v2498_v36 = vpop.f32.mrf.mxu0  ;;  %v2673_v32 = vor.u32 1.1754944e-38, %v2672_v6  ;;  %vm2671_vm8 = vcmp.eq.f32.partialorder %v2670_v47, 8.507059e+37 }
 0x27a   : > { %v2959_v23 = vmul.f32 %v2940_v41, %v5302_v24  ;;  %2922 = vst.msk [vmem:[%s4776_s23 + $0x8] sm:$0xff] %vm2920_vm9, %v2902_v29  ;;  %v2649_v19 = vmul.f32 %v3924_v44, %v2648_v55  ;;  %v5339_v30 = vadd.f32 %v5298_v58, %v2498_v36 }
 0x27c   : > { %v3926_v7 = vpop.eup %3925  ;;  %2978 = vst.msk [vmem:[%s4776_s23] sm:$0xff] %vm695_vm5, %v2959_v23  ;;  %v2650_v14 = vadd.f32 %v3924_v44, %v2649_v19  ;;  %v3707_v16 = vmul.f32 -1.442695, %v5339_v30 }
 0x27d   : > { %v3928_v56 = vpop.eup %3927  ;;  %v2601_v49 = vadd.f32 1.0, %v3926_v7  ;;  %v1415_v61 = vpop.permute.xlu2 %1414 }
 0x27e   : > { %v2654_v57 = vsel %vm2653_vm2, %v3924_v44, %v2650_v14  ;;  %v2662_v4 = vmul.f32 %v3928_v56, %v2600_v37  ;;  %3929 = vpow2.f32 %v3707_v16  ;;  %vm2667_vm6 = vweird.f32 %v3928_v56  ;;  %1461 = vst.msk [vmem:[%s4776_s23 + $0x58] sm:$0xff] %vm1449_vm14, %v1415_v61 }
 0x27f   : > { %v2659_v51 = vsel %vm2656_vm4, %v2658_v35, %v2654_v57  ;;  %3931 = vrcp.f32 %v2601_v49  ;;  %vm2668_vm7 = vmor %vm2666_vm0, %vm2667_vm6  ;;  %v2685_v10 = vand.u32 2147483647, %v2601_v49  ;;  %v2687_v54 = vand.u32 2147483648, %v2601_v49 }
 0x280   : > { %v2903_v46 = vmul.f32 %v2659_v51, %v5316_v15  ;;  %v2663_v3 = vsub.f32 1.0, %v2662_v4  ;;  %vm2681_vm11 = vweird.f32 %v2601_v49 }
 0x281   : > { %v2941_v9 = vld [vmem:[%s4776_s23 + $0x8] sm:$0xff]  ;;  %v2501_v50 = vpop.f32.mrf.mxu0  ;;  %v2688_v40 = vor.u32 1.1754944e-38, %v2687_v54  ;;  %vm2686_vm13 = vcmp.eq.f32.partialorder %v2685_v10, 8.507059e+37 }
 0x282   : > { %v2960_v11 = vmul.f32 %v2941_v9, %v5309_v1  ;;  %2923 = vst.msk [vmem:[%s4776_s23 + $0x10] sm:$0xff] %vm2920_vm9, %v2903_v46  ;;  %v2664_v27 = vmul.f32 %v3928_v56, %v2663_v3  ;;  %v5350_v52 = vadd.f32 %v5298_v58, %v2501_v50 }
 0x283   : > { %v2997_v5 = vld [vmem:[%s4776_s23] sm:$0xff] }
 0x284   : > { %v3930_v20 = vpop.eup %3929  ;;  %2979 = vst.msk [vmem:[%s4776_s23 + $0x8] sm:$0xff] %vm695_vm5, %v2960_v11  ;;  %v2665_v22 = vadd.f32 %v3928_v56, %v2664_v27  ;;  %v3708_v31 = vmul.f32 -1.442695, %v5350_v52  ;;  %3035 = vrot.lane.b32.xlu1 %v2997_v5, %s4053_s25 }
 0x285   : > { %v3932_v12 = vpop.eup %3931  ;;  %v2602_v28 = vadd.f32 1.0, %v3930_v20  ;;  %v1411_v3 = vpop.permute.xlu0 %1410 }
 0x286   : > { %v2669_v26 = vsel %vm2668_vm7, %v3928_v56, %v2665_v22  ;;  %v2677_v13 = vmul.f32 %v3932_v12, %v2601_v49  ;;  %3933 = vpow2.f32 %v3708_v31  ;;  %vm2682_vm10 = vweird.f32 %v3932_v12  ;;  %1459 = vst.msk [vmem:[%s4776_s23 + $0x48] sm:$0xff] %vm1449_vm14, %v1411_v3 }
 0x287   : > { %v2674_v53 = vsel %vm2671_vm8, %v2673_v32, %v2669_v26  ;;  %3935 = vrcp.f32 %v2602_v28  ;;  %vm2683_vm12 = vmor %vm2681_vm11, %vm2682_vm10  ;;  %v2700_v41 = vand.u32 2147483647, %v2602_v28  ;;  %v2702_v60 = vand.u32 2147483648, %v2602_v28 }
 0x288   : > { %v2904_v0 = vmul.f32 %v2674_v53, %v5322_v63  ;;  %v2678_v21 = vsub.f32 1.0, %v2677_v13  ;;  %vm2696_vm1 = vweird.f32 %v2602_v28 }
 0x289   : > { %v2942_v59 = vld [vmem:[%s4776_s23 + $0x10] sm:$0xff]  ;;  %v2504_v34 = vpop.f32.mrf.mxu0  ;;  %v2703_v49 = vor.u32 1.1754944e-38, %v2702_v60  ;;  %vm2701_vm4 = vcmp.eq.f32.partialorder %v2700_v41, 8.507059e+37 }
 0x28a   : > { %v2961_v17 = vmul.f32 %v2942_v59, %v5316_v15  ;;  %2924 = vst.msk [vmem:[%s4776_s23 + $0x18] sm:$0xff] %vm2920_vm9, %v2904_v0  ;;  %v2679_v2 = vmul.f32 %v3932_v12, %v2678_v21  ;;  %v5363_v8 = vadd.f32 %v5298_v58, %v2504_v34 }
 0x28b   : > { %v2998_v62 = vld [vmem:[%s4776_s23 + $0x8] sm:$0xff] }
 0x28c   : > { %v3934_v33 = vpop.eup %3933  ;;  %2980 = vst.msk [vmem:[%s4776_s23 + $0x10] sm:$0xff] %vm695_vm5, %v2961_v17  ;;  %v2680_v38 = vadd.f32 %v3932_v12, %v2679_v2  ;;  %v3709_v25 = vmul.f32 -1.442695, %v5363_v8  ;;  %3037 = vrot.lane.b32.xlu2 %v2998_v62, %s4053_s25 }
 0x28d   : > { %v3936_v42 = vpop.eup %3935  ;;  %v5370_v44 = vadd.f32 1.0, %v3934_v33  ;;  %v1413_v10 = vpop.permute.xlu1 %1412 }
 0x28e   : > { %v2684_v18 = vsel %vm2683_vm12, %v3932_v12, %v2680_v38  ;;  %v2692_v37 = vmul.f32 %v3936_v42, %v2602_v28  ;;  %3937 = vpow2.f32 %v3709_v25  ;;  %vm2697_vm15 = vweird.f32 %v3936_v42  ;;  %1460 = vst.msk [vmem:[%s4776_s23 + $0x50] sm:$0xff] %vm1449_vm14, %v1413_v10 }
 0x28f   : > { %v2689_v43 = vsel %vm2686_vm13, %v2688_v40, %v2684_v18  ;;  %3939 = vrcp.f32 %v5370_v44  ;;  %vm2698_vm2 = vmor %vm2696_vm1, %vm2697_vm15  ;;  %v2715_v50 = vand.u32 2147483647, %v5370_v44  ;;  %v2717_v11 = vand.u32 2147483648, %v5370_v44 }
 0x290   : > { %v2905_v48 = vmul.f32 %v2689_v43, %v5330_v39  ;;  %v2693_v29 = vsub.f32 1.0, %v2692_v37  ;;  %vm2711_vm0 = vweird.f32 %v5370_v44 }
 0x291   : > { %v2943_v55 = vld [vmem:[%s4776_s23 + $0x18] sm:$0xff]  ;;  %v2507_v45 = vpop.f32.mrf.mxu0  ;;  %v2718_v13 = vor.u32 1.1754944e-38, %v2717_v11  ;;  %vm2716_vm8 = vcmp.eq.f32.partialorder %v2715_v50, 8.507059e+37 }
 0x292   : > { %v2962_v36 = vmul.f32 %v2943_v55, %v5322_v63  ;;  %2925 = vst.msk [vmem:[%s4776_s23 + $0x20] sm:$0xff] %vm2920_vm9, %v2905_v48  ;;  %v2694_v23 = vmul.f32 %v3936_v42, %v2693_v29  ;;  %v5381_v19 = vadd.f32 %v5298_v58, %v2507_v45 }
 0x293   : > { %v2999_v7 = vld [vmem:[%s4776_s23 + $0x10] sm:$0xff] }
 0x294   : > { %v3938_v14 = vpop.eup %3937  ;;  %2981 = vst.msk [vmem:[%s4776_s23 + $0x18] sm:$0xff] %vm695_vm5, %v2962_v36  ;;  %v2695_v16 = vadd.f32 %v3936_v42, %v2694_v23  ;;  %v3710_v56 = vmul.f32 -1.442695, %v5381_v19  ;;  %3039 = vrot.lane.b32.xlu0 %v2999_v7, %s4053_s25 }
 0x295   : > { %v3940_v35 = vpop.eup %3939  ;;  %v5388_v57 = vadd.f32 1.0, %v3938_v14  ;;  %v1421_v60 = vpop.permute.xlu2 %1420 }
 0x296   : > { %v2699_v4 = vsel %vm2698_vm2, %v3936_v42, %v2695_v16  ;;  %v2707_v51 = vmul.f32 %v3940_v35, %v5370_v44  ;;  %3941 = vpow2.f32 %v3710_v56  ;;  %vm2712_vm6 = vweird.f32 %v3940_v35  ;;  %1464 = vst.msk [vmem:[%s4776_s23 + $0x70] sm:$0xff] %vm1449_vm14, %v1421_v60 }
 0x297   : > { %v2704_v46 = vsel %vm2701_vm4, %v2703_v49, %v2699_v4  ;;  %3943 = vrcp.f32 %v5388_v57  ;;  %vm2713_vm7 = vmor %vm2711_vm0, %vm2712_vm6  ;;  %v2730_v2 = vand.u32 2147483647, %v5388_v57  ;;  %v2732_v62 = vand.u32 2147483648, %v5388_v57 }
 0x298   : > { %v2906_v9 = vmul.f32 %v2704_v46, %v5339_v30  ;;  %v2708_v47 = vsub.f32 1.0, %v2707_v51  ;;  %vm2726_vm11 = vweird.f32 %v5388_v57 }
 0x299   : > { %v2944_v6 = vld [vmem:[%s4776_s23 + $0x20] sm:$0xff]  ;;  %v2510_v27 = vpop.f32.mrf.mxu0  ;;  %v2733_v61 = vor.u32 1.1754944e-38, %v2732_v62  ;;  %vm2731_vm13 = vcmp.eq.f32.partialorder %v2730_v2, 8.507059e+37 }
 0x29a   : > { %v2963_v5 = vmul.f32 %v2944_v6, %v5330_v39  ;;  %2926 = vst.msk [vmem:[%s4776_s23 + $0x28] sm:$0xff] %vm2920_vm9, %v2906_v9  ;;  %v2709_v20 = vmul.f32 %v3940_v35, %v2708_v47  ;;  %v5402_v22 = vadd.f32 %v5298_v58, %v2510_v27 }
 0x29b   : > { %v3000_v31 = vld [vmem:[%s4776_s23 + $0x18] sm:$0xff] }
 0x29c   : > { %v3942_v12 = vpop.eup %3941  ;;  %2982 = vst.msk [vmem:[%s4776_s23 + $0x20] sm:$0xff] %vm695_vm5, %v2963_v5  ;;  %v2710_v32 = vadd.f32 %v3940_v35, %v2709_v20  ;;  %v3711_v28 = vmul.f32 -1.442695, %v5402_v22  ;;  %3041 = vrot.lane.b32.xlu1 %v3000_v31, %s4053_s25 }
 0x29d   : > { %v3944_v26 = vpop.eup %3943  ;;  %v5410_v53 = vadd.f32 1.0, %v3942_v12  ;;  %v1417_v27 = vpop.permute.xlu0 %1416 }
 0x29e   : > { %v2714_v0 = vsel %vm2713_vm7, %v3940_v35, %v2710_v32  ;;  %v2722_v21 = vmul.f32 %v3944_v26, %v5388_v57  ;;  %3945 = vpow2.f32 %v3711_v28  ;;  %vm2727_vm10 = vweird.f32 %v3944_v26  ;;  %1462 = vst.msk [vmem:[%s4776_s23 + $0x60] sm:$0xff] %vm1449_vm14, %v1417_v27 }
 0x29f   : > { %v2719_v59 = vsel %vm2716_vm8, %v2718_v13, %v2714_v0  ;;  %3947 = vrcp.f32 %v5410_v53  ;;  %vm2728_vm12 = vmor %vm2726_vm11, %vm2727_vm10  ;;  %v2745_v7 = vand.u32 2147483647, %v5410_v53  ;;  %v2747_v14 = vand.u32 2147483648, %v5410_v53 }
 0x2a0   : > { %v2907_v54 = vmul.f32 %v2719_v59, %v5350_v52  ;;  %v2723_v34 = vsub.f32 1.0, %v2722_v21  ;;  %vm2741_vm1 = vweird.f32 %v5410_v53 }
 0x2a1   : > { %v2945_v17 = vld [vmem:[%s4776_s23 + $0x28] sm:$0xff]  ;;  %v2513_v33 = vpop.f32.mrf.mxu0  ;;  %v2748_v9 = vor.u32 1.1754944e-38, %v2747_v14  ;;  %vm2746_vm4 = vcmp.eq.f32.partialorder %v2745_v7, 8.507059e+37 }
 0x2a2   : > { %v2964_v38 = vmul.f32 %v2945_v17, %v5339_v30  ;;  %2927 = vst.msk [vmem:[%s4776_s23 + $0x30] sm:$0xff] %vm2920_vm9, %v2907_v54  ;;  %v2724_v25 = vmul.f32 %v3944_v26, %v2723_v34  ;;  %v5424_v42 = vadd.f32 %v5298_v58, %v2513_v33 }
 0x2a3   : > { %v3001_v40 = vld [vmem:[%s4776_s23 + $0x20] sm:$0xff] }
 0x2a4   : > { %v3946_v44 = vpop.eup %3945  ;;  %2983 = vst.msk [vmem:[%s4776_s23 + $0x28] sm:$0xff] %vm695_vm5, %v2964_v38  ;;  %v2725_v18 = vadd.f32 %v3944_v26, %v2724_v25  ;;  %v3712_v37 = vmul.f32 -1.442695, %v5424_v42  ;;  %3043 = vrot.lane.b32.xlu2 %v3001_v40, %s4053_s25 }
 0x2a5   : > { %v3948_v43 = vpop.eup %3947  ;;  %v5432_v48 = vadd.f32 1.0, %v3946_v44  ;;  %v1419_v38 = vpop.permute.xlu1 %1418 }
 0x2a6   : > { %v2729_v29 = vsel %vm2728_vm12, %v3944_v26, %v2725_v18  ;;  %v2737_v55 = vmul.f32 %v3948_v43, %v5410_v53  ;;  %3949 = vpow2.f32 %v3712_v37  ;;  %vm2742_vm15 = vweird.f32 %v3948_v43  ;;  %1463 = vst.msk [vmem:[%s4776_s23 + $0x68] sm:$0xff] %vm1449_vm14, %v1419_v38 }
 0x2a7   : > { %v2734_v41 = vsel %vm2731_vm13, %v2733_v61, %v2729_v29  ;;  %3951 = vrcp.f32 %v5432_v48  ;;  %vm2743_vm2 = vmor %vm2741_vm1, %vm2742_vm15  ;;  %v2760_v12 = vand.u32 2147483647, %v5432_v48  ;;  %v2762_v32 = vand.u32 2147483648, %v5432_v48 }
 0x2a8   : > { %v2908_v45 = vmul.f32 %v2734_v41, %v5363_v8  ;;  %v2738_v36 = vsub.f32 1.0, %v2737_v55  ;;  %vm2756_vm0 = vweird.f32 %v5432_v48 }
 0x2a9   : > { %v2946_v23 = vld [vmem:[%s4776_s23 + $0x30] sm:$0xff]  ;;  %v2516_v16 = vpop.f32.mrf.mxu0  ;;  %v2763_v34 = vor.u32 1.1754944e-38, %v2762_v32  ;;  %vm2761_vm8 = vcmp.eq.f32.partialorder %v2760_v12, 8.507059e+37 }
 0x2aa   : > { %v2965_v56 = vmul.f32 %v2946_v23, %v5350_v52  ;;  %2928 = vst.msk [vmem:[%s4776_s23 + $0x38] sm:$0xff] %vm2920_vm9, %v2908_v45  ;;  %v2739_v35 = vmul.f32 %v3948_v43, %v2738_v36  ;;  %v5446_v49 = vadd.f32 %v5298_v58, %v2516_v16 }
 0x2ab   : > { %v3002_v57 = vld [vmem:[%s4776_s23 + $0x28] sm:$0xff] }
 0x2ac   : > { %v3950_v4 = vpop.eup %3949  ;;  %2984 = vst.msk [vmem:[%s4776_s23 + $0x30] sm:$0xff] %vm695_vm5, %v2965_v56  ;;  %v2740_v51 = vadd.f32 %v3948_v43, %v2739_v35  ;;  %v3713_v46 = vmul.f32 -1.442695, %v5446_v49  ;;  %3045 = vrot.lane.b32.xlu0 %v3002_v57, %s4053_s25 }
 0x2ad   : > { %v3952_v3 = vpop.eup %3951  ;;  %v5454_v47 = vadd.f32 1.0, %v3950_v4  ;;  %v1427_v35 = vpop.permute.xlu2 %1426 }
 0x2ae   : > { %v2744_v6 = vsel %vm2743_vm2, %v3948_v43, %v2740_v51  ;;  %v2752_v50 = vmul.f32 %v3952_v3, %v5432_v48  ;;  %3953 = vpow2.f32 %v3713_v46  ;;  %vm2757_vm6 = vweird.f32 %v3952_v3  ;;  %1467 = vst.msk [vmem:[%s4776_s23 + $0x88] sm:$0xff] %vm1449_vm14, %v1427_v35 }
 0x2af   : > { %v2749_v11 = vsel %vm2746_vm4, %v2748_v9, %v2744_v6  ;;  %3955 = vrcp.f32 %v5454_v47  ;;  %vm2758_vm7 = vmor %vm2756_vm0, %vm2757_vm6  ;;  %v2775_v18 = vand.u32 2147483647, %v5454_v47  ;;  %v2777_v37 = vand.u32 2147483648, %v5454_v47 }
 0x2b0   : > { %v2909_v5 = vmul.f32 %v2749_v11, %v5381_v19  ;;  %v2753_v20 = vsub.f32 1.0, %v2752_v50  ;;  %vm2771_vm11 = vweird.f32 %v5454_v47 }
 0x2b1   : > { %v2947_v31 = vld [vmem:[%s4776_s23 + $0x38] sm:$0xff]  ;;  %v2519_v28 = vpop.f32.mrf.mxu0  ;;  %v2778_v23 = vor.u32 1.1754944e-38, %v2777_v37  ;;  %vm2776_vm13 = vcmp.eq.f32.partialorder %v2775_v18, 8.507059e+37 }
 0x2b2   : > { %v2966_v26 = vmul.f32 %v2947_v31, %v5363_v8  ;;  %2929 = vst.msk [vmem:[%s4776_s23 + $0x40] sm:$0xff] %vm2920_vm9, %v2909_v5  ;;  %v2754_v13 = vmul.f32 %v3952_v3, %v2753_v20  ;;  %v5468_v53 = vadd.f32 %v5298_v58, %v2519_v28 }
 0x2b3   : > { %v3003_v0 = vld [vmem:[%s4776_s23 + $0x30] sm:$0xff] }
 0x2b4   : > { %v3954_v21 = vpop.eup %3953  ;;  %2985 = vst.msk [vmem:[%s4776_s23 + $0x38] sm:$0xff] %vm695_vm5, %v2966_v26  ;;  %v2755_v59 = vadd.f32 %v3952_v3, %v2754_v13  ;;  %v3714_v10 = vmul.f32 -1.442695, %v5468_v53  ;;  %3047 = vrot.lane.b32.xlu1 %v3003_v0, %s4053_s25 }
 0x2b5   : > { %v3956_v54 = vpop.eup %3955  ;;  %v5476_v17 = vadd.f32 1.0, %v3954_v21  ;;  %v1423_v0 = vpop.permute.xlu0 %1422 }
 0x2b6   : > { %v2759_v2 = vsel %vm2758_vm7, %v3952_v3, %v2755_v59  ;;  %v2767_v62 = vmul.f32 %v3956_v54, %v5454_v47  ;;  %3957 = vpow2.f32 %v3714_v10  ;;  %vm2772_vm10 = vweird.f32 %v3956_v54  ;;  %1465 = vst.msk [vmem:[%s4776_s23 + $0x78] sm:$0xff] %vm1449_vm14, %v1423_v0 }
 0x2b7   : > { %v2764_v33 = vsel %vm2761_vm8, %v2763_v34, %v2759_v2  ;;  %3959 = vrcp.f32 %v5476_v17  ;;  %vm2773_vm12 = vmor %vm2771_vm11, %vm2772_vm10  ;;  %v2790_v51 = vand.u32 2147483647, %v5476_v17  ;;  %v2792_v46 = vand.u32 2147483648, %v5476_v17 }
 0x2b8   : > { %v2910_v25 = vmul.f32 %v2764_v33, %v5402_v22  ;;  %v2768_v40 = vsub.f32 1.0, %v2767_v62  ;;  %vm2786_vm1 = vweird.f32 %v5476_v17 }
 0x2b9   : > { %v2948_v44 = vld [vmem:[%s4776_s23 + $0x40] sm:$0xff]  ;;  %v2522_v43 = vpop.f32.mrf.mxu0  ;;  %v2793_v12 = vor.u32 1.1754944e-38, %v2792_v46  ;;  %vm2791_vm4 = vcmp.eq.f32.partialorder %v2790_v51, 8.507059e+37 }
 0x2ba   : > { %v2967_v61 = vmul.f32 %v2948_v44, %v5381_v19  ;;  %v2769_v48 = vmul.f32 %v3956_v54, %v2768_v40  ;;  %2930 = vst.msk [vmem:[%s4776_s23 + $0x48] sm:$0xff] %vm2920_vm9, %v2910_v25  ;;  %v5490_v29 = vadd.f32 %v5298_v58, %v2522_v43 }
 0x2bb   : > { %v3004_v55 = vld [vmem:[%s4776_s23 + $0x38] sm:$0xff] }
 0x2bc   : > { %v3958_v41 = vpop.eup %3957  ;;  %2986 = vst.msk [vmem:[%s4776_s23 + $0x40] sm:$0xff] %vm695_vm5, %v2967_v61  ;;  %v2770_v60 = vadd.f32 %v3956_v54, %v2769_v48  ;;  %v3715_v45 = vmul.f32 -1.442695, %v5490_v29  ;;  %3049 = vrot.lane.b32.xlu2 %v3004_v55, %s4053_s25 }
 0x2bd   : > { %v3960_v36 = vpop.eup %3959  ;;  %v5498_v7 = vadd.f32 1.0, %v3958_v41  ;;  %v1425_v41 = vpop.permute.xlu1 %1424 }
 0x2be   : > { %v2774_v14 = vsel %vm2773_vm12, %v3956_v54, %v2770_v60  ;;  %v2782_v16 = vmul.f32 %v3960_v36, %v5476_v17  ;;  %3961 = vpow2.f32 %v3715_v45  ;;  %vm2787_vm15 = vweird.f32 %v3960_v36  ;;  %1466 = vst.msk [vmem:[%s4776_s23 + $0x80] sm:$0xff] %vm1449_vm14, %v1425_v41 }
 0x2bf   : > { %v2779_v56 = vsel %vm2776_vm13, %v2778_v23, %v2774_v14  ;;  %3963 = vrcp.f32 %v5498_v7  ;;  %vm2788_vm2 = vmor %vm2786_vm1, %vm2787_vm15  ;;  %v2805_v10 = vand.u32 2147483647, %v5498_v7  ;;  %v2807_v54 = vand.u32 2147483648, %v5498_v7 }
 0x2c0   : > { %v2911_v57 = vmul.f32 %v2779_v56, %v5424_v42  ;;  %v2783_v4 = vsub.f32 1.0, %v2782_v16  ;;  %vm2801_vm0 = vweird.f32 %v5498_v7 }
 0x2c1   : > { %v2949_v3 = vld [vmem:[%s4776_s23 + $0x48] sm:$0xff]  ;;  %v2525_v9 = vpop.f32.mrf.mxu0  ;;  %v2808_v37 = vor.u32 1.1754944e-38, %v2807_v54  ;;  %vm2806_vm8 = vcmp.eq.f32.partialorder %v2805_v10, 8.507059e+37 }
 0x2c2   : > { %v2784_v47 = vmul.f32 %v3960_v36, %v2783_v4  ;;  %v2968_v6 = vmul.f32 %v2949_v3, %v5402_v22  ;;  %2931 = vst.msk [vmem:[%s4776_s23 + $0x50] sm:$0xff] %vm2920_vm9, %v2911_v57  ;;  %v5512_v50 = vadd.f32 %v5298_v58, %v2525_v9 }
 0x2c3   : > { %v3005_v11 = vld [vmem:[%s4776_s23 + $0x40] sm:$0xff] }
 0x2c4   : > { %v3962_v27 = vpop.eup %3961  ;;  %v2785_v5 = vadd.f32 %v3960_v36, %v2784_v47  ;;  %2987 = vst.msk [vmem:[%s4776_s23 + $0x48] sm:$0xff] %vm695_vm5, %v2968_v6  ;;  %v3716_v20 = vmul.f32 -1.442695, %v5512_v50  ;;  %3051 = vrot.lane.b32.xlu0 %v3005_v11, %s4053_s25 }
 0x2c5   : > { %v3964_v31 = vpop.eup %3963  ;;  %v5520_v32 = vadd.f32 1.0, %v3962_v27 }
 0x2c6   : > { %v2789_v28 = vsel %vm2788_vm2, %v3960_v36, %v2785_v5  ;;  %v2797_v26 = vmul.f32 %v3964_v31, %v5498_v7  ;;  %3965 = vpow2.f32 %v3716_v20  ;;  %vm2802_vm6 = vweird.f32 %v3964_v31 }
 0x2c7   : > { %v2794_v13 = vsel %vm2791_vm4, %v2793_v12, %v2789_v28  ;;  %3967 = vrcp.f32 %v5520_v32  ;;  %vm2803_vm7 = vmor %vm2801_vm0, %vm2802_vm6  ;;  %v2820_v23 = vand.u32 2147483647, %v5520_v32  ;;  %v2822_v7 = vand.u32 2147483648, %v5520_v32 }
 0x2c8   : > { %v2912_v21 = vmul.f32 %v2794_v13, %v5446_v49  ;;  %v2798_v59 = vsub.f32 1.0, %v2797_v26  ;;  %vm2816_vm11 = vweird.f32 %v5520_v32 }
 0x2c9   : > { %v2950_v34 = vld [vmem:[%s4776_s23 + $0x50] sm:$0xff]  ;;  %v2528_v17 = vpop.f32.mrf.mxu0  ;;  %v2823_v9 = vor.u32 1.1754944e-38, %v2822_v7  ;;  %vm2821_vm13 = vcmp.eq.f32.partialorder %v2820_v23, 8.507059e+37 }
 0x2ca   : > { %2932 = vst.msk [vmem:[%s4776_s23 + $0x58] sm:$0xff] %vm2920_vm9, %v2912_v21  ;;  %v2799_v2 = vmul.f32 %v3964_v31, %v2798_v59  ;;  %v2969_v62 = vmul.f32 %v2950_v34, %v5424_v42  ;;  %v5534_v33 = vadd.f32 %v5298_v58, %v2528_v17 }
 0x2cb   : > { %v3006_v38 = vld [vmem:[%s4776_s23 + $0x48] sm:$0xff] }
 0x2cc   : > { %v3966_v25 = vpop.eup %3965  ;;  %v2800_v40 = vadd.f32 %v3964_v31, %v2799_v2  ;;  %2988 = vst.msk [vmem:[%s4776_s23 + $0x50] sm:$0xff] %vm695_vm5, %v2969_v62  ;;  %v3717_v44 = vmul.f32 -1.442695, %v5534_v33  ;;  %3053 = vrot.lane.b32.xlu1 %v3006_v38, %s4053_s25 }
 0x2cd   : > { %v3968_v18 = vpop.eup %3967  ;;  %v2611_v43 = vadd.f32 1.0, %v3966_v25 }
 0x2ce   : > { %v2804_v61 = vsel %vm2803_vm7, %v3964_v31, %v2800_v40  ;;  %v2812_v48 = vmul.f32 %v3968_v18, %v5520_v32  ;;  %3969 = vpow2.f32 %v3717_v44  ;;  %vm2817_vm10 = vweird.f32 %v3968_v18  ;;  %v1429_v40 = vpop.permute.xlu0 %1428 }
 0x2cf   : > { %v2809_v55 = vsel %vm2806_vm8, %v2808_v37, %v2804_v61  ;;  %3971 = vrcp.f32 %v2611_v43  ;;  %vm2818_vm12 = vmor %vm2816_vm11, %vm2817_vm10  ;;  %v2835_v31 = vand.u32 2147483647, %v2611_v43  ;;  %v2837_v12 = vand.u32 2147483648, %v2611_v43  ;;  %1468 = vst.msk [vmem:[%s4776_s23 + $0x90] sm:$0xff] %vm1449_vm14, %v1429_v40 }
 0x2d0   : > { %v2913_v60 = vmul.f32 %v2809_v55, %v5468_v53  ;;  %v2813_v45 = vsub.f32 1.0, %v2812_v48  ;;  %vm2831_vm1 = vweird.f32 %v2611_v43 }
 0x2d1   : > { %v2951_v36 = vld [vmem:[%s4776_s23 + $0x58] sm:$0xff]  ;;  %v2531_v14 = vpop.f32.mrf.mxu0  ;;  %v2838_v17 = vor.u32 1.1754944e-38, %v2837_v12  ;;  %vm2836_vm4 = vcmp.eq.f32.partialorder %v2835_v31, 8.507059e+37 }
 0x2d2   : > { %v2970_v16 = vmul.f32 %v2951_v36, %v5446_v49  ;;  %v2814_v56 = vmul.f32 %v3968_v18, %v2813_v45  ;;  %2933 = vst.msk [vmem:[%s4776_s23 + $0x60] sm:$0xff] %vm2920_vm9, %v2913_v60  ;;  %v5553_v35 = vadd.f32 %v5298_v58, %v2531_v14 }
 0x2d3   : > { %v3007_v57 = vld [vmem:[%s4776_s23 + $0x50] sm:$0xff] }
 0x2d4   : > { %v3970_v4 = vpop.eup %3969  ;;  %2989 = vst.msk [vmem:[%s4776_s23 + $0x58] sm:$0xff] %vm695_vm5, %v2970_v16  ;;  %v2815_v51 = vadd.f32 %v3968_v18, %v2814_v56  ;;  %v3718_v46 = vmul.f32 -1.442695, %v5553_v35  ;;  %3055 = vrot.lane.b32.xlu2 %v3007_v57, %s4053_s25 }
 0x2d5   : > { %v3972_v3 = vpop.eup %3971  ;;  %v2612_v47 = vadd.f32 1.0, %v3970_v4 }
 0x2d6   : > { %v2819_v6 = vsel %vm2818_vm12, %v3968_v18, %v2815_v51  ;;  %v2827_v11 = vmul.f32 %v3972_v3, %v2611_v43  ;;  %3973 = vpow2.f32 %v3718_v46  ;;  %vm2832_vm15 = vweird.f32 %v3972_v3 }
 0x2d7   : > { %v2824_v27 = vsel %vm2821_vm13, %v2823_v9, %v2819_v6  ;;  %3975 = vrcp.f32 %v2612_v47  ;;  %vm2833_vm2 = vmor %vm2831_vm1, %vm2832_vm15  ;;  %v2850_v37 = vand.u32 2147483647, %v2612_v47  ;;  %v2852_v43 = vand.u32 2147483648, %v2612_v47 }
 0x2d8   : > { %v2914_v5 = vmul.f32 %v2824_v27, %v5490_v29  ;;  %v2828_v20 = vsub.f32 1.0, %v2827_v11  ;;  %vm2846_vm0 = vweird.f32 %v2612_v47 }
 0x2d9   : > { %v2952_v32 = vld [vmem:[%s4776_s23 + $0x60] sm:$0xff]  ;;  %v2534_v28 = vpop.f32.mrf.mxu0  ;;  %v2853_v16 = vor.u32 1.1754944e-38, %v2852_v43  ;;  %vm2851_vm8 = vcmp.eq.f32.partialorder %v2850_v37, 8.507059e+37 }
 0x2da   : > { %v2829_v26 = vmul.f32 %v3972_v3, %v2828_v20  ;;  %v2971_v13 = vmul.f32 %v2952_v32, %v5468_v53  ;;  %2934 = vst.msk [vmem:[%s4776_s23 + $0x68] sm:$0xff] %vm2920_vm9, %v2914_v5  ;;  %v5567_v0 = vadd.f32 %v5298_v58, %v2534_v28 }
 0x2db   : > { %v3008_v21 = vld [vmem:[%s4776_s23 + $0x58] sm:$0xff] }
 0x2dc   : > { %v3974_v59 = vpop.eup %3973  ;;  %v2830_v10 = vadd.f32 %v3972_v3, %v2829_v26  ;;  %2990 = vst.msk [vmem:[%s4776_s23 + $0x60] sm:$0xff] %vm695_vm5, %v2971_v13  ;;  %v3719_v54 = vmul.f32 -1.442695, %v5567_v0  ;;  %3057 = vrot.lane.b32.xlu0 %v3008_v21, %s4053_s25 }
 0x2dd   : > { %v3976_v34 = vpop.eup %3975  ;;  %v2613_v2 = vadd.f32 1.0, %v3974_v59 }
 0x2de   : > { %v2834_v62 = vsel %vm2833_vm2, %v3972_v3, %v2830_v10  ;;  %v2842_v38 = vmul.f32 %v3976_v34, %v2612_v47  ;;  %3977 = vpow2.f32 %v3719_v54  ;;  %vm2847_vm6 = vweird.f32 %v3976_v34 }
 0x2df   : > { %v2839_v25 = vsel %vm2836_vm4, %v2838_v17, %v2834_v62  ;;  %3979 = vrcp.f32 %v2613_v2  ;;  %vm2848_vm7 = vmor %vm2846_vm0, %vm2847_vm6  ;;  %v2867_v9 = vand.u32 2147483648, %v2613_v2  ;;  %v2865_v11 = vand.u32 2147483647, %v2613_v2 }
 0x2e0   : > { %v2915_v44 = vmul.f32 %v2839_v25, %v5512_v50  ;;  %v2843_v18 = vsub.f32 1.0, %v2842_v38  ;;  %vm2861_vm11 = vweird.f32 %v2613_v2 }
 0x2e1   : > { %v2953_v61 = vld [vmem:[%s4776_s23 + $0x68] sm:$0xff]  ;;  %v2537_v48 = vpop.f32.mrf.mxu0  ;;  %v2868_v12 = vor.u32 1.1754944e-38, %v2867_v9  ;;  %vm2866_vm13 = vcmp.eq.f32.partialorder %v2865_v11, 8.507059e+37 }
 0x2e2   : > { %2935 = vst.msk [vmem:[%s4776_s23 + $0x70] sm:$0xff] %vm2920_vm9, %v2915_v44  ;;  %v2844_v55 = vmul.f32 %v3976_v34, %v2843_v18  ;;  %v2972_v41 = vmul.f32 %v2953_v61, %v5490_v29  ;;  %v5582_v60 = vadd.f32 %v5298_v58, %v2537_v48 }
 0x2e3   : > { %v3009_v45 = vld [vmem:[%s4776_s23 + $0x60] sm:$0xff] }
 0x2e4   : > { %v3978_v36 = vpop.eup %3977  ;;  %v2845_v23 = vadd.f32 %v3976_v34, %v2844_v55  ;;  %2991 = vst.msk [vmem:[%s4776_s23 + $0x68] sm:$0xff] %vm695_vm5, %v2972_v41  ;;  %v3720_v7 = vmul.f32 -1.442695, %v5582_v60  ;;  %3059 = vrot.lane.b32.xlu1 %v3009_v45, %s4053_s25 }
 0x2e5   : > { %v3980_v14 = vpop.eup %3979  ;;  %v2614_v56 = vadd.f32 1.0, %v3978_v36 }
 0x2e6   : > { %v2849_v57 = vsel %vm2848_vm7, %v3976_v34, %v2845_v23  ;;  %v2857_v58 = vmul.f32 %v3980_v14, %v2613_v2  ;;  %3981 = vpow2.f32 %v3720_v7  ;;  %vm2862_vm10 = vweird.f32 %v3980_v14  ;;  %v3038_v37 = vpop.permute.xlu2 %3037 }
 0x2e7   : > { %v2854_v4 = vsel %vm2851_vm8, %v2853_v16, %v2849_v57  ;;  %3983 = vrcp.f32 %v2614_v56  ;;  %vm2863_vm12 = vmor %vm2861_vm11, %vm2862_vm10  ;;  %v2882_v10 = vand.u32 2147483648, %v2614_v56  ;;  %v2880_v17 = vand.u32 2147483647, %v2614_v56 }
 0x2e8   : > { %v2916_v51 = vmul.f32 %v2854_v4, %v5534_v33  ;;  %v2858_v46 = vsub.f32 1.0, %v2857_v58  ;;  %vm2876_vm1 = vweird.f32 %v2614_v56  ;;  %v3093_v36 = vmul.f32 %v3038_v37, %v5309_v1 }
 0x2e9   : > { %v2954_v3 = vld [vmem:[%s4776_s23 + $0x70] sm:$0xff]  ;;  %v2883_v40 = vor.u32 1.1754944e-38, %v2882_v10  ;;  %vm2881_vm4 = vcmp.eq.f32.partialorder %v2880_v17, 8.507059e+37 }
 0x2ea   : > { %v2973_v47 = vmul.f32 %v2954_v3, %v5512_v50  ;;  %v2859_v6 = vmul.f32 %v3980_v14, %v2858_v46  ;;  %2936 = vst.msk [vmem:[%s4776_s23 + $0x78] sm:$0xff] %vm2920_vm9, %v2916_v51 }
 0x2eb   : > { %v3010_v27 = vld [vmem:[%s4776_s23 + $0x68] sm:$0xff] }
 0x2ec   : > { %v3982_v5 = vpop.eup %3981  ;;  %2992 = vst.msk [vmem:[%s4776_s23 + $0x70] sm:$0xff] %vm695_vm5, %v2973_v47  ;;  %v2860_v20 = vadd.f32 %v3980_v14, %v2859_v6  ;;  %3061 = vrot.lane.b32.xlu2 %v3010_v27, %s4053_s25 }
 0x2ed   : > { %v3984_v31 = vpop.eup %3983  ;;  %v2615_v32 = vadd.f32 1.0, %v3982_v5 }
 0x2ee   : > { %v2864_v28 = vsel %vm2863_vm12, %v3980_v14, %v2860_v20  ;;  %v2872_v26 = vmul.f32 %v3984_v31, %v2614_v56  ;;  %vm2877_vm15 = vweird.f32 %v3984_v31 }
 0x2ef   : > { %v2869_v13 = vsel %vm2866_vm13, %v2868_v12, %v2864_v28  ;;  %3985 = vrcp.f32 %v2615_v32  ;;  %vm2878_vm2 = vmor %vm2876_vm1, %vm2877_vm15  ;;  %v2897_v45 = vand.u32 2147483648, %v2615_v32  ;;  %v2895_v14 = vand.u32 2147483647, %v2615_v32 }
 0x2f0   : > { %v2917_v21 = vmul.f32 %v2869_v13, %v5553_v35  ;;  %v2873_v59 = vsub.f32 1.0, %v2872_v26  ;;  %vm2891_vm0 = vweird.f32 %v2615_v32 }
 0x2f1   : > { %v2955_v54 = vld [vmem:[%s4776_s23 + $0x78] sm:$0xff]  ;;  %v2898_v58 = vor.u32 1.1754944e-38, %v2897_v45  ;;  %vm2896_vm8 = vcmp.eq.f32.partialorder %v2895_v14, 8.507059e+37 }
 0x2f2   : > { %v2874_v34 = vmul.f32 %v3984_v31, %v2873_v59  ;;  %v2974_v2 = vmul.f32 %v2955_v54, %v5534_v33  ;;  %2937 = vst.msk [vmem:[%s4776_s23 + $0x80] sm:$0xff] %vm2920_vm9, %v2917_v21 }
 0x2f3   : > { %v3011_v62 = vld [vmem:[%s4776_s23 + $0x70] sm:$0xff] }
 0x2f4   : > { %v2875_v38 = vadd.f32 %v3984_v31, %v2874_v34  ;;  %2993 = vst.msk [vmem:[%s4776_s23 + $0x78] sm:$0xff] %vm695_vm5, %v2974_v2  ;;  %3063 = vrot.lane.b32.xlu0 %v3011_v62, %s4053_s25 }
 0x2f5   : > { %v3986_v25 = vpop.eup %3985 }
 0x2f6   : > { %v2879_v44 = vsel %vm2878_vm2, %v3984_v31, %v2875_v38  ;;  %v2887_v18 = vmul.f32 %v3986_v25, %v2615_v32  ;;  %v3036_v43 = vpop.permute.xlu1 %3035  ;;  %vm2892_vm6 = vweird.f32 %v3986_v25 }
 0x2f7   : > { %v2884_v61 = vsel %vm2881_vm4, %v2883_v40, %v2879_v44  ;;  %v3092_v48 = vmul.f32 %v3036_v43, %v5302_v24  ;;  %vm2893_vm7 = vmor %vm2891_vm0, %vm2892_vm6 }
 0x2f8   : > { %v2918_v55 = vmul.f32 %v2884_v61, %v5567_v0  ;;  %v2888_v41 = vsub.f32 1.0, %v2887_v18 }
 0x2f9   : > { %v2956_v23 = vld [vmem:[%s4776_s23 + $0x80] sm:$0xff]  ;;  %3130 = vrot.lane.b32.xlu2 %v3092_v48, %s4052_s17 }
 0x2fa   : > { %2938 = vst.msk [vmem:[%s4776_s23 + $0x88] sm:$0xff] %vm2920_vm9, %v2918_v55  ;;  %v2889_v7 = vmul.f32 %v3986_v25, %v2888_v41  ;;  %v2975_v16 = vmul.f32 %v2956_v23, %v5553_v35 }
 0x2fb   : > { %v3012_v56 = vld [vmem:[%s4776_s23 + $0x78] sm:$0xff] }
 0x2fc   : > { %v2890_v57 = vadd.f32 %v3986_v25, %v2889_v7  ;;  %2994 = vst.msk [vmem:[%s4776_s23 + $0x80] sm:$0xff] %vm695_vm5, %v2975_v16  ;;  %3132 = vrot.lane.b32.xlu0 %v3093_v36, %s4052_s17  ;;  %3065 = vrot.lane.b32.xlu1 %v3012_v56, %s4053_s25 }
 0x2fe   : > { %v2894_v4 = vsel %vm2893_vm7, %v3986_v25, %v2890_v57  ;;  %v3044_v12 = vpop.permute.xlu2 %3043 }
 0x2ff   : > { %v2899_v51 = vsel %vm2896_vm8, %v2898_v58, %v2894_v4  ;;  %v3096_v28 = vmul.f32 %v3044_v12, %v5330_v39 }
 0x300   : > { %v2919_v46 = vmul.f32 %v2899_v51, %v5582_v60 }
 0x301   : > { %v2957_v3 = vld [vmem:[%s4776_s23 + $0x88] sm:$0xff] }
 0x302   : > { %v2976_v9 = vmul.f32 %v2957_v3, %v5567_v0  ;;  %2939 = vst.msk [vmem:[%s4776_s23 + $0x90] sm:$0xff] %vm2920_vm9, %v2919_v46 }
 0x303   : > { %v3013_v47 = vld [vmem:[%s4776_s23 + $0x80] sm:$0xff] }
 0x304   : > { %2995 = vst.msk [vmem:[%s4776_s23 + $0x88] sm:$0xff] %vm695_vm5, %v2976_v9  ;;  %3067 = vrot.lane.b32.xlu2 %v3013_v47, %s4053_s25 }
 0x306   : > { %v3040_v6 = vpop.permute.xlu0 %3039 }
 0x307   : > { %v3094_v11 = vmul.f32 %v3040_v6, %v5316_v15 }
 0x309   : > { %v2958_v27 = vld [vmem:[%s4776_s23 + $0x90] sm:$0xff]  ;;  %3134 = vrot.lane.b32.xlu1 %v3094_v11, %s4052_s17 }
 0x30a   : > { %v2977_v5 = vmul.f32 %v2958_v27, %v5582_v60 }
 0x30b   : > { %v3014_v20 = vld [vmem:[%s4776_s23 + $0x88] sm:$0xff] }
 0x30c   : > { %2996 = vst.msk [vmem:[%s4776_s23 + $0x90] sm:$0xff] %vm695_vm5, %v2977_v5  ;;  %3069 = vrot.lane.b32.xlu0 %v3014_v20, %s4053_s25 }
 0x30e   : > { %v3042_v31 = vpop.permute.xlu1 %3041 }
 0x30f   : > { %v3095_v32 = vmul.f32 %v3042_v31, %v5322_v63 }
 0x311   : > { %3136 = vrot.lane.b32.xlu2 %v3095_v32, %s4052_s17 }
 0x313   : > { %v3015_v26 = vld [vmem:[%s4776_s23 + $0x90] sm:$0xff] }
 0x314   : > { %3138 = vrot.lane.b32.xlu0 %v3096_v28, %s4052_s17  ;;  %3071 = vrot.lane.b32.xlu1 %v3015_v26, %s4053_s25 }
 0x316   : > { %v3050_v13 = vpop.permute.xlu2 %3049 }
 0x317   : > { %v3099_v21 = vmul.f32 %v3050_v13, %v5363_v8 }
 0x31c   : > { %3144 = vrot.lane.b32.xlu0 %v3099_v21, %s4052_s17 }
 0x31e   : > { %v3046_v59 = vpop.permute.xlu0 %3045 }
 0x31f   : > { %v3097_v10 = vmul.f32 %v3046_v59, %v5339_v30 }
 0x321   : > { %3140 = vrot.lane.b32.xlu1 %v3097_v10, %s4052_s17 }
 0x326   : > { %v3048_v54 = vpop.permute.xlu1 %3047 }
 0x327   : > { %v3098_v34 = vmul.f32 %v3048_v54, %v5350_v52 }
 0x329   : > { %3142 = vrot.lane.b32.xlu2 %v3098_v34, %s4052_s17 }
 0x32e   : > { %v3056_v17 = vpop.permute.xlu2 %3055 }
 0x32f   : > { %v3102_v2 = vmul.f32 %v3056_v17, %v5424_v42 }
 0x331   : > { %3150 = vrot.lane.b32.xlu0 %v3102_v2, %s4052_s17 }
 0x336   : > { %v3052_v62 = vpop.permute.xlu0 %3051 }
 0x337   : > { %v3100_v38 = vmul.f32 %v3052_v62, %v5381_v19 }
 0x339   : > { %3146 = vrot.lane.b32.xlu1 %v3100_v38, %s4052_s17 }
 0x33e   : > { %v3054_v25 = vpop.permute.xlu1 %3053 }
 0x33f   : > { %v3101_v40 = vmul.f32 %v3054_v25, %v5402_v22 }
 0x341   : > { %3148 = vrot.lane.b32.xlu2 %v3101_v40, %s4052_s17 }
 0x346   : > { %v3062_v44 = vpop.permute.xlu2 %3061 }
 0x347   : > { %v3105_v18 = vmul.f32 %v3062_v44, %v5490_v29 }
 0x349   : > { %3156 = vrot.lane.b32.xlu0 %v3105_v18, %s4052_s17 }
 0x34e   : > { %v3058_v37 = vpop.permute.xlu0 %3057 }
 0x34f   : > { %v3103_v43 = vmul.f32 %v3058_v37, %v5446_v49 }
 0x351   : > { %3152 = vrot.lane.b32.xlu1 %v3103_v43, %s4052_s17 }
 0x353   : > { %v3131_v61 = vpop.permute.xlu2 %3130 }
 0x354   : > { %3187 = vst.msk [vmem:[%s4776_s23] sm:$0xff] %vm1091_vm3, %v3131_v61 }
 0x356   : > { %v3060_v48 = vpop.permute.xlu1 %3059 }
 0x357   : > { %v3104_v55 = vmul.f32 %v3060_v48, %v5468_v53 }
 0x359   : > { %3154 = vrot.lane.b32.xlu2 %v3104_v55, %s4052_s17 }
 0x35b   : > { %v3206_v41 = vld [vmem:[%s4776_s23] sm:$0xff] }
 0x35c   : > { %3244 = vrot.lane.b32.xlu0 %v3206_v41, %s4051_s27 }
 0x35e   : > { %v3068_v45 = vpop.permute.xlu2 %3067 }
 0x35f   : > { %v3108_v36 = vmul.f32 %v3068_v45, %v5553_v35 }
 0x364   : > { %3162 = vrot.lane.b32.xlu0 %v3108_v36, %s4052_s17 }
 0x366   : > { %v3064_v23 = vpop.permute.xlu0 %3063 }
 0x367   : > { %v3106_v7 = vmul.f32 %v3064_v23, %v5512_v50 }
 0x369   : > { %3158 = vrot.lane.b32.xlu1 %v3106_v7, %s4052_s17 }
 0x36b   : > { %v3137_v14 = vpop.permute.xlu2 %3136 }
 0x36c   : > { %3190 = vst.msk [vmem:[%s4776_s23 + $0x18] sm:$0xff] %vm1091_vm3, %v3137_v14 }
 0x36e   : > { %v3133_v16 = vpop.permute.xlu0 %3132  ;;  %v3066_v56 = vpop.permute.xlu1 %3065 }
 0x36f   : > { %3188 = vst.msk [vmem:[%s4776_s23 + $0x8] sm:$0xff] %vm1091_vm3, %v3133_v16  ;;  %v3107_v57 = vmul.f32 %v3066_v56, %v5534_v33 }
 0x371   : > { %3160 = vrot.lane.b32.xlu2 %v3107_v57, %s4052_s17 }
 0x373   : > { %v3209_v58 = vld [vmem:[%s4776_s23 + $0x18] sm:$0xff] }
 0x374   : > { %3250 = vrot.lane.b32.xlu0 %v3209_v58, %s4051_s27 }
 0x376   : > { %v3207_v4 = vld [vmem:[%s4776_s23 + $0x8] sm:$0xff] }
 0x377   : > { %3246 = vrot.lane.b32.xlu1 %v3207_v4, %s4051_s27 }
 0x37b   : > { %v3135_v51 = vpop.permute.xlu1 %3134 }
 0x37c   : > { %3189 = vst.msk [vmem:[%s4776_s23 + $0x10] sm:$0xff] %vm1091_vm3, %v3135_v51 }
 0x37e   : > { %v3070_v46 = vpop.permute.xlu0 %3069 }
 0x37f   : > { %v3109_v3 = vmul.f32 %v3070_v46, %v5567_v0 }
 0x381   : > { %3164 = vrot.lane.b32.xlu1 %v3109_v3, %s4052_s17 }
 0x383   : > { %v3143_v9 = vpop.permute.xlu2 %3142  ;;  %v3208_v47 = vld [vmem:[%s4776_s23 + $0x10] sm:$0xff] }
 0x384   : > { %3193 = vst.msk [vmem:[%s4776_s23 + $0x30] sm:$0xff] %vm1091_vm3, %v3143_v9  ;;  %3248 = vrot.lane.b32.xlu2 %v3208_v47, %s4051_s27 }
 0x386   : > { %v3139_v6 = vpop.permute.xlu0 %3138  ;;  %v3072_v11 = vpop.permute.xlu1 %3071 }
 0x387   : > { %3191 = vst.msk [vmem:[%s4776_s23 + $0x20] sm:$0xff] %vm1091_vm3, %v3139_v6  ;;  %v3110_v27 = vmul.f32 %v3072_v11, %v5582_v60 }
 0x38b   : > { %v3212_v5 = vld [vmem:[%s4776_s23 + $0x30] sm:$0xff] }
 0x38c   : > { %3256 = vrot.lane.b32.xlu0 %v3212_v5, %s4051_s27  ;;  %3166 = vrot.lane.b32.xlu2 %v3110_v27, %s4052_s17 }
 0x38e   : > { %v3145_v20 = vpop.permute.xlu0 %3144  ;;  %v3210_v31 = vld [vmem:[%s4776_s23 + $0x20] sm:$0xff] }
 0x38f   : > { %3194 = vst.msk [vmem:[%s4776_s23 + $0x38] sm:$0xff] %vm1091_vm3, %v3145_v20  ;;  %3252 = vrot.lane.b32.xlu1 %v3210_v31, %s4051_s27 }
 0x393   : > { %v3141_v12 = vpop.permute.xlu1 %3140 }
 0x394   : > { %3192 = vst.msk [vmem:[%s4776_s23 + $0x28] sm:$0xff] %vm1091_vm3, %v3141_v12 }
 0x396   : > { %v3213_v32 = vld [vmem:[%s4776_s23 + $0x38] sm:$0xff] }
 0x397   : > { %3258 = vrot.lane.b32.xlu1 %v3213_v32, %s4051_s27 }
 0x39b   : > { %v3149_v28 = vpop.permute.xlu2 %3148  ;;  %v3211_v26 = vld [vmem:[%s4776_s23 + $0x28] sm:$0xff] }
 0x39c   : > { %3196 = vst.msk [vmem:[%s4776_s23 + $0x48] sm:$0xff] %vm1091_vm3, %v3149_v28  ;;  %3254 = vrot.lane.b32.xlu2 %v3211_v26, %s4051_s27 }
 0x3a3   : > { %v3151_v13 = vpop.permute.xlu0 %3150  ;;  %v3215_v21 = vld [vmem:[%s4776_s23 + $0x48] sm:$0xff] }
 0x3a4   : > { %3197 = vst.msk [vmem:[%s4776_s23 + $0x50] sm:$0xff] %vm1091_vm3, %v3151_v13  ;;  %3262 = vrot.lane.b32.xlu0 %v3215_v21, %s4051_s27 }
 0x3ab   : > { %v3147_v59 = vpop.permute.xlu1 %3146  ;;  %v3216_v10 = vld [vmem:[%s4776_s23 + $0x50] sm:$0xff] }
 0x3ac   : > { %3195 = vst.msk [vmem:[%s4776_s23 + $0x40] sm:$0xff] %vm1091_vm3, %v3147_v59  ;;  %3264 = vrot.lane.b32.xlu1 %v3216_v10, %s4051_s27 }
 0x3b3   : > { %v3155_v54 = vpop.permute.xlu2 %3154  ;;  %v3214_v34 = vld [vmem:[%s4776_s23 + $0x40] sm:$0xff] }
 0x3b4   : > { %3199 = vst.msk [vmem:[%s4776_s23 + $0x60] sm:$0xff] %vm1091_vm3, %v3155_v54  ;;  %3260 = vrot.lane.b32.xlu2 %v3214_v34, %s4051_s27 }
 0x3bb   : > { %v3157_v17 = vpop.permute.xlu0 %3156  ;;  %v3218_v2 = vld [vmem:[%s4776_s23 + $0x60] sm:$0xff] }
 0x3bc   : > { %3200 = vst.msk [vmem:[%s4776_s23 + $0x68] sm:$0xff] %vm1091_vm3, %v3157_v17  ;;  %3268 = vrot.lane.b32.xlu0 %v3218_v2, %s4051_s27 }
 0x3c3   : > { %v3153_v62 = vpop.permute.xlu1 %3152  ;;  %v3219_v38 = vld [vmem:[%s4776_s23 + $0x68] sm:$0xff] }
 0x3c4   : > { %3198 = vst.msk [vmem:[%s4776_s23 + $0x58] sm:$0xff] %vm1091_vm3, %v3153_v62  ;;  %3270 = vrot.lane.b32.xlu1 %v3219_v38, %s4051_s27 }
 0x3cb   : > { %v3161_v25 = vpop.permute.xlu2 %3160  ;;  %v3217_v40 = vld [vmem:[%s4776_s23 + $0x58] sm:$0xff] }
 0x3cc   : > { %3202 = vst.msk [vmem:[%s4776_s23 + $0x78] sm:$0xff] %vm1091_vm3, %v3161_v25  ;;  %3266 = vrot.lane.b32.xlu2 %v3217_v40, %s4051_s27 }
 0x3ce   : > { %v3245_v44 = vpop.permute.xlu0 %3244 }
 0x3cf   : > { %v3301_v18 = vmul.f32 %v3245_v44, %v5302_v24 }
 0x3d1   : > { %3339 = vrot.lane.b32.xlu1 %v3301_v18, %s4051_s27 }
 0x3d3   : > { %v3221_v37 = vld [vmem:[%s4776_s23 + $0x78] sm:$0xff] }
 0x3d4   : > { %3274 = vrot.lane.b32.xlu0 %v3221_v37, %s4051_s27 }
 0x3d6   : > { %v3163_v43 = vpop.permute.xlu0 %3162 }
 0x3d7   : > { %3203 = vst.msk [vmem:[%s4776_s23 + $0x80] sm:$0xff] %vm1091_vm3, %v3163_v43 }
 0x3db   : > { %v3159_v61 = vpop.permute.xlu1 %3158 }
 0x3dc   : > { %3201 = vst.msk [vmem:[%s4776_s23 + $0x70] sm:$0xff] %vm1091_vm3, %v3159_v61 }
 0x3de   : > { %v3249_v48 = vpop.permute.xlu2 %3248  ;;  %v3222_v55 = vld [vmem:[%s4776_s23 + $0x80] sm:$0xff] }
 0x3df   : > { %3276 = vrot.lane.b32.xlu1 %v3222_v55, %s4051_s27  ;;  %v3303_v16 = vmul.f32 %v3249_v48, %v5316_v15 }
 0x3e3   : > { %v3220_v24 = vld [vmem:[%s4776_s23 + $0x70] sm:$0xff] }
 0x3e4   : > { %3272 = vrot.lane.b32.xlu2 %v3220_v24, %s4051_s27 }
 0x3e6   : > { %v3251_v41 = vpop.permute.xlu0 %3250  ;;  %v3167_v45 = vpop.permute.xlu2 %3166 }
 0x3e7   : > { %v3304_v36 = vmul.f32 %v3251_v41, %v5322_v63  ;;  %3205 = vst.msk [vmem:[%s4776_s23 + $0x90] sm:$0xff] %vm1091_vm3, %v3167_v45 }
 0x3e9   : > { %3345 = vrot.lane.b32.xlu1 %v3304_v36, %s4051_s27  ;;  %v3247_v23 = vpop.permute.xlu1 %3246 }
 0x3ea   : > { %v3302_v51 = vmul.f32 %v3247_v23, %v5309_v1 }
 0x3ee   : > { %v3224_v7 = vld [vmem:[%s4776_s23 + $0x90] sm:$0xff] }
 0x3ef   : > { %3280 = vrot.lane.b32.xlu0 %v3224_v7, %s4051_s27 }
 0x3f3   : > { %v3165_v14 = vpop.permute.xlu1 %3164 }
 0x3f4   : > { %3204 = vst.msk [vmem:[%s4776_s23 + $0x88] sm:$0xff] %vm1091_vm3, %v3165_v14 }
 0x3f6   : > { %v3255_v56 = vpop.permute.xlu2 %3254 }
 0x3f7   : > { %3343 = vrot.lane.b32.xlu0 %v3303_v16, %s4051_s27  ;;  %v3306_v63 = vmul.f32 %v3255_v56, %v5339_v30 }
 0x3fb   : > { %v3223_v57 = vld [vmem:[%s4776_s23 + $0x88] sm:$0xff] }
 0x3fc   : > { %3278 = vrot.lane.b32.xlu2 %v3223_v57, %s4051_s27 }
 0x3fe   : > { %v3257_v58 = vpop.permute.xlu0 %3256 }
 0x3ff   : > { %v3307_v4 = vmul.f32 %v3257_v58, %v5350_v52  ;;  %3349 = vrot.lane.b32.xlu0 %v3306_v63, %s4051_s27 }
 0x401   : > { %3351 = vrot.lane.b32.xlu1 %v3307_v4, %s4051_s27  ;;  %v3253_v15 = vpop.permute.xlu1 %3252 }
 0x402   : > { %v3305_v46 = vmul.f32 %v3253_v15, %v5330_v39 }
 0x404   : > { %3341 = vrot.lane.b32.xlu2 %v3302_v51, %s4051_s27 }
 0x409   : > { %v3259_v9 = vpop.permute.xlu1 %3258 }
 0x40a   : > { %v3308_v52 = vmul.f32 %v3259_v9, %v5363_v8 }
 0x40c   : > { %3347 = vrot.lane.b32.xlu2 %v3305_v46, %s4051_s27 }
 0x40e   : > { %v3261_v3 = vpop.permute.xlu2 %3260 }
 0x40f   : > { %v3309_v30 = vmul.f32 %v3261_v3, %v5381_v19 }
 0x411   : > { %3355 = vrot.lane.b32.xlu0 %v3309_v30, %s4051_s27 }
 0x414   : > { %3353 = vrot.lane.b32.xlu2 %v3308_v52, %s4051_s27 }
 0x416   : > { %v3263_v47 = vpop.permute.xlu0 %3262 }
 0x417   : > { %v3310_v1 = vmul.f32 %v3263_v47, %v5402_v22 }
 0x419   : > { %3357 = vrot.lane.b32.xlu1 %v3310_v1, %s4051_s27 }
 0x41e   : > { %v3265_v6 = vpop.permute.xlu1 %3264 }
 0x41f   : > { %v3311_v39 = vmul.f32 %v3265_v6, %v5424_v42 }
 0x421   : > { %3359 = vrot.lane.b32.xlu2 %v3311_v39, %s4051_s27 }
 0x426   : > { %v3267_v11 = vpop.permute.xlu2 %3266 }
 0x427   : > { %v3312_v19 = vmul.f32 %v3267_v11, %v5446_v49 }
 0x429   : > { %3361 = vrot.lane.b32.xlu0 %v3312_v19, %s4051_s27 }
 0x42e   : > { %v3269_v27 = vpop.permute.xlu0 %3268 }
 0x42f   : > { %v3313_v8 = vmul.f32 %v3269_v27, %v5468_v53 }
 0x431   : > { %3363 = vrot.lane.b32.xlu1 %v3313_v8, %s4051_s27 }
 0x436   : > { %v3271_v5 = vpop.permute.xlu1 %3270 }
 0x437   : > { %v3314_v22 = vmul.f32 %v3271_v5, %v5490_v29 }
 0x439   : > { %3365 = vrot.lane.b32.xlu2 %v3314_v22, %s4051_s27 }
 0x43e   : > { %v3273_v20 = vpop.permute.xlu2 %3272 }
 0x43f   : > { %v3315_v42 = vmul.f32 %v3273_v20, %v5512_v50 }
 0x441   : > { %3367 = vrot.lane.b32.xlu0 %v3315_v42, %s4051_s27 }
 0x443   : > { %v3340_v49 = vpop.permute.xlu1 %3339 }
 0x444   : > { %3396 = vst.msk [vmem:[%s4776_s23] sm:$0xff] %vm1449_vm14, %v3340_v49 }
 0x446   : > { %v3275_v31 = vpop.permute.xlu0 %3274 }
 0x447   : > { %v3316_v53 = vmul.f32 %v3275_v31, %v5534_v33 }
 0x449   : > { %3369 = vrot.lane.b32.xlu1 %v3316_v53, %s4051_s27 }
 0x451   : > { %v3277_v12 = vpop.permute.xlu1 %3276 }
 0x452   : > { %v3317_v29 = vmul.f32 %v3277_v12, %v5553_v35 }
 0x454   : > { %3371 = vrot.lane.b32.xlu2 %v3317_v29, %s4051_s27 }
 0x456   : > { %v3279_v50 = vpop.permute.xlu2 %3278 }
 0x457   : > { %v3318_v32 = vmul.f32 %v3279_v50, %v5567_v0 }
 0x459   : > { %3373 = vrot.lane.b32.xlu0 %v3318_v32, %s4051_s27 }
 0x45b   : > { %v3346_v28 = vpop.permute.xlu1 %3345 }
 0x45c   : > { %3399 = vst.msk [vmem:[%s4776_s23 + $0x18] sm:$0xff] %vm1449_vm14, %v3346_v28 }
 0x45e   : > { %v3342_v33 = vpop.permute.xlu2 %3341 }
 0x45f   : > { %3397 = vst.msk [vmem:[%s4776_s23 + $0x8] sm:$0xff] %vm1449_vm14, %v3342_v33 }
 0x461   : > { %v3281_v26 = vpop.permute.xlu0 %3280 }
 0x462   : > { %v3319_v35 = vmul.f32 %v3281_v26, %v5582_v60 }
 0x464   : > { %3375 = vrot.lane.b32.xlu1 %v3319_v35, %s4051_s27  ;;  %s3725_s27 = smul.u32 152, %s4127_s13 }
 0x466   : > { %v3348_v13 = vpop.permute.xlu2 %3347  ;;  %s3427_s16 = scalar_lea.hbm %s5866_s9, %s3725_s27  ;;  %s4007_s27 = scalar_lea.hbm %s5866_s9, 304 }
 0x467   : > { %3400 = vst.msk [vmem:[%s4776_s23 + $0x20] sm:$0xff] %vm1449_vm14, %v3348_v13  ;;  %s3430_s26 = sshll.u32 %s3427_s16, 4  ;;  %s3431_s26 = int_to_ptr.hbm [resolvable:$true] %s3430_s26 }
 0x468   : > { %s4001_s29 = sshra.s32 %s3431_s26, 4  ;;  %s4002_s29 = int_to_ptr.hbm [resolvable:$true] %s4001_s29 }
 0x469   : > { %v3344_v0 = vpop.permute.xlu0 %3343  ;;  %s4003_s21 = scalar_lea.hbm %s4002_s29, 152  ;;  %p4008_p0 = scmp.lt.s32.totalorder %s4002_s29, %s5866_s9 }
 0x46a   : > { %3398 = vst.msk [vmem:[%s4776_s23 + $0x10] sm:$0xff] %vm1449_vm14, %v3344_v0  ;;  %p4004_p11 = scmp.ne.s32.totalorder %s4002_s29, %s4003_s21  ;;  %p4009_p1 = scmp.lt.s32.totalorder %s4007_s27, %s4003_s21 }
 0x46c   : > { %p4005_p12 = pnand %p4004_p11, %p4144_p5  ;;  %p4010_p2 = por %p4009_p1, %p4008_p0 }
 0x46e   : > { %v3354_v21 = vpop.permute.xlu2 %3353  ;;  %p4006_p13 = pneg %p4005_p12 }
 0x46f   : > { %3403 = vst.msk [vmem:[%s4776_s23 + $0x38] sm:$0xff] %vm1449_vm14, %v3354_v21 }
 0x470   : > { %p4011_p3 = pnand %p4010_p2, %p4006_p13 }
 0x471   : > { %v3350_v59 = vpop.permute.xlu0 %3349 }
 0x472   : > { %3401 = vst.msk [vmem:[%s4776_s23 + $0x28] sm:$0xff] %vm1449_vm14, %v3350_v59 }
 0x473   : > { %v3352_v60 = vpop.permute.xlu1 %3351 }
 0x474   : > { %3402 = vst.msk [vmem:[%s4776_s23 + $0x30] sm:$0xff] %vm1449_vm14, %v3352_v60 }
 0x47b   : > { %v3360_v10 = vpop.permute.xlu2 %3359 }
 0x47c   : > { %3406 = vst.msk [vmem:[%s4776_s23 + $0x50] sm:$0xff] %vm1449_vm14, %v3360_v10 }
 0x483   : > { %v3356_v54 = vpop.permute.xlu0 %3355 }
 0x484   : > { %3404 = vst.msk [vmem:[%s4776_s23 + $0x40] sm:$0xff] %vm1449_vm14, %v3356_v54 }
 0x48b   : > { %v3358_v34 = vpop.permute.xlu1 %3357 }
 0x48c   : > { %3405 = vst.msk [vmem:[%s4776_s23 + $0x48] sm:$0xff] %vm1449_vm14, %v3358_v34 }
 0x493   : > { %v3366_v17 = vpop.permute.xlu2 %3365 }
 0x494   : > { %3409 = vst.msk [vmem:[%s4776_s23 + $0x68] sm:$0xff] %vm1449_vm14, %v3366_v17 }
 0x49b   : > { %v3362_v2 = vpop.permute.xlu0 %3361 }
 0x49c   : > { %3407 = vst.msk [vmem:[%s4776_s23 + $0x58] sm:$0xff] %vm1449_vm14, %v3362_v2 }
 0x4a3   : > { %v3364_v62 = vpop.permute.xlu1 %3363 }
 0x4a4   : > { %3408 = vst.msk [vmem:[%s4776_s23 + $0x60] sm:$0xff] %vm1449_vm14, %v3364_v62 }
 0x4ae   : > { %v3372_v38 = vpop.permute.xlu2 %3371 }
 0x4af   : > { %3412 = vst.msk [vmem:[%s4776_s23 + $0x80] sm:$0xff] %vm1449_vm14, %v3372_v38 }
 0x4b3   : > { %v3368_v25 = vpop.permute.xlu0 %3367 }
 0x4b4   : > { %3410 = vst.msk [vmem:[%s4776_s23 + $0x70] sm:$0xff] %vm1449_vm14, %v3368_v25 }
 0x4bb   : > { %v3370_v40 = vpop.permute.xlu1 %3369 }
 0x4bc   : > { %3411 = vst.msk [vmem:[%s4776_s23 + $0x78] sm:$0xff] %vm1449_vm14, %v3370_v40 }
 0x4cb   : > { %v3374_v44 = vpop.permute.xlu0 %3373 }
 0x4cc   : > { %3413 = vst.msk [vmem:[%s4776_s23 + $0x88] sm:$0xff] %vm1449_vm14, %v3374_v44 }
 0x4d6   : > { %v3376_v18 = vpop.permute.xlu1 %3375 }
 0x4d7   : > { %3414 = vst.msk [vmem:[%s4776_s23 + $0x90] sm:$0xff] %vm1449_vm14, %v3376_v18 }
 0x4d8   : > { %4014 = shalt.err (!%p4011_p3)
}
 0x4d9   : > { %s4054_s24 = smov 128   ;;  %s4055_s23 = smov 8  }
 0x4da   : > { %3751 = dma.vmem_to_hbm [thread:$0]  (%p4144_p5), %s3429_s22, 2432, %s3431_s26, %s3416_s28, %s4054_s24, %s4054_s24, %s4055_s23  }
 0x4db PF: > { %p3757_p4 = scmp.ge.s32.totalorder %s4049_s12, 2  ;;  %s3445_s16 = sand.u32 1, %s4037_s30  }
 0x4dc   : > { %s3446_s13 = scalar_lea.sflag [#allocation3], %s3445_s16 }
 0x4dd   : > { %p3754_p7 = pnand %p3757_p4, %p4148_p6 }
 0x4df   : > { %p3755_p8 = pneg %p3754_p7 }
 0x4e1   : > { %4032 = dma.done.wait (%p3755_p8), %s3446_s13, 2432  }
 0x4e2   : > { %4034 = vsyncadd (%p3755_p8), %s3446_s13, 4294964864  ;;  %p19_p9 = scmp.ge.s32.totalorder %s4131_s15, 4   ;;  %s5869_s30 = smov %s4041_s10 }
 0x4e3   : > { %s5870_s10 = smov %s4045_s11  ;;  %s5871_s11 = smov %s4142_s18 }
 0x4e4   : > { %s5872_s12 = smov %s4131_s15  ;;  %21 = sbr.rel (!%p19_p9) target bundleno = 3 (0x3), region = 94 }
 0x4e9   :  { %3452 = vsyncpa [#allocation3], 1 }
 0x4ea   :  { %3454 = vsyncpa [#allocation3 + $0x1], 1 }

</bundles_post_ra>
